<compile_context>
chip_gen: v7x
topology: tpu7x:2x2x1
jax: 0.10.0
libtpu: 0.0.40
codegen_flags: <defaults>
</compile_context>

<pallas_src>
import functools

import jax
import jax.numpy as jnp
from jax import lax
from jax.experimental import pallas as pl
from jax.experimental.pallas import tpu as pltpu

EPS = 1e-5          # PyTorch BatchNorm2d default eps
LANE = 128          # TPU lane width


def _round_up(x, m):
    return (x + m - 1) // m * m


@functools.lru_cache(maxsize=None)
def _vmem_limit_bytes():
    cap = 128 * 1024 * 1024
    try:
        cap = int(getattr(pltpu.get_tpu_info(), "vmem_capacity_bytes", cap))
    except Exception:
        pass
    # ~75% of physical VMEM: 48 MiB on v7x (64 MiB/TC), capped at 96 MiB on v5e/v6e (128 MiB).
    return int(min(cap * 3 // 4, 96 * 1024 * 1024))


def _pick_cout_tile(cout_p, vmem_bytes):
    if cout_p % 512 == 0 and vmem_bytes >= 64 * 1024 * 1024:
        return 512
    if cout_p % 256 == 0:
        return 256
    return 128


def _pad_to(arr, axis, target):
    pad = [(0, 0)] * arr.ndim
    pad[axis] = (0, target - arr.shape[axis])
    return jnp.pad(arr, pad)


# ----------------------------------------------------------------------------
# Kernel A: (optional prev-BN affine) -> 3x3 conv (pad=1) + bias + ReLU + partial BN stats
# ----------------------------------------------------------------------------
def _conv3x3_bn_stats_kernel(*refs, apply_affine):
    # x_ref : (H, W, Cin_p)  bf16       one image (batch dim squeezed by BlockSpec)
    # w_ref : (9*Cin_p, TCo) bf16       conv weights, rows ordered (kh, kw, ci)
    # b_ref : (1, TCo)       f32        conv bias
    # [sc_ref, sh_ref : (1, Cin_p) f32] previous BatchNorm folded to a per-channel affine
    # y_ref : (H, W, TCo)    bf16       relu(conv) output
    # stat_ref : (2, TCo)    f32        [sum, sum_sq] over this image's H*W positions
    # xp_ref : (H+2, W+2, Cin_p) bf16   persistent scratch: affined + zero-haloed image
    if apply_affine:
        x_ref, w_ref, b_ref, sc_ref, sh_ref, y_ref, stat_ref, xp_ref = refs
    else:
        x_ref, w_ref, b_ref, y_ref, stat_ref, xp_ref = refs

    Hp, Wp, Cin = xp_ref.shape
    H, W = Hp - 2, Wp - 2
    TCo = w_ref.shape[1]

    # ---- per-image prep, done ONCE (c == 0) and reused for every Cout block ----
    @pl.when(pl.program_id(1) == 0)
    def _():
        xb = x_ref[...]                                        # (H, W, Cin) bf16
        if apply_affine:
            # previous BatchNorm as a per-channel affine, in bf16 (result feeds a bf16 matmul)
            sc = sc_ref[...].astype(jnp.bfloat16)
            sh = sh_ref[...].astype(jnp.bfloat16)
            xb = (xb.reshape(H * W, Cin) * sc + sh).reshape(H, W, Cin)
        # zero halo built in a persistent VMEM scratch (no padded copy in HBM, no per-c recompute)
        xp_ref[0] = jnp.zeros((Wp, Cin), jnp.bfloat16)          # top halo row
        xp_ref[H + 1] = jnp.zeros((Wp, Cin), jnp.bfloat16)      # bottom halo row
        zc = jnp.zeros((H, 1, Cin), jnp.bfloat16)
        xp_ref[1:H + 1] = jnp.concatenate([zc, xb, zc], axis=1)  # interior rows with W halo

    # ---- 3x3 conv: 9 unrolled MXU matmuls accumulated in f32 (no im2col buffer) ----
    acc = jnp.zeros((H * W, TCo), jnp.float32)
    for kh in range(3):
        for kw in range(3):
            patch = xp_ref[kh:kh + H, kw:kw + W, :].reshape(H * W, Cin)
            w_tap = w_ref[(3 * kh + kw) * Cin:(3 * kh + kw + 1) * Cin, :]
            acc = acc + jnp.dot(patch, w_tap, preferred_element_type=jnp.float32)

    y = jnp.maximum(acc + b_ref[...], 0.0)                      # relu(relu(.)) == relu(.)

    # single-pass partial BatchNorm statistics (finalized in the wrapper, O(C) work)
    stat_ref[...] = jnp.concatenate(
        [jnp.sum(y, axis=0, keepdims=True),
         jnp.sum(y * y, axis=0, keepdims=True)], axis=0)

    y_ref[...] = y.reshape(H, W, TCo).astype(y_ref.dtype)


def conv3x3_relu_stats(x, w_flat, b, sc=None, sh=None):
    # x: (N, H, W, Cin_p) bf16; w_flat: (9*Cin_p, Cout_p) bf16; b: (1, Cout_p) f32
    # sc / sh: optional (1, Cin_p) f32 affine applied to the input (omitted for conv1)
    N, H, W, Cin_p = x.shape
    Cout_p = w_flat.shape[1]
    vmem = _vmem_limit_bytes()
    tco = _pick_cout_tile(Cout_p, vmem)
    grid = (N, Cout_p // tco)
    apply_affine = sc is not None

    in_specs = [
        pl.BlockSpec((None, H, W, Cin_p), lambda n, c: (n, 0, 0, 0)),
        pl.BlockSpec((9 * Cin_p, tco), lambda n, c: (0, c)),
        pl.BlockSpec((1, tco), lambda n, c: (0, c)),
    ]
    args = [x, w_flat, b]
    if apply_affine:
        in_specs += [pl.BlockSpec((1, Cin_p), lambda n, c: (0, 0)),
                     pl.BlockSpec((1, Cin_p), lambda n, c: (0, 0))]
        args += [sc, sh]

    return pl.pallas_call(
        functools.partial(_conv3x3_bn_stats_kernel, apply_affine=apply_affine),
        grid_spec=pltpu.PrefetchScalarGridSpec(
            num_scalar_prefetch=0,
            grid=grid,
            in_specs=in_specs,
            out_specs=[
                pl.BlockSpec((None, H, W, tco), lambda n, c: (n, 0, 0, c)),
                pl.BlockSpec((None, 2, tco), lambda n, c: (n, 0, c)),
            ],
            scratch_shapes=[pltpu.VMEM((H + 2, W + 2, Cin_p), jnp.bfloat16)],
        ),
        out_shape=(
            jax.ShapeDtypeStruct((N, H, W, Cout_p), jnp.bfloat16),
            jax.ShapeDtypeStruct((N, 2, Cout_p), jnp.float32),
        ),
        compiler_params=pltpu.CompilerParams(
            # Cout axis must stay serial (persistent per-image scratch reused across it);
            # batch may be megacore-sharded.
            dimension_semantics=("parallel", "arbitrary"),
            vmem_limit_bytes=vmem,
        ),
    )(*args)


def _bn_affine(stats, gamma_p, beta_p, count):
    # stats: (N, 2, C_p) per-image [sum, sum_sq]; training-mode (biased) BatchNorm.
    s = jnp.sum(stats[:, 0, :], axis=0)
    ss = jnp.sum(stats[:, 1, :], axis=0)
    mean = s / count
    var = jnp.maximum(ss / count - mean * mean, 0.0)
    scale = gamma_p * lax.rsqrt(var + EPS)
    shift = beta_p - mean * scale
    return scale.reshape(1, -1), shift.reshape(1, -1)


# ----------------------------------------------------------------------------
# Kernel B: ConvTranspose2d(k=2, s=2) + bias + ReLU (BN2 already folded into weights/bias)
# ----------------------------------------------------------------------------
def _upconv2x2_relu_kernel(x_ref, w_ref, b_ref, o_ref):
    # x_ref : (H, W, Cin_p)      bf16
    # w_ref : (Cin_p, 4*TCo)     bf16   columns ordered (kh, kw, co); BN2 scale pre-folded
    # b_ref : (1, 4*TCo)         f32    bias with BN2 shift pre-folded
    # o_ref : (2, 2, H, W, TCo)  bf16   per-tap subpixel planes, lane-dense (W, TCo) stores
    H, W, Cin = x_ref.shape
    TCo = o_ref.shape[-1]

    y = jnp.dot(x_ref[...].reshape(H * W, Cin), w_ref[...],
                preferred_element_type=jnp.float32)              # (H*W, 4*TCo)
    y = jnp.maximum(y + b_ref[...], 0.0)

    for kh in range(2):
        for kw in range(2):
            t = 2 * kh + kw
            o_ref[kh, kw] = y[:, t * TCo:(t + 1) * TCo].reshape(H, W, TCo).astype(o_ref.dtype)


def upconv2x2_relu(x, w4, b4, cout_p, tco, vmem):
    N, H, W, Cin_p = x.shape
    grid = (N, cout_p // tco)
    return pl.pallas_call(
        _upconv2x2_relu_kernel,
        grid_spec=pltpu.PrefetchScalarGridSpec(
            num_scalar_prefetch=0,
            grid=grid,
            in_specs=[
                pl.BlockSpec((None, H, W, Cin_p), lambda n, c: (n, 0, 0, 0)),
                pl.BlockSpec((Cin_p, 4 * tco), lambda n, c: (0, c)),
                pl.BlockSpec((1, 4 * tco), lambda n, c: (0, c)),
            ],
            out_specs=pl.BlockSpec((None, 2, 2, H, W, tco),
                                   lambda n, c: (n, 0, 0, 0, 0, c)),
        ),
        out_shape=jax.ShapeDtypeStruct((N, 2, 2, H, W, cout_p), jnp.bfloat16),
        compiler_params=pltpu.CompilerParams(
            dimension_semantics=("parallel", "parallel"),
            vmem_limit_bytes=vmem,
        ),
    )(x, w4, b4)   # (N, kh, kw, H, W, C) bf16


# ----------------------------------------------------------------------------
# Parameters (deterministic, PyTorch-default-style init) and full forward
# ----------------------------------------------------------------------------
def init_params(key, in_channels, l1_channels, out_channels):
    def uni(k, shape, fan_in):
        bound = 1.0 / (fan_in ** 0.5)
        return jax.random.uniform(k, shape, jnp.float32, -bound, bound)

    ks = jax.random.split(key, 6)
    p = {}
    # conv1: Conv2d(in, l1, 3, padding=1, bias=True)   -> HWIO weights
    p["w1"] = uni(ks[0], (3, 3, in_channels, l1_channels), in_channels * 9)
    p["b1"] = uni(ks[1], (l1_channels,), in_channels * 9)
    p["gamma1"] = jnp.ones((l1_channels,), jnp.float32)
    p["beta1"] = jnp.zeros((l1_channels,), jnp.float32)
    # conv2: Conv2d(l1, out, 3, padding=1, bias=True)
    p["w2"] = uni(ks[2], (3, 3, l1_channels, out_channels), l1_channels * 9)
    p["b2"] = uni(ks[3], (out_channels,), l1_channels * 9)
    p["gamma2"] = jnp.ones((out_channels,), jnp.float32)
    p["beta2"] = jnp.zeros((out_channels,), jnp.float32)
    # upconv: ConvTranspose2d(out, out, kernel_size=2, stride=2, bias=True); weight (Cin, Cout, kH, kW)
    p["wt"] = uni(ks[4], (out_channels, out_channels, 2, 2), out_channels * 4)
    p["bt"] = uni(ks[5], (out_channels,), out_channels * 4)
    return p


def bottleneck_forward(x_nchw, p):
    N, Cin, H, W = x_nchw.shape
    C1 = p["w1"].shape[-1]
    C2 = p["w2"].shape[-1]
    Cin_p = _round_up(Cin, LANE)
    C1_p = _round_up(C1, LANE)
    C2_p = _round_up(C2, LANE)
    count = float(N * H * W)

    # NCHW -> NHWC, channels zero-padded to lane-dense width, bf16 activations
    x = jnp.transpose(x_nchw, (0, 2, 3, 1))
    x = _pad_to(x, 3, Cin_p).astype(jnp.bfloat16)

    # ---- conv1 + relu (+ BN1 stats); identity input affine skipped entirely ----
    w1 = _pad_to(_pad_to(p["w1"], 2, Cin_p), 3, C1_p).reshape(9 * Cin_p, C1_p).astype(jnp.bfloat16)
    b1 = _pad_to(p["b1"], 0, C1_p).reshape(1, C1_p)
    y1, st1 = conv3x3_relu_stats(x, w1, b1)
    sc1, sh1 = _bn_affine(st1, _pad_to(p["gamma1"], 0, C1_p), _pad_to(p["beta1"], 0, C1_p), count)

    # ---- conv2 + relu (+ BN2 stats); BN1 applied as a once-per-image bf16 affine in kernel A ----
    # (scale/shift cannot be folded into w2/b2 exactly because of the zero halo)
    w2 = _pad_to(_pad_to(p["w2"], 2, C1_p), 3, C2_p).reshape(9 * C1_p, C2_p).astype(jnp.bfloat16)
    b2 = _pad_to(p["b2"], 0, C2_p).reshape(1, C2_p)
    y2, st2 = conv3x3_relu_stats(y1, w2, b2, sc1, sh1)
    sc2, sh2 = _bn_affine(st2, _pad_to(p["gamma2"], 0, C2_p), _pad_to(p["beta2"], 0, C2_p), count)

    # ---- upconv (ConvT 2x2 s2) + relu; BN2 folded EXACTLY into weights + bias (no halo) ----
    vmem = _vmem_limit_bytes()
    tco = _pick_cout_tile(C2_p, vmem)
    n_co = C2_p // tco
    wt = _pad_to(_pad_to(p["wt"], 0, C2_p), 1, C2_p)                        # (ci, co, kh, kw) f32
    w4 = jnp.transpose(wt, (0, 2, 3, 1)).reshape(C2_p, 2, 2, n_co, tco)     # (ci, kh, kw, nco, tco)
    w4 = jnp.transpose(w4, (0, 3, 1, 2, 4)).reshape(C2_p, n_co * 4 * tco)   # cols = (nco, kh, kw, co)
    bt = _pad_to(p["bt"], 0, C2_p)
    b4 = jnp.broadcast_to(bt.reshape(n_co, 1, tco), (n_co, 4, tco)).reshape(1, n_co * 4 * tco)
    b4 = b4 + sh2 @ w4                                    # shift fold (uses unscaled weights)
    w4 = (w4 * sc2.reshape(-1, 1)).astype(jnp.bfloat16)   # scale fold

    y3 = upconv2x2_relu(y2, w4, b4, C2_p, tco, vmem)      # (N, kh, kw, H, W, C2_p) bf16
    y3 = y3[..., :C2]                                     # drop channel padding
    # depth-to-space folded into the single final XLA transpose:
    out = jnp.transpose(y3, (0, 5, 3, 1, 4, 2)).reshape(N, C2, 2 * H, 2 * W)
    return out.astype(jnp.float32)                        # NCHW, f32 like the PyTorch module


# ----------------------------------------------------------------------------
# Pure-JAX reference (f32) for a sanity check
# ----------------------------------------------------------------------------
def reference_forward(x, p):
    def conv3x3(x, w, b):
        y = lax.conv_general_dilated(x, w, window_strides=(1, 1),
                                     padding=((1, 1), (1, 1)),
                                     dimension_numbers=("NCHW", "HWIO", "NCHW"))
        return y + b.reshape(1, -1, 1, 1)

    def bn_train(y, gamma, beta):
        mean = jnp.mean(y, axis=(0, 2, 3), keepdims=True)
        var = jnp.mean((y - mean) ** 2, axis=(0, 2, 3), keepdims=True)
        return (gamma.reshape(1, -1, 1, 1) * (y - mean) * lax.rsqrt(var + EPS)
                + beta.reshape(1, -1, 1, 1))

    y = bn_train(jnp.maximum(conv3x3(x, p["w1"], p["b1"]), 0.0), p["gamma1"], p["beta1"])
    y = bn_train(jnp.maximum(conv3x3(y, p["w2"], p["b2"]), 0.0), p["gamma2"], p["beta2"])
    N, C, H, W = y.shape
    Cout = p["wt"].shape[1]
    t = jnp.einsum("ncij,cokl->noikjl", y, p["wt"])
    t = t.reshape(N, Cout, 2 * H, 2 * W) + p["bt"].reshape(1, -1, 1, 1)
    return jnp.maximum(t, 0.0)


if __name__ == "__main__":
    in_channels, l1_channels, out_channels = 4, 8, 16
    N, H, W = 2, 16, 16

    key = jax.random.PRNGKey(0)
    kx, kp = jax.random.split(key)
    x = jax.random.normal(kx, (N, in_channels, H, W), jnp.float32)   # NCHW like PyTorch
    params = init_params(kp, in_channels, l1_channels, out_channels)

    out = jax.jit(bottleneck_forward)(x, params)
    out = jax.block_until_ready(out)

    assert out.shape == (N, out_channels, 2 * H, 2 * W), out.shape
    assert jnp.isfinite(out).all()

    ref = reference_forward(x, params)
    err = float(jnp.max(jnp.abs(out.astype(jnp.float32) - ref)))
    scale = float(jnp.max(jnp.abs(ref)))
    assert err <= 0.05 * scale + 0.05, ("mismatch vs reference", err, scale)

    print("KERNEL_OK")
</pallas_src>

<mosaic_0001>
module attributes {stable_mosaic.version = 11 : i64} {
  func.func @_conv3x3_bn_stats_kernel(%arg0: i32, %arg1: i32, %arg2: memref<1x16x16x128xbf16, #tpu.memory_space<vmem>>, %arg3: memref<1152x128xbf16, #tpu.memory_space<vmem>>, %arg4: memref<1x128xf32, #tpu.memory_space<vmem>>, %arg5: memref<1x128xf32, #tpu.memory_space<vmem>>, %arg6: memref<1x128xf32, #tpu.memory_space<vmem>>, %arg7: memref<1x16x16x128xbf16, #tpu.memory_space<vmem>>, %arg8: memref<1x2x128xf32, #tpu.memory_space<vmem>>, %arg9: memref<18x18x128xbf16, #tpu.memory_space<vmem>>) attributes {dimension_semantics = [#tpu.dimension_semantics<parallel>, #tpu.dimension_semantics<arbitrary>], iteration_bounds = array<i64: 2, 1>, scalar_prefetch = 0 : i64, scratch_operands = 1 : i64, tpu.core_type = #tpu.core_type<tc>, window_params = [{transform_indices = @transform_0, window_bounds = array<i64: 1, 16, 16, 128>}, {transform_indices = @transform_1, window_bounds = array<i64: 1152, 128>}, {transform_indices = @transform_2, window_bounds = array<i64: 1, 128>}, {pipeline_mode = #tpu.pipeline_mode<synchronous>, transform_indices = @transform_3, window_bounds = array<i64: 1, 128>}, {pipeline_mode = #tpu.pipeline_mode<synchronous>, transform_indices = @transform_4, window_bounds = array<i64: 1, 128>}, {transform_indices = @transform_5, window_bounds = array<i64: 1, 16, 16, 128>}, {transform_indices = @transform_6, window_bounds = array<i64: 1, 2, 128>}]} {
    %c0_i32 = arith.constant 0 : i32
    %0 = arith.cmpi eq, %arg1, %c0_i32 : i32
    %1 = arith.extui %0 : i1 to i32
    %c0_i32_0 = arith.constant 0 : i32
    %2 = arith.cmpi ne, %1, %c0_i32_0 : i32
    scf.if %2 {
      %c0_56 = arith.constant 0 : index
      %c0_57 = arith.constant 0 : index
      %c0_58 = arith.constant 0 : index
      %c0_59 = arith.constant 0 : index
      %68 = vector.load %arg2[%c0_56, %c0_57, %c0_58, %c0_59] : memref<1x16x16x128xbf16, #tpu.memory_space<vmem>>, vector<1x16x16x128xbf16>
      %69 = vector.shape_cast %68 : vector<1x16x16x128xbf16> to vector<16x16x128xbf16>
      %c0_60 = arith.constant 0 : index
      %c0_61 = arith.constant 0 : index
      %70 = vector.load %arg5[%c0_60, %c0_61] : memref<1x128xf32, #tpu.memory_space<vmem>>, vector<1x128xf32>
      %71 = arith.truncf %70 : vector<1x128xf32> to vector<1x128xbf16>
      %c0_62 = arith.constant 0 : index
      %c0_63 = arith.constant 0 : index
      %72 = vector.load %arg6[%c0_62, %c0_63] : memref<1x128xf32, #tpu.memory_space<vmem>>, vector<1x128xf32>
      %73 = arith.truncf %72 : vector<1x128xf32> to vector<1x128xbf16>
      %74 = vector.shape_cast %69 : vector<16x16x128xbf16> to vector<256x128xbf16>
      %75 = vector.broadcast %71 : vector<1x128xbf16> to vector<256x128xbf16>
      %76 = arith.mulf %74, %75 : vector<256x128xbf16>
      %77 = vector.broadcast %73 : vector<1x128xbf16> to vector<256x128xbf16>
      %78 = arith.addf %76, %77 : vector<256x128xbf16>
      %79 = vector.shape_cast %78 : vector<256x128xbf16> to vector<16x16x128xbf16>
      %cst_64 = arith.constant 0.000000e+00 : bf16
      %80 = vector.broadcast %cst_64 : bf16 to vector<18x128xbf16>
      %c0_65 = arith.constant 0 : index
      %c0_66 = arith.constant 0 : index
      %c0_67 = arith.constant 0 : index
      %81 = vector.load %arg9[%c0_65, %c0_66, %c0_67] : memref<18x18x128xbf16, #tpu.memory_space<vmem>>, vector<1x18x128xbf16>
      %82 = vector.shape_cast %81 : vector<1x18x128xbf16> to vector<18x128xbf16>
      %83 = vector.shape_cast %80 : vector<18x128xbf16> to vector<1x18x128xbf16>
      tpu.vector_store %arg9[%c0_65, %c0_66, %c0_67], %83 {strides = array<i32>} : memref<18x18x128xbf16, #tpu.memory_space<vmem>>, vector<1x18x128xbf16>,
      %cst_68 = arith.constant 0.000000e+00 : bf16
      %84 = vector.broadcast %cst_68 : bf16 to vector<18x128xbf16>
      %c17 = arith.constant 17 : index
      %c0_69 = arith.constant 0 : index
      %c0_70 = arith.constant 0 : index
      %85 = vector.load %arg9[%c17, %c0_69, %c0_70] : memref<18x18x128xbf16, #tpu.memory_space<vmem>>, vector<1x18x128xbf16>
      %86 = vector.shape_cast %85 : vector<1x18x128xbf16> to vector<18x128xbf16>
      %87 = vector.shape_cast %84 : vector<18x128xbf16> to vector<1x18x128xbf16>
      tpu.vector_store %arg9[%c17, %c0_69, %c0_70], %87 {strides = array<i32>} : memref<18x18x128xbf16, #tpu.memory_space<vmem>>, vector<1x18x128xbf16>,
      %cst_71 = arith.constant 0.000000e+00 : bf16
      %88 = vector.broadcast %cst_71 : bf16 to vector<16x1x128xbf16>
      %89 = tpu.concatenate %88, %79, %88 in 1 : vector<16x1x128xbf16>, vector<16x16x128xbf16>, vector<16x1x128xbf16> -> vector<16x18x128xbf16>
      %c1_72 = arith.constant 1 : index
      %c0_73 = arith.constant 0 : index
      %c0_74 = arith.constant 0 : index
      %90 = vector.load %arg9[%c1_72, %c0_73, %c0_74] : memref<18x18x128xbf16, #tpu.memory_space<vmem>>, vector<16x18x128xbf16>
      tpu.vector_store %arg9[%c1_72, %c0_73, %c0_74], %89 {strides = array<i32>} : memref<18x18x128xbf16, #tpu.memory_space<vmem>>, vector<16x18x128xbf16>,
    } else {
    }
    %cst = arith.constant 0.000000e+00 : f32
    %3 = vector.broadcast %cst : f32 to vector<256x128xf32>
    %c0 = arith.constant 0 : index
    %c0_1 = arith.constant 0 : index
    %c0_2 = arith.constant 0 : index
    %4 = vector.load %arg9[%c0, %c0_1, %c0_2] : memref<18x18x128xbf16, #tpu.memory_space<vmem>>, vector<16x16x128xbf16>
    %5 = vector.shape_cast %4 : vector<16x16x128xbf16> to vector<256x128xbf16>
    %c0_3 = arith.constant 0 : index
    %c0_4 = arith.constant 0 : index
    %6 = vector.load %arg3[%c0_3, %c0_4] : memref<1152x128xbf16, #tpu.memory_space<vmem>>, vector<128x128xbf16>
    %cst_5 = arith.constant dense<0.000000e+00> : vector<256x128xf32>
    %7 = tpu.matmul %5, %6, %cst_5 {dimension_numbers = #tpu.dot_dimension_numbers<[1], [0], [0], [1], [0, 0, 1, 1], [], []>} : vector<256x128xbf16>, vector<128x128xbf16>, vector<256x128xf32> -> vector<256x128xf32>
    %8 = arith.addf %3, %7 : vector<256x128xf32>
    %c0_6 = arith.constant 0 : index
    %c1 = arith.constant 1 : index
    %c0_7 = arith.constant 0 : index
    %9 = vector.load %arg9[%c0_6, %c1, %c0_7] : memref<18x18x128xbf16, #tpu.memory_space<vmem>>, vector<16x16x128xbf16>
    %10 = vector.shape_cast %9 : vector<16x16x128xbf16> to vector<256x128xbf16>
    %c128 = arith.constant 128 : index
    %c0_8 = arith.constant 0 : index
    %11 = vector.load %arg3[%c128, %c0_8] : memref<1152x128xbf16, #tpu.memory_space<vmem>>, vector<128x128xbf16>
    %cst_9 = arith.constant dense<0.000000e+00> : vector<256x128xf32>
    %12 = tpu.matmul %10, %11, %cst_9 {dimension_numbers = #tpu.dot_dimension_numbers<[1], [0], [0], [1], [0, 0, 1, 1], [], []>} : vector<256x128xbf16>, vector<128x128xbf16>, vector<256x128xf32> -> vector<256x128xf32>
    %13 = arith.addf %8, %12 : vector<256x128xf32>
    %c0_10 = arith.constant 0 : index
    %c2 = arith.constant 2 : index
    %c0_11 = arith.constant 0 : index
    %14 = vector.load %arg9[%c0_10, %c2, %c0_11] : memref<18x18x128xbf16, #tpu.memory_space<vmem>>, vector<16x16x128xbf16>
    %15 = vector.shape_cast %14 : vector<16x16x128xbf16> to vector<256x128xbf16>
    %c256 = arith.constant 256 : index
    %c0_12 = arith.constant 0 : index
    %16 = vector.load %arg3[%c256, %c0_12] : memref<1152x128xbf16, #tpu.memory_space<vmem>>, vector<128x128xbf16>
    %cst_13 = arith.constant dense<0.000000e+00> : vector<256x128xf32>
    %17 = tpu.matmul %15, %16, %cst_13 {dimension_numbers = #tpu.dot_dimension_numbers<[1], [0], [0], [1], [0, 0, 1, 1], [], []>} : vector<256x128xbf16>, vector<128x128xbf16>, vector<256x128xf32> -> vector<256x128xf32>
    %18 = arith.addf %13, %17 : vector<256x128xf32>
    %c1_14 = arith.constant 1 : index
    %c0_15 = arith.constant 0 : index
    %c0_16 = arith.constant 0 : index
    %19 = vector.load %arg9[%c1_14, %c0_15, %c0_16] : memref<18x18x128xbf16, #tpu.memory_space<vmem>>, vector<16x16x128xbf16>
    %20 = vector.shape_cast %19 : vector<16x16x128xbf16> to vector<256x128xbf16>
    %c384 = arith.constant 384 : index
    %c0_17 = arith.constant 0 : index
    %21 = vector.load %arg3[%c384, %c0_17] : memref<1152x128xbf16, #tpu.memory_space<vmem>>, vector<128x128xbf16>
    %cst_18 = arith.constant dense<0.000000e+00> : vector<256x128xf32>
    %22 = tpu.matmul %20, %21, %cst_18 {dimension_numbers = #tpu.dot_dimension_numbers<[1], [0], [0], [1], [0, 0, 1, 1], [], []>} : vector<256x128xbf16>, vector<128x128xbf16>, vector<256x128xf32> -> vector<256x128xf32>
    %23 = arith.addf %18, %22 : vector<256x128xf32>
    %c1_19 = arith.constant 1 : index
    %c1_20 = arith.constant 1 : index
    %c0_21 = arith.constant 0 : index
    %24 = vector.load %arg9[%c1_19, %c1_20, %c0_21] : memref<18x18x128xbf16, #tpu.memory_space<vmem>>, vector<16x16x128xbf16>
    %25 = vector.shape_cast %24 : vector<16x16x128xbf16> to vector<256x128xbf16>
    %c512 = arith.constant 512 : index
    %c0_22 = arith.constant 0 : index
    %26 = vector.load %arg3[%c512, %c0_22] : memref<1152x128xbf16, #tpu.memory_space<vmem>>, vector<128x128xbf16>
    %cst_23 = arith.constant dense<0.000000e+00> : vector<256x128xf32>
    %27 = tpu.matmul %25, %26, %cst_23 {dimension_numbers = #tpu.dot_dimension_numbers<[1], [0], [0], [1], [0, 0, 1, 1], [], []>} : vector<256x128xbf16>, vector<128x128xbf16>, vector<256x128xf32> -> vector<256x128xf32>
    %28 = arith.addf %23, %27 : vector<256x128xf32>
    %c1_24 = arith.constant 1 : index
    %c2_25 = arith.constant 2 : index
    %c0_26 = arith.constant 0 : index
    %29 = vector.load %arg9[%c1_24, %c2_25, %c0_26] : memref<18x18x128xbf16, #tpu.memory_space<vmem>>, vector<16x16x128xbf16>
    %30 = vector.shape_cast %29 : vector<16x16x128xbf16> to vector<256x128xbf16>
    %c640 = arith.constant 640 : index
    %c0_27 = arith.constant 0 : index
    %31 = vector.load %arg3[%c640, %c0_27] : memref<1152x128xbf16, #tpu.memory_space<vmem>>, vector<128x128xbf16>
    %cst_28 = arith.constant dense<0.000000e+00> : vector<256x128xf32>
    %32 = tpu.matmul %30, %31, %cst_28 {dimension_numbers = #tpu.dot_dimension_numbers<[1], [0], [0], [1], [0, 0, 1, 1], [], []>} : vector<256x128xbf16>, vector<128x128xbf16>, vector<256x128xf32> -> vector<256x128xf32>
    %33 = arith.addf %28, %32 : vector<256x128xf32>
    %c2_29 = arith.constant 2 : index
    %c0_30 = arith.constant 0 : index
    %c0_31 = arith.constant 0 : index
    %34 = vector.load %arg9[%c2_29, %c0_30, %c0_31] : memref<18x18x128xbf16, #tpu.memory_space<vmem>>, vector<16x16x128xbf16>
    %35 = vector.shape_cast %34 : vector<16x16x128xbf16> to vector<256x128xbf16>
    %c768 = arith.constant 768 : index
    %c0_32 = arith.constant 0 : index
    %36 = vector.load %arg3[%c768, %c0_32] : memref<1152x128xbf16, #tpu.memory_space<vmem>>, vector<128x128xbf16>
    %cst_33 = arith.constant dense<0.000000e+00> : vector<256x128xf32>
    %37 = tpu.matmul %35, %36, %cst_33 {dimension_numbers = #tpu.dot_dimension_numbers<[1], [0], [0], [1], [0, 0, 1, 1], [], []>} : vector<256x128xbf16>, vector<128x128xbf16>, vector<256x128xf32> -> vector<256x128xf32>
    %38 = arith.addf %33, %37 : vector<256x128xf32>
    %c2_34 = arith.constant 2 : index
    %c1_35 = arith.constant 1 : index
    %c0_36 = arith.constant 0 : index
    %39 = vector.load %arg9[%c2_34, %c1_35, %c0_36] : memref<18x18x128xbf16, #tpu.memory_space<vmem>>, vector<16x16x128xbf16>
    %40 = vector.shape_cast %39 : vector<16x16x128xbf16> to vector<256x128xbf16>
    %c896 = arith.constant 896 : index
    %c0_37 = arith.constant 0 : index
    %41 = vector.load %arg3[%c896, %c0_37] : memref<1152x128xbf16, #tpu.memory_space<vmem>>, vector<128x128xbf16>
    %cst_38 = arith.constant dense<0.000000e+00> : vector<256x128xf32>
    %42 = tpu.matmul %40, %41, %cst_38 {dimension_numbers = #tpu.dot_dimension_numbers<[1], [0], [0], [1], [0, 0, 1, 1], [], []>} : vector<256x128xbf16>, vector<128x128xbf16>, vector<256x128xf32> -> vector<256x128xf32>
    %43 = arith.addf %38, %42 : vector<256x128xf32>
    %c2_39 = arith.constant 2 : index
    %c2_40 = arith.constant 2 : index
    %c0_41 = arith.constant 0 : index
    %44 = vector.load %arg9[%c2_39, %c2_40, %c0_41] : memref<18x18x128xbf16, #tpu.memory_space<vmem>>, vector<16x16x128xbf16>
    %45 = vector.shape_cast %44 : vector<16x16x128xbf16> to vector<256x128xbf16>
    %c1024 = arith.constant 1024 : index
    %c0_42 = arith.constant 0 : index
    %46 = vector.load %arg3[%c1024, %c0_42] : memref<1152x128xbf16, #tpu.memory_space<vmem>>, vector<128x128xbf16>
    %cst_43 = arith.constant dense<0.000000e+00> : vector<256x128xf32>
    %47 = tpu.matmul %45, %46, %cst_43 {dimension_numbers = #tpu.dot_dimension_numbers<[1], [0], [0], [1], [0, 0, 1, 1], [], []>} : vector<256x128xbf16>, vector<128x128xbf16>, vector<256x128xf32> -> vector<256x128xf32>
    %48 = arith.addf %43, %47 : vector<256x128xf32>
    %c0_44 = arith.constant 0 : index
    %c0_45 = arith.constant 0 : index
    %49 = vector.load %arg4[%c0_44, %c0_45] : memref<1x128xf32, #tpu.memory_space<vmem>>, vector<1x128xf32>
    %50 = vector.broadcast %49 : vector<1x128xf32> to vector<256x128xf32>
    %51 = arith.addf %48, %50 : vector<256x128xf32>
    %cst_46 = arith.constant 0.000000e+00 : f32
    %52 = vector.broadcast %cst_46 : f32 to vector<256x128xf32>
    %53 = arith.maximumf %51, %52 : vector<256x128xf32>
    %cst_47 = arith.constant dense<0.000000e+00> : vector<128xf32>
    %54 = vector.multi_reduction <add>, %53, %cst_47 [0] : vector<256x128xf32> to vector<128xf32>
    %55 = vector.shape_cast %54 : vector<128xf32> to vector<1x128xf32>
    %56 = arith.mulf %53, %53 : vector<256x128xf32>
    %cst_48 = arith.constant dense<0.000000e+00> : vector<128xf32>
    %57 = vector.multi_reduction <add>, %56, %cst_48 [0] : vector<256x128xf32> to vector<128xf32>
    %58 = vector.shape_cast %57 : vector<128xf32> to vector<1x128xf32>
    %59 = tpu.concatenate %55, %58 in 0 : vector<1x128xf32>, vector<1x128xf32> -> vector<2x128xf32>
    %c0_49 = arith.constant 0 : index
    %c0_50 = arith.constant 0 : index
    %c0_51 = arith.constant 0 : index
    %60 = vector.load %arg8[%c0_49, %c0_50, %c0_51] : memref<1x2x128xf32, #tpu.memory_space<vmem>>, vector<1x2x128xf32>
    %61 = vector.shape_cast %60 : vector<1x2x128xf32> to vector<2x128xf32>
    %62 = vector.shape_cast %59 : vector<2x128xf32> to vector<1x2x128xf32>
    tpu.vector_store %arg8[%c0_49, %c0_50, %c0_51], %62 {strides = array<i32>} : memref<1x2x128xf32, #tpu.memory_space<vmem>>, vector<1x2x128xf32>,
    %63 = vector.shape_cast %53 : vector<256x128xf32> to vector<16x16x128xf32>
    %64 = arith.truncf %63 : vector<16x16x128xf32> to vector<16x16x128xbf16>
    %c0_52 = arith.constant 0 : index
    %c0_53 = arith.constant 0 : index
    %c0_54 = arith.constant 0 : index
    %c0_55 = arith.constant 0 : index
    %65 = vector.load %arg7[%c0_52, %c0_53, %c0_54, %c0_55] : memref<1x16x16x128xbf16, #tpu.memory_space<vmem>>, vector<1x16x16x128xbf16>
    %66 = vector.shape_cast %65 : vector<1x16x16x128xbf16> to vector<16x16x128xbf16>
    %67 = vector.shape_cast %64 : vector<16x16x128xbf16> to vector<1x16x16x128xbf16>
    tpu.vector_store %arg7[%c0_52, %c0_53, %c0_54, %c0_55], %67 {strides = array<i32>} : memref<1x16x16x128xbf16, #tpu.memory_space<vmem>>, vector<1x16x16x128xbf16>,
    return
  }
  func.func @transform_0(%arg0: i32, %arg1: i32) -> (i32, i32, i32, i32) {
    %c0_i32 = arith.constant 0 : i32
    %c0_i32_0 = arith.constant 0 : i32
    %c0_i32_1 = arith.constant 0 : i32
    %c0_i32_2 = arith.constant 0 : i32
    return %arg0, %c0_i32, %c0_i32_0, %c0_i32_1 : i32, i32, i32, i32
  }
  func.func @transform_1(%arg0: i32, %arg1: i32) -> (i32, i32) {
    %c0_i32 = arith.constant 0 : i32
    %c0_i32_0 = arith.constant 0 : i32
    return %c0_i32, %arg1 : i32, i32
  }
  func.func @transform_2(%arg0: i32, %arg1: i32) -> (i32, i32) {
    %c0_i32 = arith.constant 0 : i32
    %c0_i32_0 = arith.constant 0 : i32
    return %c0_i32, %arg1 : i32, i32
  }
  func.func @transform_3(%arg0: i32, %arg1: i32) -> (i32, i32) {
    %c0_i32 = arith.constant 0 : i32
    %c0_i32_0 = arith.constant 0 : i32
    %c0_i32_1 = arith.constant 0 : i32
    return %c0_i32, %c0_i32_0 : i32, i32
  }
  func.func @transform_4(%arg0: i32, %arg1: i32) -> (i32, i32) {
    %c0_i32 = arith.constant 0 : i32
    %c0_i32_0 = arith.constant 0 : i32
    %c0_i32_1 = arith.constant 0 : i32
    return %c0_i32, %c0_i32_0 : i32, i32
  }
  func.func @transform_5(%arg0: i32, %arg1: i32) -> (i32, i32, i32, i32) {
    %c0_i32 = arith.constant 0 : i32
    %c0_i32_0 = arith.constant 0 : i32
    %c0_i32_1 = arith.constant 0 : i32
    return %arg0, %c0_i32, %c0_i32_0, %arg1 : i32, i32, i32, i32
  }
  func.func @transform_6(%arg0: i32, %arg1: i32) -> (i32, i32, i32) {
    %c0_i32 = arith.constant 0 : i32
    %c0_i32_0 = arith.constant 0 : i32
    return %arg0, %c0_i32, %arg1 : i32, i32, i32
  }
}

module attributes {stable_mosaic.version = 11 : i64} {
  func.func @_conv3x3_bn_stats_kernel(%arg0: i32, %arg1: i32, %arg2: memref<1x16x16x128xbf16, #tpu.memory_space<vmem>>, %arg3: memref<1152x128xbf16, #tpu.memory_space<vmem>>, %arg4: memref<1x128xf32, #tpu.memory_space<vmem>>, %arg5: memref<1x16x16x128xbf16, #tpu.memory_space<vmem>>, %arg6: memref<1x2x128xf32, #tpu.memory_space<vmem>>, %arg7: memref<18x18x128xbf16, #tpu.memory_space<vmem>>) attributes {dimension_semantics = [#tpu.dimension_semantics<parallel>, #tpu.dimension_semantics<arbitrary>], iteration_bounds = array<i64: 2, 1>, scalar_prefetch = 0 : i64, scratch_operands = 1 : i64, tpu.core_type = #tpu.core_type<tc>, window_params = [{transform_indices = @transform_0, window_bounds = array<i64: 1, 16, 16, 128>}, {transform_indices = @transform_1, window_bounds = array<i64: 1152, 128>}, {transform_indices = @transform_2, window_bounds = array<i64: 1, 128>}, {transform_indices = @transform_3, window_bounds = array<i64: 1, 16, 16, 128>}, {transform_indices = @transform_4, window_bounds = array<i64: 1, 2, 128>}]} {
    %c0_i32 = arith.constant 0 : i32
    %0 = arith.cmpi eq, %arg1, %c0_i32 : i32
    %1 = arith.extui %0 : i1 to i32
    %c0_i32_0 = arith.constant 0 : i32
    %2 = arith.cmpi ne, %1, %c0_i32_0 : i32
    scf.if %2 {
      %c0_56 = arith.constant 0 : index
      %c0_57 = arith.constant 0 : index
      %c0_58 = arith.constant 0 : index
      %c0_59 = arith.constant 0 : index
      %68 = vector.load %arg2[%c0_56, %c0_57, %c0_58, %c0_59] : memref<1x16x16x128xbf16, #tpu.memory_space<vmem>>, vector<1x16x16x128xbf16>
      %69 = vector.shape_cast %68 : vector<1x16x16x128xbf16> to vector<16x16x128xbf16>
      %cst_60 = arith.constant 0.000000e+00 : bf16
      %70 = vector.broadcast %cst_60 : bf16 to vector<18x128xbf16>
      %c0_61 = arith.constant 0 : index
      %c0_62 = arith.constant 0 : index
      %c0_63 = arith.constant 0 : index
      %71 = vector.load %arg7[%c0_61, %c0_62, %c0_63] : memref<18x18x128xbf16, #tpu.memory_space<vmem>>, vector<1x18x128xbf16>
      %72 = vector.shape_cast %71 : vector<1x18x128xbf16> to vector<18x128xbf16>
      %73 = vector.shape_cast %70 : vector<18x128xbf16> to vector<1x18x128xbf16>
      tpu.vector_store %arg7[%c0_61, %c0_62, %c0_63], %73 {strides = array<i32>} : memref<18x18x128xbf16, #tpu.memory_space<vmem>>, vector<1x18x128xbf16>,
      %cst_64 = arith.constant 0.000000e+00 : bf16
      %74 = vector.broadcast %cst_64 : bf16 to vector<18x128xbf16>
      %c17 = arith.constant 17 : index
      %c0_65 = arith.constant 0 : index
      %c0_66 = arith.constant 0 : index
      %75 = vector.load %arg7[%c17, %c0_65, %c0_66] : memref<18x18x128xbf16, #tpu.memory_space<vmem>>, vector<1x18x128xbf16>
      %76 = vector.shape_cast %75 : vector<1x18x128xbf16> to vector<18x128xbf16>
      %77 = vector.shape_cast %74 : vector<18x128xbf16> to vector<1x18x128xbf16>
      tpu.vector_store %arg7[%c17, %c0_65, %c0_66], %77 {strides = array<i32>} : memref<18x18x128xbf16, #tpu.memory_space<vmem>>, vector<1x18x128xbf16>,
      %cst_67 = arith.constant 0.000000e+00 : bf16
      %78 = vector.broadcast %cst_67 : bf16 to vector<16x1x128xbf16>
      %79 = tpu.concatenate %78, %69, %78 in 1 : vector<16x1x128xbf16>, vector<16x16x128xbf16>, vector<16x1x128xbf16> -> vector<16x18x128xbf16>
      %c1_68 = arith.constant 1 : index
      %c0_69 = arith.constant 0 : index
      %c0_70 = arith.constant 0 : index
      %80 = vector.load %arg7[%c1_68, %c0_69, %c0_70] : memref<18x18x128xbf16, #tpu.memory_space<vmem>>, vector<16x18x128xbf16>
      tpu.vector_store %arg7[%c1_68, %c0_69, %c0_70], %79 {strides = array<i32>} : memref<18x18x128xbf16, #tpu.memory_space<vmem>>, vector<16x18x128xbf16>,
    } else {
    }
    %cst = arith.constant 0.000000e+00 : f32
    %3 = vector.broadcast %cst : f32 to vector<256x128xf32>
    %c0 = arith.constant 0 : index
    %c0_1 = arith.constant 0 : index
    %c0_2 = arith.constant 0 : index
    %4 = vector.load %arg7[%c0, %c0_1, %c0_2] : memref<18x18x128xbf16, #tpu.memory_space<vmem>>, vector<16x16x128xbf16>
    %5 = vector.shape_cast %4 : vector<16x16x128xbf16> to vector<256x128xbf16>
    %c0_3 = arith.constant 0 : index
    %c0_4 = arith.constant 0 : index
    %6 = vector.load %arg3[%c0_3, %c0_4] : memref<1152x128xbf16, #tpu.memory_space<vmem>>, vector<128x128xbf16>
    %cst_5 = arith.constant dense<0.000000e+00> : vector<256x128xf32>
    %7 = tpu.matmul %5, %6, %cst_5 {dimension_numbers = #tpu.dot_dimension_numbers<[1], [0], [0], [1], [0, 0, 1, 1], [], []>} : vector<256x128xbf16>, vector<128x128xbf16>, vector<256x128xf32> -> vector<256x128xf32>
    %8 = arith.addf %3, %7 : vector<256x128xf32>
    %c0_6 = arith.constant 0 : index
    %c1 = arith.constant 1 : index
    %c0_7 = arith.constant 0 : index
    %9 = vector.load %arg7[%c0_6, %c1, %c0_7] : memref<18x18x128xbf16, #tpu.memory_space<vmem>>, vector<16x16x128xbf16>
    %10 = vector.shape_cast %9 : vector<16x16x128xbf16> to vector<256x128xbf16>
    %c128 = arith.constant 128 : index
    %c0_8 = arith.constant 0 : index
    %11 = vector.load %arg3[%c128, %c0_8] : memref<1152x128xbf16, #tpu.memory_space<vmem>>, vector<128x128xbf16>
    %cst_9 = arith.constant dense<0.000000e+00> : vector<256x128xf32>
    %12 = tpu.matmul %10, %11, %cst_9 {dimension_numbers = #tpu.dot_dimension_numbers<[1], [0], [0], [1], [0, 0, 1, 1], [], []>} : vector<256x128xbf16>, vector<128x128xbf16>, vector<256x128xf32> -> vector<256x128xf32>
    %13 = arith.addf %8, %12 : vector<256x128xf32>
    %c0_10 = arith.constant 0 : index
    %c2 = arith.constant 2 : index
    %c0_11 = arith.constant 0 : index
    %14 = vector.load %arg7[%c0_10, %c2, %c0_11] : memref<18x18x128xbf16, #tpu.memory_space<vmem>>, vector<16x16x128xbf16>
    %15 = vector.shape_cast %14 : vector<16x16x128xbf16> to vector<256x128xbf16>
    %c256 = arith.constant 256 : index
    %c0_12 = arith.constant 0 : index
    %16 = vector.load %arg3[%c256, %c0_12] : memref<1152x128xbf16, #tpu.memory_space<vmem>>, vector<128x128xbf16>
    %cst_13 = arith.constant dense<0.000000e+00> : vector<256x128xf32>
    %17 = tpu.matmul %15, %16, %cst_13 {dimension_numbers = #tpu.dot_dimension_numbers<[1], [0], [0], [1], [0, 0, 1, 1], [], []>} : vector<256x128xbf16>, vector<128x128xbf16>, vector<256x128xf32> -> vector<256x128xf32>
    %18 = arith.addf %13, %17 : vector<256x128xf32>
    %c1_14 = arith.constant 1 : index
    %c0_15 = arith.constant 0 : index
    %c0_16 = arith.constant 0 : index
    %19 = vector.load %arg7[%c1_14, %c0_15, %c0_16] : memref<18x18x128xbf16, #tpu.memory_space<vmem>>, vector<16x16x128xbf16>
    %20 = vector.shape_cast %19 : vector<16x16x128xbf16> to vector<256x128xbf16>
    %c384 = arith.constant 384 : index
    %c0_17 = arith.constant 0 : index
    %21 = vector.load %arg3[%c384, %c0_17] : memref<1152x128xbf16, #tpu.memory_space<vmem>>, vector<128x128xbf16>
    %cst_18 = arith.constant dense<0.000000e+00> : vector<256x128xf32>
    %22 = tpu.matmul %20, %21, %cst_18 {dimension_numbers = #tpu.dot_dimension_numbers<[1], [0], [0], [1], [0, 0, 1, 1], [], []>} : vector<256x128xbf16>, vector<128x128xbf16>, vector<256x128xf32> -> vector<256x128xf32>
    %23 = arith.addf %18, %22 : vector<256x128xf32>
    %c1_19 = arith.constant 1 : index
    %c1_20 = arith.constant 1 : index
    %c0_21 = arith.constant 0 : index
    %24 = vector.load %arg7[%c1_19, %c1_20, %c0_21] : memref<18x18x128xbf16, #tpu.memory_space<vmem>>, vector<16x16x128xbf16>
    %25 = vector.shape_cast %24 : vector<16x16x128xbf16> to vector<256x128xbf16>
    %c512 = arith.constant 512 : index
    %c0_22 = arith.constant 0 : index
    %26 = vector.load %arg3[%c512, %c0_22] : memref<1152x128xbf16, #tpu.memory_space<vmem>>, vector<128x128xbf16>
    %cst_23 = arith.constant dense<0.000000e+00> : vector<256x128xf32>
    %27 = tpu.matmul %25, %26, %cst_23 {dimension_numbers = #tpu.dot_dimension_numbers<[1], [0], [0], [1], [0, 0, 1, 1], [], []>} : vector<256x128xbf16>, vector<128x128xbf16>, vector<256x128xf32> -> vector<256x128xf32>
    %28 = arith.addf %23, %27 : vector<256x128xf32>
    %c1_24 = arith.constant 1 : index
    %c2_25 = arith.constant 2 : index
    %c0_26 = arith.constant 0 : index
    %29 = vector.load %arg7[%c1_24, %c2_25, %c0_26] : memref<18x18x128xbf16, #tpu.memory_space<vmem>>, vector<16x16x128xbf16>
    %30 = vector.shape_cast %29 : vector<16x16x128xbf16> to vector<256x128xbf16>
    %c640 = arith.constant 640 : index
    %c0_27 = arith.constant 0 : index
    %31 = vector.load %arg3[%c640, %c0_27] : memref<1152x128xbf16, #tpu.memory_space<vmem>>, vector<128x128xbf16>
    %cst_28 = arith.constant dense<0.000000e+00> : vector<256x128xf32>
    %32 = tpu.matmul %30, %31, %cst_28 {dimension_numbers = #tpu.dot_dimension_numbers<[1], [0], [0], [1], [0, 0, 1, 1], [], []>} : vector<256x128xbf16>, vector<128x128xbf16>, vector<256x128xf32> -> vector<256x128xf32>
    %33 = arith.addf %28, %32 : vector<256x128xf32>
    %c2_29 = arith.constant 2 : index
    %c0_30 = arith.constant 0 : index
    %c0_31 = arith.constant 0 : index
    %34 = vector.load %arg7[%c2_29, %c0_30, %c0_31] : memref<18x18x128xbf16, #tpu.memory_space<vmem>>, vector<16x16x128xbf16>
    %35 = vector.shape_cast %34 : vector<16x16x128xbf16> to vector<256x128xbf16>
    %c768 = arith.constant 768 : index
    %c0_32 = arith.constant 0 : index
    %36 = vector.load %arg3[%c768, %c0_32] : memref<1152x128xbf16, #tpu.memory_space<vmem>>, vector<128x128xbf16>
    %cst_33 = arith.constant dense<0.000000e+00> : vector<256x128xf32>
    %37 = tpu.matmul %35, %36, %cst_33 {dimension_numbers = #tpu.dot_dimension_numbers<[1], [0], [0], [1], [0, 0, 1, 1], [], []>} : vector<256x128xbf16>, vector<128x128xbf16>, vector<256x128xf32> -> vector<256x128xf32>
    %38 = arith.addf %33, %37 : vector<256x128xf32>
    %c2_34 = arith.constant 2 : index
    %c1_35 = arith.constant 1 : index
    %c0_36 = arith.constant 0 : index
    %39 = vector.load %arg7[%c2_34, %c1_35, %c0_36] : memref<18x18x128xbf16, #tpu.memory_space<vmem>>, vector<16x16x128xbf16>
    %40 = vector.shape_cast %39 : vector<16x16x128xbf16> to vector<256x128xbf16>
    %c896 = arith.constant 896 : index
    %c0_37 = arith.constant 0 : index
    %41 = vector.load %arg3[%c896, %c0_37] : memref<1152x128xbf16, #tpu.memory_space<vmem>>, vector<128x128xbf16>
    %cst_38 = arith.constant dense<0.000000e+00> : vector<256x128xf32>
    %42 = tpu.matmul %40, %41, %cst_38 {dimension_numbers = #tpu.dot_dimension_numbers<[1], [0], [0], [1], [0, 0, 1, 1], [], []>} : vector<256x128xbf16>, vector<128x128xbf16>, vector<256x128xf32> -> vector<256x128xf32>
    %43 = arith.addf %38, %42 : vector<256x128xf32>
    %c2_39 = arith.constant 2 : index
    %c2_40 = arith.constant 2 : index
    %c0_41 = arith.constant 0 : index
    %44 = vector.load %arg7[%c2_39, %c2_40, %c0_41] : memref<18x18x128xbf16, #tpu.memory_space<vmem>>, vector<16x16x128xbf16>
    %45 = vector.shape_cast %44 : vector<16x16x128xbf16> to vector<256x128xbf16>
    %c1024 = arith.constant 1024 : index
    %c0_42 = arith.constant 0 : index
    %46 = vector.load %arg3[%c1024, %c0_42] : memref<1152x128xbf16, #tpu.memory_space<vmem>>, vector<128x128xbf16>
    %cst_43 = arith.constant dense<0.000000e+00> : vector<256x128xf32>
    %47 = tpu.matmul %45, %46, %cst_43 {dimension_numbers = #tpu.dot_dimension_numbers<[1], [0], [0], [1], [0, 0, 1, 1], [], []>} : vector<256x128xbf16>, vector<128x128xbf16>, vector<256x128xf32> -> vector<256x128xf32>
    %48 = arith.addf %43, %47 : vector<256x128xf32>
    %c0_44 = arith.constant 0 : index
    %c0_45 = arith.constant 0 : index
    %49 = vector.load %arg4[%c0_44, %c0_45] : memref<1x128xf32, #tpu.memory_space<vmem>>, vector<1x128xf32>
    %50 = vector.broadcast %49 : vector<1x128xf32> to vector<256x128xf32>
    %51 = arith.addf %48, %50 : vector<256x128xf32>
    %cst_46 = arith.constant 0.000000e+00 : f32
    %52 = vector.broadcast %cst_46 : f32 to vector<256x128xf32>
    %53 = arith.maximumf %51, %52 : vector<256x128xf32>
    %cst_47 = arith.constant dense<0.000000e+00> : vector<128xf32>
    %54 = vector.multi_reduction <add>, %53, %cst_47 [0] : vector<256x128xf32> to vector<128xf32>
    %55 = vector.shape_cast %54 : vector<128xf32> to vector<1x128xf32>
    %56 = arith.mulf %53, %53 : vector<256x128xf32>
    %cst_48 = arith.constant dense<0.000000e+00> : vector<128xf32>
    %57 = vector.multi_reduction <add>, %56, %cst_48 [0] : vector<256x128xf32> to vector<128xf32>
    %58 = vector.shape_cast %57 : vector<128xf32> to vector<1x128xf32>
    %59 = tpu.concatenate %55, %58 in 0 : vector<1x128xf32>, vector<1x128xf32> -> vector<2x128xf32>
    %c0_49 = arith.constant 0 : index
    %c0_50 = arith.constant 0 : index
    %c0_51 = arith.constant 0 : index
    %60 = vector.load %arg6[%c0_49, %c0_50, %c0_51] : memref<1x2x128xf32, #tpu.memory_space<vmem>>, vector<1x2x128xf32>
    %61 = vector.shape_cast %60 : vector<1x2x128xf32> to vector<2x128xf32>
    %62 = vector.shape_cast %59 : vector<2x128xf32> to vector<1x2x128xf32>
    tpu.vector_store %arg6[%c0_49, %c0_50, %c0_51], %62 {strides = array<i32>} : memref<1x2x128xf32, #tpu.memory_space<vmem>>, vector<1x2x128xf32>,
    %63 = vector.shape_cast %53 : vector<256x128xf32> to vector<16x16x128xf32>
    %64 = arith.truncf %63 : vector<16x16x128xf32> to vector<16x16x128xbf16>
    %c0_52 = arith.constant 0 : index
    %c0_53 = arith.constant 0 : index
    %c0_54 = arith.constant 0 : index
    %c0_55 = arith.constant 0 : index
    %65 = vector.load %arg5[%c0_52, %c0_53, %c0_54, %c0_55] : memref<1x16x16x128xbf16, #tpu.memory_space<vmem>>, vector<1x16x16x128xbf16>
    %66 = vector.shape_cast %65 : vector<1x16x16x128xbf16> to vector<16x16x128xbf16>
    %67 = vector.shape_cast %64 : vector<16x16x128xbf16> to vector<1x16x16x128xbf16>
    tpu.vector_store %arg5[%c0_52, %c0_53, %c0_54, %c0_55], %67 {strides = array<i32>} : memref<1x16x16x128xbf16, #tpu.memory_space<vmem>>, vector<1x16x16x128xbf16>,
    return
  }
  func.func @transform_0(%arg0: i32, %arg1: i32) -> (i32, i32, i32, i32) {
    %c0_i32 = arith.constant 0 : i32
    %c0_i32_0 = arith.constant 0 : i32
    %c0_i32_1 = arith.constant 0 : i32
    %c0_i32_2 = arith.constant 0 : i32
    return %arg0, %c0_i32, %c0_i32_0, %c0_i32_1 : i32, i32, i32, i32
  }
  func.func @transform_1(%arg0: i32, %arg1: i32) -> (i32, i32) {
    %c0_i32 = arith.constant 0 : i32
    %c0_i32_0 = arith.constant 0 : i32
    return %c0_i32, %arg1 : i32, i32
  }
  func.func @transform_2(%arg0: i32, %arg1: i32) -> (i32, i32) {
    %c0_i32 = arith.constant 0 : i32
    %c0_i32_0 = arith.constant 0 : i32
    return %c0_i32, %arg1 : i32, i32
  }
  func.func @transform_3(%arg0: i32, %arg1: i32) -> (i32, i32, i32, i32) {
    %c0_i32 = arith.constant 0 : i32
    %c0_i32_0 = arith.constant 0 : i32
    %c0_i32_1 = arith.constant 0 : i32
    return %arg0, %c0_i32, %c0_i32_0, %arg1 : i32, i32, i32, i32
  }
  func.func @transform_4(%arg0: i32, %arg1: i32) -> (i32, i32, i32) {
    %c0_i32 = arith.constant 0 : i32
    %c0_i32_0 = arith.constant 0 : i32
    return %arg0, %c0_i32, %arg1 : i32, i32, i32
  }
}

module attributes {stable_mosaic.version = 11 : i64} {
  func.func @_upconv2x2_relu_kernel(%arg0: i32, %arg1: i32, %arg2: memref<1x16x16x128xbf16, #tpu.memory_space<vmem>>, %arg3: memref<128x512xbf16, #tpu.memory_space<vmem>>, %arg4: memref<1x512xf32, #tpu.memory_space<vmem>>, %arg5: memref<1x2x2x16x16x128xbf16, #tpu.memory_space<vmem>>) attributes {dimension_semantics = [#tpu.dimension_semantics<parallel>, #tpu.dimension_semantics<parallel>], iteration_bounds = array<i64: 2, 1>, scalar_prefetch = 0 : i64, scratch_operands = 0 : i64, tpu.core_type = #tpu.core_type<tc>, window_params = [{transform_indices = @transform_0, window_bounds = array<i64: 1, 16, 16, 128>}, {transform_indices = @transform_1, window_bounds = array<i64: 128, 512>}, {transform_indices = @transform_2, window_bounds = array<i64: 1, 512>}, {transform_indices = @transform_3, window_bounds = array<i64: 1, 2, 2, 16, 16, 128>}]} {
    %c0 = arith.constant 0 : index
    %c0_0 = arith.constant 0 : index
    %c0_1 = arith.constant 0 : index
    %c0_2 = arith.constant 0 : index
    %0 = vector.load %arg2[%c0, %c0_0, %c0_1, %c0_2] : memref<1x16x16x128xbf16, #tpu.memory_space<vmem>>, vector<1x16x16x128xbf16>
    %1 = vector.shape_cast %0 : vector<1x16x16x128xbf16> to vector<16x16x128xbf16>
    %2 = vector.shape_cast %1 : vector<16x16x128xbf16> to vector<256x128xbf16>
    %c0_3 = arith.constant 0 : index
    %c0_4 = arith.constant 0 : index
    %3 = vector.load %arg3[%c0_3, %c0_4] : memref<128x512xbf16, #tpu.memory_space<vmem>>, vector<128x512xbf16>
    %cst = arith.constant dense<0.000000e+00> : vector<256x512xf32>
    %4 = tpu.matmul %2, %3, %cst {dimension_numbers = #tpu.dot_dimension_numbers<[1], [0], [0], [1], [0, 0, 1, 1], [], []>} : vector<256x128xbf16>, vector<128x512xbf16>, vector<256x512xf32> -> vector<256x512xf32>
    %c0_5 = arith.constant 0 : index
    %c0_6 = arith.constant 0 : index
    %5 = vector.load %arg4[%c0_5, %c0_6] : memref<1x512xf32, #tpu.memory_space<vmem>>, vector<1x512xf32>
    %6 = vector.broadcast %5 : vector<1x512xf32> to vector<256x512xf32>
    %7 = arith.addf %4, %6 : vector<256x512xf32>
    %cst_7 = arith.constant 0.000000e+00 : f32
    %8 = vector.broadcast %cst_7 : f32 to vector<256x512xf32>
    %9 = arith.maximumf %7, %8 : vector<256x512xf32>
    %10 = vector.extract_strided_slice %9 {offsets = [0, 0], sizes = [256, 128], strides = [1, 1]} : vector<256x512xf32> to vector<256x128xf32>
    %11 = vector.shape_cast %10 : vector<256x128xf32> to vector<16x16x128xf32>
    %12 = arith.truncf %11 : vector<16x16x128xf32> to vector<16x16x128xbf16>
    %c0_8 = arith.constant 0 : index
    %c0_9 = arith.constant 0 : index
    %c0_10 = arith.constant 0 : index
    %c0_11 = arith.constant 0 : index
    %c0_12 = arith.constant 0 : index
    %c0_13 = arith.constant 0 : index
    %13 = vector.load %arg5[%c0_8, %c0_9, %c0_10, %c0_11, %c0_12, %c0_13] : memref<1x2x2x16x16x128xbf16, #tpu.memory_space<vmem>>, vector<1x1x1x16x16x128xbf16>
    %14 = vector.shape_cast %13 : vector<1x1x1x16x16x128xbf16> to vector<16x16x128xbf16>
    %15 = vector.shape_cast %12 : vector<16x16x128xbf16> to vector<1x1x1x16x16x128xbf16>
    tpu.vector_store %arg5[%c0_8, %c0_9, %c0_10, %c0_11, %c0_12, %c0_13], %15 {strides = array<i32>} : memref<1x2x2x16x16x128xbf16, #tpu.memory_space<vmem>>, vector<1x1x1x16x16x128xbf16>,
    %16 = vector.extract_strided_slice %9 {offsets = [0, 128], sizes = [256, 128], strides = [1, 1]} : vector<256x512xf32> to vector<256x128xf32>
    %17 = vector.shape_cast %16 : vector<256x128xf32> to vector<16x16x128xf32>
    %18 = arith.truncf %17 : vector<16x16x128xf32> to vector<16x16x128xbf16>
    %c0_14 = arith.constant 0 : index
    %c0_15 = arith.constant 0 : index
    %c1 = arith.constant 1 : index
    %c0_16 = arith.constant 0 : index
    %c0_17 = arith.constant 0 : index
    %c0_18 = arith.constant 0 : index
    %19 = vector.load %arg5[%c0_14, %c0_15, %c1, %c0_16, %c0_17, %c0_18] : memref<1x2x2x16x16x128xbf16, #tpu.memory_space<vmem>>, vector<1x1x1x16x16x128xbf16>
    %20 = vector.shape_cast %19 : vector<1x1x1x16x16x128xbf16> to vector<16x16x128xbf16>
    %21 = vector.shape_cast %18 : vector<16x16x128xbf16> to vector<1x1x1x16x16x128xbf16>
    tpu.vector_store %arg5[%c0_14, %c0_15, %c1, %c0_16, %c0_17, %c0_18], %21 {strides = array<i32>} : memref<1x2x2x16x16x128xbf16, #tpu.memory_space<vmem>>, vector<1x1x1x16x16x128xbf16>,
    %22 = vector.extract_strided_slice %9 {offsets = [0, 256], sizes = [256, 128], strides = [1, 1]} : vector<256x512xf32> to vector<256x128xf32>
    %23 = vector.shape_cast %22 : vector<256x128xf32> to vector<16x16x128xf32>
    %24 = arith.truncf %23 : vector<16x16x128xf32> to vector<16x16x128xbf16>
    %c0_19 = arith.constant 0 : index
    %c1_20 = arith.constant 1 : index
    %c0_21 = arith.constant 0 : index
    %c0_22 = arith.constant 0 : index
    %c0_23 = arith.constant 0 : index
    %c0_24 = arith.constant 0 : index
    %25 = vector.load %arg5[%c0_19, %c1_20, %c0_21, %c0_22, %c0_23, %c0_24] : memref<1x2x2x16x16x128xbf16, #tpu.memory_space<vmem>>, vector<1x1x1x16x16x128xbf16>
    %26 = vector.shape_cast %25 : vector<1x1x1x16x16x128xbf16> to vector<16x16x128xbf16>
    %27 = vector.shape_cast %24 : vector<16x16x128xbf16> to vector<1x1x1x16x16x128xbf16>
    tpu.vector_store %arg5[%c0_19, %c1_20, %c0_21, %c0_22, %c0_23, %c0_24], %27 {strides = array<i32>} : memref<1x2x2x16x16x128xbf16, #tpu.memory_space<vmem>>, vector<1x1x1x16x16x128xbf16>,
    %28 = vector.extract_strided_slice %9 {offsets = [0, 384], sizes = [256, 128], strides = [1, 1]} : vector<256x512xf32> to vector<256x128xf32>
    %29 = vector.shape_cast %28 : vector<256x128xf32> to vector<16x16x128xf32>
    %30 = arith.truncf %29 : vector<16x16x128xf32> to vector<16x16x128xbf16>
    %c0_25 = arith.constant 0 : index
    %c1_26 = arith.constant 1 : index
    %c1_27 = arith.constant 1 : index
    %c0_28 = arith.constant 0 : index
    %c0_29 = arith.constant 0 : index
    %c0_30 = arith.constant 0 : index
    %31 = vector.load %arg5[%c0_25, %c1_26, %c1_27, %c0_28, %c0_29, %c0_30] : memref<1x2x2x16x16x128xbf16, #tpu.memory_space<vmem>>, vector<1x1x1x16x16x128xbf16>
    %32 = vector.shape_cast %31 : vector<1x1x1x16x16x128xbf16> to vector<16x16x128xbf16>
    %33 = vector.shape_cast %30 : vector<16x16x128xbf16> to vector<1x1x1x16x16x128xbf16>
    tpu.vector_store %arg5[%c0_25, %c1_26, %c1_27, %c0_28, %c0_29, %c0_30], %33 {strides = array<i32>} : memref<1x2x2x16x16x128xbf16, #tpu.memory_space<vmem>>, vector<1x1x1x16x16x128xbf16>,
    return
  }
  func.func @transform_0(%arg0: i32, %arg1: i32) -> (i32, i32, i32, i32) {
    %c0_i32 = arith.constant 0 : i32
    %c0_i32_0 = arith.constant 0 : i32
    %c0_i32_1 = arith.constant 0 : i32
    %c0_i32_2 = arith.constant 0 : i32
    return %arg0, %c0_i32, %c0_i32_0, %c0_i32_1 : i32, i32, i32, i32
  }
  func.func @transform_1(%arg0: i32, %arg1: i32) -> (i32, i32) {
    %c0_i32 = arith.constant 0 : i32
    %c0_i32_0 = arith.constant 0 : i32
    return %c0_i32, %arg1 : i32, i32
  }
  func.func @transform_2(%arg0: i32, %arg1: i32) -> (i32, i32) {
    %c0_i32 = arith.constant 0 : i32
    %c0_i32_0 = arith.constant 0 : i32
    return %c0_i32, %arg1 : i32, i32
  }
  func.func @transform_3(%arg0: i32, %arg1: i32) -> (i32, i32, i32, i32, i32, i32) {
    %c0_i32 = arith.constant 0 : i32
    %c0_i32_0 = arith.constant 0 : i32
    %c0_i32_1 = arith.constant 0 : i32
    %c0_i32_2 = arith.constant 0 : i32
    %c0_i32_3 = arith.constant 0 : i32
    return %arg0, %c0_i32, %c0_i32_0, %c0_i32_1, %c0_i32_2, %arg1 : i32, i32, i32, i32, i32, i32
  }
}

</mosaic_0001>

<bundles_post_ra>
// kernel: bottleneck_forward.5
= control target key start
LH: loop header
LB: loop body
LE: loop exit
PB: predicated region body
PF: predicated region fallthrough
CT: control target
= control target key end

     0   :  { %8 = vsyncpa [#allocation3], 0  ;;  %s3541_s0 = inlined_call_operand.hbm [shape: bf16[2,16,16,128], index: 0, kind: input, shape index: {}]   ;;  %s3542_s1 = inlined_call_operand.hbm [shape: bf16[128,512], index: 1, kind: input, shape index: {}]   ;;  %s3543_s2 = inlined_call_operand.hbm [shape: f32[1,512], index: 2, kind: input, shape index: {}]   ;;  %s3544_s3 = inlined_call_operand.hbm [shape: bf16[2,2,2,16,16,128], index: 3, kind: output, shape index: {}]  }
   0x1   :  { %10 = vsyncpa [#allocation3 + $0x1], 0 }
   0x2   :  { %11 = vsyncpa [#allocation6], 0 }
   0x3   :  { %12 = vsyncpa [#allocation4], 0 }
   0x4   :  { %14 = vsyncpa [#allocation4 + $0x1], 0  ;;  %s3032_s12 = smov 0   ;;  %s3034_s13 = smov 0  }
   0x5   :  { %s3036_s14 = smov 0   ;;  %s3038_s15 = smov 0  }
   0x6   :  { %s3040_s16 = smov 0   ;;  %s3042_s17 = smov 0  }
   0x7 LB: > { %s1869_s18 = sadd.s32 4294967295, %s2999_s17   ;;  %s1870_s19 = sadd.s32 4294967294, %s2999_s17   ;;  %s2999_s17 = sphi %s3042_s17, %s20_s17   ;;  %s2995_s16 = sphi %s3040_s16, %s3566_s16   ;;  %s2991_s15 = sphi %s3038_s15, %s3565_s15   ;;  %s2987_s14 = sphi %s3036_s14, %s3564_s14   ;;  %s2983_s13 = sphi %s3034_s13, %s3563_s13   ;;  %s2979_s12 = sphi %s3032_s12, %s3562_s12  }
   0x8   : > { %p52_p0 = scmp.ne.s32.totalorder %s2983_s13, %s2979_s12  ;;  %p3066_p1 = scmp.eq.s32.totalorder %s1869_s18, 0 }
   0x9   : > { %p3070_p2 = scmp.eq.s32.totalorder %s1869_s18, 1  ;;  %p136_p3 = scmp.eq.s32.totalorder %s1870_s19, 1 }
   0xa   : > { %s3549_s20 = scalar_select %p3066_p1, 1, 0 }
   0xb   : > { %p3076_p4 = por %p3066_p1, %p52_p0  ;;  %p1871_p5 = scmp.ge.s32.totalorder %s2999_s17, 1 }
   0xc   : > { %p3081_p6 = por %p136_p3, %p52_p0  ;;  %p143_p7 = scmp.lt.s32.totalorder %s2999_s17, 3 }
   0xd   : > { %s3551_s22 = scalar_select %p3076_p4, 1, 0 }
   0xe   : > { %s3552_s23 = scalar_select %p3081_p6, 1, 0 }
   0xf   : > { %p3086_p8 = pnand %p1871_p5, %p143_p7  ;;  %s3001_s25 = smov [#allocation5]  }
  0x10   : > { %s158_s26 = sshll.u32 %s3001_s25, 4  ;;  %s3002_s28 = smov [#allocation7]   ;;  %s3090_s26 = int_to_ptr.vmem [resolvable:$true] %s158_s26 }
  0x11   : > { %p2685_p9 = pneg %p3086_p8  ;;  %s175_s29 = sshll.u32 %s3002_s28, 4  ;;  %s3101_s29 = int_to_ptr.vmem [resolvable:$true] %s175_s29 }
  0x12   : > { %s2827_s5 = scalar_lea.hbm %s3542_s1, 4096 }
  0x13   : > { %p3097_p11 = pnand %p2685_p9, %p3066_p1  ;;  %p2828_p12 = scmp.ne.s32.totalorder %s3542_s1, %s2827_s5 }
  0x14   : > { %p2834_p5 = scmp.lt.u32.totalorder %s2827_s5, %s3542_s1 }
  0x15   : > { %p2829_p13 = pneg %p3097_p11 }
  0x17   : > { %p2830_p0 = pnand %p2829_p13, %p2828_p12 }
  0x19   : > { %p2831_p3 = pneg %p2830_p0 }
  0x1b   : > { %p2836_p7 = pnand %p2834_p5, %p2831_p3 }
  0x1d   : > { %2839 = shalt.err (!%p2836_p7)
}
  0x1e   : > { %s2840_s10 = scalar_lea.vmem %s3090_s26, 4096  ;;  %p2848_p1 = scmp.lt.s32.totalorder %s3090_s26, %s3090_s26 }
  0x1f   : > { %p2841_p9 = scmp.ne.s32.totalorder %s3090_s26, %s2840_s10  ;;  %p2849_p12 = scmp.lt.s32.totalorder %s2840_s10, %s2840_s10 }
  0x21   : > { %p2843_p10 = pnand %p2841_p9, %p2829_p13  ;;  %p2850_p0 = por %p2849_p12, %p2848_p1 }
  0x23   : > { %p2844_p6 = pneg %p2843_p10 }
  0x25   : > { %p2851_p4 = pnand %p2850_p0, %p2844_p6 }
  0x27   : > { %2854 = shalt.err (!%p2851_p4)
}
  0x28   : > { %s3003_s11 = smov 256   ;;  %s3004_s18 = smov 16  }
  0x29   : > { %2688 = dma.hbm_to_vmem [thread:$0]  (!%p3097_p11), %s3542_s1, 4096, %s3090_s26, [#allocation6], %s3003_s11, %s3003_s11, %s3004_s18  }
  0x2a   : > { %s2855_s4 = scalar_lea.hbm %s3543_s2, 64 }
  0x2b   : > { %p2856_p1 = scmp.ne.s32.totalorder %s3543_s2, %s2855_s4  ;;  %p2862_p10 = scmp.lt.u32.totalorder %s2855_s4, %s3543_s2 }
  0x2d   : > { %p2858_p4 = pnand %p2856_p1, %p2829_p13 }
  0x2f   : > { %p2859_p6 = pneg %p2858_p4 }
  0x31   : > { %p2864_p3 = pnand %p2862_p10, %p2859_p6 }
  0x33   : > { %2867 = shalt.err (!%p2864_p3)
}
  0x34   : > { %s2868_s26 = scalar_lea.vmem %s3101_s29, 64  ;;  %p2876_p12 = scmp.lt.s32.totalorder %s3101_s29, %s3101_s29 }
  0x35   : > { %p2869_p5 = scmp.ne.s32.totalorder %s3101_s29, %s2868_s26  ;;  %p2877_p0 = scmp.lt.s32.totalorder %s2868_s26, %s2868_s26 }
  0x37   : > { %p2871_p7 = pnand %p2869_p5, %p2829_p13  ;;  %p2878_p1 = por %p2877_p0, %p2876_p12 }
  0x39   : > { %p2872_p9 = pneg %p2871_p7 }
  0x3b   : > { %p2879_p4 = pnand %p2878_p1, %p2872_p9 }
  0x3d   : > { %2882 = shalt.err (!%p2879_p4)
}
  0x3e   : > { %2691 = dma.hbm_to_vmem [thread:$0]  (!%p3097_p11), %s3543_s2, 64, %s3101_s29, [#allocation6]  }
  0x3f   : > { %s32_s11 = sadd.s32 1, %s2995_s16  ;;  %s39_s18 = sadd.s32 1, %s2987_s14 }
  0x40   : > { %p34_p13 = scmp.ge.s32.totalorder %s32_s11, 2  ;;  %p46_p6 = scmp.ne.s32.totalorder %s2987_s14, %s2983_s13 }
  0x41   : > { %p47_p10 = scmp.eq.s32.totalorder %s2999_s17, 0  ;;  %p2702_p3 = scmp.lt.s32.totalorder %s2999_s17, 2 }
  0x42   : > { %s3568_s11 = smov (%p34_p13, %s32_s11), 0  ;;  %p3165_p7 = por %p3070_p2, %p46_p6 }
  0x43   : > { %p48_p5 = por %p47_p10, %p46_p6  ;;  %s36_s19 = ssub.s32 %s2995_s16, %s3568_s11 }
  0x44   : > { %s3555_s27 = scalar_select %p3165_p7, 1, 0 }
  0x45   : > { %s186_s25 = sand.u32 1, %s2987_s14   ;;  %p37_p9 = scmp.eq.s32.totalorder %s36_s19, 0 }
  0x46   : > { %s1875_s29 = sshll.u32 %s186_s25, 7  ;;  %s2160_s28 = sshll.u32 %s2995_s16, 11 }
  0x47   : > { %s3174_s30 = scalar_select %p37_p9, %s2987_s14, %s39_s18  }
  0x48   : > { %s3179_s6 = scalar_lea.hbm %s3541_s0, %s2160_s28  ;;  %s190_s21 = scalar_lea.vmem [#allocation2], %s1875_s29 }
  0x49   : > { %s197_s7 = sshll.u32 %s190_s21, 4  ;;  %p3183_p2 = pnand %p2702_p3, %p48_p5  ;;  %s3187_s7 = int_to_ptr.vmem [resolvable:$true] %s197_s7 }
  0x4a   : > { %s3189_s26 = scalar_lea.sflag [#allocation3], %s186_s25  ;;  %s2883_s9 = scalar_lea.hbm %s3179_s6, 2048 }
  0x4b   : > { %p2884_p11 = scmp.ne.s32.totalorder %s3179_s6, %s2883_s9  ;;  %p2885_p12 = pneg %p3183_p2 }
  0x4c   : > { %s2888_s19 = scalar_lea.hbm %s3541_s0, 4096  ;;  %p2889_p4 = scmp.lt.u32.totalorder %s3179_s6, %s3541_s0 }
  0x4d   : > { %p2886_p0 = pnand %p2885_p12, %p2884_p11  ;;  %p2890_p13 = scmp.lt.u32.totalorder %s2888_s19, %s2883_s9 }
  0x4e   : > { %p2892_p10 = scmp.lt.u32.totalorder %s2883_s9, %s3179_s6 }
  0x4f   : > { %p2887_p1 = pneg %p2886_p0  ;;  %p2891_p6 = por %p2890_p13, %p2889_p4 }
  0x51   : > { %p2893_p3 = por %p2892_p10, %p2891_p6 }
  0x53   : > { %p2894_p5 = pnand %p2893_p3, %p2887_p1 }
  0x55   : > { %2897 = shalt.err (!%p2894_p5)
}
  0x56   : > { %s2898_s25 = scalar_lea.vmem %s3187_s7, 2048  ;;  %s3005_s4 = smov [#allocation2]  }
  0x57   : > { %p2899_p9 = scmp.ne.s32.totalorder %s3187_s7, %s2898_s25  ;;  %s2903_s5 = sshll.u32 %s3005_s4, 4  ;;  %s2904_s5 = int_to_ptr.vmem [resolvable:$false] %s2903_s5 }
  0x58   : > { %s2905_s21 = scalar_lea.vmem %s2904_s5, 4096  ;;  %p2906_p7 = scmp.lt.s32.totalorder %s3187_s7, %s2904_s5 }
  0x59   : > { %p2901_p11 = pnand %p2899_p9, %p2885_p12  ;;  %p2907_p4 = scmp.lt.s32.totalorder %s2905_s21, %s2898_s25 }
  0x5b   : > { %p2902_p0 = pneg %p2901_p11  ;;  %p2908_p13 = por %p2907_p4, %p2906_p7 }
  0x5d   : > { %p2909_p6 = pnand %p2908_p13, %p2902_p0 }
  0x5f   : > { %2912 = shalt.err (!%p2909_p6)
}
  0x60   : > { %s3006_s9 = smov 64   ;;  %s3007_s10 = smov 4  }
  0x61   : > { %2695 = dma.hbm_to_vmem [thread:$0]  (!%p3183_p2), %s3179_s6, 2048, %s3187_s7, %s3189_s26, %s3006_s9, %s3006_s9, %s3007_s10  }
  0x62   : > { %209 = sbr.rel (%p3086_p8) target bundleno = 499 (0x1f3), region = 32  ;;  %s3220_s18 = sand.u32 (!%p3086_p8), 1, %s2983_s13  }
  0x63   : > { %s1879_s19 = sshll.u32 (!%p3086_p8), %s3220_s18, 7  ;;  %s212_s29 = scalar_lea.sflag (!%p3086_p8), [#allocation3], %s3220_s18 }
  0x64   : > { %s3224_s28 = scalar_lea.vmem (!%p3086_p8), [#allocation2], %s1879_s19  ;;  %p3557_p7 = scmp.ne.s32.totalorder (!%p3086_p8), %s3551_s22, 0 }
  0x69   : > { %2966 = dma.done.wait (%p3557_p7), %s212_s29, 2048  }
  0x6a   : > { %2968 = vsyncadd (%p3557_p7), %s212_s29, 4294965248  ;;  %p3558_p2 = scmp.ne.s32.totalorder %s3549_s20, 0 }
  0x6c   : > { %2970 = dma.done.wait (%p3558_p2), [#allocation6], 4160  }
  0x6d   : > { %2972 = vsyncadd (%p3558_p2), [#allocation6], 4294963136  ;;  %v3008_v0 = vmov 0   ;;  %v2763_v1 = vld [vmem:[#allocation5 + $0x4] ss:$16 sps:$4 sm:$0xff]   ;;  %v2812_v34 = vld [vmem:[%s3224_s28 + $0x8] sm:$0xff]   ;;  %v315_v49 = vlaneseq }
  0x6e   : > { %623 = vmatprep.mubr.bf16.mxu0 %v3008_v0  ;;  %816 = vmatprep.mubr.bf16.mxu1 %v3008_v0  ;;  %v2765_v2 = vld [vmem:[#allocation5 + $0xc] ss:$16 sps:$4 sm:$0xff]   ;;  %v2767_v3 = vld [vmem:[#allocation5] ss:$16 sps:$4 sm:$0xff]   ;;  %v2768_v4 = vld [vmem:[#allocation5 + $0x8] ss:$16 sps:$4 sm:$0xff]  }
  0x6f   : > { %591 = vmatprep.subr.bf16.mxu0 %v2763_v1  ;;  %784 = vmatprep.subr.bf16.mxu1 %v2765_v2  ;;  %v2769_v5 = vld [vmem:[#allocation5 + $0x24] ss:$16 sps:$4 sm:$0xff]   ;;  %v2771_v6 = vld [vmem:[#allocation5 + $0x2c] ss:$16 sps:$4 sm:$0xff]   ;;  %v2773_v7 = vld [vmem:[#allocation5 + $0x20] ss:$16 sps:$4 sm:$0xff]  }
  0x70   : > { %592 = vmatpush1.bf16.msra.mxu0 %v2767_v3  ;;  %785 = vmatpush1.bf16.msra.mxu1 %v2768_v4  ;;  %v2774_v8 = vld [vmem:[#allocation5 + $0x28] ss:$16 sps:$4 sm:$0xff]   ;;  %v2775_v9 = vld [vmem:[#allocation5 + $0x44] ss:$16 sps:$4 sm:$0xff]   ;;  %v2777_v10 = vld [vmem:[#allocation5 + $0x4c] ss:$16 sps:$4 sm:$0xff]  }
  0x71   : > { %593 = vmatprep.subr.bf16.mxu0 %v2769_v5  ;;  %786 = vmatprep.subr.bf16.mxu1 %v2771_v6  ;;  %v2779_v11 = vld [vmem:[#allocation5 + $0x40] ss:$16 sps:$4 sm:$0xff]   ;;  %v2780_v12 = vld [vmem:[#allocation5 + $0x48] ss:$16 sps:$4 sm:$0xff]   ;;  %v2781_v13 = vld [vmem:[#allocation5 + $0x64] ss:$16 sps:$4 sm:$0xff]  }
  0x72   : > { %v2783_v14 = vld [vmem:[#allocation5 + $0x6c] ss:$16 sps:$4 sm:$0xff]   ;;  %v2785_v15 = vld [vmem:[#allocation5 + $0x60] ss:$16 sps:$4 sm:$0xff]   ;;  %v2786_v16 = vld [vmem:[#allocation5 + $0x68] ss:$16 sps:$4 sm:$0xff]  }
  0x73   : > { %v2787_v17 = vld [vmem:[#allocation5 + $0x84] ss:$16 sps:$4 sm:$0xff]   ;;  %v2789_v18 = vld [vmem:[#allocation5 + $0x8c] ss:$16 sps:$4 sm:$0xff]   ;;  %v2791_v19 = vld [vmem:[#allocation5 + $0x80] ss:$16 sps:$4 sm:$0xff]  }
  0x74   : > { %594 = vmatpush1.bf16.msra.mxu0 %v2773_v7  ;;  %787 = vmatpush1.bf16.msra.mxu1 %v2774_v8  ;;  %v2792_v20 = vld [vmem:[#allocation5 + $0x88] ss:$16 sps:$4 sm:$0xff]   ;;  %v2793_v21 = vld [vmem:[#allocation5 + $0xa4] ss:$16 sps:$4 sm:$0xff]   ;;  %v2795_v22 = vld [vmem:[#allocation5 + $0xac] ss:$16 sps:$4 sm:$0xff]  }
  0x75   : > { %595 = vmatprep.subr.bf16.mxu0 %v2775_v9  ;;  %788 = vmatprep.subr.bf16.mxu1 %v2777_v10  ;;  %v2797_v23 = vld [vmem:[#allocation5 + $0xa0] ss:$16 sps:$4 sm:$0xff]   ;;  %v2798_v24 = vld [vmem:[#allocation5 + $0xa8] ss:$16 sps:$4 sm:$0xff]   ;;  %v2799_v25 = vld [vmem:[#allocation5 + $0xc4] ss:$16 sps:$4 sm:$0xff]  }
  0x76   : > { %v2801_v26 = vld [vmem:[#allocation5 + $0xcc] ss:$16 sps:$4 sm:$0xff]   ;;  %v2803_v27 = vld [vmem:[#allocation5 + $0xc0] ss:$16 sps:$4 sm:$0xff]   ;;  %v2804_v28 = vld [vmem:[#allocation5 + $0xc8] ss:$16 sps:$4 sm:$0xff]  }
  0x77   : > { %v2805_v29 = vld [vmem:[#allocation5 + $0xe4] ss:$16 sps:$4 sm:$0xff]   ;;  %v2807_v30 = vld [vmem:[#allocation5 + $0xec] ss:$16 sps:$4 sm:$0xff]   ;;  %v2809_v31 = vld [vmem:[#allocation5 + $0xe0] ss:$16 sps:$4 sm:$0xff]  }
  0x78   : > { %596 = vmatpush1.bf16.msra.mxu0 %v2779_v11  ;;  %789 = vmatpush1.bf16.msra.mxu1 %v2780_v12  ;;  %v2810_v32 = vld [vmem:[#allocation5 + $0xe8] ss:$16 sps:$4 sm:$0xff]   ;;  %v2811_v33 = vld [vmem:[%s3224_s28] sm:$0xff]   ;;  %v2813_v35 = vld [vmem:[%s3224_s28 + $0x10] sm:$0xff]   ;;  %v316_v50 = vshrl.u32 %v315_v49, 7  ;;  %s1882_s20 = sshll.u32 %s3220_s18, 9 }
  0x79   : > { %597 = vmatprep.subr.bf16.mxu0 %v2781_v13  ;;  %790 = vmatprep.subr.bf16.mxu1 %v2783_v14  ;;  %v2814_v36 = vld [vmem:[%s3224_s28 + $0x18] sm:$0xff]   ;;  %v2815_v37 = vld [vmem:[%s3224_s28 + $0x20] sm:$0xff]   ;;  %v2816_v38 = vld [vmem:[%s3224_s28 + $0x28] sm:$0xff]   ;;  %s3299_s22 = scalar_lea.vmem [#allocation8], %s1882_s20  ;;  %s2289_s24 = sshll.u32 %s2991_s15, 13 }
  0x7a   : > { %v2817_v39 = vld [vmem:[%s3224_s28 + $0x30] sm:$0xff]   ;;  %v2818_v40 = vld [vmem:[%s3224_s28 + $0x38] sm:$0xff]   ;;  %v2819_v41 = vld [vmem:[%s3224_s28 + $0x40] sm:$0xff]   ;;  %v317_v51 = vsub.s32 0, %v316_v50  ;;  %v325_v52 = vsub.s32 2, %v316_v50  ;;  %v321_v54 = vsub.s32 1, %v316_v50  ;;  %s3486_s15 = scalar_lea.hbm %s3544_s3, %s2289_s24 }
  0x7b   : > { %v2820_v42 = vld [vmem:[%s3224_s28 + $0x48] sm:$0xff]   ;;  %v2821_v43 = vld [vmem:[%s3224_s28 + $0x50] sm:$0xff]   ;;  %v2822_v44 = vld [vmem:[%s3224_s28 + $0x58] sm:$0xff]   ;;  %v329_v55 = vsub.s32 3, %v316_v50  ;;  %s1763_s6 = sshll.u32 %s3299_s22, 4  ;;  %s1749_s26 = scalar_lea.sflag [#allocation4], %s3220_s18  ;;  %s3488_s6 = int_to_ptr.vmem [resolvable:$true] %s1763_s6 }
  0x7c   : > { %598 = vmatpush1.bf16.msra.mxu0 %v2785_v15  ;;  %791 = vmatpush1.bf16.msra.mxu1 %v2786_v16  ;;  %v2823_v45 = vld [vmem:[%s3224_s28 + $0x60] sm:$0xff]   ;;  %v2824_v46 = vld [vmem:[%s3224_s28 + $0x68] sm:$0xff]   ;;  %v2825_v47 = vld [vmem:[%s3224_s28 + $0x70] sm:$0xff]   ;;  %s2913_s25 = scalar_lea.vmem %s3488_s6, 8192  ;;  %p3559_p12 = scmp.ne.s32.totalorder %s3555_s27, 0 }
  0x7d   : > { %599 = vmatprep.subr.bf16.mxu0 %v2787_v17  ;;  %792 = vmatprep.subr.bf16.mxu1 %v2789_v18  ;;  %v2826_v48 = vld [vmem:[%s3224_s28 + $0x78] sm:$0xff]   ;;  %v313_v53 = vld [vmem:[#allocation7] sm:$0xf]  ;;  %p2914_p8 = scmp.ne.s32.totalorder %s3488_s6, %s2913_s25  ;;  %s3009_s4 = smov [#allocation8]  }
  0x7e   : > { %v3282_v56 = vrot.slane %v313_v53, %v317_v51  ;;  %v3284_v57 = vrot.slane %v313_v53, %v325_v52  ;;  %v3286_v58 = vrot.slane %v313_v53, %v321_v54  ;;  %v3288_v59 = vrot.slane %v313_v53, %v329_v55  ;;  %s2917_s5 = sshll.u32 %s3009_s4, 4  ;;  %s2918_s5 = int_to_ptr.vmem [resolvable:$false] %s2917_s5 }
  0x7f   : > { %p2915_p1 = pnand %p2914_p8, %p3559_p12  ;;  %s2919_s21 = scalar_lea.vmem %s2918_s5, 16384 }
  0x80   : > { %600 = vmatpush1.bf16.msra.mxu0 %v2791_v19  ;;  %793 = vmatpush1.bf16.msra.mxu1 %v2792_v20  ;;  %p2920_p3 = scmp.lt.s32.totalorder %s3488_s6, %s2918_s5  ;;  %p2921_p5 = scmp.lt.s32.totalorder %s2919_s21, %s2913_s25 }
  0x81   : > { %601 = vmatprep.subr.bf16.mxu0 %v2793_v21  ;;  %794 = vmatprep.subr.bf16.mxu1 %v2795_v22  ;;  %p2916_p10 = pneg %p2915_p1 }
  0x82   : > { %p2922_p9 = por %p2921_p5, %p2920_p3 }
  0x84   : > { %602 = vmatpush1.bf16.msra.mxu0 %v2797_v23  ;;  %795 = vmatpush1.bf16.msra.mxu1 %v2798_v24  ;;  %p2923_p11 = pnand %p2922_p9, %p2916_p10 }
  0x85   : > { %603 = vmatprep.subr.bf16.mxu0 %v2799_v25  ;;  %796 = vmatprep.subr.bf16.mxu1 %v2801_v26 }
  0x88   : > { %604 = vmatpush1.bf16.msra.mxu0 %v2803_v27  ;;  %797 = vmatpush1.bf16.msra.mxu1 %v2804_v28 }
  0x89   : > { %605 = vmatprep.subr.bf16.mxu0 %v2805_v29  ;;  %798 = vmatprep.subr.bf16.mxu1 %v2807_v30 }
  0x8c   : > { %606 = vmatpush1.bf16.msra.mxu0 %v2809_v31  ;;  %799 = vmatpush1.bf16.msra.mxu1 %v2810_v32 }
  0x8f   : > { %624 = vmatmul.mubr.bf16.vlgmr.msra.gmra.mrb[0].mxu0 %v2811_v33  ;;  %817 = vmatmul.mubr.bf16.vlgmr.msra.gmra.mrb[0].mxu1 %v2811_v33 }
  0x90   : > { %633 = vmatprep.mubr.bf16.mxu0 %v3008_v0  ;;  %826 = vmatprep.mubr.bf16.mxu1 %v3008_v0 }
  0x97   : > { %634 = vmatmul.mubr.bf16.gmra.mrb[4].mxu0 %v2812_v34  ;;  %827 = vmatmul.mubr.bf16.gmra.mrb[4].mxu1 %v2812_v34 }
  0x98   : > { %643 = vmatprep.mubr.bf16.mxu0 %v3008_v0  ;;  %836 = vmatprep.mubr.bf16.mxu1 %v3008_v0 }
  0x9f   : > { %644 = vmatmul.mubr.bf16.gmra.mrb[8].mxu0 %v2813_v35  ;;  %837 = vmatmul.mubr.bf16.gmra.mrb[8].mxu1 %v2813_v35 }
  0xa0   : > { %653 = vmatprep.mubr.bf16.mxu0 %v3008_v0  ;;  %846 = vmatprep.mubr.bf16.mxu1 %v3008_v0 }
  0xa7   : > { %654 = vmatmul.mubr.bf16.gmra.mrb[12].mxu0 %v2814_v36  ;;  %847 = vmatmul.mubr.bf16.gmra.mrb[12].mxu1 %v2814_v36 }
  0xa8   : > { %663 = vmatprep.mubr.bf16.mxu0 %v3008_v0  ;;  %856 = vmatprep.mubr.bf16.mxu1 %v3008_v0 }
  0xaf   : > { %664 = vmatmul.mubr.bf16.gmra.mrb[16].mxu0 %v2815_v37  ;;  %857 = vmatmul.mubr.bf16.gmra.mrb[16].mxu1 %v2815_v37 }
  0xb0   : > { %673 = vmatprep.mubr.bf16.mxu0 %v3008_v0  ;;  %866 = vmatprep.mubr.bf16.mxu1 %v3008_v0 }
  0xb7   : > { %674 = vmatmul.mubr.bf16.gmra.mrb[20].mxu0 %v2816_v38  ;;  %867 = vmatmul.mubr.bf16.gmra.mrb[20].mxu1 %v2816_v38 }
  0xb8   : > { %683 = vmatprep.mubr.bf16.mxu0 %v3008_v0  ;;  %876 = vmatprep.mubr.bf16.mxu1 %v3008_v0 }
  0xbf   : > { %684 = vmatmul.mubr.bf16.gmra.mrb[24].mxu0 %v2817_v39  ;;  %877 = vmatmul.mubr.bf16.gmra.mrb[24].mxu1 %v2817_v39 }
  0xc0   : > { %693 = vmatprep.mubr.bf16.mxu0 %v3008_v0  ;;  %886 = vmatprep.mubr.bf16.mxu1 %v3008_v0 }
  0xc7   : > { %694 = vmatmul.mubr.bf16.gmra.mrb[28].mxu0 %v2818_v40  ;;  %887 = vmatmul.mubr.bf16.gmra.mrb[28].mxu1 %v2818_v40 }
  0xc8   : > { %703 = vmatprep.mubr.bf16.mxu0 %v3008_v0  ;;  %896 = vmatprep.mubr.bf16.mxu1 %v3008_v0 }
  0xcf   : > { %704 = vmatmul.mubr.bf16.gmra.mrb[32].mxu0 %v2819_v41  ;;  %897 = vmatmul.mubr.bf16.gmra.mrb[32].mxu1 %v2819_v41 }
  0xd0   : > { %713 = vmatprep.mubr.bf16.mxu0 %v3008_v0  ;;  %906 = vmatprep.mubr.bf16.mxu1 %v3008_v0 }
  0xd7   : > { %714 = vmatmul.mubr.bf16.gmra.mrb[36].mxu0 %v2820_v42  ;;  %907 = vmatmul.mubr.bf16.gmra.mrb[36].mxu1 %v2820_v42 }
  0xd8   : > { %723 = vmatprep.mubr.bf16.mxu0 %v3008_v0  ;;  %916 = vmatprep.mubr.bf16.mxu1 %v3008_v0 }
  0xdf   : > { %724 = vmatmul.mubr.bf16.gmra.mrb[40].mxu0 %v2821_v43  ;;  %917 = vmatmul.mubr.bf16.gmra.mrb[40].mxu1 %v2821_v43 }
  0xe0   : > { %733 = vmatprep.mubr.bf16.mxu0 %v3008_v0  ;;  %926 = vmatprep.mubr.bf16.mxu1 %v3008_v0 }
  0xe7   : > { %734 = vmatmul.mubr.bf16.gmra.mrb[44].mxu0 %v2822_v44  ;;  %927 = vmatmul.mubr.bf16.gmra.mrb[44].mxu1 %v2822_v44 }
  0xe8   : > { %743 = vmatprep.mubr.bf16.mxu0 %v3008_v0  ;;  %936 = vmatprep.mubr.bf16.mxu1 %v3008_v0 }
  0xef   : > { %744 = vmatmul.mubr.bf16.gmra.mrb[48].mxu0 %v2823_v45  ;;  %937 = vmatmul.mubr.bf16.gmra.mrb[48].mxu1 %v2823_v45 }
  0xf0   : > { %753 = vmatprep.mubr.bf16.mxu0 %v3008_v0  ;;  %946 = vmatprep.mubr.bf16.mxu1 %v3008_v0 }
  0xf7   : > { %754 = vmatmul.mubr.bf16.gmra.mrb[52].mxu0 %v2824_v46  ;;  %947 = vmatmul.mubr.bf16.gmra.mrb[52].mxu1 %v2824_v46 }
  0xf8   : > { %763 = vmatprep.mubr.bf16.mxu0 %v3008_v0  ;;  %956 = vmatprep.mubr.bf16.mxu1 %v3008_v0 }
  0xff   : > { %764 = vmatmul.mubr.bf16.gmra.mrb[56].mxu0 %v2825_v47  ;;  %957 = vmatmul.mubr.bf16.gmra.mrb[56].mxu1 %v2825_v47 }
 0x100   : > { %773 = vmatprep.mubr.bf16.mxu0 %v3008_v0  ;;  %966 = vmatprep.mubr.bf16.mxu1 %v3008_v0 }
 0x107   : > { %774 = vmatmul.mubr.bf16.gmra.mrb[60].mxu0 %v2826_v48  ;;  %967 = vmatmul.mubr.bf16.gmra.mrb[60].mxu1 %v2826_v48 }
 0x162   : > { %v625_v60 = vpop.f32.mrb[0].mxu0  ;;  %v818_v61 = vpop.f32.mrb[0].mxu1 }
 0x163   : > { %v626_v62 = vadd.f32 %v625_v60, %v3282_v56  ;;  %v819_v63 = vadd.f32 %v818_v61, %v3284_v57  ;;  %v627_v0 = vpop.f32.mrb[1].mxu0  ;;  %v820_v1 = vpop.f32.mrb[1].mxu1 }
 0x164   : > { %v628_v2 = vadd.f32 %v627_v0, %v3286_v58  ;;  %v821_v3 = vadd.f32 %v820_v1, %v3288_v59  ;;  %v629_v4 = vpop.f32.mrb[2].mxu0  ;;  %v822_v5 = vpop.f32.mrb[2].mxu1 }
 0x165   : > { %v630_v6 = vadd.f32 %v629_v4, %v3282_v56  ;;  %v823_v7 = vadd.f32 %v822_v5, %v3284_v57  ;;  %v631_v8 = vpop.f32.mrb[3].mxu0  ;;  %v824_v9 = vpop.f32.mrb[3].mxu1  ;;  %v977_v12 = vmax.f32 %v626_v62, 0.0  ;;  %v979_v13 = vmax.f32 %v819_v63, 0.0 }
 0x166   : > { %v632_v10 = vadd.f32 %v631_v8, %v3286_v58  ;;  %v825_v11 = vadd.f32 %v824_v9, %v3288_v59  ;;  %v978_v16 = vmax.f32 %v628_v2, 0.0  ;;  %v980_v17 = vmax.f32 %v821_v3, 0.0 }
 0x167   : > { %v981_v14 = vmax.f32 %v630_v6, 0.0  ;;  %v983_v15 = vmax.f32 %v823_v7, 0.0 }
 0x168   : > { %v982_v18 = vmax.f32 %v632_v10, 0.0  ;;  %v984_v19 = vmax.f32 %v825_v11, 0.0 }
 0x169   : > { %v2293_v20 = vpack.c.bf16 %v981_v14, %v977_v12  ;;  %v2453_v21 = vpack.c.bf16 %v983_v15, %v979_v13 }
 0x16a   : > { %v2373_v22 = vpack.c.bf16 %v982_v18, %v978_v16  ;;  %v2533_v23 = vpack.c.bf16 %v984_v19, %v980_v17  ;;  %v635_v24 = vpop.f32.mrb[4].mxu0  ;;  %v828_v25 = vpop.f32.mrb[4].mxu1 }
 0x16b   : > { %2294 = vst [vmem:[%s3299_s22] sm:$0xff] %v2293_v20   ;;  %2641 = vst [vmem:[%s3299_s22 + $0x100] sm:$0xff] %v2453_v21   ;;  %v636_v26 = vadd.f32 %v635_v24, %v3282_v56  ;;  %v829_v27 = vadd.f32 %v828_v25, %v3284_v57  ;;  %v637_v28 = vpop.f32.mrb[5].mxu0  ;;  %v830_v29 = vpop.f32.mrb[5].mxu1 }
 0x16c   : > { %2625 = vst [vmem:[%s3299_s22 + $0x80] sm:$0xff] %v2373_v22   ;;  %2657 = vst [vmem:[%s3299_s22 + $0x180] sm:$0xff] %v2533_v23   ;;  %v638_v30 = vadd.f32 %v637_v28, %v3286_v58  ;;  %v831_v31 = vadd.f32 %v830_v29, %v3288_v59  ;;  %v639_v32 = vpop.f32.mrb[6].mxu0  ;;  %v832_v33 = vpop.f32.mrb[6].mxu1 }
 0x16d   : > { %v640_v34 = vadd.f32 %v639_v32, %v3282_v56  ;;  %v833_v35 = vadd.f32 %v832_v33, %v3284_v57  ;;  %v641_v36 = vpop.f32.mrb[7].mxu0  ;;  %v834_v37 = vpop.f32.mrb[7].mxu1  ;;  %v985_v40 = vmax.f32 %v636_v26, 0.0  ;;  %v987_v41 = vmax.f32 %v829_v27, 0.0 }
 0x16e   : > { %v642_v38 = vadd.f32 %v641_v36, %v3286_v58  ;;  %v835_v39 = vadd.f32 %v834_v37, %v3288_v59  ;;  %v986_v44 = vmax.f32 %v638_v30, 0.0  ;;  %v988_v45 = vmax.f32 %v831_v31, 0.0 }
 0x16f   : > { %v989_v42 = vmax.f32 %v640_v34, 0.0  ;;  %v991_v43 = vmax.f32 %v833_v35, 0.0 }
 0x170   : > { %v990_v46 = vmax.f32 %v642_v38, 0.0  ;;  %v992_v47 = vmax.f32 %v835_v39, 0.0 }
 0x171   : > { %v2298_v48 = vpack.c.bf16 %v989_v42, %v985_v40  ;;  %v2458_v49 = vpack.c.bf16 %v991_v43, %v987_v41 }
 0x172   : > { %v2378_v50 = vpack.c.bf16 %v990_v46, %v986_v44  ;;  %v2538_v51 = vpack.c.bf16 %v992_v47, %v988_v45  ;;  %v645_v52 = vpop.f32.mrb[8].mxu0  ;;  %v838_v53 = vpop.f32.mrb[8].mxu1 }
 0x173   : > { %2610 = vst [vmem:[%s3299_s22 + $0x8] sm:$0xff] %v2298_v48   ;;  %2642 = vst [vmem:[%s3299_s22 + $0x108] sm:$0xff] %v2458_v49   ;;  %v646_v54 = vadd.f32 %v645_v52, %v3282_v56  ;;  %v839_v55 = vadd.f32 %v838_v53, %v3284_v57  ;;  %v647_v60 = vpop.f32.mrb[9].mxu0  ;;  %v840_v61 = vpop.f32.mrb[9].mxu1 }
 0x174   : > { %2626 = vst [vmem:[%s3299_s22 + $0x88] sm:$0xff] %v2378_v50   ;;  %2658 = vst [vmem:[%s3299_s22 + $0x188] sm:$0xff] %v2538_v51   ;;  %v648_v62 = vadd.f32 %v647_v60, %v3286_v58  ;;  %v841_v63 = vadd.f32 %v840_v61, %v3288_v59  ;;  %v649_v0 = vpop.f32.mrb[10].mxu0  ;;  %v842_v1 = vpop.f32.mrb[10].mxu1 }
 0x175   : > { %v650_v2 = vadd.f32 %v649_v0, %v3282_v56  ;;  %v843_v3 = vadd.f32 %v842_v1, %v3284_v57  ;;  %v651_v4 = vpop.f32.mrb[11].mxu0  ;;  %v844_v5 = vpop.f32.mrb[11].mxu1  ;;  %v993_v8 = vmax.f32 %v646_v54, 0.0  ;;  %v995_v9 = vmax.f32 %v839_v55, 0.0 }
 0x176   : > { %v652_v6 = vadd.f32 %v651_v4, %v3286_v58  ;;  %v845_v7 = vadd.f32 %v844_v5, %v3288_v59  ;;  %v994_v12 = vmax.f32 %v648_v62, 0.0  ;;  %v996_v13 = vmax.f32 %v841_v63, 0.0 }
 0x177   : > { %v997_v10 = vmax.f32 %v650_v2, 0.0  ;;  %v999_v11 = vmax.f32 %v843_v3, 0.0 }
 0x178   : > { %v998_v14 = vmax.f32 %v652_v6, 0.0  ;;  %v1000_v15 = vmax.f32 %v845_v7, 0.0 }
 0x179   : > { %v2303_v16 = vpack.c.bf16 %v997_v10, %v993_v8  ;;  %v2463_v17 = vpack.c.bf16 %v999_v11, %v995_v9 }
 0x17a   : > { %v2383_v18 = vpack.c.bf16 %v998_v14, %v994_v12  ;;  %v2543_v19 = vpack.c.bf16 %v1000_v15, %v996_v13  ;;  %v655_v20 = vpop.f32.mrb[12].mxu0  ;;  %v848_v21 = vpop.f32.mrb[12].mxu1 }
 0x17b   : > { %2611 = vst [vmem:[%s3299_s22 + $0x10] sm:$0xff] %v2303_v16   ;;  %2643 = vst [vmem:[%s3299_s22 + $0x110] sm:$0xff] %v2463_v17   ;;  %v656_v22 = vadd.f32 %v655_v20, %v3282_v56  ;;  %v849_v23 = vadd.f32 %v848_v21, %v3284_v57  ;;  %v657_v24 = vpop.f32.mrb[13].mxu0  ;;  %v850_v25 = vpop.f32.mrb[13].mxu1 }
 0x17c   : > { %2627 = vst [vmem:[%s3299_s22 + $0x90] sm:$0xff] %v2383_v18   ;;  %2659 = vst [vmem:[%s3299_s22 + $0x190] sm:$0xff] %v2543_v19   ;;  %v658_v26 = vadd.f32 %v657_v24, %v3286_v58  ;;  %v851_v27 = vadd.f32 %v850_v25, %v3288_v59  ;;  %v659_v28 = vpop.f32.mrb[14].mxu0  ;;  %v852_v29 = vpop.f32.mrb[14].mxu1 }
 0x17d   : > { %v660_v30 = vadd.f32 %v659_v28, %v3282_v56  ;;  %v853_v31 = vadd.f32 %v852_v29, %v3284_v57  ;;  %v661_v32 = vpop.f32.mrb[15].mxu0  ;;  %v854_v33 = vpop.f32.mrb[15].mxu1  ;;  %v1001_v36 = vmax.f32 %v656_v22, 0.0  ;;  %v1003_v37 = vmax.f32 %v849_v23, 0.0 }
 0x17e   : > { %v662_v34 = vadd.f32 %v661_v32, %v3286_v58  ;;  %v855_v35 = vadd.f32 %v854_v33, %v3288_v59  ;;  %v1002_v40 = vmax.f32 %v658_v26, 0.0  ;;  %v1004_v41 = vmax.f32 %v851_v27, 0.0 }
 0x17f   : > { %v1005_v38 = vmax.f32 %v660_v30, 0.0  ;;  %v1007_v39 = vmax.f32 %v853_v31, 0.0 }
 0x180   : > { %v1006_v42 = vmax.f32 %v662_v34, 0.0  ;;  %v1008_v43 = vmax.f32 %v855_v35, 0.0 }
 0x181   : > { %v2308_v44 = vpack.c.bf16 %v1005_v38, %v1001_v36  ;;  %v2468_v45 = vpack.c.bf16 %v1007_v39, %v1003_v37 }
 0x182   : > { %v2388_v46 = vpack.c.bf16 %v1006_v42, %v1002_v40  ;;  %v2548_v47 = vpack.c.bf16 %v1008_v43, %v1004_v41  ;;  %v665_v48 = vpop.f32.mrb[16].mxu0  ;;  %v858_v49 = vpop.f32.mrb[16].mxu1 }
 0x183   : > { %2612 = vst [vmem:[%s3299_s22 + $0x18] sm:$0xff] %v2308_v44   ;;  %2644 = vst [vmem:[%s3299_s22 + $0x118] sm:$0xff] %v2468_v45   ;;  %v666_v50 = vadd.f32 %v665_v48, %v3282_v56  ;;  %v859_v51 = vadd.f32 %v858_v49, %v3284_v57  ;;  %v667_v52 = vpop.f32.mrb[17].mxu0  ;;  %v860_v53 = vpop.f32.mrb[17].mxu1 }
 0x184   : > { %2628 = vst [vmem:[%s3299_s22 + $0x98] sm:$0xff] %v2388_v46   ;;  %2660 = vst [vmem:[%s3299_s22 + $0x198] sm:$0xff] %v2548_v47   ;;  %v668_v54 = vadd.f32 %v667_v52, %v3286_v58  ;;  %v861_v55 = vadd.f32 %v860_v53, %v3288_v59  ;;  %v669_v60 = vpop.f32.mrb[18].mxu0  ;;  %v862_v61 = vpop.f32.mrb[18].mxu1 }
 0x185   : > { %v670_v62 = vadd.f32 %v669_v60, %v3282_v56  ;;  %v863_v63 = vadd.f32 %v862_v61, %v3284_v57  ;;  %v671_v0 = vpop.f32.mrb[19].mxu0  ;;  %v864_v1 = vpop.f32.mrb[19].mxu1  ;;  %v1009_v4 = vmax.f32 %v666_v50, 0.0  ;;  %v1011_v5 = vmax.f32 %v859_v51, 0.0 }
 0x186   : > { %v672_v2 = vadd.f32 %v671_v0, %v3286_v58  ;;  %v865_v3 = vadd.f32 %v864_v1, %v3288_v59  ;;  %v1010_v8 = vmax.f32 %v668_v54, 0.0  ;;  %v1012_v9 = vmax.f32 %v861_v55, 0.0 }
 0x187   : > { %v1013_v6 = vmax.f32 %v670_v62, 0.0  ;;  %v1015_v7 = vmax.f32 %v863_v63, 0.0 }
 0x188   : > { %v1014_v10 = vmax.f32 %v672_v2, 0.0  ;;  %v1016_v11 = vmax.f32 %v865_v3, 0.0 }
 0x189   : > { %v2313_v12 = vpack.c.bf16 %v1013_v6, %v1009_v4  ;;  %v2473_v13 = vpack.c.bf16 %v1015_v7, %v1011_v5 }
 0x18a   : > { %v2393_v14 = vpack.c.bf16 %v1014_v10, %v1010_v8  ;;  %v2553_v15 = vpack.c.bf16 %v1016_v11, %v1012_v9  ;;  %v675_v16 = vpop.f32.mrb[20].mxu0  ;;  %v868_v17 = vpop.f32.mrb[20].mxu1 }
 0x18b   : > { %2613 = vst [vmem:[%s3299_s22 + $0x20] sm:$0xff] %v2313_v12   ;;  %2645 = vst [vmem:[%s3299_s22 + $0x120] sm:$0xff] %v2473_v13   ;;  %v676_v18 = vadd.f32 %v675_v16, %v3282_v56  ;;  %v869_v19 = vadd.f32 %v868_v17, %v3284_v57  ;;  %v677_v20 = vpop.f32.mrb[21].mxu0  ;;  %v870_v21 = vpop.f32.mrb[21].mxu1 }
 0x18c   : > { %2629 = vst [vmem:[%s3299_s22 + $0xa0] sm:$0xff] %v2393_v14   ;;  %2661 = vst [vmem:[%s3299_s22 + $0x1a0] sm:$0xff] %v2553_v15   ;;  %v678_v22 = vadd.f32 %v677_v20, %v3286_v58  ;;  %v871_v23 = vadd.f32 %v870_v21, %v3288_v59  ;;  %v679_v24 = vpop.f32.mrb[22].mxu0  ;;  %v872_v25 = vpop.f32.mrb[22].mxu1 }
 0x18d   : > { %v680_v26 = vadd.f32 %v679_v24, %v3282_v56  ;;  %v873_v27 = vadd.f32 %v872_v25, %v3284_v57  ;;  %v681_v28 = vpop.f32.mrb[23].mxu0  ;;  %v874_v29 = vpop.f32.mrb[23].mxu1  ;;  %v1017_v32 = vmax.f32 %v676_v18, 0.0  ;;  %v1019_v33 = vmax.f32 %v869_v19, 0.0 }
 0x18e   : > { %v682_v30 = vadd.f32 %v681_v28, %v3286_v58  ;;  %v875_v31 = vadd.f32 %v874_v29, %v3288_v59  ;;  %v1018_v36 = vmax.f32 %v678_v22, 0.0  ;;  %v1020_v37 = vmax.f32 %v871_v23, 0.0 }
 0x18f   : > { %v1021_v34 = vmax.f32 %v680_v26, 0.0  ;;  %v1023_v35 = vmax.f32 %v873_v27, 0.0 }
 0x190   : > { %v1022_v38 = vmax.f32 %v682_v30, 0.0  ;;  %v1024_v39 = vmax.f32 %v875_v31, 0.0 }
 0x191   : > { %v2318_v40 = vpack.c.bf16 %v1021_v34, %v1017_v32  ;;  %v2478_v41 = vpack.c.bf16 %v1023_v35, %v1019_v33 }
 0x192   : > { %v2398_v42 = vpack.c.bf16 %v1022_v38, %v1018_v36  ;;  %v2558_v43 = vpack.c.bf16 %v1024_v39, %v1020_v37  ;;  %v685_v44 = vpop.f32.mrb[24].mxu0  ;;  %v878_v45 = vpop.f32.mrb[24].mxu1 }
 0x193   : > { %2614 = vst [vmem:[%s3299_s22 + $0x28] sm:$0xff] %v2318_v40   ;;  %2646 = vst [vmem:[%s3299_s22 + $0x128] sm:$0xff] %v2478_v41   ;;  %v686_v46 = vadd.f32 %v685_v44, %v3282_v56  ;;  %v879_v47 = vadd.f32 %v878_v45, %v3284_v57  ;;  %v687_v48 = vpop.f32.mrb[25].mxu0  ;;  %v880_v49 = vpop.f32.mrb[25].mxu1 }
 0x194   : > { %2630 = vst [vmem:[%s3299_s22 + $0xa8] sm:$0xff] %v2398_v42   ;;  %2662 = vst [vmem:[%s3299_s22 + $0x1a8] sm:$0xff] %v2558_v43   ;;  %v688_v50 = vadd.f32 %v687_v48, %v3286_v58  ;;  %v881_v51 = vadd.f32 %v880_v49, %v3288_v59  ;;  %v689_v52 = vpop.f32.mrb[26].mxu0  ;;  %v882_v53 = vpop.f32.mrb[26].mxu1 }
 0x195   : > { %v690_v54 = vadd.f32 %v689_v52, %v3282_v56  ;;  %v883_v55 = vadd.f32 %v882_v53, %v3284_v57  ;;  %v691_v60 = vpop.f32.mrb[27].mxu0  ;;  %v884_v61 = vpop.f32.mrb[27].mxu1  ;;  %v1025_v0 = vmax.f32 %v686_v46, 0.0  ;;  %v1027_v1 = vmax.f32 %v879_v47, 0.0 }
 0x196   : > { %v692_v62 = vadd.f32 %v691_v60, %v3286_v58  ;;  %v885_v63 = vadd.f32 %v884_v61, %v3288_v59  ;;  %v1026_v4 = vmax.f32 %v688_v50, 0.0  ;;  %v1028_v5 = vmax.f32 %v881_v51, 0.0 }
 0x197   : > { %v1029_v2 = vmax.f32 %v690_v54, 0.0  ;;  %v1031_v3 = vmax.f32 %v883_v55, 0.0 }
 0x198   : > { %v1030_v6 = vmax.f32 %v692_v62, 0.0  ;;  %v1032_v7 = vmax.f32 %v885_v63, 0.0 }
 0x199   : > { %v2323_v8 = vpack.c.bf16 %v1029_v2, %v1025_v0  ;;  %v2483_v9 = vpack.c.bf16 %v1031_v3, %v1027_v1 }
 0x19a   : > { %v2403_v10 = vpack.c.bf16 %v1030_v6, %v1026_v4  ;;  %v2563_v11 = vpack.c.bf16 %v1032_v7, %v1028_v5  ;;  %v695_v12 = vpop.f32.mrb[28].mxu0  ;;  %v888_v13 = vpop.f32.mrb[28].mxu1 }
 0x19b   : > { %2615 = vst [vmem:[%s3299_s22 + $0x30] sm:$0xff] %v2323_v8   ;;  %2647 = vst [vmem:[%s3299_s22 + $0x130] sm:$0xff] %v2483_v9   ;;  %v696_v14 = vadd.f32 %v695_v12, %v3282_v56  ;;  %v889_v15 = vadd.f32 %v888_v13, %v3284_v57  ;;  %v697_v16 = vpop.f32.mrb[29].mxu0  ;;  %v890_v17 = vpop.f32.mrb[29].mxu1 }
 0x19c   : > { %2631 = vst [vmem:[%s3299_s22 + $0xb0] sm:$0xff] %v2403_v10   ;;  %2663 = vst [vmem:[%s3299_s22 + $0x1b0] sm:$0xff] %v2563_v11   ;;  %v698_v18 = vadd.f32 %v697_v16, %v3286_v58  ;;  %v891_v19 = vadd.f32 %v890_v17, %v3288_v59  ;;  %v699_v20 = vpop.f32.mrb[30].mxu0  ;;  %v892_v21 = vpop.f32.mrb[30].mxu1 }
 0x19d   : > { %v700_v22 = vadd.f32 %v699_v20, %v3282_v56  ;;  %v893_v23 = vadd.f32 %v892_v21, %v3284_v57  ;;  %v701_v24 = vpop.f32.mrb[31].mxu0  ;;  %v894_v25 = vpop.f32.mrb[31].mxu1  ;;  %v1033_v28 = vmax.f32 %v696_v14, 0.0  ;;  %v1035_v29 = vmax.f32 %v889_v15, 0.0 }
 0x19e   : > { %v702_v26 = vadd.f32 %v701_v24, %v3286_v58  ;;  %v895_v27 = vadd.f32 %v894_v25, %v3288_v59  ;;  %v1034_v32 = vmax.f32 %v698_v18, 0.0  ;;  %v1036_v33 = vmax.f32 %v891_v19, 0.0 }
 0x19f   : > { %v1037_v30 = vmax.f32 %v700_v22, 0.0  ;;  %v1039_v31 = vmax.f32 %v893_v23, 0.0 }
 0x1a0   : > { %v1038_v34 = vmax.f32 %v702_v26, 0.0  ;;  %v1040_v35 = vmax.f32 %v895_v27, 0.0 }
 0x1a1   : > { %v2328_v36 = vpack.c.bf16 %v1037_v30, %v1033_v28  ;;  %v2488_v37 = vpack.c.bf16 %v1039_v31, %v1035_v29 }
 0x1a2   : > { %v2408_v38 = vpack.c.bf16 %v1038_v34, %v1034_v32  ;;  %v2568_v39 = vpack.c.bf16 %v1040_v35, %v1036_v33  ;;  %v705_v40 = vpop.f32.mrb[32].mxu0  ;;  %v898_v41 = vpop.f32.mrb[32].mxu1 }
 0x1a3   : > { %2616 = vst [vmem:[%s3299_s22 + $0x38] sm:$0xff] %v2328_v36   ;;  %2648 = vst [vmem:[%s3299_s22 + $0x138] sm:$0xff] %v2488_v37   ;;  %v706_v42 = vadd.f32 %v705_v40, %v3282_v56  ;;  %v899_v43 = vadd.f32 %v898_v41, %v3284_v57  ;;  %v707_v44 = vpop.f32.mrb[33].mxu0  ;;  %v900_v45 = vpop.f32.mrb[33].mxu1 }
 0x1a4   : > { %2632 = vst [vmem:[%s3299_s22 + $0xb8] sm:$0xff] %v2408_v38   ;;  %2664 = vst [vmem:[%s3299_s22 + $0x1b8] sm:$0xff] %v2568_v39   ;;  %v708_v46 = vadd.f32 %v707_v44, %v3286_v58  ;;  %v901_v47 = vadd.f32 %v900_v45, %v3288_v59  ;;  %v709_v48 = vpop.f32.mrb[34].mxu0  ;;  %v902_v49 = vpop.f32.mrb[34].mxu1 }
 0x1a5   : > { %v710_v50 = vadd.f32 %v709_v48, %v3282_v56  ;;  %v903_v51 = vadd.f32 %v902_v49, %v3284_v57  ;;  %v711_v52 = vpop.f32.mrb[35].mxu0  ;;  %v904_v53 = vpop.f32.mrb[35].mxu1  ;;  %v1041_v60 = vmax.f32 %v706_v42, 0.0  ;;  %v1043_v61 = vmax.f32 %v899_v43, 0.0 }
 0x1a6   : > { %v712_v54 = vadd.f32 %v711_v52, %v3286_v58  ;;  %v905_v55 = vadd.f32 %v904_v53, %v3288_v59  ;;  %v1042_v0 = vmax.f32 %v708_v46, 0.0  ;;  %v1044_v1 = vmax.f32 %v901_v47, 0.0 }
 0x1a7   : > { %v1045_v62 = vmax.f32 %v710_v50, 0.0  ;;  %v1047_v63 = vmax.f32 %v903_v51, 0.0 }
 0x1a8   : > { %v1046_v2 = vmax.f32 %v712_v54, 0.0  ;;  %v1048_v3 = vmax.f32 %v905_v55, 0.0 }
 0x1a9   : > { %v2333_v4 = vpack.c.bf16 %v1045_v62, %v1041_v60  ;;  %v2493_v5 = vpack.c.bf16 %v1047_v63, %v1043_v61 }
 0x1aa   : > { %v2413_v6 = vpack.c.bf16 %v1046_v2, %v1042_v0  ;;  %v2573_v7 = vpack.c.bf16 %v1048_v3, %v1044_v1  ;;  %v715_v8 = vpop.f32.mrb[36].mxu0  ;;  %v908_v9 = vpop.f32.mrb[36].mxu1 }
 0x1ab   : > { %2617 = vst [vmem:[%s3299_s22 + $0x40] sm:$0xff] %v2333_v4   ;;  %2649 = vst [vmem:[%s3299_s22 + $0x140] sm:$0xff] %v2493_v5   ;;  %v716_v10 = vadd.f32 %v715_v8, %v3282_v56  ;;  %v909_v11 = vadd.f32 %v908_v9, %v3284_v57  ;;  %v717_v12 = vpop.f32.mrb[37].mxu0  ;;  %v910_v13 = vpop.f32.mrb[37].mxu1 }
 0x1ac   : > { %2633 = vst [vmem:[%s3299_s22 + $0xc0] sm:$0xff] %v2413_v6   ;;  %2665 = vst [vmem:[%s3299_s22 + $0x1c0] sm:$0xff] %v2573_v7   ;;  %v718_v14 = vadd.f32 %v717_v12, %v3286_v58  ;;  %v911_v15 = vadd.f32 %v910_v13, %v3288_v59  ;;  %v719_v16 = vpop.f32.mrb[38].mxu0  ;;  %v912_v17 = vpop.f32.mrb[38].mxu1 }
 0x1ad   : > { %v720_v18 = vadd.f32 %v719_v16, %v3282_v56  ;;  %v913_v19 = vadd.f32 %v912_v17, %v3284_v57  ;;  %v721_v20 = vpop.f32.mrb[39].mxu0  ;;  %v914_v21 = vpop.f32.mrb[39].mxu1  ;;  %v1049_v24 = vmax.f32 %v716_v10, 0.0  ;;  %v1051_v25 = vmax.f32 %v909_v11, 0.0 }
 0x1ae   : > { %v722_v22 = vadd.f32 %v721_v20, %v3286_v58  ;;  %v915_v23 = vadd.f32 %v914_v21, %v3288_v59  ;;  %v1050_v28 = vmax.f32 %v718_v14, 0.0  ;;  %v1052_v29 = vmax.f32 %v911_v15, 0.0 }
 0x1af   : > { %v1053_v26 = vmax.f32 %v720_v18, 0.0  ;;  %v1055_v27 = vmax.f32 %v913_v19, 0.0 }
 0x1b0   : > { %v1054_v30 = vmax.f32 %v722_v22, 0.0  ;;  %v1056_v31 = vmax.f32 %v915_v23, 0.0 }
 0x1b1   : > { %v2338_v32 = vpack.c.bf16 %v1053_v26, %v1049_v24  ;;  %v2498_v33 = vpack.c.bf16 %v1055_v27, %v1051_v25 }
 0x1b2   : > { %v2418_v34 = vpack.c.bf16 %v1054_v30, %v1050_v28  ;;  %v2578_v35 = vpack.c.bf16 %v1056_v31, %v1052_v29  ;;  %v725_v36 = vpop.f32.mrb[40].mxu0  ;;  %v918_v37 = vpop.f32.mrb[40].mxu1 }
 0x1b3   : > { %2618 = vst [vmem:[%s3299_s22 + $0x48] sm:$0xff] %v2338_v32   ;;  %2650 = vst [vmem:[%s3299_s22 + $0x148] sm:$0xff] %v2498_v33   ;;  %v726_v38 = vadd.f32 %v725_v36, %v3282_v56  ;;  %v919_v39 = vadd.f32 %v918_v37, %v3284_v57  ;;  %v727_v40 = vpop.f32.mrb[41].mxu0  ;;  %v920_v41 = vpop.f32.mrb[41].mxu1 }
 0x1b4   : > { %2634 = vst [vmem:[%s3299_s22 + $0xc8] sm:$0xff] %v2418_v34   ;;  %2666 = vst [vmem:[%s3299_s22 + $0x1c8] sm:$0xff] %v2578_v35   ;;  %v728_v42 = vadd.f32 %v727_v40, %v3286_v58  ;;  %v921_v43 = vadd.f32 %v920_v41, %v3288_v59  ;;  %v729_v44 = vpop.f32.mrb[42].mxu0  ;;  %v922_v45 = vpop.f32.mrb[42].mxu1 }
 0x1b5   : > { %v730_v46 = vadd.f32 %v729_v44, %v3282_v56  ;;  %v923_v47 = vadd.f32 %v922_v45, %v3284_v57  ;;  %v731_v48 = vpop.f32.mrb[43].mxu0  ;;  %v924_v49 = vpop.f32.mrb[43].mxu1  ;;  %v1057_v52 = vmax.f32 %v726_v38, 0.0  ;;  %v1059_v53 = vmax.f32 %v919_v39, 0.0 }
 0x1b6   : > { %v732_v50 = vadd.f32 %v731_v48, %v3286_v58  ;;  %v925_v51 = vadd.f32 %v924_v49, %v3288_v59  ;;  %v1058_v60 = vmax.f32 %v728_v42, 0.0  ;;  %v1060_v61 = vmax.f32 %v921_v43, 0.0 }
 0x1b7   : > { %v1061_v54 = vmax.f32 %v730_v46, 0.0  ;;  %v1063_v55 = vmax.f32 %v923_v47, 0.0 }
 0x1b8   : > { %v1062_v62 = vmax.f32 %v732_v50, 0.0  ;;  %v1064_v63 = vmax.f32 %v925_v51, 0.0 }
 0x1b9   : > { %v2343_v0 = vpack.c.bf16 %v1061_v54, %v1057_v52  ;;  %v2503_v1 = vpack.c.bf16 %v1063_v55, %v1059_v53 }
 0x1ba   : > { %v2423_v2 = vpack.c.bf16 %v1062_v62, %v1058_v60  ;;  %v2583_v3 = vpack.c.bf16 %v1064_v63, %v1060_v61  ;;  %v735_v4 = vpop.f32.mrb[44].mxu0  ;;  %v928_v5 = vpop.f32.mrb[44].mxu1 }
 0x1bb   : > { %2619 = vst [vmem:[%s3299_s22 + $0x50] sm:$0xff] %v2343_v0   ;;  %2651 = vst [vmem:[%s3299_s22 + $0x150] sm:$0xff] %v2503_v1   ;;  %v736_v6 = vadd.f32 %v735_v4, %v3282_v56  ;;  %v929_v7 = vadd.f32 %v928_v5, %v3284_v57  ;;  %v737_v8 = vpop.f32.mrb[45].mxu0  ;;  %v930_v9 = vpop.f32.mrb[45].mxu1 }
 0x1bc   : > { %2635 = vst [vmem:[%s3299_s22 + $0xd0] sm:$0xff] %v2423_v2   ;;  %2667 = vst [vmem:[%s3299_s22 + $0x1d0] sm:$0xff] %v2583_v3   ;;  %v738_v10 = vadd.f32 %v737_v8, %v3286_v58  ;;  %v931_v11 = vadd.f32 %v930_v9, %v3288_v59  ;;  %v739_v12 = vpop.f32.mrb[46].mxu0  ;;  %v932_v13 = vpop.f32.mrb[46].mxu1 }
 0x1bd   : > { %v740_v14 = vadd.f32 %v739_v12, %v3282_v56  ;;  %v933_v15 = vadd.f32 %v932_v13, %v3284_v57  ;;  %v741_v16 = vpop.f32.mrb[47].mxu0  ;;  %v934_v17 = vpop.f32.mrb[47].mxu1  ;;  %v1065_v20 = vmax.f32 %v736_v6, 0.0  ;;  %v1067_v21 = vmax.f32 %v929_v7, 0.0 }
 0x1be   : > { %v742_v18 = vadd.f32 %v741_v16, %v3286_v58  ;;  %v935_v19 = vadd.f32 %v934_v17, %v3288_v59  ;;  %v1066_v24 = vmax.f32 %v738_v10, 0.0  ;;  %v1068_v25 = vmax.f32 %v931_v11, 0.0 }
 0x1bf   : > { %v1069_v22 = vmax.f32 %v740_v14, 0.0  ;;  %v1071_v23 = vmax.f32 %v933_v15, 0.0 }
 0x1c0   : > { %v1070_v26 = vmax.f32 %v742_v18, 0.0  ;;  %v1072_v27 = vmax.f32 %v935_v19, 0.0 }
 0x1c1   : > { %v2348_v28 = vpack.c.bf16 %v1069_v22, %v1065_v20  ;;  %v2508_v29 = vpack.c.bf16 %v1071_v23, %v1067_v21 }
 0x1c2   : > { %v2428_v30 = vpack.c.bf16 %v1070_v26, %v1066_v24  ;;  %v2588_v31 = vpack.c.bf16 %v1072_v27, %v1068_v25  ;;  %v745_v32 = vpop.f32.mrb[48].mxu0  ;;  %v938_v33 = vpop.f32.mrb[48].mxu1 }
 0x1c3   : > { %2620 = vst [vmem:[%s3299_s22 + $0x58] sm:$0xff] %v2348_v28   ;;  %2652 = vst [vmem:[%s3299_s22 + $0x158] sm:$0xff] %v2508_v29   ;;  %v746_v34 = vadd.f32 %v745_v32, %v3282_v56  ;;  %v939_v35 = vadd.f32 %v938_v33, %v3284_v57  ;;  %v747_v36 = vpop.f32.mrb[49].mxu0  ;;  %v940_v37 = vpop.f32.mrb[49].mxu1 }
 0x1c4   : > { %2636 = vst [vmem:[%s3299_s22 + $0xd8] sm:$0xff] %v2428_v30   ;;  %2668 = vst [vmem:[%s3299_s22 + $0x1d8] sm:$0xff] %v2588_v31   ;;  %v748_v38 = vadd.f32 %v747_v36, %v3286_v58  ;;  %v941_v39 = vadd.f32 %v940_v37, %v3288_v59  ;;  %v749_v40 = vpop.f32.mrb[50].mxu0  ;;  %v942_v41 = vpop.f32.mrb[50].mxu1 }
 0x1c5   : > { %v750_v42 = vadd.f32 %v749_v40, %v3282_v56  ;;  %v943_v43 = vadd.f32 %v942_v41, %v3284_v57  ;;  %v751_v44 = vpop.f32.mrb[51].mxu0  ;;  %v944_v45 = vpop.f32.mrb[51].mxu1  ;;  %v1073_v48 = vmax.f32 %v746_v34, 0.0  ;;  %v1075_v49 = vmax.f32 %v939_v35, 0.0 }
 0x1c6   : > { %v752_v46 = vadd.f32 %v751_v44, %v3286_v58  ;;  %v945_v47 = vadd.f32 %v944_v45, %v3288_v59  ;;  %v1074_v52 = vmax.f32 %v748_v38, 0.0  ;;  %v1076_v53 = vmax.f32 %v941_v39, 0.0 }
 0x1c7   : > { %v1077_v50 = vmax.f32 %v750_v42, 0.0  ;;  %v1079_v51 = vmax.f32 %v943_v43, 0.0 }
 0x1c8   : > { %v1078_v54 = vmax.f32 %v752_v46, 0.0  ;;  %v1080_v55 = vmax.f32 %v945_v47, 0.0 }
 0x1c9   : > { %v2353_v60 = vpack.c.bf16 %v1077_v50, %v1073_v48  ;;  %v2513_v61 = vpack.c.bf16 %v1079_v51, %v1075_v49 }
 0x1ca   : > { %v2433_v62 = vpack.c.bf16 %v1078_v54, %v1074_v52  ;;  %v2593_v63 = vpack.c.bf16 %v1080_v55, %v1076_v53  ;;  %v755_v0 = vpop.f32.mrb[52].mxu0  ;;  %v948_v1 = vpop.f32.mrb[52].mxu1 }
 0x1cb   : > { %2621 = vst [vmem:[%s3299_s22 + $0x60] sm:$0xff] %v2353_v60   ;;  %2653 = vst [vmem:[%s3299_s22 + $0x160] sm:$0xff] %v2513_v61   ;;  %v756_v2 = vadd.f32 %v755_v0, %v3282_v56  ;;  %v949_v3 = vadd.f32 %v948_v1, %v3284_v57  ;;  %v757_v4 = vpop.f32.mrb[53].mxu0  ;;  %v950_v5 = vpop.f32.mrb[53].mxu1 }
 0x1cc   : > { %2637 = vst [vmem:[%s3299_s22 + $0xe0] sm:$0xff] %v2433_v62   ;;  %2669 = vst [vmem:[%s3299_s22 + $0x1e0] sm:$0xff] %v2593_v63   ;;  %v758_v6 = vadd.f32 %v757_v4, %v3286_v58  ;;  %v951_v7 = vadd.f32 %v950_v5, %v3288_v59  ;;  %v759_v8 = vpop.f32.mrb[54].mxu0  ;;  %v952_v9 = vpop.f32.mrb[54].mxu1 }
 0x1cd   : > { %v760_v10 = vadd.f32 %v759_v8, %v3282_v56  ;;  %v953_v11 = vadd.f32 %v952_v9, %v3284_v57  ;;  %v761_v12 = vpop.f32.mrb[55].mxu0  ;;  %v954_v13 = vpop.f32.mrb[55].mxu1  ;;  %v1081_v16 = vmax.f32 %v756_v2, 0.0  ;;  %v1083_v17 = vmax.f32 %v949_v3, 0.0 }
 0x1ce   : > { %v762_v14 = vadd.f32 %v761_v12, %v3286_v58  ;;  %v955_v15 = vadd.f32 %v954_v13, %v3288_v59  ;;  %v1082_v20 = vmax.f32 %v758_v6, 0.0  ;;  %v1084_v21 = vmax.f32 %v951_v7, 0.0 }
 0x1cf   : > { %v1085_v18 = vmax.f32 %v760_v10, 0.0  ;;  %v1087_v19 = vmax.f32 %v953_v11, 0.0 }
 0x1d0   : > { %v1086_v22 = vmax.f32 %v762_v14, 0.0  ;;  %v1088_v23 = vmax.f32 %v955_v15, 0.0 }
 0x1d1   : > { %v2358_v24 = vpack.c.bf16 %v1085_v18, %v1081_v16  ;;  %v2518_v25 = vpack.c.bf16 %v1087_v19, %v1083_v17 }
 0x1d2   : > { %v2438_v26 = vpack.c.bf16 %v1086_v22, %v1082_v20  ;;  %v2598_v27 = vpack.c.bf16 %v1088_v23, %v1084_v21  ;;  %v765_v28 = vpop.f32.mrb[56].mxu0  ;;  %v958_v29 = vpop.f32.mrb[56].mxu1 }
 0x1d3   : > { %2622 = vst [vmem:[%s3299_s22 + $0x68] sm:$0xff] %v2358_v24   ;;  %2654 = vst [vmem:[%s3299_s22 + $0x168] sm:$0xff] %v2518_v25   ;;  %v766_v30 = vadd.f32 %v765_v28, %v3282_v56  ;;  %v959_v31 = vadd.f32 %v958_v29, %v3284_v57  ;;  %v767_v32 = vpop.f32.mrb[57].mxu0  ;;  %v960_v33 = vpop.f32.mrb[57].mxu1 }
 0x1d4   : > { %2638 = vst [vmem:[%s3299_s22 + $0xe8] sm:$0xff] %v2438_v26   ;;  %2670 = vst [vmem:[%s3299_s22 + $0x1e8] sm:$0xff] %v2598_v27   ;;  %v768_v34 = vadd.f32 %v767_v32, %v3286_v58  ;;  %v961_v35 = vadd.f32 %v960_v33, %v3288_v59  ;;  %v769_v36 = vpop.f32.mrb[58].mxu0  ;;  %v962_v37 = vpop.f32.mrb[58].mxu1 }
 0x1d5   : > { %v770_v38 = vadd.f32 %v769_v36, %v3282_v56  ;;  %v963_v39 = vadd.f32 %v962_v37, %v3284_v57  ;;  %v771_v40 = vpop.f32.mrb[59].mxu0  ;;  %v964_v41 = vpop.f32.mrb[59].mxu1  ;;  %v1089_v44 = vmax.f32 %v766_v30, 0.0  ;;  %v1091_v45 = vmax.f32 %v959_v31, 0.0 }
 0x1d6   : > { %v772_v42 = vadd.f32 %v771_v40, %v3286_v58  ;;  %v965_v43 = vadd.f32 %v964_v41, %v3288_v59  ;;  %v1090_v48 = vmax.f32 %v768_v34, 0.0  ;;  %v1092_v49 = vmax.f32 %v961_v35, 0.0 }
 0x1d7   : > { %v1093_v46 = vmax.f32 %v770_v38, 0.0  ;;  %v1095_v47 = vmax.f32 %v963_v39, 0.0 }
 0x1d8   : > { %v1094_v50 = vmax.f32 %v772_v42, 0.0  ;;  %v1096_v51 = vmax.f32 %v965_v43, 0.0 }
 0x1d9   : > { %v2363_v52 = vpack.c.bf16 %v1093_v46, %v1089_v44  ;;  %v2523_v53 = vpack.c.bf16 %v1095_v47, %v1091_v45 }
 0x1da   : > { %v2443_v54 = vpack.c.bf16 %v1094_v50, %v1090_v48  ;;  %v2603_v55 = vpack.c.bf16 %v1096_v51, %v1092_v49  ;;  %v775_v60 = vpop.f32.mrb[60].mxu0  ;;  %v968_v61 = vpop.f32.mrb[60].mxu1 }
 0x1db   : > { %2623 = vst [vmem:[%s3299_s22 + $0x70] sm:$0xff] %v2363_v52   ;;  %2655 = vst [vmem:[%s3299_s22 + $0x170] sm:$0xff] %v2523_v53   ;;  %v776_v62 = vadd.f32 %v775_v60, %v3282_v56  ;;  %v969_v63 = vadd.f32 %v968_v61, %v3284_v57  ;;  %v777_v0 = vpop.f32.mrb[61].mxu0  ;;  %v970_v1 = vpop.f32.mrb[61].mxu1 }
 0x1dc   : > { %2639 = vst [vmem:[%s3299_s22 + $0xf0] sm:$0xff] %v2443_v54   ;;  %2671 = vst [vmem:[%s3299_s22 + $0x1f0] sm:$0xff] %v2603_v55   ;;  %v778_v2 = vadd.f32 %v777_v0, %v3286_v58  ;;  %v971_v3 = vadd.f32 %v970_v1, %v3288_v59  ;;  %v779_v4 = vpop.f32.mrb[62].mxu0  ;;  %v972_v5 = vpop.f32.mrb[62].mxu1 }
 0x1dd   : > { %v780_v6 = vadd.f32 %v779_v4, %v3282_v56  ;;  %v973_v7 = vadd.f32 %v972_v5, %v3284_v57  ;;  %v781_v8 = vpop.f32.mrb[63].mxu0  ;;  %v974_v9 = vpop.f32.mrb[63].mxu1  ;;  %v1097_v12 = vmax.f32 %v776_v62, 0.0  ;;  %v1099_v13 = vmax.f32 %v969_v63, 0.0 }
 0x1de   : > { %v782_v10 = vadd.f32 %v781_v8, %v3286_v58  ;;  %v975_v11 = vadd.f32 %v974_v9, %v3288_v59  ;;  %v1098_v56 = vmax.f32 %v778_v2, 0.0  ;;  %v1100_v16 = vmax.f32 %v971_v3, 0.0 }
 0x1df   : > { %v1101_v14 = vmax.f32 %v780_v6, 0.0  ;;  %v1103_v15 = vmax.f32 %v973_v7, 0.0 }
 0x1e0   : > { %v1102_v57 = vmax.f32 %v782_v10, 0.0  ;;  %v1104_v17 = vmax.f32 %v975_v11, 0.0 }
 0x1e1   : > { %v2368_v18 = vpack.c.bf16 %v1101_v14, %v1097_v12  ;;  %v2528_v58 = vpack.c.bf16 %v1103_v15, %v1099_v13 }
 0x1e2   : > { %v2448_v59 = vpack.c.bf16 %v1102_v57, %v1098_v56  ;;  %v2608_v19 = vpack.c.bf16 %v1104_v17, %v1100_v16 }
 0x1e3   : > { %2624 = vst [vmem:[%s3299_s22 + $0x78] sm:$0xff] %v2368_v18   ;;  %2656 = vst [vmem:[%s3299_s22 + $0x178] sm:$0xff] %v2528_v58  }
 0x1e4   : > { %2640 = vst [vmem:[%s3299_s22 + $0xf8] sm:$0xff] %v2448_v59   ;;  %2672 = vst [vmem:[%s3299_s22 + $0x1f8] sm:$0xff] %v2608_v19  }
 0x1e5   : > { %2926 = shalt.err (!%p2923_p11)
}
 0x1e6   : > { %s2927_s9 = scalar_lea.hbm %s3486_s15, 8192  ;;  %s2931_s29 = scalar_lea.hbm %s3544_s3, 16384 }
 0x1e7   : > { %p2928_p0 = scmp.ne.s32.totalorder %s3486_s15, %s2927_s9  ;;  %p2932_p6 = scmp.lt.u32.totalorder %s3486_s15, %s3544_s3 }
 0x1e8   : > { %p2933_p7 = scmp.lt.u32.totalorder %s2931_s29, %s2927_s9  ;;  %p2935_p8 = scmp.lt.u32.totalorder %s2927_s9, %s3486_s15 }
 0x1e9   : > { %p2929_p4 = pnand %p2928_p0, %p3559_p12 }
 0x1ea   : > { %p2934_p2 = por %p2933_p7, %p2932_p6 }
 0x1eb   : > { %p2930_p13 = pneg %p2929_p4 }
 0x1ec   : > { %p2936_p1 = por %p2935_p8, %p2934_p2 }
 0x1ee   : > { %p2937_p10 = pnand %p2936_p1, %p2930_p13 }
 0x1f0   : > { %2940 = shalt.err (!%p2937_p10)
}
 0x1f1   : > { %s3010_s22 = smov 64   ;;  %s3011_s24 = smov 4  }
 0x1f2   : > { %2683 = dma.vmem_to_hbm [thread:$0]  (%p3559_p12), %s3488_s6, 8192, %s3486_s15, %s1749_s26, %s3010_s22, %s3010_s22, %s3011_s24  }
 0x1f3 PF: > { %s1778_s7 = sand.u32 1, %s2979_s12   ;;  %p3560_p3 = scmp.ne.s32.totalorder %s3552_s23, 0 }
 0x1f4   : > { %p3561_p5 = scmp.ge.s32.totalorder %s2999_s17, 2  ;;  %s1779_s8 = scalar_lea.sflag [#allocation4], %s1778_s7 }
 0x1f6   : > { %p2697_p9 = pnand %p3561_p5, %p3560_p3 }
 0x1f8   : > { %2974 = dma.done.wait (!%p2697_p9), %s1779_s8, 8192  }
 0x1f9   : > { %2976 = vsyncadd (!%p2697_p9), %s1779_s8, 4294959104  ;;  %s20_s17 = sadd.s32 1, %s2999_s17   ;;  %s3562_s12 = smov %s2983_s13 }
 0x1fa   : > { %p17_p11 = scmp.ge.s32.totalorder %s20_s17, 4   ;;  %s3563_s13 = smov %s2987_s14 }
 0x1fb   : > { %s3564_s14 = smov %s3174_s30  ;;  %s3565_s15 = smov %s2995_s16 }
 0x1fc   : > { %s3566_s16 = smov %s3568_s11  ;;  %19 = sbr.rel (!%p17_p11) target bundleno = 7 (0x7), region = 90 }
 0x203   :  { %1784 = vsyncpa [#allocation3], 1 }
 0x204   :  { %1786 = vsyncpa [#allocation3 + $0x1], 1 }
 0x205   :  { %1787 = vsyncpa [#allocation6], 1 }
 0x206   :  { %1788 = vsyncpa [#allocation4], 1 }
 0x207   :  { %1790 = vsyncpa [#allocation4 + $0x1], 1 }

// kernel: bottleneck_forward.4
= control target key start
LH: loop header
LB: loop body
LE: loop exit
PB: predicated region body
PF: predicated region fallthrough
CT: control target
= control target key end

     0   :  { %s10330_s0 = inlined_call_operand.hbm [shape: bf16[2,16,16,128], index: 0, kind: input, shape index: {}]   ;;  %s10331_s1 = inlined_call_operand.hbm [shape: bf16[1152,128], index: 1, kind: input, shape index: {}]   ;;  %s10332_s2 = inlined_call_operand.hbm [shape: f32[1,128], index: 2, kind: input, shape index: {}]   ;;  %s10333_s3 = inlined_call_operand.hbm [shape: f32[1,128], index: 3, kind: input, shape index: {}]   ;;  %s10334_s4 = inlined_call_operand.hbm [shape: f32[1,128], index: 4, kind: input, shape index: {}]   ;;  %s10335_s5 = inlined_call_operand.hbm [shape: bf16[2,16,16,128], index: 5, kind: output, shape index: {0}]   ;;  %s10336_s6 = inlined_call_operand.hbm [shape: f32[2,2,128], index: 6, kind: output, shape index: {1}]  }
   0x1   :  { %10352 = sst [smem:[#allocation31_spill]] %s10336_s6 }
   0x2   :  { %12 = vsyncpa [#allocation4], 0 }
   0x3   :  { %14 = vsyncpa [#allocation4 + $0x1], 0 }
   0x4   :  { %15 = vsyncpa [#allocation7], 0 }
   0x5   :  { %16 = vsyncpa [#allocation10], 0 }
   0x6   :  { %17 = vsyncpa [#allocation5], 0 }
   0x7   :  { %19 = vsyncpa [#allocation5 + $0x1], 0 }
   0x8   :  { %20 = vsyncpa [#allocation14], 0 }
   0x9   :  { %22 = vsyncpa [#allocation14 + $0x1], 0  ;;  %s8371_s21 = smov 0   ;;  %s8373_s22 = smov 0  }
   0xa   :  { %s8375_s23 = smov 0   ;;  %s8377_s24 = smov 0  }
   0xb   :  { %s8379_s25 = smov 0   ;;  %s8381_s26 = smov 0  }
   0xc LB: > { %10353 = sst [smem:[#allocation20_spill]] %s8302_s21  ;;  %s6314_s27 = sadd.s32 4294967295, %s8322_s26   ;;  %s8322_s26 = sphi %s8381_s26, %s28_s26   ;;  %s8318_s25 = sphi %s8379_s25, %s10431_s25   ;;  %s8314_s24 = sphi %s8377_s24, %s10430_s24   ;;  %s8310_s23 = sphi %s8375_s23, %s10429_s23   ;;  %s8306_s22 = sphi %s8373_s22, %s10428_s22   ;;  %s8302_s21 = sphi %s8371_s21, %s10427_s21  }
   0xd   : > { %s6315_s28 = sadd.s32 4294967294, %s8322_s26   ;;  %p60_p0 = scmp.ne.s32.totalorder %s8306_s22, %s8302_s21 }
   0xe   : > { %p8405_p1 = scmp.eq.s32.totalorder %s6314_s27, 0  ;;  %p8409_p2 = scmp.eq.s32.totalorder %s6314_s27, 1 }
   0xf   : > { %p186_p3 = scmp.eq.s32.totalorder %s6315_s28, 1  ;;  %p6316_p5 = scmp.ge.s32.totalorder %s8322_s26, 1 }
  0x10   : > { %s10354_s29 = scalar_select %p8405_p1, 1, 0 }
  0x11   : > { %s10355_s30 = scalar_select %p8409_p2, 1, 0 }
  0x12   : > { %p8415_p4 = por %p8405_p1, %p60_p0  ;;  %p8420_p6 = por %p186_p3, %p60_p0 }
  0x13   : > { %p221_p7 = scmp.lt.s32.totalorder %s8322_s26, 3  ;;  %s8324_s10 = smov [#allocation6]  }
  0x14   : > { %s10356_s7 = scalar_select %p8415_p4, 1, 0 }
  0x15   : > { %s10357_s8 = scalar_select %p8420_p6, 1, 0 }
  0x16   : > { %p8425_p8 = pnand %p6316_p5, %p221_p7  ;;  %s235_s11 = sshll.u32 %s8324_s10, 4  ;;  %s8429_s11 = int_to_ptr.vmem [resolvable:$true] %s235_s11 }
  0x17   : > { %10358 = sst [smem:[#allocation21_spill]] %s10357_s8  ;;  %s8325_s13 = smov [#allocation9]  }
  0x18   : > { %s10359_s9 = scalar_select %p8425_p8, 1, 0 }
  0x19   : > { %p7774_p9 = pneg %p8425_p8  ;;  %s262_s14 = sshll.u32 %s8325_s13, 4  ;;  %s8440_s14 = int_to_ptr.vmem [resolvable:$true] %s262_s14 }
  0x1a   : > { %s8326_s15 = smov [#allocation8]   ;;  %s8058_s19 = scalar_lea.hbm %s10331_s1, 9216 }
  0x1b   : > { %p8436_p11 = pnand %p7774_p9, %p8405_p1  ;;  %s8442_s16 = sshll.u32 %s8326_s15, 4  ;;  %s252_s16 = int_to_ptr.vmem [resolvable:$true] %s8442_s16 }
  0x1c   : > { %p8059_p12 = scmp.ne.s32.totalorder %s10331_s1, %s8058_s19  ;;  %p8065_p5 = scmp.lt.u32.totalorder %s8058_s19, %s10331_s1 }
  0x1d   : > { %p8452_p13 = pneg %p8436_p11 }
  0x1f   : > { %p8061_p0 = pnand %p8452_p13, %p8059_p12 }
  0x21   : > { %p8062_p3 = pneg %p8061_p0 }
  0x23   : > { %p8067_p7 = pnand %p8065_p5, %p8062_p3 }
  0x25   : > { %8070 = shalt.err (!%p8067_p7)
}
  0x26   : > { %s8071_s15 = scalar_lea.vmem %s8429_s11, 9216  ;;  %p8079_p1 = scmp.lt.s32.totalorder %s8429_s11, %s8429_s11 }
  0x27   : > { %p8072_p9 = scmp.ne.s32.totalorder %s8429_s11, %s8071_s15  ;;  %p8080_p4 = scmp.lt.s32.totalorder %s8071_s15, %s8071_s15 }
  0x29   : > { %p8074_p10 = pnand %p8072_p9, %p8452_p13  ;;  %p8081_p12 = por %p8080_p4, %p8079_p1 }
  0x2b   : > { %p8075_p6 = pneg %p8074_p10 }
  0x2d   : > { %p8082_p0 = pnand %p8081_p12, %p8075_p6 }
  0x2f   : > { %8085 = shalt.err (!%p8082_p0)
}
  0x30   : > { %s8327_s17 = smov 64   ;;  %s8328_s18 = smov 4  }
  0x31   : > { %7777 = dma.hbm_to_vmem [thread:$0]  (!%p8436_p11), %s10331_s1, 9216, %s8429_s11, [#allocation7], %s8327_s17, %s8327_s17, %s8328_s18  }
  0x32   : > { %s8086_s13 = scalar_lea.hbm %s10333_s3, 16 }
  0x33   : > { %p8087_p1 = scmp.ne.s32.totalorder %s10333_s3, %s8086_s13  ;;  %p8093_p10 = scmp.lt.u32.totalorder %s8086_s13, %s10333_s3 }
  0x35   : > { %p8089_p4 = pnand %p8087_p1, %p8452_p13 }
  0x37   : > { %p8090_p6 = pneg %p8089_p4 }
  0x39   : > { %p8095_p3 = pnand %p8093_p10, %p8090_p6 }
  0x3b   : > { %8098 = shalt.err (!%p8095_p3)
}
  0x3c   : > { %s8099_s11 = scalar_lea.vmem %s8440_s14, 16  ;;  %s8106_s8 = scalar_lea.vmem %s8440_s14, 32 }
  0x3d   : > { %p8100_p5 = scmp.ne.s32.totalorder %s8440_s14, %s8099_s11  ;;  %p8107_p12 = scmp.lt.s32.totalorder %s8440_s14, %s8440_s14 }
  0x3e   : > { %p8108_p0 = scmp.lt.s32.totalorder %s8106_s8, %s8099_s11 }
  0x3f   : > { %p8102_p7 = pnand %p8100_p5, %p8452_p13 }
  0x40   : > { %p8109_p1 = por %p8108_p0, %p8107_p12 }
  0x41   : > { %p8103_p9 = pneg %p8102_p7 }
  0x43   : > { %p8110_p4 = pnand %p8109_p1, %p8103_p9 }
  0x45   : > { %8113 = shalt.err (!%p8110_p4)
}
  0x46   : > { %7783 = dma.hbm_to_vmem [thread:$0]  (!%p8436_p11), %s10333_s3, 16, %s8440_s14, [#allocation10]  }
  0x47   : > { %s8114_s27 = scalar_lea.hbm %s10332_s2, 16 }
  0x48   : > { %p8115_p6 = scmp.ne.s32.totalorder %s10332_s2, %s8114_s27  ;;  %p8121_p5 = scmp.lt.u32.totalorder %s8114_s27, %s10332_s2 }
  0x4a   : > { %p8117_p10 = pnand %p8115_p6, %p8452_p13 }
  0x4c   : > { %p8118_p3 = pneg %p8117_p10 }
  0x4e   : > { %p8123_p7 = pnand %p8121_p5, %p8118_p3 }
  0x50   : > { %8126 = shalt.err (!%p8123_p7)
}
  0x51   : > { %s8127_s8 = scalar_lea.vmem %s252_s16, 16  ;;  %s8134_s14 = scalar_lea.vmem %s252_s16, 32 }
  0x52   : > { %p8128_p9 = scmp.ne.s32.totalorder %s252_s16, %s8127_s8  ;;  %p8135_p1 = scmp.lt.s32.totalorder %s252_s16, %s252_s16 }
  0x53   : > { %p8136_p4 = scmp.lt.s32.totalorder %s8134_s14, %s8127_s8 }
  0x54   : > { %p8130_p12 = pnand %p8128_p9, %p8452_p13 }
  0x55   : > { %p8137_p8 = por %p8136_p4, %p8135_p1 }
  0x56   : > { %p8131_p0 = pneg %p8130_p12 }
  0x58   : > { %p8138_p2 = pnand %p8137_p8, %p8131_p0 }
  0x5a   : > { %8141 = shalt.err (!%p8138_p2)
}
  0x5b   : > { %7780 = dma.hbm_to_vmem [thread:$0]  (!%p8436_p11), %s10332_s2, 16, %s252_s16, [#allocation7]  }
  0x5c   : > { %s8329_s19 = smov [#allocation11]   ;;  %s8142_s13 = scalar_lea.hbm %s10334_s4, 16 }
  0x5d   : > { %s273_s20 = sshll.u32 %s8329_s19, 4  ;;  %p8143_p6 = scmp.ne.s32.totalorder %s10334_s4, %s8142_s13  ;;  %s274_s20 = int_to_ptr.vmem [resolvable:$true] %s273_s20 }
  0x5e   : > { %p8149_p10 = scmp.lt.u32.totalorder %s8142_s13, %s10334_s4 }
  0x5f   : > { %p8145_p2 = pnand %p8143_p6, %p8452_p13 }
  0x61   : > { %p8146_p8 = pneg %p8145_p2 }
  0x63   : > { %p8151_p3 = pnand %p8149_p10, %p8146_p8 }
  0x65   : > { %8154 = shalt.err (!%p8151_p3)
}
  0x66   : > { %s8155_s16 = scalar_lea.vmem %s274_s20, 16  ;;  %s8162_s6 = scalar_lea.vmem %s274_s20, 32 }
  0x67   : > { %p8156_p5 = scmp.ne.s32.totalorder %s274_s20, %s8155_s16  ;;  %p8163_p12 = scmp.lt.s32.totalorder %s274_s20, %s274_s20 }
  0x68   : > { %p8164_p0 = scmp.lt.s32.totalorder %s8162_s6, %s8155_s16 }
  0x69   : > { %p8158_p7 = pnand %p8156_p5, %p8452_p13 }
  0x6a   : > { %p8165_p1 = por %p8164_p0, %p8163_p12 }
  0x6b   : > { %p8159_p9 = pneg %p8158_p7 }
  0x6d   : > { %p8166_p4 = pnand %p8165_p1, %p8159_p9 }
  0x6f   : > { %8169 = shalt.err (!%p8166_p4)
}
  0x70   : > { %7786 = dma.hbm_to_vmem [thread:$0]  (!%p8436_p11), %s10334_s4, 16, %s274_s20, [#allocation10]  }
  0x71   : > { %s40_s28 = sadd.s32 1, %s8318_s25  ;;  %s47_s27 = sadd.s32 1, %s8310_s23 }
  0x72   : > { %p42_p13 = scmp.ge.s32.totalorder %s40_s28, 2  ;;  %p54_p6 = scmp.ne.s32.totalorder %s8310_s23, %s8306_s22 }
  0x73   : > { %p55_p2 = scmp.eq.s32.totalorder %s8322_s26, 0  ;;  %p7802_p8 = scmp.lt.s32.totalorder %s8322_s26, 2 }
  0x74   : > { %s10433_s28 = smov (%p42_p13, %s40_s28), 0  ;;  %p10362_p3 = scmp.ne.s32.totalorder %s10355_s30, 0 }
  0x75   : > { %p56_p10 = por %p55_p2, %p54_p6  ;;  %s44_s10 = ssub.s32 %s8318_s25, %s10433_s28 }
  0x76   : > { %p8547_p5 = por %p10362_p3, %p54_p6  ;;  %s284_s13 = sand.u32 1, %s8310_s23  }
  0x77   : > { %p45_p7 = scmp.eq.s32.totalorder %s44_s10, 0  ;;  %s6322_s20 = sshll.u32 %s284_s13, 7 }
  0x78   : > { %s6703_s15 = sshll.u32 %s8318_s25, 11  ;;  %s288_s30 = scalar_lea.vmem [#allocation3], %s6322_s20 }
  0x79   : > { %s8556_s11 = scalar_select %p45_p7, %s8310_s23, %s47_s27  }
  0x7a   : > { %s8561_s16 = scalar_lea.hbm %s10330_s0, %s6703_s15  ;;  %s295_s6 = sshll.u32 %s288_s30, 4  ;;  %s8569_s6 = int_to_ptr.vmem [resolvable:$true] %s295_s6 }
  0x7b   : > { %p8565_p11 = pnand %p7802_p8, %p56_p10  ;;  %s8571_s19 = scalar_lea.sflag [#allocation4], %s284_s13 }
  0x7c   : > { %s8170_s27 = scalar_lea.hbm %s8561_s16, 2048  ;;  %s8175_s15 = scalar_lea.hbm %s10330_s0, 4096 }
  0x7d   : > { %p8171_p9 = scmp.ne.s32.totalorder %s8561_s16, %s8170_s27  ;;  %p8172_p12 = pneg %p8565_p11 }
  0x7e   : > { %p8176_p4 = scmp.lt.u32.totalorder %s8561_s16, %s10330_s0  ;;  %p8177_p13 = scmp.lt.u32.totalorder %s8175_s15, %s8170_s27 }
  0x7f   : > { %p8173_p0 = pnand %p8172_p12, %p8171_p9  ;;  %p8179_p2 = scmp.lt.u32.totalorder %s8170_s27, %s8561_s16 }
  0x80   : > { %p8178_p6 = por %p8177_p13, %p8176_p4 }
  0x81   : > { %p8174_p1 = pneg %p8173_p0 }
  0x82   : > { %p8180_p8 = por %p8179_p2, %p8178_p6 }
  0x84   : > { %p8181_p10 = pnand %p8180_p8, %p8174_p1 }
  0x86   : > { %8184 = shalt.err (!%p8181_p10)
}
  0x87   : > { %s8185_s13 = scalar_lea.vmem %s8569_s6, 2048  ;;  %s8330_s30 = smov [#allocation3]  }
  0x88   : > { %p8186_p3 = scmp.ne.s32.totalorder %s8569_s6, %s8185_s13  ;;  %s8190_s10 = sshll.u32 %s8330_s30, 4  ;;  %s8191_s10 = int_to_ptr.vmem [resolvable:$false] %s8190_s10 }
  0x89   : > { %s8192_s20 = scalar_lea.vmem %s8191_s10, 4096  ;;  %p8193_p0 = scmp.lt.s32.totalorder %s8569_s6, %s8191_s10 }
  0x8a   : > { %p8188_p7 = pnand %p8186_p3, %p8172_p12  ;;  %p8194_p4 = scmp.lt.s32.totalorder %s8192_s20, %s8185_s13 }
  0x8c   : > { %p8189_p9 = pneg %p8188_p7  ;;  %p8195_p13 = por %p8194_p4, %p8193_p0 }
  0x8e   : > { %p8196_p6 = pnand %p8195_p13, %p8189_p9 }
  0x90   : > { %8199 = shalt.err (!%p8196_p6)
}
  0x91   : > { %7790 = dma.hbm_to_vmem [thread:$0]  (!%p8565_p11), %s8561_s16, 2048, %s8569_s6, %s8571_s19, %s8327_s17, %s8327_s17, %s8328_s18  }
  0x92   : > { %p10365_p12 = scmp.ne.s32.totalorder %s10359_s9, 0 }
  0x94   : > { %307 = sbr.rel (%p10365_p12) target bundleno = 852 (0x354), region = 40 }
  0x9b   : > { %s8605_s27 = sand.u32 1, %s8306_s22   ;;  %p10366_p1 = scmp.ne.s32.totalorder %s10356_s7, 0 }
  0x9c   : > { %s6326_s15 = sshll.u32 %s8605_s27, 7  ;;  %s310_s8 = scalar_lea.sflag [#allocation4], %s8605_s27 }
  0x9d   : > { %s8611_s21 = scalar_lea.vmem [#allocation3], %s6326_s15 }
  0x9e   : > { %8281 = dma.done.wait (%p10366_p1), %s310_s8, 2048  }
  0x9f   : > { %8283 = vsyncadd (%p10366_p1), %s310_s8, 4294965248  ;;  %p10367_p11 = scmp.ne.s32.totalorder %s10354_s29, 0 }
  0xa1   : > { %8285 = dma.done.wait (%p10367_p11), [#allocation7], 9232  }
  0xa2   : > { %8287 = vsyncadd (%p10367_p11), [#allocation7], 4294958064 }
  0xa3   : > { %8289 = dma.done.wait (%p10367_p11), [#allocation10], 32  }
  0xa4   : > { %8291 = vsyncadd (%p10367_p11), [#allocation10], 4294967264  ;;  %v8331_v0 = vmov 0   ;;  %v7865_v1 = vld [vmem:[#allocation6 + $0x40] sm:$0xff]   ;;  %v7867_v3 = vld [vmem:[#allocation6 + $0x48] sm:$0xff]   ;;  %v407_v9 = vlaneseq  ;;  %vm721_vm3 = vcmask 1040384  }
  0xa5   : > { %490 = vst [vmem:[#allocation2] sm:$0xf] %v8331_v0  ;;  %491 = vst [vmem:[#allocation2 + $0x4] sm:$0xf] %v8331_v0  ;;  %v7866_v2 = vld [vmem:[#allocation6 + $0x100] sm:$0xff]   ;;  %7048 = vmatprep.subr.bf16.mxu1 %v7865_v1  ;;  %v7868_v4 = vld [vmem:[#allocation6 + $0x108] sm:$0xff]  }
  0xa6   : > { %492 = vst [vmem:[#allocation2 + $0x8] sm:$0x1] %v8331_v0  ;;  %494 = vst [vmem:[#allocation2 + $0xcc] sm:$0xf] %v8331_v0  ;;  %7240 = vmatprep.subr.bf16.mxu0 %v7866_v2  ;;  %7049 = vmatpush3.bf16.msra.mxu1 %v7865_v1  ;;  %v7869_v5 = vld [vmem:[#allocation6 + $0x50] sm:$0xff]   ;;  %v7871_v7 = vld [vmem:[#allocation6 + $0x58] sm:$0xff]  }
  0xa7   : > { %495 = vst [vmem:[#allocation2 + $0xd0] sm:$0xf] %v8331_v0  ;;  %496 = vst [vmem:[#allocation2 + $0xd4] sm:$0x1] %v8331_v0  ;;  %7241 = vmatpush3.bf16.msra.mxu0 %v7866_v2  ;;  %7050 = vmatprep.subr.bf16.mxu1 %v7867_v3  ;;  %v7870_v6 = vld [vmem:[#allocation6 + $0x110] sm:$0xff]   ;;  %v7872_v8 = vld [vmem:[#allocation6 + $0x118] sm:$0xff]  }
  0xa8   : > { %7242 = vmatprep.subr.bf16.mxu0 %v7868_v4  ;;  %v7873_v10 = vld [vmem:[#allocation6 + $0x60] sm:$0xff]   ;;  %vm1045_vm0 = vsmask.f32 3328  ;;  %v7875_v12 = vld [vmem:[#allocation6 + $0x68] sm:$0xff]   ;;  %v408_v13 = vshrl.u32 %v407_v9, 7  ;;  %v7877_v29 = vld [vmem:[#allocation6 + $0x70] sm:$0xff]  }
  0xa9   : > { %v7874_v11 = vld [vmem:[#allocation6 + $0x120] sm:$0xff]   ;;  %v7876_v17 = vld [vmem:[#allocation6 + $0x128] sm:$0xff]   ;;  %vm1046_vm1 = vsmask.f32 7440  ;;  %v7878_v33 = vld [vmem:[#allocation6 + $0x130] sm:$0xff]   ;;  %vm2074_vm6 = vcmask 1042432  }
  0xaa   : > { %7051 = vmatpush3.bf16.msra.mxu1 %v7867_v3  ;;  %v400_v23 = vld [vmem:[#allocation9] sm:$0x1]  ;;  %v402_v28 = vld [vmem:[#allocation11] sm:$0x1]  ;;  %v409_v32 = vsub.s32 0, %v408_v13  ;;  %v7879_v37 = vld [vmem:[#allocation6 + $0x78] sm:$0xff]  }
  0xab   : > { %7243 = vmatpush3.bf16.msra.mxu0 %v7868_v4  ;;  %7052 = vmatprep.subr.bf16.mxu1 %v7869_v5  ;;  %v401_v30 = vpack.c.bf16 %v400_v23, %v400_v23  ;;  %v403_v31 = vpack.c.bf16 %v402_v28, %v402_v28  ;;  %vm8627_vm2 = vmor %vm1045_vm0, %vm1046_vm1  ;;  %v7880_v41 = vld [vmem:[#allocation6 + $0x138] sm:$0xff]   ;;  %v368_v44 = vld [vmem:[%s8611_s21] sm:$0xf]  ;;  %vm722_vm4 = vsmask.f32 256  ;;  %vm2075_vm7 = vcmask 1046532  }
  0xac   : > { %7244 = vmatprep.subr.bf16.mxu0 %v7870_v6  ;;  %v981_v14 = vld [vmem:[#allocation2] sm:$0xf]  ;;  %v982_v15 = vld [vmem:[#allocation2 + $0x4] sm:$0xf]  ;;  %v369_v45 = vld [vmem:[%s8611_s21 + $0x4] sm:$0xf] }
  0xad   : > { %v1029_v16 = vld [vmem:[#allocation2 + $0x8] sm:$0x1]  ;;  %v1049_v18 = vshrl.u32 %v981_v14, 16  ;;  %v1052_v19 = vshll.u32 %v981_v14, 16  ;;  %v1058_v20 = vshll.u32 %v982_v15, 16  ;;  %v1062_v21 = vshrl.u32 %v982_v15, 16  ;;  %vm8682_vm5 = vmand %vm721_vm3, %vm722_vm4 }
  0xae   : > { %7053 = vmatpush3.bf16.msra.mxu1 %v7869_v5  ;;  %v1068_v22 = vshll.u32 %v1029_v16, 16  ;;  %v405_v39 = vpack.i.b16 %v401_v30, %v401_v30  ;;  %v448_v40 = vpack.i.b16 %v403_v31, %v403_v31  ;;  %v370_v48 = vld [vmem:[%s8611_s21 + $0x8] sm:$0xf]  ;;  %v8642_v54 = vld [vmem:[#allocation6] sm:$0xff]   ;;  %v371_v55 = vld [vmem:[%s8611_s21 + $0xc] sm:$0xf] }
  0xaf   : > { %7245 = vmatpush3.bf16.msra.mxu0 %v7870_v6  ;;  %7054 = vmatprep.subr.bf16.mxu1 %v7871_v7  ;;  %v1051_v24 = vrot.slane %v1049_v18, 4  ;;  %v1054_v25 = vrot.slane %v1052_v19, 5  ;;  %v1060_v26 = vrot.slane %v1058_v20, 5  ;;  %v1064_v27 = vrot.slane %v1062_v21, 4  ;;  %v372_v56 = vld [vmem:[%s8611_s21 + $0x10] sm:$0xf]  ;;  %vm8838_vm8 = vmor %vm2074_vm6, %vm2075_vm7 }
  0xb0   : > { %7246 = vmatprep.subr.bf16.mxu0 %v7872_v8  ;;  %v1070_v36 = vrot.slane %v1068_v22, 5  ;;  %v410_v46 = vrot.slane %v405_v39, %v409_v32  ;;  %v453_v47 = vrot.slane %v448_v40, %v409_v32  ;;  %v373_v57 = vld [vmem:[%s8611_s21 + $0x14] sm:$0xf]  ;;  %v374_v58 = vld [vmem:[%s8611_s21 + $0x18] sm:$0xf]  ;;  %v8650_v61 = vld [vmem:[#allocation6 + $0x140] sm:$0xff]  }
  0xb1   : > { %v1055_v34 = vor.u32 %v1054_v25, %v1051_v24  ;;  %v1065_v35 = vor.u32 %v1064_v27, %v1060_v26  ;;  %v375_v63 = vld [vmem:[%s8611_s21 + $0x1c] sm:$0xf]  ;;  %v376_v3 = vld [vmem:[%s8611_s21 + $0x20] sm:$0xf]  ;;  %v378_v13 = vld [vmem:[%s8611_s21 + $0x28] sm:$0xf] }
  0xb2   : > { %7055 = vmatpush3.bf16.msra.mxu1 %v7871_v7  ;;  %v8638_v52 = vcombine.low %v410_v46, %v410_v46  ;;  %v8640_v53 = vcombine.low %v453_v47, %v453_v47  ;;  %v380_v22 = vld [vmem:[%s8611_s21 + $0x30] sm:$0xf]  ;;  %s10189_s29 = scalar_lea.vmem [#allocation12], %s6326_s15  ;;  %s6736_s7 = sshll.u32 %s8314_s24, 11 }
  0xb3   : > { %7247 = vmatpush3.bf16.msra.mxu0 %v7872_v8  ;;  %7056 = vmatprep.subr.bf16.mxu1 %v7873_v10  ;;  %v1056_v42 = vrot.slane %v1055_v34, 4  ;;  %v1066_v43 = vrot.slane %v1065_v35, 4  ;;  %v377_v8 = vld [vmem:[%s8611_s21 + $0x24] sm:$0xf]  ;;  %v7925_v35 = vld [vmem:[#allocation6 + $0xa8] sm:$0xff]   ;;  %s6142_s9 = sshll.u32 %s10189_s29, 4  ;;  %s10245_s16 = scalar_lea.hbm %s10335_s5, %s6736_s7  ;;  %s10247_s9 = int_to_ptr.vmem [resolvable:$true] %s6142_s9 }
  0xb4   : > { %7248 = vmatprep.subr.bf16.mxu0 %v7874_v11  ;;  %v415_v59 = vmul.bf16 %v8638_v52, %v368_v44  ;;  %v416_v60 = vmul.bf16 %v8638_v52, %v369_v45  ;;  %v417_v62 = vmul.bf16 %v8638_v52, %v370_v48  ;;  %v418_v0 = vmul.bf16 %v8638_v52, %v371_v55  ;;  %s6123_s6 = scalar_lea.sflag [#allocation5], %s8605_s27  ;;  %s8200_s19 = scalar_lea.vmem %s10247_s9, 2048 }
  0xb5   : > { %v1061_v49 = vsel %vm8627_vm2, %v1056_v42, %v1060_v26  ;;  %v1071_v50 = vsel %vm8627_vm2, %v1066_v43, %v1070_v36  ;;  %v419_v1 = vmul.bf16 %v8638_v52, %v372_v56  ;;  %v420_v2 = vmul.bf16 %v8638_v52, %v373_v57  ;;  %p8201_p2 = scmp.ne.s32.totalorder %s10247_s9, %s8200_s19  ;;  %s8332_s14 = smov [#allocation12]  }
  0xb6   : > { %7057 = vmatpush3.bf16.msra.mxu1 %v7873_v10  ;;  %v6399_v51 = vcombine.low %v1061_v49, %v1071_v50  ;;  %v458_v4 = vadd.bf16 %v8640_v53, %v415_v59  ;;  %v459_v5 = vadd.bf16 %v8640_v53, %v416_v60  ;;  %v460_v6 = vadd.bf16 %v8640_v53, %v417_v62  ;;  %v381_v49 = vld [vmem:[%s8611_s21 + $0x34] sm:$0xf]  ;;  %s8204_s13 = sshll.u32 %s8332_s14, 4  ;;  %s8205_s13 = int_to_ptr.vmem [resolvable:$false] %s8204_s13 }
  0xb7   : > { %7249 = vmatpush3.bf16.msra.mxu0 %v7874_v11  ;;  %7058 = vmatprep.subr.bf16.mxu1 %v7875_v12  ;;  %v421_v7 = vmul.bf16 %v8638_v52, %v374_v58  ;;  %v461_v9 = vadd.bf16 %v8640_v53, %v418_v0  ;;  %v462_v10 = vadd.bf16 %v8640_v53, %v419_v1  ;;  %p8202_p8 = pnand %p8201_p2, %p8547_p5  ;;  %s8206_s30 = scalar_lea.vmem %s8205_s13, 4096 }
  0xb8   : > { %7250 = vmatprep.subr.bf16.mxu0 %v7876_v17  ;;  %7064 = vmatprep.mubr.bf16.mxu1 %v6399_v51  ;;  %v463_v11 = vadd.bf16 %v8640_v53, %v420_v2  ;;  %v6335_v14 = vcombine.low %v458_v4, %v459_v5  ;;  %v423_v16 = vmul.bf16 %v8638_v52, %v376_v3  ;;  %v382_v2 = vld [vmem:[%s8611_s21 + $0x38] sm:$0xf]  ;;  %v383_v3 = vld [vmem:[%s8611_s21 + $0x3c] sm:$0xf]  ;;  %p8207_p3 = scmp.lt.s32.totalorder %s10247_s9, %s8205_s13  ;;  %p8208_p7 = scmp.lt.s32.totalorder %s8206_s30, %s8200_s19 }
  0xb9   : > { %v464_v15 = vadd.bf16 %v8640_v53, %v421_v7  ;;  %v6336_v18 = vcombine.low %v460_v6, %v461_v9  ;;  %v424_v21 = vmul.bf16 %v8638_v52, %v377_v8  ;;  %v425_v26 = vmul.bf16 %v8638_v52, %v378_v13  ;;  %v384_v8 = vld [vmem:[%s8611_s21 + $0x40] sm:$0xf]  ;;  %p8203_p10 = pneg %p8202_p8 }
  0xba   : > { %7059 = vmatpush3.bf16.msra.mxu1 %v7875_v12  ;;  %v422_v12 = vmul.bf16 %v8638_v52, %v375_v63  ;;  %v6337_v19 = vcombine.low %v462_v10, %v463_v11  ;;  %v578_v23 = vshrl.u32 %v6335_v14, 16  ;;  %v581_v24 = vshll.u32 %v6335_v14, 16  ;;  %p8209_p9 = por %p8208_p7, %p8207_p3 }
  0xbb   : > { %7251 = vmatpush3.bf16.msra.mxu0 %v7876_v17  ;;  %7060 = vmatprep.subr.bf16.mxu1 %v7877_v29  ;;  %v379_v17 = vld [vmem:[%s8611_s21 + $0x2c] sm:$0xf]  ;;  %v466_v25 = vadd.bf16 %v8640_v53, %v423_v16  ;;  %v585_v27 = vshrl.u32 %v6336_v18, 16  ;;  %v588_v28 = vshll.u32 %v6336_v18, 16  ;;  %v468_v39 = vadd.bf16 %v8640_v53, %v425_v26 }
  0xbc   : > { %7252 = vmatprep.subr.bf16.mxu0 %v7878_v33  ;;  %v465_v20 = vadd.bf16 %v8640_v53, %v422_v12  ;;  %v595_v30 = vshll.u32 %v6337_v19, 16  ;;  %v580_v31 = vrot.slane %v578_v23, 7  ;;  %v426_v34 = vmul.bf16 %v8638_v52, %v379_v17  ;;  %v385_v17 = vld [vmem:[%s8611_s21 + $0x44] sm:$0xf]  ;;  %p8210_p0 = pnand %p8209_p9, %p8203_p10 }
  0xbd   : > { %v587_v36 = vrot.slane %v585_v27, 7  ;;  %v427_v40 = vmul.bf16 %v8638_v52, %v380_v22  ;;  %v428_v11 = vmul.bf16 %v8638_v52, %v381_v49  ;;  %v429_v16 = vmul.bf16 %v8638_v52, %v382_v2 }
  0xbe   : > { %7061 = vmatpush3.bf16.msra.mxu1 %v7877_v29  ;;  %v592_v29 = vshrl.u32 %v6337_v19, 16  ;;  %v6338_v32 = vcombine.low %v464_v15, %v465_v20  ;;  %v740_v42 = vsel %vm8682_vm5, %v580_v31, 0  ;;  %v469_v10 = vadd.bf16 %v8640_v53, %v426_v34 }
  0xbf   : > { %7253 = vmatpush3.bf16.msra.mxu0 %v7878_v33  ;;  %7062 = vmatprep.subr.bf16.mxu1 %v7879_v37  ;;  %v467_v33 = vadd.bf16 %v8640_v53, %v424_v21  ;;  %v6353_v45 = vcombine.low %v740_v42, %v740_v42  ;;  %v590_v46 = vor.u32 %v588_v28, %v587_v36  ;;  %v741_v47 = vsel %vm8682_vm5, %v587_v36, 0 }
  0xc0   : > { %7254 = vmatprep.subr.bf16.mxu0 %v7880_v41  ;;  %v599_v43 = vshrl.u32 %v6338_v32, 16  ;;  %v602_v44 = vshll.u32 %v6338_v32, 16  ;;  %v6356_v51 = vcombine.low %v741_v47, %v741_v47  ;;  %v470_v12 = vadd.bf16 %v8640_v53, %v427_v40 }
  0xc1   : > { %935 = vst [vmem:[#allocation2 + $0x14] sm:$0x1] %v6353_v45  ;;  %v725_v59 = vsel %vm8682_vm5, 0, %v590_v46  ;;  %v6339_v7 = vcombine.low %v466_v25, %v467_v33  ;;  %v8713_v20 = vcombine.low %v468_v39, %v469_v10  ;;  %v471_v21 = vadd.bf16 %v8640_v53, %v428_v11 }
  0xc2   : > { %7063 = vmatpush3.bf16.msra.mxu1 %v7879_v37  ;;  %v594_v37 = vrot.slane %v592_v29, 7  ;;  %v601_v56 = vrot.slane %v599_v43, 7  ;;  %v6354_v62 = vcombine.low %v725_v59, %v725_v59  ;;  %v6355_v63 = vcombine.high %v725_v59, %v725_v59  ;;  %938 = vst [vmem:[#allocation2 + $0x20] sm:$0x1] %v6356_v51 }
  0xc3   : > { %7255 = vmatpush3.bf16.msra.mxu0 %v7880_v41  ;;  %7096 = vmatprep.subr.bf16.mxu1 %v8642_v54  ;;  %v583_v41 = vor.u32 %v581_v24, %v580_v31  ;;  %v606_v14 = vshrl.u32 %v6339_v7, 16  ;;  %v609_v15 = vshll.u32 %v6339_v7, 16  ;;  %v430_v23 = vmul.bf16 %v8638_v52, %v383_v3 }
  0xc4   : > { %7288 = vmatprep.subr.bf16.mxu0 %v8650_v61  ;;  %v597_v48 = vor.u32 %v595_v30, %v594_v37  ;;  %v742_v55 = vsel %vm8682_vm5, %v594_v37, 0  ;;  %v604_v5 = vor.u32 %v602_v44, %v601_v56  ;;  %v743_v6 = vsel %vm8682_vm5, %v601_v56, 0  ;;  %936 = vst [vmem:[#allocation2 + $0x18] sm:$0xf] %v6354_v62  ;;  %937 = vst [vmem:[#allocation2 + $0x1c] sm:$0xf] %v6355_v63 }
  0xc5   : > { %v724_v50 = vsel %vm8682_vm5, 0, %v583_v41  ;;  %v6359_v4 = vcombine.low %v742_v55, %v742_v55  ;;  %v6362_v9 = vcombine.low %v743_v6, %v743_v6  ;;  %v8716_v22 = vrot.slane %v606_v14, 7 }
  0xc6   : > { %v6351_v57 = vcombine.low %v724_v50, %v724_v50  ;;  %v6352_v58 = vcombine.high %v724_v50, %v724_v50  ;;  %v726_v60 = vsel %vm8682_vm5, 0, %v597_v48  ;;  %v727_v13 = vsel %vm8682_vm5, 0, %v604_v5 }
  0xc7   : > { %v6357_v0 = vcombine.low %v726_v60, %v726_v60  ;;  %v6358_v1 = vcombine.high %v726_v60, %v726_v60  ;;  %941 = vst [vmem:[#allocation2 + $0x2c] sm:$0x1] %v6359_v4  ;;  %v6360_v18 = vcombine.low %v727_v13, %v727_v13  ;;  %v6361_v19 = vcombine.high %v727_v13, %v727_v13 }
  0xc8   : > { %933 = vst [vmem:[#allocation2 + $0xc] sm:$0xf] %v6351_v57  ;;  %934 = vst [vmem:[#allocation2 + $0x10] sm:$0xf] %v6352_v58  ;;  %v431_v24 = vmul.bf16 %v8638_v52, %v384_v8  ;;  %v1030_v25 = vld [vmem:[#allocation2 + $0x14] sm:$0x1]  ;;  %v8725_v29 = vadd.bf16 %v8640_v53, %v429_v16  ;;  %v432_v30 = vmul.bf16 %v8638_v52, %v385_v17 }
  0xc9   : > { %939 = vst [vmem:[#allocation2 + $0x24] sm:$0xf] %v6357_v0  ;;  %940 = vst [vmem:[#allocation2 + $0x28] sm:$0xf] %v6358_v1  ;;  %v8720_v26 = vld [vmem:[#allocation2 + $0x14] sm:$0x1]  ;;  %v8730_v34 = vcombine.low %v470_v12, %v471_v21  ;;  %v8733_v40 = vor.u32 %v609_v15, %v8716_v22  ;;  %v8736_v41 = vadd.bf16 %v8640_v53, %v430_v23 }
  0xca   : > { %944 = vst [vmem:[#allocation2 + $0x38] sm:$0x1] %v6362_v9  ;;  %942 = vst [vmem:[#allocation2 + $0x30] sm:$0xf] %v6360_v18  ;;  %v613_v27 = vshrl.u32 %v8713_v20, 16  ;;  %v616_v28 = vshll.u32 %v8713_v20, 16  ;;  %v8739_v42 = vadd.bf16 %v8640_v53, %v431_v24  ;;  %v8742_v43 = vadd.bf16 %v8640_v53, %v432_v30 }
  0xcb   : > { %943 = vst [vmem:[#allocation2 + $0x34] sm:$0xf] %v6361_v19  ;;  %v1092_v31 = vshll.u32 %v1030_v25, 16  ;;  %v2964_v32 = vshll.u32 %v8720_v26, 16  ;;  %v3718_v33 = vrot.slane %v8720_v26, 5 }
  0xcc   : > { %v2899_v56 = vld [vmem:[#allocation2 + $0x18] sm:$0xf]  ;;  %v8747_v62 = vld [vmem:[#allocation2 + $0x1c] sm:$0xf]  ;;  %v8750_v9 = vld [vmem:[#allocation2 + $0x20] sm:$0x1] }
  0xcd   : > { %v1094_v49 = vrot.slane %v1092_v31, 5  ;;  %v2966_v5 = vrot.slane %v2964_v32, 5  ;;  %v2969_v6 = vshrl.u32 %v2899_v56, 16  ;;  %v2972_v10 = vshll.u32 %v2899_v56, 16  ;;  %v985_v30 = vld [vmem:[#allocation2 + $0x18] sm:$0xf] }
  0xce   : > { %v2978_v11 = vshll.u32 %v8747_v62, 16  ;;  %v2982_v15 = vshrl.u32 %v8747_v62, 16  ;;  %v2988_v25 = vshll.u32 %v8750_v9, 16  ;;  %v1097_v56 = vshrl.u32 %v985_v30, 16 }
  0xcf   : > { %v983_v36 = vld [vmem:[#allocation2 + $0xc] sm:$0xf]  ;;  %v984_v37 = vld [vmem:[#allocation2 + $0x10] sm:$0xf]  ;;  %v2971_v14 = vrot.slane %v2969_v6, 4  ;;  %v2974_v18 = vrot.slane %v2972_v10, 5 }
  0xd0   : > { %v2896_v39 = vld [vmem:[#allocation2 + $0xc] sm:$0xf]  ;;  %v1073_v44 = vshrl.u32 %v983_v36, 16  ;;  %v1076_v45 = vshll.u32 %v983_v36, 16  ;;  %v1082_v46 = vshll.u32 %v984_v37, 16  ;;  %v1086_v47 = vshrl.u32 %v984_v37, 16 }
  0xd1   : > { %v8744_v48 = vld [vmem:[#allocation2 + $0x10] sm:$0xf]  ;;  %v2945_v50 = vshrl.u32 %v2896_v39, 16  ;;  %v2948_v51 = vshll.u32 %v2896_v39, 16  ;;  %v2980_v19 = vrot.slane %v2978_v11, 5  ;;  %v2984_v24 = vrot.slane %v2982_v15, 4 }
  0xd2   : > { %v2954_v55 = vshll.u32 %v8744_v48, 16  ;;  %v1075_v57 = vrot.slane %v1073_v44, 4  ;;  %v1078_v58 = vrot.slane %v1076_v45, 5  ;;  %v1084_v59 = vrot.slane %v1082_v46, 5  ;;  %v986_v39 = vld [vmem:[#allocation2 + $0x1c] sm:$0xf] }
  0xd3   : > { %v1088_v60 = vrot.slane %v1086_v47, 4  ;;  %v2947_v63 = vrot.slane %v2945_v50, 4  ;;  %v2950_v0 = vrot.slane %v2948_v51, 5  ;;  %v2958_v2 = vshrl.u32 %v8744_v48, 16  ;;  %v7884_v44 = vld [vmem:[#allocation6 + $0x8] sm:$0xff]   ;;  %v7887_v6 = vld [vmem:[#allocation6 + $0x10] sm:$0xff]  }
  0xd4   : > { %v2956_v1 = vrot.slane %v2954_v55, 5  ;;  %v1079_v3 = vor.u32 %v1078_v58, %v1075_v57  ;;  %v2975_v37 = vor.u32 %v2974_v18, %v2971_v14  ;;  %v2985_v45 = vor.u32 %v2984_v24, %v2980_v19  ;;  %v1031_v51 = vld [vmem:[#allocation2 + $0x20] sm:$0x1]  ;;  %v987_v58 = vld [vmem:[#allocation2 + $0x24] sm:$0xf] }
  0xd5   : > { %v1089_v4 = vor.u32 %v1088_v60, %v1084_v59  ;;  %v2951_v7 = vor.u32 %v2950_v0, %v2947_v63  ;;  %v2960_v8 = vrot.slane %v2958_v2, 4  ;;  %v2990_v46 = vrot.slane %v2988_v25, 5  ;;  %v1032_v10 = vld [vmem:[#allocation2 + $0x2c] sm:$0x1]  ;;  %v8774_v24 = vld [vmem:[#allocation2 + $0x28] sm:$0xf] }
  0xd6   : > { %v1080_v12 = vrot.slane %v1079_v3, 4  ;;  %v3722_v47 = vrot.slane %v8747_v62, 5  ;;  %v3725_v50 = vrot.slane %v8750_v9, 5  ;;  %v2976_v55 = vrot.slane %v2975_v37, 4  ;;  %v7885_v37 = vld [vmem:[#allocation6 + $0x150] sm:$0xff]  }
  0xd7   : > { %v1090_v13 = vrot.slane %v1089_v4, 4  ;;  %v2952_v16 = vrot.slane %v2951_v7, 4  ;;  %v2961_v17 = vor.u32 %v2960_v8, %v2956_v1  ;;  %v1100_v57 = vshll.u32 %v985_v30, 16 }
  0xd8   : > { %v1085_v21 = vsel %vm8627_vm2, %v1080_v12, %v1084_v59  ;;  %v2986_v60 = vrot.slane %v2985_v45, 4  ;;  %v8768_v63 = vrot.slane %v3722_v47, 4  ;;  %v1106_v0 = vshll.u32 %v986_v39, 16 }
  0xd9   : > { %v1095_v23 = vsel %vm8627_vm2, %v1090_v13, %v1094_v49  ;;  %v2957_v32 = vsel %vm8627_vm2, %v2952_v16, %v2956_v1  ;;  %v2962_v36 = vrot.slane %v2961_v17, 4  ;;  %v2981_v1 = vsel %vm8627_vm2, %v2976_v55, %v2980_v19  ;;  %v7883_v13 = vld [vmem:[#allocation6 + $0x148] sm:$0xff]  }
  0xda   : > { %v6400_v31 = vcombine.low %v1085_v21, %v1095_v23  ;;  %v1099_v2 = vrot.slane %v1097_v56, 4  ;;  %v1102_v3 = vrot.slane %v1100_v57, 5  ;;  %v1110_v4 = vshrl.u32 %v986_v39, 16  ;;  %v2902_v17 = vld [vmem:[#allocation2 + $0x24] sm:$0xf]  ;;  %v7890_v39 = vld [vmem:[#allocation6 + $0x18] sm:$0xff]  }
  0xdb   : > { %v2967_v49 = vsel %vm8627_vm2, %v2962_v36, %v2966_v5  ;;  %v988_v5 = vld [vmem:[#allocation2 + $0x28] sm:$0xf]  ;;  %v2991_v7 = vsel %vm8627_vm2, %v2986_v60, %v2990_v46  ;;  %v1116_v8 = vshll.u32 %v1031_v51, 16  ;;  %v1121_v11 = vshrl.u32 %v987_v58, 16  ;;  %v8776_v36 = vld [vmem:[#allocation2 + $0x2c] sm:$0x1] }
  0xdc   : > { %7065 = vmatmul.mubr.bf16.vlgmr.msra.gmra.mrb[0].mxu1 %v6400_v31  ;;  %v6511_v59 = vcombine.low %v2957_v32, %v2967_v49  ;;  %v6512_v12 = vcombine.low %v2981_v1, %v2991_v7  ;;  %v1103_v14 = vor.u32 %v1102_v3, %v1099_v2  ;;  %v1112_v15 = vrot.slane %v1110_v4, 4  ;;  %v8782_v2 = vld [vmem:[#allocation2 + $0x34] sm:$0xf]  ;;  %v8788_v7 = vld [vmem:[#allocation2 + $0x38] sm:$0x1] }
  0xdd   : > { %7097 = vmatpush3.bf16.msra.mxu1 %v8642_v54  ;;  %v1108_v54 = vrot.slane %v1106_v0, 5  ;;  %v1124_v16 = vshll.u32 %v987_v58, 16  ;;  %v1118_v18 = vrot.slane %v1116_v8, 5  ;;  %v1123_v19 = vrot.slane %v1121_v11, 4  ;;  %v2905_v58 = vld [vmem:[#allocation2 + $0x30] sm:$0xf] }
  0xde   : > { %7098 = vmatprep.subr.bf16.mxu1 %v7884_v44  ;;  %7256 = vmatprep.mubr.bf16.mxu0 %v6511_v59  ;;  %v1130_v21 = vshll.u32 %v988_v5, 16  ;;  %v1134_v23 = vshrl.u32 %v988_v5, 16  ;;  %v1104_v25 = vrot.slane %v1103_v14, 4  ;;  %v1140_v32 = vshll.u32 %v1032_v10, 16  ;;  %v989_v14 = vld [vmem:[#allocation2 + $0x30] sm:$0xf] }
  0xdf   : > { %7257 = vmatmul.mubr.bf16.vlgmr.msra.gmra.mrb[0].mxu0 %v6512_v12  ;;  %v1113_v30 = vor.u32 %v1112_v15, %v1108_v54  ;;  %v1126_v31 = vrot.slane %v1124_v16, 5  ;;  %v2993_v51 = vshrl.u32 %v2902_v17, 16  ;;  %v2996_v49 = vshll.u32 %v2902_v17, 16 }
  0xe0   : > { %7289 = vmatpush3.bf16.msra.mxu0 %v8650_v61  ;;  %v1132_v45 = vrot.slane %v1130_v21, 5  ;;  %v1136_v46 = vrot.slane %v1134_v23, 4  ;;  %v1142_v57 = vrot.slane %v1140_v32, 5  ;;  %v3002_v1 = vshll.u32 %v8774_v24, 16 }
  0xe1   : > { %7099 = vmatpush3.bf16.msra.mxu1 %v7884_v44  ;;  %7290 = vmatprep.subr.bf16.mxu0 %v7883_v13  ;;  %v1109_v44 = vsel %vm8627_vm2, %v1104_v25, %v1108_v54  ;;  %v1114_v55 = vrot.slane %v1113_v30, 4  ;;  %v1127_v56 = vor.u32 %v1126_v31, %v1123_v19  ;;  %v2995_v60 = vrot.slane %v2993_v51, 4  ;;  %v7893_v54 = vld [vmem:[#allocation6 + $0x20] sm:$0xff]   ;;  %v7895_v25 = vld [vmem:[#allocation6 + $0x28] sm:$0xff]  }
  0xe2   : > { %7100 = vmatprep.subr.bf16.mxu1 %v7887_v6  ;;  %v1137_v59 = vor.u32 %v1136_v46, %v1132_v45  ;;  %v2998_v0 = vrot.slane %v2996_v49, 5  ;;  %v3006_v4 = vshrl.u32 %v8774_v24, 16  ;;  %v3012_v5 = vshll.u32 %v8776_v36, 16  ;;  %v990_v46 = vld [vmem:[#allocation2 + $0x34] sm:$0xf] }
  0xe3   : > { %v1119_v61 = vsel %vm8627_vm2, %v1114_v55, %v1118_v18  ;;  %v1128_v3 = vrot.slane %v1127_v56, 4  ;;  %v3004_v12 = vrot.slane %v3002_v1, 5  ;;  %v3017_v17 = vshrl.u32 %v2905_v58, 16  ;;  %v7886_v18 = vld [vmem:[#allocation6 + $0x158] sm:$0xff]   ;;  %v1033_v56 = vld [vmem:[#allocation2 + $0x38] sm:$0x1] }
  0xe4   : > { %7291 = vmatpush3.bf16.msra.mxu0 %v7883_v13  ;;  %v6401_v8 = vcombine.low %v1109_v44, %v1119_v61  ;;  %v1138_v10 = vrot.slane %v1137_v59, 4  ;;  %v2999_v11 = vor.u32 %v2998_v0, %v2995_v60  ;;  %v3008_v15 = vrot.slane %v3006_v4, 4  ;;  %v7897_v4 = vld [vmem:[#allocation6 + $0x30] sm:$0xff]  }
  0xe5   : > { %7101 = vmatpush3.bf16.msra.mxu1 %v7887_v6  ;;  %v1133_v6 = vsel %vm8627_vm2, %v1128_v3, %v1132_v45  ;;  %v3014_v16 = vrot.slane %v3012_v5, 5  ;;  %7292 = vmatprep.subr.bf16.mxu0 %v7885_v37  ;;  %v3020_v23 = vshll.u32 %v2905_v58, 16  ;;  %v3026_v13 = vshll.u32 %v8782_v2, 16 }
  0xe6   : > { %7102 = vmatprep.subr.bf16.mxu1 %v7890_v39  ;;  %7068 = vmatprep.mubr.bf16.mxu1 %v6401_v8  ;;  %v1143_v19 = vsel %vm8627_vm2, %v1138_v10, %v1142_v57  ;;  %v3000_v21 = vrot.slane %v2999_v11, 4  ;;  %v3009_v31 = vor.u32 %v3008_v15, %v3004_v12  ;;  %v3019_v32 = vrot.slane %v3017_v17, 4  ;;  %v7888_v57 = vld [vmem:[#allocation6 + $0x160] sm:$0xff]  }
  0xe7   : > { %v6402_v30 = vcombine.low %v1133_v6, %v1143_v19  ;;  %v3030_v45 = vshrl.u32 %v8782_v2, 16  ;;  %v3022_v49 = vrot.slane %v3020_v23, 5  ;;  %v3028_v44 = vrot.slane %v3026_v13, 5 }
  0xe8   : > { %v3005_v51 = vsel %vm8627_vm2, %v3000_v21, %v3004_v12  ;;  %v3036_v55 = vshll.u32 %v8788_v7, 16  ;;  %7293 = vmatpush3.bf16.msra.mxu0 %v7885_v37  ;;  %v1145_v59 = vshrl.u32 %v989_v14, 16  ;;  %v1148_v60 = vshll.u32 %v989_v14, 16  ;;  %v7889_v21 = vld [vmem:[#allocation6 + $0x168] sm:$0xff]  }
  0xe9   : > { %7103 = vmatpush3.bf16.msra.mxu1 %v7890_v39  ;;  %v3010_v39 = vrot.slane %v3009_v31, 4  ;;  %v3032_v58 = vrot.slane %v3030_v45, 4  ;;  %7294 = vmatprep.subr.bf16.mxu0 %v7886_v18  ;;  %v3023_v0 = vor.u32 %v3022_v49, %v3019_v32  ;;  %v1154_v61 = vshll.u32 %v990_v46, 16 }
  0xea   : > { %7104 = vmatprep.subr.bf16.mxu1 %v7893_v54  ;;  %7069 = vmatmul.mubr.bf16.gmra.mrb[4].mxu1 %v6402_v30  ;;  %v3038_v1 = vrot.slane %v3036_v55, 5  ;;  %v1158_v3 = vshrl.u32 %v990_v46, 16  ;;  %v1147_v8 = vrot.slane %v1145_v59, 4  ;;  %v1150_v10 = vrot.slane %v1148_v60, 5  ;;  %v7899_v30 = vld [vmem:[#allocation6 + $0x38] sm:$0xff]   ;;  %v8811_v46 = vld [vmem:[#allocation6 + $0x170] sm:$0xff]  }
  0xeb   : > { %v3015_v5 = vsel %vm8627_vm2, %v3010_v39, %v3014_v16  ;;  %v3033_v37 = vor.u32 %v3032_v58, %v3028_v44  ;;  %v3024_v12 = vrot.slane %v3023_v0, 4  ;;  %v1156_v6 = vrot.slane %v1154_v61, 5  ;;  %v8830_v60 = vld [vmem:[%s8611_s21 + $0x48] sm:$0xf]  ;;  %v7903_v61 = vld [vmem:[#allocation6 + $0x80] sm:$0xff]  }
  0xec   : > { %v6513_v11 = vcombine.low %v3005_v51, %v3015_v5  ;;  %7295 = vmatpush3.bf16.msra.mxu0 %v7886_v18  ;;  %v1160_v14 = vrot.slane %v1158_v3, 4  ;;  %v1151_v17 = vor.u32 %v1150_v10, %v1147_v8  ;;  %v1164_v19 = vshll.u32 %v1033_v56, 16  ;;  %v7892_v10 = vld [vmem:[#allocation6 + $0x178] sm:$0xff]  }
  0xed   : > { %7105 = vmatpush3.bf16.msra.mxu1 %v7893_v54  ;;  %v3034_v15 = vrot.slane %v3033_v37, 4  ;;  %v728_v54 = vsel %vm8682_vm5, 0, %v8733_v40  ;;  %7296 = vmatprep.subr.bf16.mxu0 %v7888_v57  ;;  %v3029_v16 = vsel %vm8627_vm2, %v3024_v12, %v3028_v44  ;;  %v744_v18 = vsel %vm8682_vm5, %v8716_v22, 0 }
  0xee   : > { %7106 = vmatprep.subr.bf16.mxu1 %v7895_v25  ;;  %7260 = vmatprep.mubr.bf16.mxu0 %v6513_v11  ;;  %v1161_v23 = vor.u32 %v1160_v14, %v1156_v6  ;;  %v6363_v13 = vcombine.low %v728_v54, %v728_v54  ;;  %v1152_v32 = vrot.slane %v1151_v17, 4  ;;  %v1166_v45 = vrot.slane %v1164_v19, 5 }
  0xef   : > { %v3039_v31 = vsel %vm8627_vm2, %v3034_v15, %v3038_v1  ;;  %v6364_v40 = vcombine.high %v728_v54, %v728_v54  ;;  %v6365_v44 = vcombine.low %v744_v18, %v744_v18  ;;  %v615_v22 = vrot.slane %v613_v27, 7  ;;  %v8832_v1 = vld [vmem:[#allocation2 + $0xc] sm:$0xe] }
  0xf0   : > { %v6514_v51 = vcombine.low %v3029_v16, %v3039_v31  ;;  %v1162_v49 = vrot.slane %v1161_v23, 4  ;;  %945 = vst [vmem:[#allocation2 + $0x3c] sm:$0xf] %v6363_v13  ;;  %7297 = vmatpush3.bf16.msra.mxu0 %v7888_v57  ;;  %v620_v55 = vshrl.u32 %v8730_v34, 16  ;;  %v623_v56 = vshll.u32 %v8730_v34, 16 }
  0xf1   : > { %7107 = vmatpush3.bf16.msra.mxu1 %v7895_v25  ;;  %v1157_v25 = vsel %vm8627_vm2, %v1152_v32, %v1156_v6  ;;  %946 = vst [vmem:[#allocation2 + $0x40] sm:$0xf] %v6364_v40  ;;  %7298 = vmatprep.subr.bf16.mxu0 %v7889_v21  ;;  %v6342_v39 = vcombine.low %v8725_v29, %v8736_v41  ;;  %947 = vst [vmem:[#allocation2 + $0x44] sm:$0x1] %v6365_v44  ;;  %v745_v57 = vsel %vm8682_vm5, %v615_v22, 0 }
  0xf2   : > { %7108 = vmatprep.subr.bf16.mxu1 %v7897_v4  ;;  %7261 = vmatmul.mubr.bf16.gmra.mrb[4].mxu0 %v6514_v51  ;;  %v1167_v58 = vsel %vm8627_vm2, %v1162_v49, %v1166_v45  ;;  %v618_v27 = vor.u32 %v616_v28, %v615_v22  ;;  %v6343_v59 = vcombine.low %v8739_v42, %v8742_v43  ;;  %v622_v29 = vrot.slane %v620_v55, 7  ;;  %v8874_v49 = vld [vmem:[%s8611_s21 + $0x4c] sm:$0xf] }
  0xf3   : > { %v6403_v34 = vcombine.low %v1157_v25, %v1167_v58  ;;  %v6368_v0 = vcombine.low %v745_v57, %v745_v57  ;;  %v627_v41 = vshrl.u32 %v6342_v39, 16  ;;  %v630_v28 = vshll.u32 %v6342_v39, 16 }
  0xf4   : > { %v729_v20 = vsel %vm8682_vm5, 0, %v618_v27  ;;  %7299 = vmatpush3.bf16.msra.mxu0 %v7889_v21  ;;  %v634_v3 = vshrl.u32 %v6343_v59, 16  ;;  %v637_v5 = vshll.u32 %v6343_v59, 16  ;;  %v625_v37 = vor.u32 %v623_v56, %v622_v29  ;;  %v8853_v21 = vld [vmem:[#allocation6 + $0x180] sm:$0xff]  }
  0xf5   : > { %7109 = vmatpush3.bf16.msra.mxu1 %v7897_v4  ;;  %7072 = vmatprep.mubr.bf16.mxu1 %v6403_v34  ;;  %v6366_v43 = vcombine.low %v729_v20, %v729_v20  ;;  %v6367_v4 = vcombine.high %v729_v20, %v729_v20  ;;  %950 = vst [vmem:[#allocation2 + $0x50] sm:$0x1] %v6368_v0  ;;  %v746_v8 = vsel %vm8682_vm5, %v622_v29, 0  ;;  %v8845_v12 = vrot.slane %v627_v41, 7 }
  0xf6   : > { %7110 = vmatprep.subr.bf16.mxu1 %v7899_v30  ;;  %7300 = vmatprep.subr.bf16.mxu0 %v8811_v46  ;;  %v6371_v11 = vcombine.low %v746_v8, %v746_v8  ;;  %v8847_v6 = vrot.slane %v634_v3, 7  ;;  %v6535_v14 = vrot.slane %v8832_v1, 9  ;;  %v730_v19 = vsel %vm8682_vm5, 0, %v625_v37 }
  0xf7   : > { %v991_v15 = vld [vmem:[#allocation2 + $0x3c] sm:$0xf]  ;;  %948 = vst [vmem:[#allocation2 + $0x48] sm:$0xf] %v6366_v43  ;;  %949 = vst [vmem:[#allocation2 + $0x4c] sm:$0xf] %v6367_v4  ;;  %v8860_v16 = vsel %vm8838_vm8, %v8768_v63, %v3725_v50  ;;  %v433_v23 = vmul.bf16 %v8638_v52, %v8830_v60  ;;  %v6369_v32 = vcombine.low %v730_v19, %v730_v19 }
  0xf8   : > { %v2908_v17 = vld [vmem:[#allocation2 + $0x3c] sm:$0xf]  ;;  %v3715_v54 = vrot.slane %v8744_v48, 5  ;;  %v992_v18 = vld [vmem:[#allocation2 + $0x40] sm:$0xf]  ;;  %v1169_v13 = vshrl.u32 %v991_v15, 16  ;;  %v6370_v45 = vcombine.high %v730_v19, %v730_v19  ;;  %7301 = vmatpush3.bf16.msra.mxu0 %v8811_v46  ;;  %v8868_v50 = vor.u32 %v630_v28, %v8845_v12 }
  0xf9   : > { %7111 = vmatpush3.bf16.msra.mxu1 %v7899_v30  ;;  %v1172_v30 = vshll.u32 %v991_v15, 16  ;;  %v8864_v31 = vld [vmem:[#allocation2 + $0x40] sm:$0xf]  ;;  %953 = vst [vmem:[#allocation2 + $0x5c] sm:$0x1] %v6371_v11  ;;  %v1178_v40 = vshll.u32 %v992_v18, 16  ;;  %7302 = vmatprep.subr.bf16.mxu0 %v7892_v10  ;;  %v8871_v63 = vor.u32 %v637_v5, %v8847_v6  ;;  %v434_v4 = vmul.bf16 %v8638_v52, %v8874_v49 }
  0xfa   : > { %7144 = vmatprep.subr.bf16.mxu1 %v7903_v61  ;;  %v1034_v9 = vld [vmem:[#allocation2 + $0x44] sm:$0x1]  ;;  %v1182_v51 = vshrl.u32 %v992_v18, 16  ;;  %v1171_v44 = vrot.slane %v1169_v13, 4  ;;  %v3041_v56 = vshrl.u32 %v2908_v17, 16  ;;  %v3044_v58 = vshll.u32 %v2908_v17, 16 }
  0xfb   : > { %v1174_v22 = vrot.slane %v1172_v30, 5  ;;  %v1188_v25 = vshll.u32 %v1034_v9, 16  ;;  %v8876_v55 = vld [vmem:[#allocation2 + $0x44] sm:$0x1]  ;;  %951 = vst [vmem:[#allocation2 + $0x54] sm:$0xf] %v6369_v32  ;;  %v8888_v43 = vsel %vm8838_vm8, %v6535_v14, %v3715_v54 }
  0xfc   : > { %952 = vst [vmem:[#allocation2 + $0x58] sm:$0xf] %v6370_v45  ;;  %v1180_v46 = vrot.slane %v1178_v40, 5  ;;  %v1184_v39 = vrot.slane %v1182_v51, 4  ;;  %v3050_v27 = vshll.u32 %v8864_v31, 16  ;;  %v3043_v34 = vrot.slane %v3041_v56, 4  ;;  %7303 = vmatpush3.bf16.msra.mxu0 %v7892_v10 }
  0xfd   : > { %v1175_v57 = vor.u32 %v1174_v22, %v1171_v44  ;;  %v1190_v59 = vrot.slane %v1188_v25, 5  ;;  %v3054_v0 = vshrl.u32 %v8864_v31, 16  ;;  %v3046_v41 = vrot.slane %v3044_v58, 5  ;;  %7336 = vmatprep.subr.bf16.mxu0 %v8853_v21  ;;  %v8894_v19 = vld [vmem:[#allocation2 + $0x50] sm:$0x1] }
  0xfe   : > { %v1185_v29 = vor.u32 %v1184_v39, %v1180_v46  ;;  %v3052_v1 = vrot.slane %v3050_v27, 5  ;;  %v3060_v61 = vshll.u32 %v8876_v55, 16  ;;  %v2911_v3 = vld [vmem:[#allocation2 + $0x48] sm:$0xf]  ;;  %v8882_v5 = vld [vmem:[#allocation2 + $0x4c] sm:$0xf] }
  0xff   : > { %v1176_v20 = vrot.slane %v1175_v57, 4  ;;  %v3056_v28 = vrot.slane %v3054_v0, 4  ;;  %v3047_v8 = vor.u32 %v3046_v41, %v3043_v34  ;;  %v3065_v11 = vshrl.u32 %v2911_v3, 16  ;;  %v993_v30 = vld [vmem:[#allocation2 + $0x48] sm:$0xf] }
 0x100   : > { %v1186_v37 = vrot.slane %v1185_v29, 4  ;;  %v3062_v10 = vrot.slane %v3060_v61, 5  ;;  %v3068_v18 = vshll.u32 %v2911_v3, 16  ;;  %v3074_v13 = vshll.u32 %v8882_v5, 16  ;;  %v994_v40 = vld [vmem:[#allocation2 + $0x4c] sm:$0xf] }
 0x101   : > { %v1181_v15 = vsel %vm8627_vm2, %v1176_v20, %v1180_v46  ;;  %v3057_v17 = vor.u32 %v3056_v28, %v3052_v1  ;;  %v3048_v32 = vrot.slane %v3047_v8, 4  ;;  %v3067_v45 = vrot.slane %v3065_v11, 4 }
 0x102   : > { %v1191_v14 = vsel %vm8627_vm2, %v1186_v37, %v1190_v59  ;;  %v3078_v9 = vshrl.u32 %v8882_v5, 16  ;;  %v3070_v22 = vrot.slane %v3068_v18, 5  ;;  %v3076_v25 = vrot.slane %v3074_v13, 5  ;;  %v1035_v59 = vld [vmem:[#allocation2 + $0x50] sm:$0x1] }
 0x103   : > { %v6404_v51 = vcombine.low %v1181_v15, %v1191_v14  ;;  %v3058_v44 = vrot.slane %v3057_v17, 4  ;;  %v3053_v56 = vsel %vm8627_vm2, %v3048_v32, %v3052_v1  ;;  %v3084_v39 = vshll.u32 %v8894_v19, 16  ;;  %v995_v29 = vld [vmem:[#allocation2 + $0x54] sm:$0xf]  ;;  %v996_v3 = vld [vmem:[#allocation2 + $0x58] sm:$0xf] }
 0x104   : > { %v3080_v46 = vrot.slane %v3078_v9, 4  ;;  %v1193_v58 = vshrl.u32 %v993_v30, 16  ;;  %v3071_v57 = vor.u32 %v3070_v22, %v3067_v45  ;;  %v1196_v34 = vshll.u32 %v993_v30, 16  ;;  %v1036_v15 = vld [vmem:[#allocation2 + $0x5c] sm:$0x1] }
 0x105   : > { %7073 = vmatmul.mubr.bf16.gmra.mrb[8].mxu1 %v6404_v51  ;;  %v3063_v27 = vsel %vm8627_vm2, %v3058_v44, %v3062_v10  ;;  %v1202_v0 = vshll.u32 %v994_v40, 16  ;;  %v3086_v20 = vrot.slane %v3084_v39, 5  ;;  %v1206_v11 = vshrl.u32 %v994_v40, 16  ;;  %v2914_v17 = vld [vmem:[#allocation2 + $0x54] sm:$0xf] }
 0x106   : > { %v6515_v41 = vcombine.low %v3053_v56, %v3063_v27  ;;  %v3081_v61 = vor.u32 %v3080_v46, %v3076_v25  ;;  %v1195_v28 = vrot.slane %v1193_v58, 4  ;;  %v3072_v37 = vrot.slane %v3071_v57, 4  ;;  %v8905_v32 = vld [vmem:[#allocation2 + $0x58] sm:$0xf]  ;;  %v8911_v57 = vld [vmem:[#allocation2 + $0x5c] sm:$0x1] }
 0x107   : > { %v1198_v1 = vrot.slane %v1196_v34, 5  ;;  %v1204_v8 = vrot.slane %v1202_v0, 5  ;;  %v1212_v13 = vshll.u32 %v1035_v59, 16  ;;  %v1217_v10 = vshrl.u32 %v995_v29, 16 }
 0x108   : > { %7264 = vmatprep.mubr.bf16.mxu0 %v6515_v41  ;;  %v3082_v18 = vrot.slane %v3081_v61, 4  ;;  %v1220_v14 = vshll.u32 %v995_v29, 16  ;;  %v3077_v30 = vsel %vm8627_vm2, %v3072_v37, %v3076_v25  ;;  %v1208_v9 = vrot.slane %v1206_v11, 4 }
 0x109   : > { %v1199_v45 = vor.u32 %v1198_v1, %v1195_v28  ;;  %v1226_v51 = vshll.u32 %v996_v3, 16  ;;  %v1214_v22 = vrot.slane %v1212_v13, 5  ;;  %v1219_v40 = vrot.slane %v1217_v10, 4 }
 0x10a   : > { %v3087_v44 = vsel %vm8627_vm2, %v3082_v18, %v3086_v20  ;;  %v1222_v56 = vrot.slane %v1220_v14, 5  ;;  %v1209_v58 = vor.u32 %v1208_v9, %v1204_v8  ;;  %v1230_v34 = vshrl.u32 %v996_v3, 16 }
 0x10b   : > { %v6516_v46 = vcombine.low %v3077_v30, %v3087_v44  ;;  %v1200_v39 = vrot.slane %v1199_v45, 4  ;;  %v1228_v27 = vrot.slane %v1226_v51, 5  ;;  %v1236_v0 = vshll.u32 %v1036_v15, 16  ;;  %v3650_v44 = vld [vmem:[#allocation2 + $0x18] sm:$0xe] }
 0x10c   : > { %v1223_v59 = vor.u32 %v1222_v56, %v1219_v40  ;;  %v3089_v29 = vshrl.u32 %v2914_v17, 16  ;;  %v1210_v41 = vrot.slane %v1209_v58, 4  ;;  %v3092_v61 = vshll.u32 %v2914_v17, 16  ;;  %v389_v58 = vld [vmem:[%s8611_s21 + $0x54] sm:$0xf] }
 0x10d   : > { %7265 = vmatmul.mubr.bf16.gmra.mrb[8].mxu0 %v6516_v46  ;;  %v1205_v25 = vsel %vm8627_vm2, %v1200_v39, %v1204_v8  ;;  %v3098_v20 = vshll.u32 %v8905_v32, 16  ;;  %v1232_v37 = vrot.slane %v1230_v34, 4  ;;  %v1238_v1 = vrot.slane %v1236_v0, 5  ;;  %v388_v39 = vld [vmem:[%s8611_s21 + $0x50] sm:$0xf] }
 0x10e   : > { %v1224_v28 = vrot.slane %v1223_v59, 4  ;;  %v3091_v11 = vrot.slane %v3089_v29, 4  ;;  %v1215_v18 = vsel %vm8627_vm2, %v1210_v41, %v1214_v22  ;;  %v3094_v13 = vrot.slane %v3092_v61, 5 }
 0x10f   : > { %v3100_v10 = vrot.slane %v3098_v20, 5  ;;  %v3102_v3 = vshrl.u32 %v8905_v32, 16  ;;  %v6405_v15 = vcombine.low %v1205_v25, %v1215_v18  ;;  %v1233_v17 = vor.u32 %v1232_v37, %v1228_v27 }
 0x110   : > { %v1229_v8 = vsel %vm8627_vm2, %v1224_v28, %v1228_v27  ;;  %v3108_v14 = vshll.u32 %v8911_v57, 16  ;;  %v3095_v30 = vor.u32 %v3094_v13, %v3091_v11  ;;  %v731_v9 = vsel %vm8682_vm5, 0, %v8868_v50  ;;  %v3651_v27 = vld [vmem:[#allocation2 + $0x24] sm:$0xe] }
 0x111   : > { %v3104_v45 = vrot.slane %v3102_v3, 4  ;;  %v747_v51 = vsel %vm8682_vm5, %v8845_v12, 0  ;;  %7076 = vmatprep.mubr.bf16.mxu1 %v6405_v15  ;;  %v1234_v22 = vrot.slane %v1233_v17, 4  ;;  %v6372_v56 = vcombine.low %v731_v9, %v731_v9  ;;  %v8956_v3 = vld [vmem:[%s8611_s21 + $0x5c] sm:$0xf] }
 0x112   : > { %v3110_v40 = vrot.slane %v3108_v14, 5  ;;  %v6373_v46 = vcombine.high %v731_v9, %v731_v9  ;;  %v3096_v59 = vrot.slane %v3095_v30, 4  ;;  %v6374_v0 = vcombine.low %v747_v51, %v747_v51  ;;  %v8973_v15 = vld [vmem:[%s8611_s21 + $0x60] sm:$0xf] }
 0x113   : > { %v3105_v34 = vor.u32 %v3104_v45, %v3100_v10  ;;  %v732_v50 = vsel %vm8682_vm5, 0, %v8871_v63  ;;  %v1239_v29 = vsel %vm8627_vm2, %v1234_v22, %v1238_v1  ;;  %954 = vst [vmem:[#allocation2 + $0x60] sm:$0xf] %v6372_v56  ;;  %v748_v12 = vsel %vm8682_vm5, %v8847_v6, 0 }
 0x114   : > { %955 = vst [vmem:[#allocation2 + $0x64] sm:$0xf] %v6373_v46  ;;  %v6375_v25 = vcombine.low %v732_v50, %v732_v50  ;;  %v6376_v41 = vcombine.high %v732_v50, %v732_v50  ;;  %v6406_v61 = vcombine.low %v1229_v8, %v1239_v29  ;;  %v3101_v20 = vsel %vm8627_vm2, %v3096_v59, %v3100_v10  ;;  %v390_v10 = vld [vmem:[%s8611_s21 + $0x58] sm:$0xf] }
 0x115   : > { %v3106_v28 = vrot.slane %v3105_v34, 4  ;;  %956 = vst [vmem:[#allocation2 + $0x68] sm:$0x1] %v6374_v0  ;;  %v6377_v63 = vcombine.low %v748_v12, %v748_v12  ;;  %v3717_v37 = vrot.slane %v3715_v54, 4  ;;  %v6536_v1 = vrot.slane %v3650_v44, 9 }
 0x116   : > { %957 = vst [vmem:[#allocation2 + $0x6c] sm:$0xf] %v6375_v25  ;;  %958 = vst [vmem:[#allocation2 + $0x70] sm:$0xf] %v6376_v41  ;;  %v476_v6 = vadd.bf16 %v8640_v53, %v433_v23  ;;  %v477_v11 = vadd.bf16 %v8640_v53, %v434_v4  ;;  %7077 = vmatmul.mubr.bf16.gmra.mrb[12].mxu1 %v6406_v61  ;;  %v435_v48 = vmul.bf16 %v8638_v52, %v388_v39 }
 0x117   : > { %v3111_v18 = vsel %vm8627_vm2, %v3106_v28, %v3110_v40  ;;  %959 = vst [vmem:[#allocation2 + $0x74] sm:$0x1] %v6377_v63  ;;  %v436_v54 = vmul.bf16 %v8638_v52, %v389_v58  ;;  %v6537_v13 = vrot.slane %v3651_v27, 9  ;;  %v8962_v23 = vsel %vm8838_vm8, %v3717_v37, %v3718_v33 }
 0x118   : > { %v6517_v60 = vcombine.low %v3101_v20, %v3111_v18  ;;  %v8968_v49 = vsel %vm8838_vm8, %v6536_v1, %v3722_v47  ;;  %v8970_v4 = vcombine.low %v476_v6, %v477_v11  ;;  %v6551_v8 = vcombine.low %v8888_v43, %v8962_v23  ;;  %v393_v23 = vld [vmem:[%s8611_s21 + $0x64] sm:$0xf] }
 0x119   : > { %v478_v17 = vadd.bf16 %v8640_v53, %v435_v48  ;;  %v479_v33 = vadd.bf16 %v8640_v53, %v436_v54  ;;  %v3729_v14 = vrot.slane %v8774_v24, 5  ;;  %v3732_v30 = vrot.slane %v8776_v36, 5 }
 0x11a   : > { %7268 = vmatprep.mubr.bf16.mxu0 %v6517_v60  ;;  %v641_v62 = vshrl.u32 %v8970_v4, 16  ;;  %v644_v47 = vshll.u32 %v8970_v4, 16  ;;  %v2917_v45 = vld [vmem:[#allocation2 + $0x60] sm:$0xf]  ;;  %v437_v22 = vmul.bf16 %v8638_v52, %v390_v10  ;;  %v438_v40 = vmul.bf16 %v8638_v52, %v8956_v3  ;;  %v9063_v3 = vld [vmem:[%s8611_s21 + $0x6c] sm:$0xf] }
 0x11b   : > { %v8985_v9 = vld [vmem:[#allocation2 + $0x64] sm:$0xf]  ;;  %v997_v51 = vld [vmem:[#allocation2 + $0x60] sm:$0xf]  ;;  %v8987_v44 = vcombine.low %v478_v17, %v479_v33  ;;  %v3113_v39 = vshrl.u32 %v2917_v45, 16  ;;  %v3116_v58 = vshll.u32 %v2917_v45, 16  ;;  %v9003_v12 = vsel %vm8838_vm8, %v6537_v13, %v3729_v14 }
 0x11c   : > { %v8994_v46 = vld [vmem:[#allocation2 + $0x68] sm:$0x1]  ;;  %v3122_v27 = vshll.u32 %v8985_v9, 16  ;;  %v3126_v59 = vshrl.u32 %v8985_v9, 16  ;;  %v998_v0 = vld [vmem:[#allocation2 + $0x64] sm:$0xf]  ;;  %v9006_v25 = vadd.bf16 %v8640_v53, %v437_v22 }
 0x11d   : > { %v3132_v34 = vshll.u32 %v8994_v46, 16  ;;  %v1037_v50 = vld [vmem:[#allocation2 + $0x68] sm:$0x1]  ;;  %v1241_v29 = vshrl.u32 %v997_v51, 16  ;;  %v3115_v41 = vrot.slane %v3113_v39, 4  ;;  %v3118_v61 = vrot.slane %v3116_v58, 5 }
 0x11e   : > { %v3124_v20 = vrot.slane %v3122_v27, 5  ;;  %v3128_v28 = vrot.slane %v3126_v59, 4  ;;  %v999_v63 = vld [vmem:[#allocation2 + $0x6c] sm:$0xf]  ;;  %v1244_v6 = vshll.u32 %v997_v51, 16  ;;  %v1250_v11 = vshll.u32 %v998_v0, 16 }
 0x11f   : > { %v3134_v37 = vrot.slane %v3132_v34, 5  ;;  %v1243_v1 = vrot.slane %v1241_v29, 4  ;;  %v3119_v18 = vor.u32 %v3118_v61, %v3115_v41  ;;  %v1254_v54 = vshrl.u32 %v998_v0, 16  ;;  %v1000_v60 = vld [vmem:[#allocation2 + $0x70] sm:$0xf] }
 0x120   : > { %v3129_v48 = vor.u32 %v3128_v28, %v3124_v20  ;;  %v1260_v10 = vshll.u32 %v1037_v50, 16  ;;  %v1246_v17 = vrot.slane %v1244_v6, 5  ;;  %v1252_v13 = vrot.slane %v1250_v11, 5  ;;  %v1038_v59 = vld [vmem:[#allocation2 + $0x74] sm:$0x1] }
 0x121   : > { %v1265_v33 = vshrl.u32 %v999_v63, 16  ;;  %v1268_v45 = vshll.u32 %v999_v63, 16  ;;  %v3120_v22 = vrot.slane %v3119_v18, 4  ;;  %v1256_v39 = vrot.slane %v1254_v54, 4 }
 0x122   : > { %v3130_v56 = vrot.slane %v3129_v48, 4  ;;  %v1262_v58 = vrot.slane %v1260_v10, 5  ;;  %v1247_v27 = vor.u32 %v1246_v17, %v1243_v1  ;;  %v1274_v29 = vshll.u32 %v1000_v60, 16 }
 0x123   : > { %v1267_v26 = vrot.slane %v1265_v33, 4  ;;  %v1270_v34 = vrot.slane %v1268_v45, 5  ;;  %v3125_v51 = vsel %vm8627_vm2, %v3120_v22, %v3124_v20  ;;  %v1257_v50 = vor.u32 %v1256_v39, %v1252_v13 }
 0x124   : > { %v3135_v0 = vsel %vm8627_vm2, %v3130_v56, %v3134_v37  ;;  %v1278_v41 = vshrl.u32 %v1000_v60, 16  ;;  %v1248_v28 = vrot.slane %v1247_v27, 4  ;;  %v1276_v6 = vrot.slane %v1274_v29, 5  ;;  %v3652_v37 = vld [vmem:[#allocation2 + $0x30] sm:$0xe] }
 0x125   : > { %v6518_v61 = vcombine.low %v3125_v51, %v3135_v0  ;;  %v1271_v63 = vor.u32 %v1270_v34, %v1267_v26  ;;  %v1258_v11 = vrot.slane %v1257_v50, 4  ;;  %v1284_v48 = vshll.u32 %v1038_v59, 16  ;;  %v3653_v59 = vld [vmem:[#allocation2 + $0x3c] sm:$0xe]  ;;  %v3654_v0 = vld [vmem:[#allocation2 + $0x48] sm:$0xe] }
 0x126   : > { %v1280_v18 = vrot.slane %v1278_v41, 4  ;;  %v643_v1 = vrot.slane %v641_v62, 7  ;;  %v1253_v54 = vsel %vm8627_vm2, %v1248_v28, %v1252_v13  ;;  %v648_v20 = vshrl.u32 %v8987_v44, 16 }
 0x127   : > { %7269 = vmatmul.mubr.bf16.gmra.mrb[12].mxu0 %v6518_v61  ;;  %v1272_v10 = vrot.slane %v1271_v63, 4  ;;  %v651_v56 = vshll.u32 %v8987_v44, 16  ;;  %v1263_v60 = vsel %vm8627_vm2, %v1258_v11, %v1262_v58  ;;  %v1286_v17 = vrot.slane %v1284_v48, 5 }
 0x128   : > { %v1281_v26 = vor.u32 %v1280_v18, %v1276_v6  ;;  %7304 = vmatprep.mubr.bf16.mxu0 %v6551_v8  ;;  %v646_v62 = vor.u32 %v644_v47, %v643_v1  ;;  %v6407_v13 = vcombine.low %v1253_v54, %v1263_v60  ;;  %v749_v44 = vsel %vm8682_vm5, %v643_v1, 0  ;;  %v9060_v1 = vld [vmem:[%s8611_s21 + $0x68] sm:$0xf] }
 0x129   : > { %v1277_v33 = vsel %vm8627_vm2, %v1272_v10, %v1276_v6  ;;  %v650_v45 = vrot.slane %v648_v20, 7  ;;  %v6380_v58 = vcombine.low %v749_v44, %v749_v44  ;;  %v3731_v43 = vrot.slane %v3729_v14, 4  ;;  %v7896_v14 = vld [vmem:[#allocation6 + $0x188] sm:$0xff]   ;;  %v7898_v10 = vld [vmem:[#allocation6 + $0x190] sm:$0xff]   ;;  %v7900_v44 = vld [vmem:[#allocation6 + $0x198] sm:$0xff]  }
 0x12a   : > { %v1282_v22 = vrot.slane %v1281_v26, 4  ;;  %v733_v39 = vsel %vm8682_vm5, 0, %v646_v62  ;;  %7080 = vmatprep.mubr.bf16.mxu1 %v6407_v13  ;;  %v6538_v51 = vrot.slane %v3652_v37, 9  ;;  %v3736_v28 = vrot.slane %v8782_v2, 5 }
 0x12b   : > { %v6378_v4 = vcombine.low %v733_v39, %v733_v39  ;;  %v6379_v8 = vcombine.high %v733_v39, %v733_v39  ;;  %v653_v47 = vor.u32 %v651_v56, %v650_v45  ;;  %v750_v27 = vsel %vm8682_vm5, %v650_v45, 0  ;;  %962 = vst [vmem:[#allocation2 + $0x80] sm:$0x1] %v6380_v58 }
 0x12c   : > { %v1287_v34 = vsel %vm8627_vm2, %v1282_v22, %v1286_v17  ;;  %v6383_v29 = vcombine.low %v750_v27, %v750_v27  ;;  %v3733_v24 = vsel %vm8838_vm8, %v3731_v43, %v3732_v30  ;;  %v3739_v30 = vrot.slane %v8788_v7, 5 }
 0x12d   : > { %v6408_v50 = vcombine.low %v1277_v33, %v1287_v34  ;;  %960 = vst [vmem:[#allocation2 + $0x78] sm:$0xf] %v6378_v4  ;;  %961 = vst [vmem:[#allocation2 + $0x7c] sm:$0xf] %v6379_v8  ;;  %v734_v41 = vsel %vm8682_vm5, 0, %v653_v47  ;;  %v6553_v61 = vcombine.low %v9003_v12, %v3733_v24  ;;  %v481_v6 = vadd.bf16 %v8640_v53, %v438_v40 }
 0x12e   : > { %v6381_v63 = vcombine.low %v734_v41, %v734_v41  ;;  %v6382_v36 = vcombine.high %v734_v41, %v734_v41  ;;  %965 = vst [vmem:[#allocation2 + $0x8c] sm:$0x1] %v6383_v29  ;;  %v10374_v11 = vcombine.low %v8968_v49, %v8860_v16  ;;  %v3737_v12 = vsel %vm8838_vm8, %v6538_v51, %v3736_v28 }
 0x12f   : > { %7081 = vmatmul.mubr.bf16.gmra.mrb[16].mxu1 %v6408_v50  ;;  %v3738_v18 = vrot.slane %v3736_v28, 4  ;;  %v440_v2 = vmul.bf16 %v8638_v52, %v393_v23  ;;  %v10375_v48 = vmul.bf16 %v8638_v52, %v8973_v15  ;;  %v6346_v16 = vcombine.low %v9006_v25, %v481_v6 }
 0x130   : > { %7305 = vmatmul.mubr.bf16.vlgmr.msra.gmra.mrb[0].mxu0 %v10374_v11  ;;  %963 = vst [vmem:[#allocation2 + $0x84] sm:$0xf] %v6381_v63  ;;  %964 = vst [vmem:[#allocation2 + $0x88] sm:$0xf] %v6382_v36  ;;  %v6539_v49 = vrot.slane %v3653_v59, 9  ;;  %v3743_v40 = vrot.slane %v8864_v31, 5  ;;  %v441_v58 = vmul.bf16 %v8638_v52, %v9060_v1  ;;  %v442_v43 = vmul.bf16 %v8638_v52, %v9063_v3 }
 0x131   : > { %v482_v7 = vadd.bf16 %v8640_v53, %v10375_v48  ;;  %7337 = vmatpush3.bf16.msra.mxu0 %v8853_v21  ;;  %7308 = vmatprep.mubr.bf16.mxu0 %v6553_v61  ;;  %v3746_v54 = vrot.slane %v8876_v55, 5  ;;  %v3740_v15 = vsel %vm8838_vm8, %v3738_v18, %v3739_v30  ;;  %v483_v20 = vadd.bf16 %v8640_v53, %v440_v2  ;;  %v7904_v2 = vld [vmem:[#allocation6 + $0x1a0] sm:$0xff]   ;;  %v397_v55 = vld [vmem:[%s8611_s21 + $0x74] sm:$0xf] }
 0x132   : > { %7338 = vmatprep.subr.bf16.mxu0 %v7896_v14  ;;  %v6540_v56 = vrot.slane %v3654_v0, 9  ;;  %v3750_v21 = vrot.slane %v8882_v5, 5  ;;  %v6554_v37 = vcombine.low %v3737_v12, %v3740_v15  ;;  %v655_v60 = vshrl.u32 %v6346_v16, 16  ;;  %v1039_v31 = vld [vmem:[#allocation2 + $0x80] sm:$0x1] }
 0x133   : > { %v658_v26 = vshll.u32 %v6346_v16, 16  ;;  %v9075_v25 = vsel %vm8838_vm8, %v6539_v49, %v3743_v40  ;;  %v9077_v17 = vcombine.low %v482_v7, %v483_v20  ;;  %v3745_v62 = vrot.slane %v3743_v40, 4 }
 0x134   : > { %v9081_v13 = vsel %vm8838_vm8, %v6540_v56, %v3750_v21  ;;  %v9083_v33 = vrot.slane %v3750_v21, 4  ;;  %v9085_v45 = vld [vmem:[#allocation2 + $0x78] sm:$0xf]  ;;  %v9087_v5 = vld [vmem:[#allocation2 + $0x7c] sm:$0xf]  ;;  %v1308_v22 = vshll.u32 %v1039_v31, 16 }
 0x135   : > { %7339 = vmatpush3.bf16.msra.mxu0 %v7896_v14  ;;  %v657_v39 = vrot.slane %v655_v60, 7  ;;  %v1289_v23 = vshrl.u32 %v9085_v45, 16  ;;  %v1292_v4 = vshll.u32 %v9085_v45, 16  ;;  %v1298_v8 = vshll.u32 %v9087_v5, 16  ;;  %v1040_v27 = vld [vmem:[#allocation2 + $0x8c] sm:$0x1] }
 0x136   : > { %v1302_v47 = vshrl.u32 %v9087_v5, 16  ;;  %7340 = vmatprep.subr.bf16.mxu0 %v7898_v10  ;;  %v1310_v59 = vrot.slane %v1308_v22, 5  ;;  %v1332_v34 = vshll.u32 %v1040_v27, 16  ;;  %v665_v21 = vshll.u32 %v9077_v17, 16  ;;  %v396_v22 = vld [vmem:[%s8611_s21 + $0x70] sm:$0xf] }
 0x137   : > { %v660_v29 = vor.u32 %v658_v26, %v657_v39  ;;  %v751_v24 = vsel %vm8682_vm5, %v657_v39, 0  ;;  %v1291_v14 = vrot.slane %v1289_v23, 4  ;;  %v1294_v51 = vrot.slane %v1292_v4, 5  ;;  %v9099_v41 = vld [vmem:[#allocation2 + $0x84] sm:$0xf] }
 0x138   : > { %v1300_v0 = vrot.slane %v1298_v8, 5  ;;  %v1304_v50 = vrot.slane %v1302_v47, 4  ;;  %7309 = vmatmul.mubr.bf16.gmra.mrb[4].mxu0 %v6554_v37  ;;  %v9101_v61 = vld [vmem:[#allocation2 + $0x88] sm:$0xf]  ;;  %v1313_v28 = vshrl.u32 %v9099_v41, 16  ;;  %v1316_v63 = vshll.u32 %v9099_v41, 16 }
 0x139   : > { %v1334_v36 = vrot.slane %v1332_v34, 5  ;;  %v735_v30 = vsel %vm8682_vm5, 0, %v660_v29  ;;  %7341 = vmatpush3.bf16.msra.mxu0 %v7898_v10  ;;  %v1295_v6 = vor.u32 %v1294_v51, %v1291_v14  ;;  %v1322_v12 = vshll.u32 %v9101_v61, 16  ;;  %v7908_v4 = vld [vmem:[#allocation6 + $0x1a8] sm:$0xff]  }
 0x13a   : > { %v1305_v11 = vor.u32 %v1304_v50, %v1300_v0  ;;  %v1326_v18 = vshrl.u32 %v9101_v61, 16  ;;  %7342 = vmatprep.subr.bf16.mxu0 %v7900_v44  ;;  %v1315_v48 = vrot.slane %v1313_v28, 4  ;;  %v1318_v7 = vrot.slane %v1316_v63, 5  ;;  %v3655_v50 = vld [vmem:[#allocation2 + $0x54] sm:$0xe]  ;;  %v7912_v28 = vld [vmem:[#allocation6 + $0x1b0] sm:$0xff]  }
 0x13b   : > { %v6384_v1 = vcombine.low %v735_v30, %v735_v30  ;;  %v6385_v3 = vcombine.high %v735_v30, %v735_v30  ;;  %v1296_v16 = vrot.slane %v1295_v6, 4  ;;  %v1324_v40 = vrot.slane %v1322_v12, 5 }
 0x13c   : > { %v1306_v49 = vrot.slane %v1305_v11, 4  ;;  %v1328_v15 = vrot.slane %v1326_v18, 4  ;;  %v1319_v20 = vor.u32 %v1318_v7, %v1315_v48  ;;  %v6386_v56 = vcombine.low %v751_v24, %v751_v24 }
 0x13d   : > { %966 = vst [vmem:[#allocation2 + $0x90] sm:$0xf] %v6384_v1  ;;  %967 = vst [vmem:[#allocation2 + $0x94] sm:$0xf] %v6385_v3  ;;  %v662_v10 = vshrl.u32 %v9077_v17, 16  ;;  %7343 = vmatpush3.bf16.msra.mxu0 %v7900_v44  ;;  %v1301_v37 = vsel %vm8627_vm2, %v1296_v16, %v1300_v0  ;;  %v3747_v31 = vsel %vm8838_vm8, %v3745_v62, %v3746_v54  ;;  %v3753_v47 = vrot.slane %v8894_v19, 5 }
 0x13e   : > { %v1311_v60 = vsel %vm8627_vm2, %v1306_v49, %v1310_v59  ;;  %v1329_v26 = vor.u32 %v1328_v15, %v1324_v40  ;;  %7344 = vmatprep.subr.bf16.mxu0 %v7904_v2  ;;  %v1320_v23 = vrot.slane %v1319_v20, 4  ;;  %968 = vst [vmem:[#allocation2 + $0x98] sm:$0x1] %v6386_v56  ;;  %v6555_v44 = vcombine.low %v9075_v25, %v3747_v31  ;;  %v7916_v56 = vld [vmem:[#allocation6 + $0x1b8] sm:$0xff]  }
 0x13f   : > { %v6409_v39 = vcombine.low %v1301_v37, %v1311_v60  ;;  %v664_v17 = vrot.slane %v662_v10, 7  ;;  %v484_v27 = vadd.bf16 %v8640_v53, %v441_v58  ;;  %v485_v59 = vadd.bf16 %v8640_v53, %v442_v43 }
 0x140   : > { %v1330_v8 = vrot.slane %v1329_v26, 4  ;;  %v1325_v54 = vsel %vm8627_vm2, %v1320_v23, %v1324_v40  ;;  %7312 = vmatprep.mubr.bf16.mxu0 %v6555_v44  ;;  %v443_v25 = vmul.bf16 %v8638_v52, %v396_v22  ;;  %v3754_v58 = vsel %vm8838_vm8, %v9083_v33, %v3753_v47 }
 0x141   : > { %7084 = vmatprep.mubr.bf16.mxu1 %v6409_v39  ;;  %v667_v62 = vor.u32 %v665_v21, %v664_v17  ;;  %v752_v34 = vsel %vm8682_vm5, %v664_v17, 0  ;;  %v6348_v43 = vcombine.low %v484_v27, %v485_v59  ;;  %7345 = vmatpush3.bf16.msra.mxu0 %v7904_v2  ;;  %v6556_v51 = vcombine.low %v9081_v13, %v3754_v58 }
 0x142   : > { %v1335_v29 = vsel %vm8627_vm2, %v1330_v8, %v1334_v36  ;;  %v6389_v19 = vcombine.low %v752_v34, %v752_v34  ;;  %v444_v0 = vmul.bf16 %v8638_v52, %v397_v55  ;;  %7346 = vmatprep.subr.bf16.mxu0 %v7908_v4  ;;  %v486_v1 = vadd.bf16 %v8640_v53, %v443_v25  ;;  %v3656_v25 = vld [vmem:[#allocation2 + $0x60] sm:$0xe] }
 0x143   : > { %v6410_v24 = vcombine.low %v1325_v54, %v1335_v29  ;;  %v736_v14 = vsel %vm8682_vm5, 0, %v667_v62  ;;  %v669_v33 = vshrl.u32 %v6348_v43, 16  ;;  %v672_v11 = vshll.u32 %v6348_v43, 16  ;;  %7313 = vmatmul.mubr.bf16.gmra.mrb[8].mxu0 %v6556_v51  ;;  %v9154_v54 = vld [vmem:[#allocation6 + $0x1c0] sm:$0xff]  }
 0x144   : > { %v9139_v63 = vld [vmem:[#allocation2 + $0x90] sm:$0xf]  ;;  %v9141_v36 = vld [vmem:[#allocation2 + $0x94] sm:$0xf]  ;;  %v6387_v30 = vcombine.low %v736_v14, %v736_v14  ;;  %v6388_v6 = vcombine.high %v736_v14, %v736_v14  ;;  %971 = vst [vmem:[#allocation2 + $0xa4] sm:$0x1] %v6389_v19  ;;  %v487_v3 = vadd.bf16 %v8640_v53, %v444_v0 }
 0x145   : > { %7085 = vmatmul.mubr.bf16.gmra.mrb[20].mxu1 %v6410_v24  ;;  %v1337_v12 = vshrl.u32 %v9139_v63, 16  ;;  %v1340_v18 = vshll.u32 %v9139_v63, 16  ;;  %v1346_v13 = vshll.u32 %v9141_v36, 16  ;;  %v1350_v2 = vshrl.u32 %v9141_v36, 16  ;;  %v1041_v48 = vld [vmem:[#allocation2 + $0x98] sm:$0x1]  ;;  %7347 = vmatpush3.bf16.msra.mxu0 %v7908_v4 }
 0x146   : > { %969 = vst [vmem:[#allocation2 + $0x9c] sm:$0xf] %v6387_v30  ;;  %970 = vst [vmem:[#allocation2 + $0xa0] sm:$0xf] %v6388_v6  ;;  %v671_v7 = vrot.slane %v669_v33, 7  ;;  %v6541_v16 = vrot.slane %v3655_v50, 9  ;;  %7348 = vmatprep.subr.bf16.mxu0 %v7912_v28  ;;  %v6349_v60 = vcombine.low %v486_v1, %v487_v3 }
 0x147   : > { %v1339_v49 = vrot.slane %v1337_v12, 4  ;;  %v1342_v40 = vrot.slane %v1340_v18, 5  ;;  %v1348_v15 = vrot.slane %v1346_v13, 5  ;;  %v1352_v20 = vrot.slane %v1350_v2, 4 }
 0x148   : > { %v1356_v10 = vshll.u32 %v1041_v48, 16  ;;  %v674_v21 = vor.u32 %v672_v11, %v671_v7  ;;  %v753_v37 = vsel %vm8682_vm5, %v671_v7, 0  ;;  %v3757_v39 = vrot.slane %v8905_v32, 5 }
 0x149   : > { %v1343_v26 = vor.u32 %v1342_v40, %v1339_v49  ;;  %v1353_v31 = vor.u32 %v1352_v20, %v1348_v15  ;;  %v6392_v22 = vcombine.low %v753_v37, %v753_v37  ;;  %v676_v44 = vshrl.u32 %v6349_v60, 16  ;;  %7349 = vmatpush3.bf16.msra.mxu0 %v7912_v28 }
 0x14a   : > { %v1358_v23 = vrot.slane %v1356_v10, 5  ;;  %v737_v17 = vsel %vm8682_vm5, 0, %v674_v21  ;;  %v679_v4 = vshll.u32 %v6349_v60, 16  ;;  %7350 = vmatprep.subr.bf16.mxu0 %v7916_v56  ;;  %v3758_v32 = vsel %vm8838_vm8, %v6541_v16, %v3757_v39 }
 0x14b   : > { %v1344_v8 = vrot.slane %v1343_v26, 4  ;;  %v1354_v47 = vrot.slane %v1353_v31, 4  ;;  %v1042_v27 = vld [vmem:[#allocation2 + $0xa4] sm:$0x1]  ;;  %v6390_v59 = vcombine.low %v737_v17, %v737_v17  ;;  %v6391_v55 = vcombine.high %v737_v17, %v737_v17  ;;  %974 = vst [vmem:[#allocation2 + $0xb0] sm:$0x1] %v6392_v22 }
 0x14c   : > { %v1380_v62 = vshll.u32 %v1042_v27, 16  ;;  %v678_v34 = vrot.slane %v676_v44, 7  ;;  %v3759_v24 = vrot.slane %v3757_v39, 4  ;;  %v3760_v14 = vrot.slane %v8911_v57, 5  ;;  %v2921_v31 = vld [vmem:[#allocation2 + $0x70] sm:$0xf] }
 0x14d   : > { %v1349_v29 = vsel %vm8627_vm2, %v1344_v8, %v1348_v15  ;;  %v1359_v19 = vsel %vm8627_vm2, %v1354_v47, %v1358_v23  ;;  %v9162_v58 = vld [vmem:[#allocation2 + $0x9c] sm:$0xf]  ;;  %v9164_v43 = vld [vmem:[#allocation2 + $0xa0] sm:$0xf]  ;;  %972 = vst [vmem:[#allocation2 + $0xa8] sm:$0xf] %v6390_v59  ;;  %7351 = vmatpush3.bf16.msra.mxu0 %v7916_v56 }
 0x14e   : > { %973 = vst [vmem:[#allocation2 + $0xac] sm:$0xf] %v6391_v55  ;;  %v6411_v51 = vcombine.low %v1349_v29, %v1359_v19  ;;  %v1361_v0 = vshrl.u32 %v9162_v58, 16  ;;  %v1364_v50 = vshll.u32 %v9162_v58, 16  ;;  %v1370_v28 = vshll.u32 %v9164_v43, 16  ;;  %7384 = vmatprep.subr.bf16.mxu0 %v9154_v54 }
 0x14f   : > { %v1374_v30 = vshrl.u32 %v9164_v43, 16  ;;  %v681_v6 = vor.u32 %v679_v4, %v678_v34  ;;  %v754_v33 = vsel %vm8682_vm5, %v678_v34, 0  ;;  %v6542_v11 = vrot.slane %v3656_v25, 9  ;;  %v3657_v44 = vld [vmem:[#allocation2 + $0x6c] sm:$0xe] }
 0x150   : > { %7088 = vmatprep.mubr.bf16.mxu1 %v6411_v51  ;;  %v1363_v12 = vrot.slane %v1361_v0, 4  ;;  %v1366_v57 = vrot.slane %v1364_v50, 5  ;;  %v1372_v18 = vrot.slane %v1370_v28, 5  ;;  %v6395_v13 = vcombine.low %v754_v33, %v754_v33  ;;  %v2922_v59 = vld [vmem:[#allocation2 + $0x74] sm:$0x1] }
 0x151   : > { %v1376_v2 = vrot.slane %v1374_v30, 4  ;;  %v738_v48 = vsel %vm8682_vm5, 0, %v681_v6  ;;  %v3761_v7 = vsel %vm8838_vm8, %v3759_v24, %v3760_v14  ;;  %v3764_v1 = vrot.slane %v8985_v9, 5 }
 0x152   : > { %v1367_v3 = vor.u32 %v1366_v57, %v1363_v12  ;;  %v6393_v16 = vcombine.low %v738_v48, %v738_v48  ;;  %v6394_v49 = vcombine.high %v738_v48, %v738_v48  ;;  %977 = vst [vmem:[#allocation2 + $0xbc] sm:$0x1] %v6395_v13  ;;  %v6557_v40 = vcombine.low %v3758_v32, %v3761_v7  ;;  %v1043_v56 = vld [vmem:[#allocation2 + $0xb0] sm:$0x1]  ;;  %v9205_v48 = vld [vmem:[#allocation2 + $0x7c] sm:$0xf] }
 0x153   : > { %v1377_v15 = vor.u32 %v1376_v2, %v1372_v18  ;;  %v1382_v20 = vrot.slane %v1380_v62, 5  ;;  %v3766_v10 = vrot.slane %v3764_v1, 4  ;;  %v3765_v9 = vsel %vm8838_vm8, %v6542_v11, %v3764_v1  ;;  %v9207_v7 = vld [vmem:[#allocation2 + $0x80] sm:$0x1] }
 0x154   : > { %v1368_v21 = vrot.slane %v1367_v3, 4  ;;  %v9179_v37 = vld [vmem:[#allocation2 + $0xa8] sm:$0xf]  ;;  %975 = vst [vmem:[#allocation2 + $0xb4] sm:$0xf] %v6393_v16  ;;  %7316 = vmatprep.mubr.bf16.mxu0 %v6557_v40  ;;  %v3767_v26 = vrot.slane %v8994_v46, 5 }
 0x155   : > { %v9181_v60 = vld [vmem:[#allocation2 + $0xac] sm:$0xf]  ;;  %976 = vst [vmem:[#allocation2 + $0xb8] sm:$0xf] %v6394_v49  ;;  %v1378_v22 = vrot.slane %v1377_v15, 4  ;;  %v1385_v39 = vshrl.u32 %v9179_v37, 16 }
 0x156   : > { %v1388_v23 = vshll.u32 %v9179_v37, 16  ;;  %v1394_v17 = vshll.u32 %v9181_v60, 16  ;;  %v1373_v4 = vsel %vm8627_vm2, %v1368_v21, %v1372_v18  ;;  %v1398_v8 = vshrl.u32 %v9181_v60, 16  ;;  %v3658_v40 = vld [vmem:[#allocation2 + $0x78] sm:$0xe] }
 0x157   : > { %v1404_v47 = vshll.u32 %v1043_v56, 16  ;;  %v3768_v27 = vsel %vm8838_vm8, %v3766_v10, %v3767_v26  ;;  %v1383_v46 = vsel %vm8627_vm2, %v1378_v22, %v1382_v20  ;;  %v1387_v55 = vrot.slane %v1385_v39, 4  ;;  %v3659_v22 = vld [vmem:[#allocation2 + $0x84] sm:$0xe] }
 0x158   : > { %v1390_v62 = vrot.slane %v1388_v23, 5  ;;  %v1396_v34 = vrot.slane %v1394_v17, 5  ;;  %v6412_v32 = vcombine.low %v1373_v4, %v1383_v46  ;;  %v1400_v25 = vrot.slane %v1398_v8, 4  ;;  %v2928_v17 = vld [vmem:[#allocation2 + $0x8c] sm:$0x1] }
 0x159   : > { %v6558_v29 = vcombine.low %v3765_v9, %v3768_v27  ;;  %v6543_v19 = vrot.slane %v3657_v44, 9  ;;  %v3771_v14 = vrot.slane %v2921_v31, 5  ;;  %v3774_v51 = vrot.slane %v2922_v59, 5  ;;  %v1044_v28 = vld [vmem:[#allocation2 + $0xbc] sm:$0x1] }
 0x15a   : > { %v1391_v24 = vor.u32 %v1390_v62, %v1387_v55  ;;  %7089 = vmatmul.mubr.bf16.gmra.mrb[24].mxu1 %v6412_v32  ;;  %v1401_v0 = vor.u32 %v1400_v25, %v1396_v34  ;;  %v1406_v50 = vrot.slane %v1404_v47, 5  ;;  %v1428_v16 = vshll.u32 %v1044_v28, 16  ;;  %v2927_v31 = vld [vmem:[#allocation2 + $0x88] sm:$0xf]  ;;  %v2930_v44 = vld [vmem:[#allocation2 + $0x94] sm:$0xf] }
 0x15b   : > { %7317 = vmatmul.mubr.bf16.gmra.mrb[12].mxu0 %v6558_v29  ;;  %v9196_v6 = vld [vmem:[#allocation2 + $0xb4] sm:$0xf]  ;;  %v3772_v11 = vsel %vm8838_vm8, %v6543_v19, %v3771_v14  ;;  %v3773_v12 = vrot.slane %v3771_v14, 4  ;;  %v6544_v23 = vrot.slane %v3658_v40, 9  ;;  %v3778_v47 = vrot.slane %v9205_v48, 5 }
 0x15c   : > { %v1392_v30 = vrot.slane %v1391_v24, 4  ;;  %v9198_v33 = vld [vmem:[#allocation2 + $0xb8] sm:$0xf]  ;;  %v1402_v57 = vrot.slane %v1401_v0, 4  ;;  %v1409_v18 = vshrl.u32 %v9196_v6, 16  ;;  %v1412_v13 = vshll.u32 %v9196_v6, 16 }
 0x15d   : > { %v1418_v2 = vshll.u32 %v9198_v33, 16  ;;  %v1422_v3 = vshrl.u32 %v9198_v33, 16  ;;  %v3775_v49 = vsel %vm8838_vm8, %v3773_v12, %v3774_v51  ;;  %v1430_v8 = vrot.slane %v1428_v16, 5  ;;  %v2931_v59 = vld [vmem:[#allocation2 + $0x98] sm:$0x1] }
 0x15e   : > { %v1397_v1 = vsel %vm8627_vm2, %v1392_v30, %v1396_v34  ;;  %v1407_v15 = vsel %vm8627_vm2, %v1402_v57, %v1406_v50  ;;  %v1411_v20 = vrot.slane %v1409_v18, 4  ;;  %v1414_v56 = vrot.slane %v1412_v13, 5  ;;  %v3660_v34 = vld [vmem:[#allocation2 + $0x90] sm:$0xe]  ;;  %v2934_v24 = vld [vmem:[#allocation2 + $0xa4] sm:$0x1] }
 0x15f   : > { %v1420_v10 = vrot.slane %v1418_v2, 5  ;;  %v6413_v21 = vcombine.low %v1397_v1, %v1407_v15  ;;  %v1424_v9 = vrot.slane %v1422_v3, 4  ;;  %v6559_v26 = vcombine.low %v3772_v11, %v3775_v49  ;;  %v7985_v51 = vld [vmem:[#allocation2] sm:$0xf]  ;;  %v9222_v0 = vld [vmem:[#allocation2 + $0x4] sm:$0xf] }
 0x160   : > { %v1415_v39 = vor.u32 %v1414_v56, %v1411_v20  ;;  %v3781_v27 = vrot.slane %v9207_v7, 5  ;;  %v6545_v55 = vrot.slane %v3659_v22, 9  ;;  %v3785_v62 = vrot.slane %v2927_v31, 5  ;;  %v2933_v11 = vld [vmem:[#allocation2 + $0xa0] sm:$0xf] }
 0x161   : > { %7092 = vmatprep.mubr.bf16.mxu1 %v6413_v21  ;;  %v1425_v4 = vor.u32 %v1424_v9, %v1420_v10  ;;  %7320 = vmatprep.mubr.bf16.mxu0 %v6559_v26  ;;  %v3779_v25 = vsel %vm8838_vm8, %v6544_v23, %v3778_v47  ;;  %v3780_v29 = vrot.slane %v3778_v47, 4  ;;  %v3788_v19 = vrot.slane %v2928_v17, 5  ;;  %v3661_v2 = vld [vmem:[#allocation2 + $0x9c] sm:$0xe]  ;;  %v2936_v40 = vld [vmem:[#allocation2 + $0xac] sm:$0xf] }
 0x162   : > { %v1416_v46 = vrot.slane %v1415_v39, 4  ;;  %v6423_v50 = vcombine.low %v7985_v51, %v9222_v0  ;;  %v3786_v28 = vsel %vm8838_vm8, %v6545_v55, %v3785_v62  ;;  %v3787_v30 = vrot.slane %v3785_v62, 4  ;;  %v398_v56 = vld [vmem:[%s8611_s21 + $0x78] sm:$0xf]  ;;  %v399_v26 = vld [vmem:[%s8611_s21 + $0x7c] sm:$0xf] }
 0x163   : > { %v1426_v32 = vrot.slane %v1425_v4, 4  ;;  %v3782_v57 = vsel %vm8838_vm8, %v3780_v29, %v3781_v27  ;;  %v6546_v18 = vrot.slane %v3660_v34, 9  ;;  %v3792_v13 = vrot.slane %v2930_v44, 5  ;;  %v2939_v23 = vld [vmem:[#allocation2 + $0xb8] sm:$0xf] }
 0x164   : > { %v1421_v14 = vsel %vm8627_vm2, %v1416_v46, %v1420_v10  ;;  %v6560_v3 = vcombine.low %v3779_v25, %v3782_v57  ;;  %v3789_v16 = vsel %vm8838_vm8, %v3787_v30, %v3788_v19  ;;  %v3795_v49 = vrot.slane %v2931_v59, 5  ;;  %v2937_v44 = vld [vmem:[#allocation2 + $0xb0] sm:$0x1]  ;;  %v3662_v4 = vld [vmem:[#allocation2 + $0xa8] sm:$0xe]  ;;  %v7907_v30 = vld [vmem:[#allocation6 + $0x88] sm:$0xff]  }
 0x165   : > { %v1431_v12 = vsel %vm8627_vm2, %v1426_v32, %v1430_v8  ;;  %v6561_v15 = vcombine.low %v3786_v28, %v3789_v16  ;;  %v3794_v20 = vrot.slane %v3792_v13, 4  ;;  %v6547_v10 = vrot.slane %v3661_v2, 9  ;;  %v7987_v8 = vld [vmem:[#allocation2 + $0xc] sm:$0xf]  ;;  %v9239_v47 = vld [vmem:[#allocation2 + $0x10] sm:$0xf] }
 0x166   : > { %v6414_v1 = vcombine.low %v1421_v14, %v1431_v12  ;;  %7321 = vmatmul.mubr.bf16.gmra.mrb[16].mxu0 %v6560_v3  ;;  %v3799_v21 = vrot.slane %v2933_v11, 5  ;;  %v3802_v9 = vrot.slane %v2934_v24, 5  ;;  %v3793_v31 = vsel %vm8838_vm8, %v6546_v18, %v3792_v13  ;;  %v7989_v59 = vld [vmem:[#allocation2 + $0x18] sm:$0xf]  ;;  %v9242_v46 = vld [vmem:[#allocation2 + $0x1c] sm:$0xf] }
 0x167   : > { %7324 = vmatprep.mubr.bf16.mxu0 %v6561_v15  ;;  %v3796_v22 = vsel %vm8838_vm8, %v3794_v20, %v3795_v49  ;;  %v3806_v39 = vrot.slane %v2936_v40, 5  ;;  %v6424_v27 = vcombine.low %v7987_v8, %v9239_v47  ;;  %v6425_v55 = vcombine.low %v7989_v59, %v9242_v46  ;;  %v2940_v34 = vld [vmem:[#allocation2 + $0xbc] sm:$0x1]  ;;  %v3663_v29 = vld [vmem:[#allocation2 + $0xb4] sm:$0xe]  ;;  %v7911_v49 = vld [vmem:[#allocation6 + $0x90] sm:$0xff]  }
 0x168   : > { %7093 = vmatmul.mubr.bf16.gmra.mrb[28].mxu1 %v6414_v1  ;;  %v3801_v17 = vrot.slane %v3799_v21, 4  ;;  %v3800_v62 = vsel %vm8838_vm8, %v6547_v10, %v3799_v21  ;;  %v6562_v32 = vcombine.low %v3793_v31, %v3796_v22  ;;  %v3813_v19 = vrot.slane %v2939_v23, 5  ;;  %v7991_v1 = vld [vmem:[#allocation6 + $0x80] sm:$0xff]   ;;  %v9261_v10 = vld [vmem:[#allocation2 + $0x28] sm:$0xf]  ;;  %v7915_v23 = vld [vmem:[#allocation6 + $0x98] sm:$0xff]  }
 0x169   : > { %7112 = vmatprep.mubr.bf16.mxu1 %v6423_v50  ;;  %v445_v24 = vmul.bf16 %v8638_v52, %v398_v56  ;;  %v6548_v14 = vrot.slane %v3662_v4, 9  ;;  %v3808_v51 = vrot.slane %v3806_v39, 4  ;;  %v3809_v50 = vrot.slane %v2937_v44, 5  ;;  %v7992_v56 = vld [vmem:[#allocation2 + $0x24] sm:$0xf] }
 0x16a   : > { %v3803_v25 = vsel %vm8838_vm8, %v3801_v17, %v3802_v9  ;;  %v446_v28 = vmul.bf16 %v8638_v52, %v399_v26  ;;  %v6549_v57 = vrot.slane %v3663_v29, 9  ;;  %v3815_v18 = vrot.slane %v3813_v19, 4  ;;  %v7994_v26 = vld [vmem:[#allocation2 + $0x30] sm:$0xf]  ;;  %v9264_v31 = vld [vmem:[#allocation2 + $0x34] sm:$0xf] }
 0x16b   : > { %v6563_v11 = vcombine.low %v3800_v62, %v3803_v25  ;;  %v488_v12 = vadd.bf16 %v8640_v53, %v445_v24  ;;  %v3816_v13 = vrot.slane %v2940_v34, 5  ;;  %v3807_v3 = vsel %vm8838_vm8, %v6548_v14, %v3806_v39  ;;  %v7919_v62 = vld [vmem:[#allocation6 + $0xa0] sm:$0xff]   ;;  %v7998_v29 = vld [vmem:[#allocation2 + $0x48] sm:$0xf] }
 0x16c   : > { %v489_v2 = vadd.bf16 %v8640_v53, %v446_v28  ;;  %v3810_v52 = vsel %vm8838_vm8, %v3808_v51, %v3809_v50  ;;  %v3814_v40 = vsel %vm8838_vm8, %v6549_v57, %v3813_v19  ;;  %v6426_v21 = vcombine.low %v7992_v56, %v9261_v10  ;;  %v7996_v34 = vld [vmem:[#allocation2 + $0x3c] sm:$0xf]  ;;  %v9274_v19 = vld [vmem:[#allocation2 + $0x4c] sm:$0xf] }
 0x16d   : > { %v3817_v53 = vsel %vm8838_vm8, %v3815_v18, %v3816_v13  ;;  %v6564_v9 = vcombine.low %v3807_v3, %v3810_v52  ;;  %v6427_v22 = vcombine.low %v7994_v26, %v9264_v31  ;;  %v6429_v24 = vcombine.low %v7998_v29, %v9274_v19  ;;  %v7931_v51 = vld [vmem:[#allocation6 + $0xb0] sm:$0xff]   ;;  %v2026_v26 = vld [vmem:[#allocation2] sm:$0xe] }
 0x16e   : > { %7325 = vmatmul.mubr.bf16.gmra.mrb[20].mxu0 %v6562_v32  ;;  %v6350_v16 = vcombine.low %v488_v12, %v489_v2  ;;  %v6565_v17 = vcombine.low %v3814_v40, %v3817_v53  ;;  %v9271_v32 = vld [vmem:[#allocation2 + $0x40] sm:$0xf]  ;;  %v9283_v52 = vld [vmem:[#allocation2 + $0x8] sm:$0x1]  ;;  %v7937_v53 = vld [vmem:[#allocation6 + $0xb8] sm:$0xff]   ;;  %v3180_v56 = vshll.u32 %v9207_v7, 16  ;;  %v6433_v29 = vcombine.low %v9085_v45, %v9087_v5 }
 0x16f   : > { %7328 = vmatprep.mubr.bf16.mxu0 %v6563_v11  ;;  %v6428_v25 = vcombine.low %v7996_v34, %v9271_v32  ;;  %v9277_v11 = vld [vmem:[#allocation2 + $0x58] sm:$0xf]  ;;  %v8002_v2 = vld [vmem:[#allocation2 + $0x60] sm:$0xf]  ;;  %v2093_v7 = vrot.slane %v9242_v46, 5  ;;  %v6447_v46 = vrot.slane %v2026_v26, 9  ;;  %v6434_v5 = vcombine.low %v9099_v41, %v9101_v61 }
 0x170   : > { %7113 = vmatmul.mubr.bf16.vlgmr.msra.gmra.mrb[0].mxu1 %v6424_v27  ;;  %v683_v15 = vshrl.u32 %v6350_v16, 16  ;;  %v686_v20 = vshll.u32 %v6350_v16, 16  ;;  %v2082_v16 = vrot.slane %v9283_v52, 5  ;;  %v9303_v34 = vrot.slane %v3180_v56, 5 }
 0x171   : > { %7145 = vmatpush3.bf16.msra.mxu1 %v7991_v1  ;;  %7116 = vmatprep.mubr.bf16.mxu1 %v6425_v55  ;;  %v9280_v1 = vld [vmem:[#allocation2 + $0x64] sm:$0xf] }
 0x172   : > { %7146 = vmatprep.subr.bf16.mxu1 %v7907_v30  ;;  %v685_v39 = vrot.slane %v683_v15, 7  ;;  %v6431_v3 = vcombine.low %v8002_v2, %v9280_v1  ;;  %v3170_v15 = vshll.u32 %v9205_v48, 16  ;;  %10376 = vst [vmem:[#allocation22_spill] sm:$0xff] %v9303_v34  ;;  %v7948_v34 = vld [vmem:[#allocation2 + $0x9c] sm:$0xff]  }
 0x174   : > { %v688_v44 = vor.u32 %v686_v20, %v685_v39  ;;  %v755_v4 = vsel %vm8682_vm5, %v685_v39, 0  ;;  %v3174_v20 = vshrl.u32 %v9205_v48, 16  ;;  %v2028_v48 = vld [vmem:[#allocation2 + $0x18] sm:$0xe] }
 0x175   : > { %7147 = vmatpush3.bf16.msra.mxu1 %v7907_v30  ;;  %v6398_v8 = vcombine.low %v755_v4, %v755_v4  ;;  %v8000_v30 = vld [vmem:[#allocation2 + $0x54] sm:$0xf]  ;;  %v2086_v4 = vrot.slane %v9239_v47, 5 }
 0x176   : > { %7148 = vmatprep.subr.bf16.mxu1 %v7911_v49  ;;  %7329 = vmatmul.mubr.bf16.gmra.mrb[24].mxu0 %v6564_v9  ;;  %v739_v27 = vsel %vm8682_vm5, 0, %v688_v44  ;;  %v6430_v12 = vcombine.low %v8000_v30, %v9277_v11  ;;  %v7920_v9 = vld [vmem:[#allocation2 + $0x18] sm:$0xff]   ;;  %v2027_v44 = vld [vmem:[#allocation2 + $0xc] sm:$0xe]  ;;  %v8008_v30 = vld [vmem:[#allocation2 + $0x20] sm:$0x1] }
 0x177   : > { %7332 = vmatprep.mubr.bf16.mxu0 %v6565_v17  ;;  %v6396_v59 = vcombine.low %v739_v27, %v739_v27  ;;  %v6397_v55 = vcombine.high %v739_v27, %v739_v27  ;;  %980 = vst [vmem:[#allocation2 + $0xc8] sm:$0x1] %v6398_v8  ;;  %v2079_v17 = vrot.slane %v9222_v0, 5  ;;  %v9295_v8 = vld [vmem:[#allocation6 + $0xc0] sm:$0xff]   ;;  %v2100_v27 = vrot.slane %v9261_v10, 5 }
 0x178   : > { %7117 = vmatmul.mubr.bf16.gmra.mrb[4].mxu1 %v6426_v21  ;;  %v8006_v0 = vld [vmem:[#allocation2 + $0x6c] sm:$0xf] }
 0x179   : > { %7120 = vmatprep.mubr.bf16.mxu1 %v6427_v22  ;;  %7149 = vmatpush3.bf16.msra.mxu1 %v7911_v49  ;;  %978 = vst [vmem:[#allocation2 + $0xc0] sm:$0xf] %v6396_v59  ;;  %979 = vst [vmem:[#allocation2 + $0xc4] sm:$0xf] %v6397_v55  ;;  %v8005_v22 = vld [vmem:[#allocation2 + $0x14] sm:$0x1] }
 0x17a   : > { %7150 = vmatprep.subr.bf16.mxu1 %v7915_v23  ;;  %v2089_v39 = vrot.slane %v8005_v22, 5  ;;  %v9299_v59 = vrot.slane %v3170_v15, 5  ;;  %v9301_v55 = vrot.slane %v3174_v20, 4  ;;  %v2081_v10 = vrot.slane %v2079_v17, 4  ;;  %v7927_v15 = vld [vmem:[#allocation6 + $0x1c8] sm:$0xff]  }
 0x17c   : > { %v9330_v41 = vsel %vm8838_vm8, %v2081_v10, %v2082_v16  ;;  %v4533_v16 = vld [vmem:[#allocation2 + $0x1c] sm:$0xf]  ;;  %v4535_v10 = vld [vmem:[#allocation2 + $0x24] sm:$0xf] }
 0x17d   : > { %7151 = vmatpush3.bf16.msra.mxu1 %v7915_v23 }
 0x17e   : > { %7152 = vmatprep.subr.bf16.mxu1 %v7919_v62  ;;  %v2943_v14 = vld [vmem:[#allocation2 + $0xc8] sm:$0x1] }
 0x17f   : > { %v3823_v13 = vrot.slane %v2943_v14, 5  ;;  %v2088_v14 = vrot.slane %v2086_v4, 4 }
 0x180   : > { %7121 = vmatmul.mubr.bf16.gmra.mrb[8].mxu1 %v6428_v25  ;;  %v2942_v50 = vld [vmem:[#allocation2 + $0xc4] sm:$0xf]  ;;  %v3664_v28 = vld [vmem:[#allocation2 + $0xc0] sm:$0xe]  ;;  %v9305_v25 = vld [vmem:[#allocation2 + $0x70] sm:$0xf] }
 0x181   : > { %7124 = vmatprep.mubr.bf16.mxu1 %v6429_v24  ;;  %7153 = vmatpush3.bf16.msra.mxu1 %v7919_v62  ;;  %v6550_v57 = vrot.slane %v3664_v28, 9  ;;  %v3820_v18 = vrot.slane %v2942_v50, 5  ;;  %v2029_v62 = vld [vmem:[#allocation2 + $0x24] sm:$0xe]  ;;  %v6432_v47 = vcombine.low %v8006_v0, %v9305_v25  ;;  %v2030_v50 = vld [vmem:[#allocation2 + $0x30] sm:$0xe] }
 0x182   : > { %7154 = vmatprep.subr.bf16.mxu1 %v7925_v35  ;;  %v7922_v24 = vld [vmem:[#allocation2 + $0x24] sm:$0xff]   ;;  %v2095_v28 = vrot.slane %v2093_v7, 4  ;;  %v7928_v0 = vld [vmem:[#allocation2 + $0x3c] sm:$0xff]  }
 0x183   : > { %v3821_v49 = vsel %vm8838_vm8, %v6550_v57, %v3820_v18  ;;  %v3822_v40 = vrot.slane %v3820_v18, 4  ;;  %v6450_v57 = vrot.slane %v2029_v62, 9  ;;  %v2102_v18 = vrot.slane %v2100_v27, 4 }
 0x185   : > { %7155 = vmatpush3.bf16.msra.mxu1 %v7925_v35  ;;  %v3824_v21 = vsel %vm8838_vm8, %v3822_v40, %v3823_v13  ;;  %v6448_v35 = vrot.slane %v2027_v44, 9  ;;  %v8009_v13 = vld [vmem:[#allocation2 + $0x2c] sm:$0x1]  ;;  %v6435_v40 = vcombine.low %v9139_v63, %v9141_v36  ;;  %v4532_v63 = vld [vmem:[#allocation2 + $0x18] sm:$0xf]  ;;  %v9338_v36 = vsel %vm8838_vm8, %v2088_v14, %v2089_v39 }
 0x186   : > { %7156 = vmatprep.subr.bf16.mxu1 %v7931_v51  ;;  %v6566_v23 = vcombine.low %v3821_v49, %v3824_v21  ;;  %v2103_v2 = vrot.slane %v8009_v13, 5  ;;  %v7926_v49 = vld [vmem:[#allocation2 + $0x30] sm:$0xff]   ;;  %v9346_v52 = vsel %vm8838_vm8, %v6450_v57, %v2100_v27  ;;  %v6451_v21 = vrot.slane %v2030_v50, 9  ;;  %v8010_v39 = vld [vmem:[#allocation2 + $0x38] sm:$0x1]  ;;  %v7933_v44 = vld [vmem:[#allocation6 + $0x1d0] sm:$0xff]  }
 0x187   : > { %v9334_v61 = vsel %vm8838_vm8, %v6448_v35, %v2086_v4  ;;  %v4581_v27 = vshrl.u32 %v4532_v63, 16  ;;  %v4584_v62 = vshll.u32 %v4532_v63, 16  ;;  %v7932_v35 = vld [vmem:[#allocation2 + $0x48] sm:$0xff]   ;;  %v8011_v57 = vld [vmem:[#allocation2 + $0x44] sm:$0x1]  ;;  %v10344_v63 = vrot.slane %v9277_v11, 5 }
 0x188   : > { %7125 = vmatmul.mubr.bf16.gmra.mrb[12].mxu1 %v6430_v12  ;;  %7333 = vmatmul.mubr.bf16.gmra.mrb[28].mxu0 %v6566_v23  ;;  %v2096_v12 = vrot.slane %v8008_v30, 5  ;;  %v9354_v26 = vsel %vm8838_vm8, %v2102_v18, %v2103_v2  ;;  %v2110_v23 = vrot.slane %v8010_v39, 5  ;;  %v7939_v30 = vld [vmem:[#allocation6 + $0x1d8] sm:$0xff]   ;;  %v2117_v18 = vrot.slane %v8011_v57, 5 }
 0x189   : > { %7128 = vmatprep.mubr.bf16.mxu1 %v6431_v3  ;;  %7157 = vmatpush3.bf16.msra.mxu1 %v7931_v51  ;;  %v6449_v51 = vrot.slane %v2028_v48, 9  ;;  %v2107_v3 = vrot.slane %v9264_v31, 5  ;;  %v9324_v31 = vsel %vm8838_vm8, %v6447_v46, %v2079_v17  ;;  %v2031_v17 = vld [vmem:[#allocation2 + $0x3c] sm:$0xe]  ;;  %v2114_v48 = vrot.slane %v9271_v32, 5 }
 0x18a   : > { %7158 = vmatprep.subr.bf16.mxu1 %v7937_v53  ;;  %7352 = vmatprep.mubr.bf16.mxu0 %v7920_v9  ;;  %v9350_v9 = vsel %vm8838_vm8, %v2095_v28, %v2096_v12  ;;  %v4590_v46 = vshll.u32 %v4533_v16, 16  ;;  %v6452_v50 = vrot.slane %v2031_v17, 9  ;;  %v4536_v28 = vld [vmem:[#allocation2 + $0x28] sm:$0xf]  ;;  %v2121_v2 = vrot.slane %v9274_v19, 5 }
 0x18b   : > { %v9342_v56 = vsel %vm8838_vm8, %v6449_v51, %v2093_v7  ;;  %v2109_v22 = vrot.slane %v2107_v3, 4  ;;  %v9360_v7 = vld [vmem:[#allocation2 + $0x48] sm:$0xe]  ;;  %v9374_v51 = vsel %vm8838_vm8, %v6451_v21, %v2107_v3  ;;  %v4583_v3 = vrot.slane %v4581_v27, 4  ;;  %v8012_v57 = vld [vmem:[#allocation2 + $0x50] sm:$0x1] }
 0x18c   : > { %v6453_v13 = vrot.slane %v9360_v7, 9  ;;  %v4586_v21 = vrot.slane %v4584_v62, 5  ;;  %v9385_v39 = vrot.slane %v4590_v46, 5  ;;  %v4608_v17 = vshll.u32 %v4535_v10, 16 }
 0x18d   : > { %7159 = vmatpush3.bf16.msra.mxu1 %v7937_v53  ;;  %v6436_v53 = vcombine.low %v9162_v58, %v9164_v43  ;;  %v9378_v12 = vsel %vm8838_vm8, %v2109_v22, %v2110_v23  ;;  %v4605_v23 = vshrl.u32 %v4535_v10, 16  ;;  %v2124_v7 = vrot.slane %v8012_v57, 5  ;;  %v2036_v43 = vld [vmem:[#allocation2 + $0x78] sm:$0xe] }
 0x18e   : > { %7192 = vmatprep.subr.bf16.mxu1 %v9295_v8  ;;  %v4614_v45 = vshll.u32 %v4536_v28, 16  ;;  %v4618_v14 = vshrl.u32 %v4536_v28, 16  ;;  %v2123_v27 = vrot.slane %v2121_v2, 4  ;;  %v2135_v62 = vrot.slane %v9280_v1, 5 }
 0x18f   : > { %v2142_v46 = vrot.slane %v9305_v25, 5  ;;  %v2130_v10 = vrot.slane %v10344_v63, 4  ;;  %v4587_v57 = vor.u32 %v4586_v21, %v4583_v3  ;;  %v4607_v25 = vrot.slane %v4605_v23, 4  ;;  %v8015_v3 = vld [vmem:[#allocation2 + $0x74] sm:$0x1]  ;;  %v7947_v23 = vld [vmem:[#allocation6 + $0x1e8] sm:$0xff]  }
 0x190   : > { %7129 = vmatmul.mubr.bf16.gmra.mrb[16].mxu1 %v6432_v47  ;;  %7353 = vmatmul.mubr.bf16.vlgmr.msra.gmra.mrb[0].mxu0 %v7922_v24  ;;  %v4594_v24 = vshrl.u32 %v4533_v16, 16  ;;  %v9383_v16 = vld [vmem:[#allocation2 + $0x60] sm:$0xe]  ;;  %v8014_v47 = vld [vmem:[#allocation2 + $0x68] sm:$0x1]  ;;  %v4620_v4 = vrot.slane %v4618_v14, 4  ;;  %v10377_v14 = vcombine.low %v9179_v37, %v9181_v60 }
 0x191   : > { %7132 = vmatprep.mubr.bf16.mxu1 %v6433_v29  ;;  %7385 = vmatpush3.bf16.msra.mxu0 %v9154_v54  ;;  %v9366_v54 = vld [vmem:[#allocation2 + $0x54] sm:$0xe]  ;;  %v4610_v29 = vrot.slane %v4608_v17, 5  ;;  %v2137_v63 = vrot.slane %v2135_v62, 4  ;;  %v2145_v21 = vrot.slane %v8015_v3, 5 }
 0x192   : > { %7356 = vmatprep.mubr.bf16.mxu0 %v7926_v49  ;;  %7386 = vmatprep.subr.bf16.mxu0 %v7927_v15  ;;  %v2116_v49 = vrot.slane %v2114_v48, 4  ;;  %v4596_v22 = vrot.slane %v4594_v24, 4  ;;  %v6454_v19 = vrot.slane %v9366_v54, 9  ;;  %v4537_v24 = vld [vmem:[#allocation2 + $0x2c] sm:$0x1] }
 0x193   : > { %v4611_v58 = vor.u32 %v4610_v29, %v4607_v25  ;;  %v8018_v25 = vld [vmem:[#allocation2 + $0x88] sm:$0xf] }
 0x194   : > { %v9396_v54 = vsel %vm8838_vm8, %v2116_v49, %v2117_v18  ;;  %v4597_v1 = vor.u32 %v4596_v22, %v9385_v39  ;;  %v2138_v18 = vrot.slane %v8014_v47, 5  ;;  %v9402_v49 = vrot.slane %v4614_v45, 5 }
 0x195   : > { %7387 = vmatpush3.bf16.msra.mxu0 %v7927_v15  ;;  %v4534_v15 = vld [vmem:[#allocation2 + $0x20] sm:$0x1]  ;;  %v4588_v45 = vrot.slane %v4587_v57, 4  ;;  %v4624_v47 = vshll.u32 %v4537_v24, 16 }
 0x196   : > { %7388 = vmatprep.subr.bf16.mxu0 %v7933_v44  ;;  %v4600_v32 = vshll.u32 %v4534_v15, 16  ;;  %v4598_v17 = vrot.slane %v4597_v1, 4  ;;  %v4621_v60 = vor.u32 %v4620_v4, %v9402_v49  ;;  %v10382_v15 = vcombine.low %v9334_v61, %v9338_v36 }
 0x197   : > { %v9452_v24 = vrot.slane %v4624_v47, 5  ;;  %v4541_v47 = vld [vmem:[#allocation2 + $0x3c] sm:$0xf] }
 0x198   : > { %7133 = vmatmul.mubr.bf16.gmra.mrb[20].mxu1 %v6434_v5  ;;  %v2035_v5 = vld [vmem:[#allocation2 + $0x6c] sm:$0xe]  ;;  %7357 = vmatmul.mubr.bf16.gmra.mrb[4].mxu0 %v7928_v0  ;;  %v8013_v0 = vld [vmem:[#allocation2 + $0x5c] sm:$0x1]  ;;  %v4622_v1 = vrot.slane %v4621_v60, 4  ;;  %v10380_v60 = vcombine.low %v9324_v31, %v9330_v41 }
 0x199   : > { %7136 = vmatprep.mubr.bf16.mxu1 %v6435_v40  ;;  %v9390_v40 = vsel %vm8838_vm8, %v6452_v50, %v2114_v48  ;;  %7360 = vmatprep.mubr.bf16.mxu0 %v7932_v35  ;;  %v2131_v28 = vrot.slane %v8013_v0, 5  ;;  %v7934_v48 = vld [vmem:[#allocation2 + $0x54] sm:$0xff]   ;;  %v7938_v35 = vld [vmem:[#allocation2 + $0x60] sm:$0xff]   ;;  %v6456_v20 = vrot.slane %v2035_v5, 9  ;;  %v2144_v0 = vrot.slane %v2142_v46, 4 }
 0x19a   : > { %7389 = vmatpush3.bf16.msra.mxu0 %v7933_v44  ;;  %v7943_v50 = vld [vmem:[#allocation6 + $0x1e0] sm:$0xff]   ;;  %v6455_v44 = vrot.slane %v9383_v16, 9  ;;  %v9411_v16 = vsel %vm8838_vm8, %v6453_v13, %v2121_v2  ;;  %v4602_v5 = vrot.slane %v4600_v32, 5  ;;  %v9420_v13 = vsel %vm8838_vm8, %v2123_v27, %v2124_v7  ;;  %v4538_v27 = vld [vmem:[#allocation2 + $0x30] sm:$0xf] }
 0x19b   : > { %7390 = vmatprep.subr.bf16.mxu0 %v7939_v30  ;;  %v10378_v2 = vrot.slane %v9277_v11, 5  ;;  %v9431_v29 = vsel %vm8838_vm8, %v2130_v10, %v2131_v28  ;;  %v9439_v7 = vsel %vm8838_vm8, %v2137_v63, %v2138_v18  ;;  %v9443_v11 = vsel %vm8838_vm8, %v6456_v20, %v2142_v46  ;;  %v4539_v10 = vld [vmem:[#allocation2 + $0x34] sm:$0xf]  ;;  %v7951_v28 = vld [vmem:[#allocation6 + $0x1f0] sm:$0xff]  }
 0x19c   : > { %v9435_v32 = vsel %vm8838_vm8, %v6455_v44, %v2135_v62  ;;  %v9447_v4 = vsel %vm8838_vm8, %v2144_v0, %v2145_v21  ;;  %v4593_v62 = vsel %vm8627_vm2, %v4588_v45, %v9385_v39  ;;  %v6457_v63 = vrot.slane %v2036_v43, 9  ;;  %v7940_v0 = vld [vmem:[#allocation2 + $0x6c] sm:$0xff]   ;;  %v9510_v39 = vld [vmem:[#allocation2 + $0x58] sm:$0xf] }
 0x19d   : > { %v9426_v37 = vsel %vm8838_vm8, %v6454_v19, %v10378_v2  ;;  %v2037_v19 = vld [vmem:[#allocation2 + $0x84] sm:$0xe]  ;;  %v4603_v20 = vsel %vm8627_vm2, %v4598_v17, %v4602_v5  ;;  %v4612_v46 = vrot.slane %v4611_v58, 4  ;;  %v4629_v44 = vshrl.u32 %v4538_v27, 16  ;;  %v7942_v17 = vld [vmem:[#allocation2 + $0x78] sm:$0xff]   ;;  %10381 = vst [vmem:[#allocation23_spill] sm:$0xff] %v9510_v39 }
 0x19e   : > { %7391 = vmatpush3.bf16.msra.mxu0 %v7939_v30  ;;  %v4632_v18 = vshll.u32 %v4538_v27, 16  ;;  %v6458_v58 = vrot.slane %v2037_v19, 9  ;;  %v4638_v43 = vshll.u32 %v4539_v10, 16  ;;  %v4542_v2 = vld [vmem:[#allocation2 + $0x40] sm:$0xf]  ;;  %v7955_v27 = vld [vmem:[#allocation6 + $0x1f8] sm:$0xff]   ;;  %v4627_v31 = vsel %vm8627_vm2, %v4622_v1, %v9452_v24 }
 0x19f   : > { %7392 = vmatprep.subr.bf16.mxu0 %v7943_v50  ;;  %v4544_v19 = vld [vmem:[#allocation2 + $0x48] sm:$0xf] }
 0x1a0   : > { %7137 = vmatmul.mubr.bf16.gmra.mrb[24].mxu1 %v6436_v53  ;;  %v8016_v53 = vld [vmem:[#allocation2 + $0x7c] sm:$0xf]  ;;  %7361 = vmatmul.mubr.bf16.gmra.mrb[8].mxu0 %v7934_v48  ;;  %v8017_v48 = vld [vmem:[#allocation2 + $0x80] sm:$0x1]  ;;  %v9494_v24 = vrot.slane %v4638_v43, 5 }
 0x1a1   : > { %7140 = vmatprep.mubr.bf16.mxu1 %v10377_v14  ;;  %v2149_v30 = vrot.slane %v8016_v53, 5  ;;  %7364 = vmatprep.mubr.bf16.mxu0 %v7938_v35  ;;  %v2156_v35 = vrot.slane %v8018_v25, 5  ;;  %v10379_v14 = vcombine.low %v9196_v6, %v9198_v33  ;;  %v4642_v53 = vshrl.u32 %v4539_v10, 16 }
 0x1a2   : > { %7393 = vmatpush3.bf16.msra.mxu0 %v7943_v50  ;;  %v2152_v50 = vrot.slane %v8017_v48, 5  ;;  %v9474_v48 = vcombine.low %v4593_v62, %v4603_v20  ;;  %v4617_v6 = vsel %vm8627_vm2, %v4612_v46, %v9402_v49  ;;  %v4634_v10 = vrot.slane %v4632_v18, 5  ;;  %v9486_v62 = vld [vmem:[#allocation2 + $0x4c] sm:$0xf]  ;;  %v4540_v20 = vld [vmem:[#allocation2 + $0x38] sm:$0x1] }
 0x1a3   : > { %7394 = vmatprep.subr.bf16.mxu0 %v7947_v23  ;;  %v2151_v57 = vrot.slane %v2149_v30, 4  ;;  %v9469_v5 = vsel %vm8838_vm8, %v6457_v63, %v2149_v30  ;;  %v2158_v41 = vrot.slane %v2156_v35, 4  ;;  %v4631_v63 = vrot.slane %v4629_v44, 4  ;;  %v4543_v44 = vld [vmem:[#allocation2 + $0x44] sm:$0x1] }
 0x1a4   : > { %v4653_v25 = vshrl.u32 %v4541_v47, 16  ;;  %v4656_v49 = vshll.u32 %v4541_v47, 16  ;;  %v4662_v46 = vshll.u32 %v4542_v2, 16  ;;  %v4644_v1 = vrot.slane %v4642_v53, 4  ;;  %v7944_v18 = vld [vmem:[#allocation2 + $0x84] sm:$0xff]  }
 0x1a5   : > { %v9481_v33 = vsel %vm8838_vm8, %v2151_v57, %v2152_v50  ;;  %v9492_v50 = vsel %vm8838_vm8, %v6458_v58, %v2156_v35  ;;  %v4686_v47 = vshll.u32 %v9486_v62, 16  ;;  %v9500_v57 = vcombine.low %v4617_v6, %v4627_v31  ;;  %v9506_v53 = vld [vmem:[#allocation2 + $0x90] sm:$0xe] }
 0x1a6   : > { %7395 = vmatpush3.bf16.msra.mxu0 %v7947_v23  ;;  %v8019_v23 = vld [vmem:[#allocation2 + $0x8c] sm:$0x1]  ;;  %v4635_v58 = vor.u32 %v4634_v10, %v4631_v63  ;;  %v4648_v43 = vshll.u32 %v4540_v20, 16  ;;  %v4655_v45 = vrot.slane %v4653_v25, 4  ;;  %v9508_v21 = vrot.slane %v4662_v46, 5  ;;  %v7946_v6 = vld [vmem:[#allocation2 + $0x90] sm:$0xff]  }
 0x1a7   : > { %7396 = vmatprep.subr.bf16.mxu0 %v7951_v28  ;;  %v2159_v30 = vrot.slane %v8019_v23, 5  ;;  %v9498_v23 = vld [vmem:[#allocation6 + $0x200] sm:$0xff]   ;;  %v4672_v31 = vshll.u32 %v4543_v44, 16  ;;  %v10383_v10 = vcombine.low %v9342_v56, %v9350_v9  ;;  %v7949_v20 = vld [vmem:[#allocation6 + $0xd0] sm:$0xff]   ;;  %v9520_v46 = vrot.slane %v4686_v47, 5 }
 0x1a8   : > { %7141 = vmatmul.mubr.bf16.gmra.mrb[28].mxu1 %v10379_v14  ;;  %7365 = vmatmul.mubr.bf16.gmra.mrb[12].mxu0 %v7940_v0  ;;  %v4666_v14 = vshrl.u32 %v4542_v2, 16  ;;  %v4677_v0 = vshrl.u32 %v4544_v19, 16  ;;  %v7945_v2 = vld [vmem:[#allocation6 + $0xc8] sm:$0xff]   ;;  %v9523_v36 = vrot.slane %v4648_v43, 5  ;;  %v4714_v56 = vshrl.u32 %v9510_v39, 16 }
 0x1a9   : > { %7160 = vmatprep.mubr.bf16.mxu1 %v10380_v60  ;;  %7368 = vmatprep.mubr.bf16.mxu0 %v7942_v17  ;;  %v4680_v60 = vshll.u32 %v4544_v19, 16  ;;  %v4690_v17 = vshrl.u32 %v9486_v62, 16  ;;  %v9504_v35 = vsel %vm8838_vm8, %v2158_v41, %v2159_v30  ;;  %v4658_v19 = vrot.slane %v4656_v49, 5  ;;  %v8020_v44 = vld [vmem:[#allocation2 + $0x94] sm:$0xf] }
 0x1aa   : > { %7397 = vmatpush3.bf16.msra.mxu0 %v7951_v28  ;;  %v4547_v28 = vld [vmem:[#allocation2 + $0x54] sm:$0xf]  ;;  %v4668_v3 = vrot.slane %v4666_v14, 4  ;;  %v4645_v30 = vor.u32 %v4644_v1, %v9494_v24  ;;  %v4679_v25 = vrot.slane %v4677_v0, 4  ;;  %v9530_v9 = vrot.slane %v4635_v58, 4 }
 0x1ab   : > { %7398 = vmatprep.subr.bf16.mxu0 %v7955_v27  ;;  %v4701_v41 = vshrl.u32 %v4547_v28, 16  ;;  %v4704_v63 = vshll.u32 %v4547_v28, 16  ;;  %v4682_v49 = vrot.slane %v4680_v60, 5  ;;  %v4692_v61 = vrot.slane %v4690_v17, 4  ;;  %v2039_v60 = vld [vmem:[#allocation2 + $0x9c] sm:$0xe] }
 0x1ac   : > { %v4659_v14 = vor.u32 %v4658_v19, %v4655_v45  ;;  %v4669_v1 = vor.u32 %v4668_v3, %v9508_v21  ;;  %v2163_v0 = vrot.slane %v8020_v44, 5  ;;  %v9533_v47 = vrot.slane %v4645_v30, 4  ;;  %v8021_v17 = vld [vmem:[#allocation2 + $0xa0] sm:$0xf]  ;;  %v7953_v3 = vld [vmem:[#allocation6 + $0xd8] sm:$0xff]  }
 0x1ad   : > { %v2170_v28 = vrot.slane %v8021_v17, 5  ;;  %v4703_v43 = vrot.slane %v4701_v41, 4  ;;  %v4683_v22 = vor.u32 %v4682_v49, %v4679_v25  ;;  %v8022_v58 = vld [vmem:[#allocation2 + $0x98] sm:$0x1]  ;;  %v6460_v44 = vrot.slane %v2039_v60, 9 }
 0x1ae   : > { %7399 = vmatpush3.bf16.msra.mxu0 %v7955_v27  ;;  %v9526_v27 = vld [vmem:[#allocation2 + $0x50] sm:$0x1]  ;;  %v2166_v19 = vrot.slane %v8022_v58, 5  ;;  %v4716_v30 = vrot.slane %v4714_v56, 4  ;;  %v4670_v41 = vrot.slane %v4669_v1, 4  ;;  %v10385_v49 = vcombine.low %v9346_v52, %v9354_v26 }
 0x1af   : > { %7432 = vmatprep.subr.bf16.mxu0 %v9498_v23  ;;  %10384 = vst [vmem:[#allocation24_spill] sm:$0xff] %v9526_v27  ;;  %v4696_v45 = vshll.u32 %v9526_v27, 16  ;;  %v9545_v25 = vld [vmem:[#allocation2 + $0x5c] sm:$0x1]  ;;  %v2172_v56 = vrot.slane %v2170_v28, 4 }
 0x1b0   : > { %7161 = vmatmul.mubr.bf16.vlgmr.msra.gmra.mrb[0].mxu1 %v10382_v15  ;;  %v6459_v15 = vrot.slane %v9506_v53, 9  ;;  %7369 = vmatmul.mubr.bf16.gmra.mrb[16].mxu0 %v7944_v18  ;;  %v4706_v53 = vrot.slane %v4704_v63, 5  ;;  %v4693_v18 = vor.u32 %v4692_v61, %v9520_v46  ;;  %v2165_v63 = vrot.slane %v2163_v0, 4  ;;  %v7950_v61 = vld [vmem:[#allocation2 + $0xa8] sm:$0xff]   ;;  %v8023_v60 = vld [vmem:[#allocation2 + $0xa4] sm:$0x1] }
 0x1b1   : > { %7193 = vmatpush3.bf16.msra.mxu1 %v9295_v8  ;;  %7164 = vmatprep.mubr.bf16.mxu1 %v10383_v10  ;;  %v4710_v8 = vshll.u32 %v9510_v39, 16  ;;  %v9535_v10 = vrot.slane %v4672_v31, 5  ;;  %v4660_v31 = vrot.slane %v4659_v14, 4  ;;  %v2173_v17 = vrot.slane %v8023_v60, 5  ;;  %v8024_v26 = vld [vmem:[#allocation2 + $0xac] sm:$0xf] }
 0x1b2   : > { %7194 = vmatprep.subr.bf16.mxu1 %v7945_v2  ;;  %7372 = vmatprep.mubr.bf16.mxu0 %v7946_v6  ;;  %v4707_v58 = vor.u32 %v4706_v53, %v4703_v43  ;;  %v4684_v14 = vrot.slane %v4683_v22, 4  ;;  %v4694_v1 = vrot.slane %v4693_v18, 4  ;;  %v4698_v52 = vrot.slane %v4696_v45, 5  ;;  %v2041_v39 = vld [vmem:[#allocation2 + $0xb4] sm:$0xe]  ;;  %v7957_v27 = vld [vmem:[#allocation6 + $0xe0] sm:$0xff]  }
 0x1b3   : > { %v9539_v6 = vrot.slane %v4710_v8, 5  ;;  %v4651_v8 = vsel %vm8627_vm2, %v9533_v47, %v9523_v36  ;;  %v9559_v36 = vsel %vm8838_vm8, %v6459_v15, %v2163_v0  ;;  %v9563_v47 = vsel %vm8838_vm8, %v6460_v44, %v2170_v28  ;;  %v8025_v53 = vld [vmem:[#allocation2 + $0xb8] sm:$0xf]  ;;  %v8026_v44 = vld [vmem:[#allocation2 + $0xb0] sm:$0x1] }
 0x1b4   : > { %v4665_v22 = vsel %vm8627_vm2, %v4660_v31, %v9508_v21  ;;  %v9575_v15 = vsel %vm8838_vm8, %v2165_v63, %v2166_v19  ;;  %v9579_v28 = vsel %vm8838_vm8, %v2172_v56, %v2173_v17  ;;  %v4708_v43 = vrot.slane %v4707_v58, 4  ;;  %v7959_v21 = vld [vmem:[#allocation6 + $0xe8] sm:$0xff]   ;;  %v7952_v56 = vld [vmem:[#allocation2 + $0xb4] sm:$0xff]   ;;  %v9644_v31 = vld [vmem:[#allocation2 + $0x88] sm:$0xf] }
 0x1b5   : > { %7195 = vmatpush3.bf16.msra.mxu1 %v7945_v2  ;;  %v4641_v2 = vsel %vm8627_vm2, %v9530_v9, %v9494_v24  ;;  %v2040_v24 = vld [vmem:[#allocation2 + $0xa8] sm:$0xe]  ;;  %v10386_v9 = vcombine.low %v9374_v51, %v9378_v12  ;;  %v4717_v51 = vor.u32 %v4716_v30, %v9539_v6  ;;  %v4720_v12 = vshll.u32 %v9545_v25, 16  ;;  %10392 = vst [vmem:[#allocation28_spill] sm:$0xff] %v9644_v31 }
 0x1b6   : > { %7196 = vmatprep.subr.bf16.mxu1 %v7949_v20  ;;  %v6461_v0 = vrot.slane %v2040_v24, 9  ;;  %v2184_v18 = vrot.slane %v8025_v53, 5  ;;  %v4699_v45 = vsel %vm8627_vm2, %v4694_v1, %v4698_v52  ;;  %v2180_v30 = vrot.slane %v8026_v44, 5  ;;  %v7954_v24 = vld [vmem:[#allocation2 + $0xc0] sm:$0xff]  }
 0x1b7   : > { %v4722_v63 = vrot.slane %v4720_v12, 5 }
 0x1b8   : > { %7165 = vmatmul.mubr.bf16.gmra.mrb[4].mxu1 %v10385_v49  ;;  %v2177_v49 = vrot.slane %v8024_v26, 5  ;;  %7373 = vmatmul.mubr.bf16.gmra.mrb[20].mxu0 %v7948_v34  ;;  %v6462_v34 = vrot.slane %v2041_v39, 9  ;;  %v4718_v39 = vrot.slane %v4717_v51, 4  ;;  %v2186_v52 = vrot.slane %v2184_v18, 4  ;;  %v9614_v26 = vld [vmem:[#allocation2 + $0x70] sm:$0xf] }
 0x1b9   : > { %7168 = vmatprep.mubr.bf16.mxu1 %v10386_v9  ;;  %7197 = vmatpush3.bf16.msra.mxu1 %v7949_v20  ;;  %v4675_v20 = vsel %vm8627_vm2, %v4670_v41, %v9535_v10  ;;  %v4689_v10 = vsel %vm8627_vm2, %v4684_v14, %v9520_v46  ;;  %v9588_v41 = vcombine.low %v4641_v2, %v4651_v8  ;;  %v4553_v2 = vld [vmem:[#allocation2 + $0x6c] sm:$0xf]  ;;  %v4762_v53 = vshrl.u32 %v9614_v26, 16 }
 0x1ba   : > { %7198 = vmatprep.subr.bf16.mxu1 %v7953_v3  ;;  %7376 = vmatprep.mubr.bf16.mxu0 %v7950_v61  ;;  %v2179_v19 = vrot.slane %v2177_v49, 4  ;;  %v9590_v61 = vld [vmem:[#allocation2 + $0x64] sm:$0xf]  ;;  %v9592_v60 = vcombine.low %v4665_v22, %v4675_v20  ;;  %v9600_v58 = vsel %vm8838_vm8, %v6461_v0, %v2177_v49  ;;  %v10387_v8 = vcombine.low %v9390_v40, %v9396_v54  ;;  %v4556_v49 = vld [vmem:[#allocation2 + $0x78] sm:$0xf]  ;;  %v7961_v20 = vld [vmem:[#allocation6 + $0xf0] sm:$0xff]  }
 0x1bb   : > { %v9605_v9 = vcombine.low %v4689_v10, %v4699_v45  ;;  %v4713_v14 = vsel %vm8627_vm2, %v4708_v43, %v9539_v6  ;;  %v9612_v1 = vsel %vm8838_vm8, %v6462_v34, %v2184_v18  ;;  %10388 = vst [vmem:[#allocation25_spill] sm:$0xff] %v9614_v26  ;;  %v10389_v51 = vcombine.low %v9411_v16, %v9420_v13  ;;  %v9624_v22 = vld [vmem:[#allocation2 + $0x7c] sm:$0xf] }
 0x1bc   : > { %v9621_v40 = vsel %vm8838_vm8, %v2179_v19, %v2180_v30  ;;  %v4734_v6 = vshll.u32 %v9590_v61, 16  ;;  %10390 = vst [vmem:[#allocation26_spill] sm:$0xff] %v9624_v22  ;;  %v4723_v0 = vsel %vm8627_vm2, %v4718_v39, %v4722_v63  ;;  %v4738_v43 = vshrl.u32 %v9590_v61, 16  ;;  %v8027_v19 = vld [vmem:[#allocation2 + $0xbc] sm:$0x1] }
 0x1bd   : > { %7199 = vmatpush3.bf16.msra.mxu1 %v7953_v3  ;;  %v4550_v3 = vld [vmem:[#allocation2 + $0x60] sm:$0xf]  ;;  %v4749_v16 = vshrl.u32 %v4553_v2, 16  ;;  %v4752_v13 = vshll.u32 %v4553_v2, 16  ;;  %v4758_v34 = vshll.u32 %v9614_v26, 16  ;;  %v4773_v18 = vshrl.u32 %v4556_v49, 16 }
 0x1be   : > { %7200 = vmatprep.subr.bf16.mxu1 %v7957_v27  ;;  %v4725_v54 = vshrl.u32 %v4550_v3, 16  ;;  %v4728_v12 = vshll.u32 %v4550_v3, 16  ;;  %v4776_v10 = vshll.u32 %v4556_v49, 16  ;;  %v2187_v44 = vrot.slane %v8027_v19, 5  ;;  %v9635_v30 = vld [vmem:[#allocation2 + $0x74] sm:$0x1] }
 0x1bf   : > { %v4782_v39 = vshll.u32 %v9624_v22, 16  ;;  %v4786_v63 = vshrl.u32 %v9624_v22, 16  ;;  %v7956_v3 = vld [vmem:[#allocation2 + $0xcc] sm:$0xff]   ;;  %v9641_v49 = vrot.slane %v4734_v6, 5  ;;  %v4740_v45 = vrot.slane %v4738_v43, 4 }
 0x1c0   : > { %7169 = vmatmul.mubr.bf16.gmra.mrb[8].mxu1 %v10387_v8  ;;  %7377 = vmatmul.mubr.bf16.gmra.mrb[24].mxu0 %v7952_v56  ;;  %v9639_v56 = vcombine.low %v4713_v14, %v4723_v0  ;;  %v7963_v2 = vld [vmem:[#allocation6 + $0xf8] sm:$0xff]   ;;  %v4727_v8 = vrot.slane %v4725_v54, 4  ;;  %v4751_v17 = vrot.slane %v4749_v16, 4  ;;  %v4754_v46 = vrot.slane %v4752_v13, 5 }
 0x1c1   : > { %7172 = vmatprep.mubr.bf16.mxu1 %v10389_v51  ;;  %7201 = vmatpush3.bf16.msra.mxu1 %v7957_v27  ;;  %v9629_v27 = vld [vmem:[#allocation2 + $0x68] sm:$0x1]  ;;  %v4730_v51 = vrot.slane %v4728_v12, 5  ;;  %v9646_v26 = vrot.slane %v4758_v34, 5  ;;  %v4764_v22 = vrot.slane %v4762_v53, 4  ;;  %v4778_v14 = vrot.slane %v4776_v10, 5 }
 0x1c2   : > { %7202 = vmatprep.subr.bf16.mxu1 %v7959_v21  ;;  %7380 = vmatprep.mubr.bf16.mxu0 %v7954_v24  ;;  %10391 = vst [vmem:[#allocation27_spill] sm:$0xff] %v9639_v56  ;;  %v4559_v24 = vld [vmem:[#allocation2 + $0x84] sm:$0xf]  ;;  %v4744_v19 = vshll.u32 %v9629_v27, 16  ;;  %v4562_v0 = vld [vmem:[#allocation2 + $0x90] sm:$0xf]  ;;  %v10393_v54 = vcombine.low %v9426_v37, %v9431_v29  ;;  %v10394_v13 = vcombine.low %v9435_v32, %v9439_v7 }
 0x1c3   : > { %v9651_v12 = vld [vmem:[#allocation2 + $0x80] sm:$0x1]  ;;  %v9653_v6 = vrot.slane %v4782_v39, 5  ;;  %v4788_v43 = vrot.slane %v4786_v63, 4  ;;  %v4797_v56 = vshrl.u32 %v4559_v24, 16  ;;  %v4800_v16 = vshll.u32 %v4559_v24, 16 }
 0x1c4   : > { %v4731_v34 = vor.u32 %v4730_v51, %v4727_v8  ;;  %v4768_v53 = vshll.u32 %v9635_v30, 16  ;;  %v4810_v37 = vshrl.u32 %v9644_v31, 16  ;;  %v9663_v29 = vsel %vm8838_vm8, %v2186_v52, %v2187_v44  ;;  %v9670_v51 = vld [vmem:[#allocation2 + $0x94] sm:$0xf]  ;;  %v9674_v44 = vld [vmem:[#allocation2 + $0x8c] sm:$0x1] }
 0x1c5   : > { %7203 = vmatpush3.bf16.msra.mxu1 %v7959_v21  ;;  %v4775_v21 = vrot.slane %v4773_v18, 4  ;;  %v4806_v18 = vshll.u32 %v9644_v31, 16  ;;  %v9665_v10 = vrot.slane %v4744_v19, 5  ;;  %v4821_v39 = vshrl.u32 %v4562_v0, 16  ;;  %10395 = vst [vmem:[#allocation29_spill] sm:$0xff] %v9670_v51 }
 0x1c6   : > { %7204 = vmatprep.subr.bf16.mxu1 %v7961_v20  ;;  %v4824_v63 = vshll.u32 %v4562_v0, 16  ;;  %v4741_v32 = vor.u32 %v4740_v45, %v9641_v49  ;;  %v4755_v7 = vor.u32 %v4754_v46, %v4751_v17  ;;  %v4792_v8 = vshll.u32 %v9651_v12, 16 }
 0x1c7   : > { %v4779_v24 = vor.u32 %v4778_v14, %v4775_v21  ;;  %v4789_v52 = vor.u32 %v4788_v43, %v9653_v6  ;;  %v4799_v19 = vrot.slane %v4797_v56, 4  ;;  %v9676_v0 = vrot.slane %v4731_v34, 4  ;;  %v9687_v43 = vld [vmem:[#allocation2 + $0xa0] sm:$0xf] }
 0x1c8   : > { %7173 = vmatmul.mubr.bf16.gmra.mrb[12].mxu1 %v10393_v54  ;;  %7381 = vmatmul.mubr.bf16.gmra.mrb[28].mxu0 %v7956_v3  ;;  %v4802_v54 = vrot.slane %v4800_v16, 5  ;;  %v9678_v45 = vrot.slane %v4768_v53, 5  ;;  %v9680_v46 = vrot.slane %v4806_v18, 5  ;;  %v4812_v17 = vrot.slane %v4810_v37, 4  ;;  %v9682_v3 = vld [vmem:[#allocation6 + $0x100] sm:$0xff]   ;;  %v7960_v18 = vld [vmem:[#allocation6 + $0x208] sm:$0xff]  }
 0x1c9   : > { %7176 = vmatprep.mubr.bf16.mxu1 %v10394_v13  ;;  %7205 = vmatpush3.bf16.msra.mxu1 %v7961_v20  ;;  %v4765_v20 = vor.u32 %v4764_v22, %v9646_v26  ;;  %v4565_v22 = vld [vmem:[#allocation2 + $0x9c] sm:$0xf]  ;;  %10396 = vst [vmem:[#allocation30_spill] sm:$0xff] %v9682_v3  ;;  %v4826_v21 = vrot.slane %v4824_v63, 5  ;;  %v4830_v14 = vshll.u32 %v9670_v51, 16  ;;  %v4834_v56 = vshrl.u32 %v9670_v51, 16 }
 0x1ca   : > { %7206 = vmatprep.subr.bf16.mxu1 %v7963_v2  ;;  %7400 = vmatprep.mubr.bf16.mxu0 %v9474_v48  ;;  %v4823_v48 = vrot.slane %v4821_v39, 4  ;;  %v4742_v16 = vrot.slane %v4741_v32, 4  ;;  %v4794_v34 = vrot.slane %v4792_v8, 5  ;;  %v10397_v53 = vcombine.low %v9443_v11, %v9447_v4  ;;  %v9696_v51 = vld [vmem:[#allocation2 + $0x98] sm:$0x1] }
 0x1cb   : > { %v4766_v13 = vrot.slane %v4765_v20, 4  ;;  %v4780_v37 = vrot.slane %v4779_v24, 4  ;;  %v4790_v31 = vrot.slane %v4789_v52, 4  ;;  %v4816_v39 = vshll.u32 %v9674_v44, 16 }
 0x1cc   : > { %v10398_v63 = vcombine.low %v9469_v5, %v9481_v33  ;;  %v4845_v32 = vshrl.u32 %v4565_v22, 16  ;;  %v4854_v20 = vshll.u32 %v9687_v43, 16  ;;  %v4858_v8 = vshrl.u32 %v9687_v43, 16 }
 0x1cd   : > { %7207 = vmatpush3.bf16.msra.mxu1 %v7963_v2  ;;  %v4756_v2 = vrot.slane %v4755_v7, 4  ;;  %v4848_v7 = vshll.u32 %v4565_v22, 16  ;;  %v4813_v11 = vor.u32 %v4812_v17, %v9680_v46  ;;  %v4827_v4 = vor.u32 %v4826_v21, %v4823_v48  ;;  %v4568_v17 = vld [vmem:[#allocation2 + $0xa8] sm:$0xf] }
 0x1ce   : > { %7480 = vmatprep.subr.bf16.mxu1 %v9682_v3  ;;  %v4803_v3 = vor.u32 %v4802_v54, %v4799_v19  ;;  %v9701_v24 = vrot.slane %v4830_v14, 5  ;;  %v4836_v52 = vrot.slane %v4834_v56, 4  ;;  %v4737_v5 = vsel %vm8627_vm2, %v9676_v0, %v9641_v49 }
 0x1cf   : > { %v4747_v33 = vsel %vm8627_vm2, %v4742_v16, %v9665_v10  ;;  %v4761_v19 = vsel %vm8627_vm2, %v4756_v2, %v9646_v26  ;;  %v4771_v54 = vsel %vm8627_vm2, %v4766_v13, %v9678_v45  ;;  %v4795_v49 = vsel %vm8627_vm2, %v4790_v31, %v4794_v34  ;;  %v9727_v26 = vld [vmem:[#allocation2 + $0xa4] sm:$0x1]  ;;  %v7962_v45 = vld [vmem:[#allocation6 + $0x210] sm:$0xff]  }
 0x1d0   : > { %7177 = vmatmul.mubr.bf16.gmra.mrb[16].mxu1 %v10397_v53  ;;  %7401 = vmatmul.mubr.bf16.vlgmr.msra.gmra.mrb[0].mxu0 %v9500_v57  ;;  %v4785_v57 = vsel %vm8627_vm2, %v4780_v37, %v9653_v6  ;;  %v9724_v10 = vrot.slane %v4803_v3, 4  ;;  %v4840_v0 = vshll.u32 %v9696_v51, 16  ;;  %v4847_v22 = vrot.slane %v4845_v32, 4  ;;  %v9741_v16 = vld [vmem:[#allocation2 + $0xac] sm:$0xf] }
 0x1d1   : > { %7180 = vmatprep.mubr.bf16.mxu1 %v10398_v63  ;;  %7433 = vmatpush3.bf16.msra.mxu0 %v9498_v23  ;;  %v4850_v23 = vrot.slane %v4848_v7, 5  ;;  %v9729_v48 = vrot.slane %v4854_v20, 5  ;;  %v9731_v21 = vrot.slane %v4813_v11, 4  ;;  %v9733_v6 = vrot.slane %v4816_v39, 5  ;;  %v7964_v20 = vld [vmem:[#allocation6 + $0x218] sm:$0xff]  }
 0x1d2   : > { %7404 = vmatprep.mubr.bf16.mxu0 %v9588_v41  ;;  %7434 = vmatprep.subr.bf16.mxu0 %v7960_v18  ;;  %v4860_v41 = vrot.slane %v4858_v8, 4  ;;  %v9735_v14 = vrot.slane %v4827_v4, 4  ;;  %v4837_v31 = vor.u32 %v4836_v52, %v9701_v24  ;;  %v6478_v3 = vcombine.low %v9612_v1, %v9663_v29  ;;  %v5289_v8 = vld [vmem:[#allocation2 + $0x48] sm:$0xe]  ;;  %v5290_v11 = vld [vmem:[#allocation2 + $0x54] sm:$0xe] }
 0x1d3   : > { %v4864_v56 = vshll.u32 %v9727_v26, 16  ;;  %v4869_v2 = vshrl.u32 %v4568_v17, 16  ;;  %v4872_v13 = vshll.u32 %v4568_v17, 16  ;;  %v10399_v34 = vor.u32 %v9301_v55, %v9299_v59  ;;  %v9777_v52 = vld [vmem:[#allocation2 + $0xb0] sm:$0x1]  ;;  %v10402_v17 = vld [vmem:[#allocation24_spill] sm:$0xff] }
 0x1d4   : > { %v10400_v37 = vcombine.low %v9492_v50, %v9504_v35  ;;  %v9751_v39 = vcombine.low %v4737_v5, %v4747_v33  ;;  %v9753_v63 = vcombine.low %v4761_v19, %v4771_v54  ;;  %v9755_v32 = vcombine.low %v4785_v57, %v4795_v49 }
 0x1d5   : > { %v9746_v53 = vrot.slane %v10399_v34, 4  ;;  %7435 = vmatpush3.bf16.msra.mxu0 %v7960_v18  ;;  %v10401_v7 = vcombine.low %v9559_v36, %v9575_v15  ;;  %v9764_v50 = vrot.slane %v4840_v0, 5  ;;  %v4851_v35 = vor.u32 %v4850_v23, %v4847_v22  ;;  %v7976_v15 = vld [vmem:[#allocation6 + $0x238] sm:$0xff]  }
 0x1d6   : > { %7436 = vmatprep.subr.bf16.mxu0 %v7962_v45  ;;  %v4861_v18 = vor.u32 %v4860_v41, %v9729_v48  ;;  %v9775_v4 = vrot.slane %v4837_v31, 4  ;;  %v4878_v5 = vshll.u32 %v9741_v16, 16  ;;  %v9781_v33 = vrot.slane %v4864_v56, 5  ;;  %v5291_v41 = vld [vmem:[#allocation2 + $0x60] sm:$0xe] }
 0x1d7   : > { %v9783_v19 = vrot.slane %v4869_v2, 4  ;;  %v9785_v54 = vrot.slane %v4872_v13, 5  ;;  %v4882_v57 = vshrl.u32 %v9741_v16, 16  ;;  %v6627_v49 = vrot.slane %v5289_v8, 9  ;;  %v10403_v13 = vld [vmem:[#allocation23_spill] sm:$0xff] }
 0x1d8   : > { %7181 = vmatmul.mubr.bf16.gmra.mrb[20].mxu1 %v10400_v37  ;;  %7405 = vmatmul.mubr.bf16.gmra.mrb[4].mxu0 %v9592_v60  ;;  %v5379_v0 = vrot.slane %v9486_v62, 5  ;;  %v5382_v22 = vrot.slane %v10402_v17, 5  ;;  %v6628_v23 = vrot.slane %v5290_v11, 9  ;;  %v7967_v60 = vld [vmem:[#allocation6 + $0x220] sm:$0xff]   ;;  %v9791_v31 = vrot.slane %v4851_v35, 4 }
 0x1d9   : > { %7184 = vmatprep.mubr.bf16.mxu1 %v10401_v7  ;;  %7408 = vmatprep.mubr.bf16.mxu0 %v9605_v9  ;;  %v9793_v56 = vrot.slane %v4861_v18, 4  ;;  %v4888_v2 = vshll.u32 %v9777_v52, 16  ;;  %v5386_v34 = vrot.slane %v10403_v13, 5  ;;  %v9797_v37 = vrot.slane %v4878_v5, 5  ;;  %v5292_v7 = vld [vmem:[#allocation2 + $0x6c] sm:$0xe] }
 0x1da   : > { %7437 = vmatpush3.bf16.msra.mxu0 %v7962_v45  ;;  %v9801_v9 = vsel %vm8838_vm8, %v6627_v49, %v5379_v0  ;;  %v5381_v62 = vrot.slane %v5379_v0, 4  ;;  %v5389_v45 = vrot.slane %v9545_v25, 5  ;;  %v4875_v35 = vor.u32 %v9785_v54, %v9783_v19  ;;  %v4571_v0 = vld [vmem:[#allocation2 + $0xb4] sm:$0xf]  ;;  %v10407_v13 = vld [vmem:[#allocation27_spill] sm:$0xff] }
 0x1db   : > { %7438 = vmatprep.subr.bf16.mxu0 %v7964_v20  ;;  %v9808_v18 = vsel %vm8838_vm8, %v6628_v23, %v5386_v34  ;;  %v5388_v8 = vrot.slane %v5386_v34, 4  ;;  %v6629_v11 = vrot.slane %v5291_v41, 9  ;;  %v10404_v5 = vcombine.low %v9563_v47, %v9579_v28  ;;  %v7970_v23 = vld [vmem:[#allocation6 + $0x228] sm:$0xff]   ;;  %v9831_v41 = vld [vmem:[#allocation2 + $0xb8] sm:$0xf] }
 0x1dc   : > { %v9813_v49 = vrot.slane %v4882_v57, 4  ;;  %v9817_v25 = vsel %vm8838_vm8, %v5381_v62, %v5382_v22  ;;  %v5393_v19 = vrot.slane %v9590_v61, 5  ;;  %v5396_v54 = vrot.slane %v9629_v27, 5  ;;  %v10406_v57 = vld [vmem:[#allocation25_spill] sm:$0xff] }
 0x1dd   : > { %v10405_v17 = vcombine.low %v9600_v58, %v9621_v40  ;;  %v9828_v28 = vsel %vm8838_vm8, %v5388_v8, %v5389_v45  ;;  %v5400_v22 = vrot.slane %v10406_v57, 5  ;;  %v5403_v27 = vrot.slane %v9635_v30, 5  ;;  %v10408_v30 = vld [vmem:[#allocation22_spill] sm:$0xff] }
 0x1de   : > { %7439 = vmatpush3.bf16.msra.mxu0 %v7964_v20  ;;  %v6630_v20 = vrot.slane %v5292_v7, 9  ;;  %v9837_v58 = vsel %vm8838_vm8, %v6629_v11, %v5393_v19  ;;  %v5395_v40 = vrot.slane %v5393_v19, 4  ;;  %v4893_v62 = vshrl.u32 %v4571_v0, 16  ;;  %v2923_v19 = vld [vmem:[#allocation2 + $0x78] sm:$0xf] }
 0x1df   : > { %7440 = vmatprep.subr.bf16.mxu0 %v7967_v60  ;;  %v5402_v7 = vrot.slane %v5400_v22, 4  ;;  %v9854_v8 = vrot.slane %v4888_v2, 5  ;;  %v4896_v11 = vshll.u32 %v4571_v0, 16  ;;  %v9871_v57 = vrot.slane %v4875_v35, 4 }
 0x1e0   : > { %7185 = vmatmul.mubr.bf16.gmra.mrb[24].mxu1 %v10404_v5  ;;  %7409 = vmatmul.mubr.bf16.gmra.mrb[8].mxu0 %v10407_v13  ;;  %v9847_v45 = vsel %vm8838_vm8, %v6630_v20, %v5400_v22  ;;  %v9858_v5 = vsel %vm8838_vm8, %v5395_v40, %v5396_v54  ;;  %v4902_v20 = vshll.u32 %v9831_v41, 16  ;;  %v5293_v54 = vld [vmem:[#allocation2 + $0x78] sm:$0xe]  ;;  %v4885_v22 = vor.u32 %v9813_v49, %v9797_v37  ;;  %v4574_v13 = vld [vmem:[#allocation2 + $0xc0] sm:$0xf] }
 0x1e1   : > { %7188 = vmatprep.mubr.bf16.mxu1 %v10405_v17  ;;  %7412 = vmatprep.mubr.bf16.mxu0 %v9751_v39  ;;  %v7965_v17 = vld [vmem:[#allocation2 + $0xc] sm:$0xff]   ;;  %v4867_v39 = vsel %vm8627_vm2, %v9793_v56, %v9781_v33  ;;  %v9869_v0 = vsel %vm8838_vm8, %v5402_v7, %v5403_v27  ;;  %v4906_v40 = vshrl.u32 %v9831_v41, 16  ;;  %v5294_v56 = vld [vmem:[#allocation2 + $0x84] sm:$0xe]  ;;  %v9878_v61 = vrot.slane %v4893_v62, 4 }
 0x1e2   : > { %7441 = vmatpush3.bf16.msra.mxu0 %v7967_v60  ;;  %v7973_v60 = vld [vmem:[#allocation6 + $0x230] sm:$0xff]   ;;  %v3161_v2 = vshrl.u32 %v2923_v19, 16  ;;  %v3164_v47 = vshll.u32 %v2923_v19, 16  ;;  %v3183_v35 = vsel %vm8627_vm2, %v9746_v53, %v10408_v30  ;;  %v9887_v49 = vrot.slane %v4896_v11, 5  ;;  %v9891_v53 = vld [vmem:[#allocation2 + $0xc4] sm:$0xf] }
 0x1e3   : > { %7442 = vmatprep.subr.bf16.mxu0 %v7970_v23  ;;  %v6631_v27 = vrot.slane %v5293_v54, 9  ;;  %v10409_v7 = vld [vmem:[#allocation26_spill] sm:$0xff]  ;;  %v5410_v62 = vrot.slane %v9651_v12, 5  ;;  %v4917_v19 = vshrl.u32 %v4574_v13, 16  ;;  %v6632_v36 = vrot.slane %v5294_v56, 9  ;;  %v7966_v54 = vld [vmem:[#allocation2 + $0x18] sm:$0xff]  }
 0x1e4   : > { %v5407_v33 = vrot.slane %v10409_v7, 5  ;;  %v3163_v34 = vrot.slane %v3161_v2, 4  ;;  %v3166_v55 = vrot.slane %v3164_v47, 5  ;;  %v4920_v30 = vshll.u32 %v4574_v13, 16  ;;  %v9899_v12 = vld [vmem:[#allocation2 + $0xbc] sm:$0x1] }
 0x1e5   : > { %v9901_v11 = vrot.slane %v4902_v20, 5  ;;  %v5417_v2 = vrot.slane %v9674_v44, 5  ;;  %v4886_v13 = vrot.slane %v4885_v22, 4  ;;  %v7968_v56 = vld [vmem:[#allocation2 + $0x24] sm:$0xff]   ;;  %v10412_v7 = vsel %vm8627_vm2, %v9724_v10, %v9680_v46 }
 0x1e6   : > { %7443 = vmatpush3.bf16.msra.mxu0 %v7970_v23  ;;  %v9895_v1 = vsel %vm8838_vm8, %v6631_v27, %v5407_v33  ;;  %v5409_v29 = vrot.slane %v5407_v33, 4  ;;  %v3167_v47 = vor.u32 %v3166_v55, %v3163_v34  ;;  %v4930_v55 = vshrl.u32 %v9891_v53, 16 }
 0x1e7   : > { %7444 = vmatprep.subr.bf16.mxu0 %v7973_v60  ;;  %v4912_v34 = vshll.u32 %v9899_v12, 16  ;;  %v4922_v22 = vrot.slane %v4920_v30, 5 }
 0x1e8   : > { %7189 = vmatmul.mubr.bf16.gmra.mrb[28].mxu1 %v6478_v3  ;;  %v10410_v3 = vld [vmem:[#allocation28_spill] sm:$0xff]  ;;  %7413 = vmatmul.mubr.bf16.gmra.mrb[12].mxu0 %v9753_v63  ;;  %v9909_v33 = vsel %vm8838_vm8, %v5409_v29, %v5410_v62  ;;  %v3168_v44 = vrot.slane %v3167_v47, 4  ;;  %v10413_v29 = vsel %vm8627_vm2, %v9775_v4, %v9764_v50  ;;  %v10416_v47 = vld [vmem:[#allocation30_spill] sm:$0xff] }
 0x1e9   : > { %7208 = vmatprep.mubr.bf16.mxu1 %v7965_v17  ;;  %v5414_v23 = vrot.slane %v10410_v3, 5  ;;  %v9903_v17 = vrot.slane %v4906_v40, 4  ;;  %7416 = vmatprep.mubr.bf16.mxu0 %v9755_v32  ;;  %v4926_v40 = vshll.u32 %v9891_v53, 16  ;;  %v6647_v32 = vcombine.low %v9895_v1, %v9909_v33  ;;  %v9964_v50 = vld [vmem:[#allocation2 + $0xc8] sm:$0x1] }
 0x1ea   : > { %7445 = vmatpush3.bf16.msra.mxu0 %v7973_v60  ;;  %v4919_v60 = vrot.slane %v4917_v19, 4  ;;  %v3173_v19 = vsel %vm8627_vm2, %v3168_v44, %v9299_v59  ;;  %v10415_v59 = vsel %vm8627_vm2, %v9791_v31, %v9729_v48  ;;  %v9968_v4 = vld [vmem:[#allocation2 + $0xd0] sm:$0xf]  ;;  %v8029_v31 = vld [vmem:[#allocation6 + $0x108] sm:$0xff]   ;;  %v4936_v44 = vshll.u32 %v9964_v50, 16 }
 0x1eb   : > { %v9913_v63 = vsel %vm8838_vm8, %v6632_v36, %v5414_v23  ;;  %v5416_v20 = vrot.slane %v5414_v23, 4  ;;  %7446 = vmatprep.subr.bf16.mxu0 %v7976_v15  ;;  %v10411_v36 = vsel %vm8627_vm2, %v9731_v21, %v9733_v6  ;;  %v10414_v21 = vsel %vm8627_vm2, %v9735_v14, %v9701_v24  ;;  %v4577_v6 = vld [vmem:[#allocation2 + $0xcc] sm:$0xf]  ;;  %v5295_v23 = vld [vmem:[#allocation2 + $0x90] sm:$0xe] }
 0x1ec   : > { %v6608_v62 = vcombine.low %v10412_v7, %v10411_v36  ;;  %v6609_v46 = vcombine.low %v10414_v21, %v10413_v29  ;;  %v6610_v10 = vcombine.low %v10415_v59, %v4867_v39  ;;  %v9954_v3 = vcombine.low %v3173_v19, %v3183_v35  ;;  %v8030_v7 = vld [vmem:[#allocation6 + $0x110] sm:$0xff]  }
 0x1ed   : > { %v9922_v27 = vsel %vm8838_vm8, %v5416_v20, %v5417_v2  ;;  %v4881_v24 = vsel %vm8627_vm2, %v9871_v57, %v9797_v37  ;;  %v4891_v14 = vsel %vm8627_vm2, %v4886_v13, %v9854_v8  ;;  %v9966_v48 = vrot.slane %v4926_v40, 5  ;;  %v10417_v13 = vld [vmem:[#allocation29_spill] sm:$0xff]  ;;  %v7969_v40 = vld [vmem:[#allocation2 + $0x30] sm:$0xff]  }
 0x1ee   : > { %v6648_v30 = vcombine.low %v9913_v63, %v9922_v27  ;;  %7447 = vmatpush3.bf16.msra.mxu0 %v7976_v15  ;;  %v4932_v15 = vrot.slane %v4930_v55, 4  ;;  %v4899_v39 = vor.u32 %v9887_v49, %v9878_v61  ;;  %v4909_v35 = vor.u32 %v9903_v17, %v9901_v11  ;;  %v7971_v17 = vld [vmem:[#allocation2 + $0x3c] sm:$0xff]  }
 0x1ef   : > { %v9974_v37 = vrot.slane %v4912_v34, 5  ;;  %v4923_v57 = vor.u32 %v4922_v22, %v4919_v60  ;;  %v4941_v8 = vshrl.u32 %v4577_v6, 16  ;;  %v4944_v2 = vshll.u32 %v4577_v6, 16 }
 0x1f0   : > { %7209 = vmatmul.mubr.bf16.vlgmr.msra.gmra.mrb[0].mxu1 %v7966_v54  ;;  %7417 = vmatmul.mubr.bf16.gmra.mrb[16].mxu0 %v6608_v62  ;;  %v6633_v54 = vrot.slane %v5295_v23, 9  ;;  %v5421_v20 = vrot.slane %v10417_v13, 5  ;;  %v6611_v55 = vcombine.low %v4881_v24, %v4891_v14  ;;  %v4950_v61 = vshll.u32 %v9968_v4, 16 }
 0x1f1   : > { %7488 = vmatpush3.bf16.msra.mxu1 %v10416_v47  ;;  %7212 = vmatprep.mubr.bf16.mxu1 %v7968_v56  ;;  %v5296_v56 = vld [vmem:[#allocation2 + $0x9c] sm:$0xe]  ;;  %v4954_v49 = vshrl.u32 %v9968_v4, 16  ;;  %v4933_v34 = vor.u32 %v4932_v15, %v9966_v48  ;;  %v5424_v36 = vrot.slane %v9696_v51, 5  ;;  %v4900_v62 = vrot.slane %v4899_v39, 4 }
 0x1f2   : > { %7481 = vmatprep.subr.bf16.mxu1 %v8029_v31  ;;  %7420 = vmatprep.mubr.bf16.mxu0 %v6609_v46  ;;  %v9983_v60 = vsel %vm8838_vm8, %v6633_v54, %v5421_v20  ;;  %v5423_v22 = vrot.slane %v5421_v20, 4  ;;  %v4910_v19 = vrot.slane %v4909_v35, 4  ;;  %v4924_v29 = vrot.slane %v4923_v57, 4  ;;  %v9991_v47 = vld [vmem:[#allocation2 + $0xd4] sm:$0x1]  ;;  %v7972_v54 = vld [vmem:[#allocation2 + $0x48] sm:$0xff]  }
 0x1f3   : > { %v6634_v21 = vrot.slane %v5296_v56, 9  ;;  %v4943_v46 = vrot.slane %v4941_v8, 4  ;;  %v4946_v59 = vrot.slane %v4944_v2, 5  ;;  %v5428_v23 = vrot.slane %v9687_v43, 5  ;;  %v8031_v57 = vld [vmem:[#allocation6 + $0x118] sm:$0xff]  }
 0x1f4   : > { %v9988_v6 = vsel %vm8838_vm8, %v5423_v22, %v5424_v36  ;;  %v9993_v24 = vrot.slane %v4950_v61, 5  ;;  %v4956_v51 = vrot.slane %v4954_v49, 4  ;;  %v5431_v15 = vrot.slane %v9727_v26, 5  ;;  %v8032_v49 = vld [vmem:[#allocation2 + $0x1c] sm:$0xf] }
 0x1f5   : > { %7489 = vmatpush3.bf16.msra.mxu1 %v8029_v31  ;;  %v6649_v14 = vcombine.low %v9983_v60, %v9988_v6  ;;  %v4934_v31 = vrot.slane %v4933_v34, 4  ;;  %v4938_v39 = vrot.slane %v4936_v44, 5  ;;  %v10000_v35 = vsel %vm8838_vm8, %v6634_v21, %v5428_v23  ;;  %v7974_v44 = vld [vmem:[#allocation2 + $0x54] sm:$0xff]   ;;  %v8057_v6 = vld [vmem:[#allocation2 + $0xc8] sm:$0x1] }
 0x1f6   : > { %7482 = vmatprep.subr.bf16.mxu1 %v8030_v7  ;;  %v5430_v43 = vrot.slane %v5428_v23, 4  ;;  %v4905_v8 = vsel %vm8627_vm2, %v4900_v62, %v9901_v11  ;;  %v4960_v2 = vshll.u32 %v9991_v47, 16  ;;  %v4915_v13 = vsel %vm8627_vm2, %v4910_v19, %v9974_v37  ;;  %v5297_v11 = vld [vmem:[#allocation2 + $0xa8] sm:$0xe]  ;;  %v8033_v37 = vld [vmem:[#allocation6 + $0x120] sm:$0xff]  }
 0x1f7   : > { %v4947_v20 = vor.u32 %v4946_v59, %v4943_v46  ;;  %v4957_v56 = vor.u32 %v4956_v51, %v9993_v24  ;;  %v4929_v61 = vsel %vm8627_vm2, %v4924_v29, %v9966_v48  ;;  %v5298_v34 = vld [vmem:[#allocation2 + $0xb4] sm:$0xe]  ;;  %v6612_v22 = vcombine.low %v4905_v8, %v4915_v13  ;;  %v8034_v29 = vld [vmem:[#allocation2 + $0x20] sm:$0x1] }
 0x1f8   : > { %7213 = vmatmul.mubr.bf16.gmra.mrb[4].mxu1 %v7969_v40  ;;  %7421 = vmatmul.mubr.bf16.gmra.mrb[20].mxu0 %v6610_v10  ;;  %v10008_v26 = vsel %vm8838_vm8, %v5430_v43, %v5431_v15  ;;  %v5285_v10 = vld [vmem:[#allocation2 + $0x18] sm:$0xe]  ;;  %v4962_v36 = vrot.slane %v4960_v2, 5  ;;  %v6635_v62 = vrot.slane %v5297_v11, 9  ;;  %v5435_v59 = vrot.slane %v9741_v16, 5  ;;  %v7975_v13 = vld [vmem:[#allocation2 + $0x60] sm:$0xff]  }
 0x1f9   : > { %7216 = vmatprep.mubr.bf16.mxu1 %v7971_v17  ;;  %7490 = vmatpush3.bf16.msra.mxu1 %v8030_v7  ;;  %v6650_v40 = vcombine.low %v10000_v35, %v10008_v26  ;;  %v5351_v17 = vrot.slane %v8032_v49, 5  ;;  %v6623_v7 = vrot.slane %v5285_v10, 9  ;;  %v4948_v21 = vrot.slane %v4947_v20, 4  ;;  %v8036_v16 = vld [vmem:[#allocation2 + $0x28] sm:$0xf] }
 0x1fa   : > { %7483 = vmatprep.subr.bf16.mxu1 %v8031_v57  ;;  %7424 = vmatprep.mubr.bf16.mxu0 %v6611_v55  ;;  %v4939_v55 = vsel %vm8627_vm2, %v4934_v31, %v4938_v39  ;;  %v4958_v46 = vrot.slane %v4957_v56, 4  ;;  %v5354_v23 = vrot.slane %v8034_v29, 5  ;;  %v5438_v51 = vrot.slane %v9777_v52, 5  ;;  %v8035_v31 = vld [vmem:[#allocation6 + $0x128] sm:$0xff]   ;;  %v8037_v10 = vld [vmem:[#allocation2 + $0x34] sm:$0xf] }
 0x1fb   : > { %v6613_v19 = vcombine.low %v4929_v61, %v4939_v55  ;;  %v5353_v48 = vrot.slane %v5351_v17, 4  ;;  %v6636_v15 = vrot.slane %v5298_v34, 9  ;;  %v10025_v39 = vsel %vm8838_vm8, %v6635_v62, %v5435_v59  ;;  %v5286_v56 = vld [vmem:[#allocation2 + $0x24] sm:$0xe]  ;;  %v7977_v61 = vld [vmem:[#allocation2 + $0x6c] sm:$0xff]  }
 0x1fc   : > { %v5437_v43 = vrot.slane %v5435_v59, 4  ;;  %v5358_v8 = vrot.slane %v8036_v16, 5  ;;  %v5442_v2 = vrot.slane %v9831_v41, 5  ;;  %v4953_v52 = vsel %vm8627_vm2, %v4948_v21, %v9993_v24  ;;  %v8039_v62 = vld [vmem:[#allocation2 + $0x2c] sm:$0x1] }
 0x1fd   : > { %7491 = vmatpush3.bf16.msra.mxu1 %v8031_v57  ;;  %v5352_v57 = vsel %vm8838_vm8, %v6623_v7, %v5351_v17  ;;  %v4963_v20 = vsel %vm8627_vm2, %v4958_v46, %v4962_v36  ;;  %v5365_v11 = vrot.slane %v8037_v10, 5  ;;  %v5355_v41 = vsel %vm8838_vm8, %v5353_v48, %v5354_v23  ;;  %v8038_v17 = vld [vmem:[#allocation6 + $0x130] sm:$0xff]   ;;  %v5299_v59 = vld [vmem:[#allocation2 + $0xc0] sm:$0xe]  ;;  %v8040_v29 = vld [vmem:[#allocation2 + $0x38] sm:$0x1] }
 0x1fe   : > { %7484 = vmatprep.subr.bf16.mxu1 %v8033_v37  ;;  %v10046_v24 = vsel %vm8838_vm8, %v6636_v15, %v5442_v2  ;;  %v5444_v49 = vrot.slane %v5442_v2, 4  ;;  %v6624_v34 = vrot.slane %v5286_v56, 9  ;;  %v6639_v7 = vcombine.low %v5352_v57, %v5355_v41  ;;  %v8041_v15 = vld [vmem:[#allocation6 + $0x138] sm:$0xff]   ;;  %v8042_v16 = vld [vmem:[#allocation2 + $0x40] sm:$0xf] }
 0x1ff   : > { %v5367_v48 = vrot.slane %v5365_v11, 4  ;;  %v5368_v23 = vrot.slane %v8040_v29, 5  ;;  %v5372_v2 = vrot.slane %v8042_v16, 5  ;;  %v5449_v10 = vrot.slane %v9891_v53, 5  ;;  %v8043_v53 = vld [vmem:[#allocation2 + $0x44] sm:$0x1] }
 0x200   : > { %7217 = vmatmul.mubr.bf16.gmra.mrb[8].mxu1 %v7972_v54  ;;  %7425 = vmatmul.mubr.bf16.gmra.mrb[24].mxu0 %v6612_v22  ;;  %v5445_v54 = vrot.slane %v9899_v12, 5  ;;  %v5287_v12 = vld [vmem:[#allocation2 + $0x30] sm:$0xe]  ;;  %v5360_v22 = vrot.slane %v5358_v8, 4  ;;  %v5359_v57 = vsel %vm8838_vm8, %v6624_v34, %v5358_v8 }
 0x201   : > { %7220 = vmatprep.mubr.bf16.mxu1 %v7974_v44  ;;  %7492 = vmatpush3.bf16.msra.mxu1 %v8033_v37  ;;  %v10038_v44 = vsel %vm8838_vm8, %v5437_v43, %v5438_v51  ;;  %v6614_v37 = vcombine.low %v4953_v52, %v4963_v20  ;;  %v6625_v21 = vrot.slane %v5287_v12, 9  ;;  %v5288_v51 = vld [vmem:[#allocation2 + $0x3c] sm:$0xe]  ;;  %v5300_v43 = vld [vmem:[#allocation2 + $0xcc] sm:$0xe]  ;;  %v5369_v41 = vsel %vm8838_vm8, %v5367_v48, %v5368_v23 }
 0x202   : > { %7485 = vmatprep.subr.bf16.mxu1 %v8035_v31  ;;  %7428 = vmatprep.mubr.bf16.mxu0 %v6613_v19  ;;  %v6651_v55 = vcombine.low %v10025_v39, %v10038_v44  ;;  %v10050_v36 = vsel %vm8838_vm8, %v5444_v49, %v5445_v54  ;;  %v5361_v19 = vrot.slane %v8039_v62, 5  ;;  %v6637_v54 = vrot.slane %v5299_v59, 9  ;;  %v8044_v59 = vld [vmem:[#allocation2 + $0x70] sm:$0xf] }
 0x203   : > { %v6652_v46 = vcombine.low %v10046_v24, %v10050_v36  ;;  %v5366_v20 = vsel %vm8838_vm8, %v6625_v21, %v5365_v11  ;;  %v6626_v56 = vrot.slane %v5288_v51, 9  ;;  %v5452_v12 = vrot.slane %v9964_v50, 5 }
 0x204   : > { %v5362_v52 = vsel %vm8838_vm8, %v5360_v22, %v5361_v19  ;;  %v6638_v49 = vrot.slane %v5300_v43, 9  ;;  %v5451_v34 = vrot.slane %v5449_v10, 4  ;;  %v5456_v11 = vrot.slane %v9968_v4, 5 }
 0x205   : > { %7493 = vmatpush3.bf16.msra.mxu1 %v8035_v31  ;;  %v2920_v31 = vld [vmem:[#allocation2 + $0x6c] sm:$0xf]  ;;  %v6640_v22 = vcombine.low %v5359_v57, %v5362_v52  ;;  %v5375_v62 = vrot.slane %v8043_v53, 5  ;;  %v5459_v19 = vrot.slane %v9991_v47, 5  ;;  %v6641_v21 = vcombine.low %v5366_v20, %v5369_v41  ;;  %v7980_v57 = vld [vmem:[#allocation2 + $0x90] sm:$0xff]   ;;  %v7981_v20 = vld [vmem:[#allocation2 + $0x9c] sm:$0xff]  }
 0x206   : > { %7486 = vmatprep.subr.bf16.mxu1 %v8038_v17  ;;  %v3137_v8 = vshrl.u32 %v2920_v31, 16  ;;  %v3146_v48 = vshll.u32 %v8044_v59, 16  ;;  %v3150_v50 = vshrl.u32 %v8044_v59, 16  ;;  %v10072_v29 = vsel %vm8838_vm8, %v5451_v34, %v5452_v12 }
 0x207   : > { %v10078_v4 = vsel %vm8838_vm8, %v6638_v49, %v5456_v11  ;;  %v5458_v51 = vrot.slane %v5456_v11, 4  ;;  %v2929_v11 = vld [vmem:[#allocation2 + $0x90] sm:$0xf]  ;;  %v10418_v53 = vcombine.low %v9801_v9, %v9817_v25 }
 0x208   : > { %7221 = vmatmul.mubr.bf16.gmra.mrb[12].mxu1 %v7975_v13  ;;  %7429 = vmatmul.mubr.bf16.gmra.mrb[28].mxu0 %v6614_v37  ;;  %v7978_v13 = vld [vmem:[#allocation2 + $0x78] sm:$0xff]   ;;  %v10066_v37 = vsel %vm8838_vm8, %v6637_v54, %v5449_v10  ;;  %v3148_v54 = vrot.slane %v3146_v48, 5  ;;  %v2926_v10 = vld [vmem:[#allocation2 + $0x84] sm:$0xf]  ;;  %v3209_v59 = vshrl.u32 %v2929_v11, 16 }
 0x209   : > { %7224 = vmatprep.mubr.bf16.mxu1 %v7977_v61  ;;  %7494 = vmatpush3.bf16.msra.mxu1 %v8038_v17  ;;  %v7979_v61 = vld [vmem:[#allocation2 + $0x84] sm:$0xff]   ;;  %v3140_v17 = vshll.u32 %v2920_v31, 16  ;;  %v6653_v23 = vcombine.low %v10066_v37, %v10072_v29  ;;  %v5373_v31 = vsel %vm8838_vm8, %v6626_v56, %v5372_v2  ;;  %v10084_v43 = vsel %vm8838_vm8, %v5458_v51, %v5459_v19  ;;  %v8045_v56 = vld [vmem:[#allocation2 + $0x74] sm:$0x1]  ;;  %v2932_v48 = vld [vmem:[#allocation2 + $0x9c] sm:$0xf] }
 0x20a   : > { %7487 = vmatprep.subr.bf16.mxu1 %v8041_v15  ;;  %7448 = vmatprep.mubr.bf16.mxu0 %v6639_v7  ;;  %v5374_v7 = vrot.slane %v5372_v2, 4  ;;  %v6654_v52 = vcombine.low %v10078_v4, %v10084_v43  ;;  %v3185_v12 = vshrl.u32 %v2926_v10, 16  ;;  %v3188_v49 = vshll.u32 %v2926_v10, 16 }
 0x20b   : > { %v3142_v47 = vrot.slane %v3140_v17, 5  ;;  %v8046_v17 = vld [vmem:[#allocation2 + $0x88] sm:$0xf]  ;;  %v3233_v10 = vshrl.u32 %v2932_v48, 16  ;;  %v3236_v9 = vshll.u32 %v2932_v48, 16 }
 0x20c   : > { %v5376_v16 = vsel %vm8838_vm8, %v5374_v7, %v5375_v62  ;;  %v3194_v34 = vshll.u32 %v8046_v17, 16  ;;  %v3198_v42 = vshrl.u32 %v8046_v17, 16  ;;  %v7982_v7 = vld [vmem:[#allocation2 + $0xa8] sm:$0xff]   ;;  %v3190_v51 = vrot.slane %v3188_v49, 5 }
 0x20d   : > { %7495 = vmatpush3.bf16.msra.mxu1 %v8041_v15  ;;  %v3139_v15 = vrot.slane %v3137_v8, 4  ;;  %v6642_v41 = vcombine.low %v5373_v31, %v5376_v16  ;;  %v3156_v8 = vshll.u32 %v8045_v56, 16  ;;  %v3212_v31 = vshll.u32 %v2929_v11, 16  ;;  %v8047_v16 = vld [vmem:[#allocation2 + $0x94] sm:$0xf] }
 0x20e   : > { %v3211_v17 = vrot.slane %v3209_v59, 4 }
 0x20f   : > { %v3158_v19 = vrot.slane %v3156_v8, 5 }
 0x210   : > { %7225 = vmatmul.mubr.bf16.gmra.mrb[16].mxu1 %v7978_v13  ;;  %7449 = vmatmul.mubr.bf16.vlgmr.msra.gmra.mrb[0].mxu0 %v6640_v22  ;;  %v3152_v13 = vrot.slane %v3150_v50, 4  ;;  %v7983_v50 = vld [vmem:[#allocation2 + $0xb4] sm:$0xff]  }
 0x211   : > { %7228 = vmatprep.mubr.bf16.mxu1 %v7979_v61  ;;  %7452 = vmatprep.mubr.bf16.mxu0 %v6641_v21  ;;  %v3143_v61 = vor.u32 %v3142_v47, %v3139_v15  ;;  %v3187_v21 = vrot.slane %v3185_v12, 4  ;;  %v10093_v15 = vrot.slane %v3194_v34, 5  ;;  %v3200_v47 = vrot.slane %v3198_v42, 4 }
 0x212   : > { %v3153_v2 = vor.u32 %v3152_v13, %v3148_v54  ;;  %v3218_v13 = vshll.u32 %v8047_v16, 16  ;;  %v10419_v34 = vcombine.low %v9808_v18, %v9828_v28  ;;  %v8050_v28 = vld [vmem:[#allocation2 + $0x98] sm:$0x1] }
 0x213   : > { %v3144_v22 = vrot.slane %v3143_v61, 4  ;;  %v8048_v61 = vld [vmem:[#allocation2 + $0x8c] sm:$0x1]  ;;  %v3191_v12 = vor.u32 %v3190_v51, %v3187_v21  ;;  %v3201_v49 = vor.u32 %v3200_v47, %v10093_v15 }
 0x214   : > { %v3154_v62 = vrot.slane %v3153_v2, 4  ;;  %v8049_v2 = vld [vmem:[#allocation2 + $0xa0] sm:$0xf]  ;;  %v10103_v42 = vrot.slane %v3218_v13, 5 }
 0x215   : > { %v3242_v56 = vshll.u32 %v8049_v2, 16  ;;  %v3246_v8 = vshrl.u32 %v8049_v2, 16  ;;  %v3192_v51 = vrot.slane %v3191_v12, 4  ;;  %v3202_v47 = vrot.slane %v3201_v49, 4 }
 0x216   : > { %v3159_v25 = vsel %vm8627_vm2, %v3154_v62, %v3158_v19  ;;  %v10420_v62 = vcombine.low %v9837_v58, %v9858_v5 }
 0x217   : > { %v10108_v48 = vrot.slane %v3242_v56, 5  ;;  %v3248_v59 = vrot.slane %v3246_v8, 4  ;;  %v3197_v2 = vsel %vm8627_vm2, %v3192_v51, %v10093_v15 }
 0x218   : > { %7229 = vmatmul.mubr.bf16.gmra.mrb[20].mxu1 %v7980_v57  ;;  %7453 = vmatmul.mubr.bf16.gmra.mrb[4].mxu0 %v6642_v41  ;;  %v3149_v57 = vsel %vm8627_vm2, %v3144_v22, %v3148_v54  ;;  %v3204_v41 = vshll.u32 %v8048_v61, 16  ;;  %v3214_v54 = vrot.slane %v3212_v31, 5  ;;  %v3235_v22 = vrot.slane %v3233_v10, 4  ;;  %v2938_v61 = vld [vmem:[#allocation2 + $0xb4] sm:$0xf] }
 0x219   : > { %7232 = vmatprep.mubr.bf16.mxu1 %v7981_v20  ;;  %7456 = vmatprep.mubr.bf16.mxu0 %v10418_v53  ;;  %v3222_v20 = vshrl.u32 %v8047_v16, 16  ;;  %v7984_v53 = vld [vmem:[#allocation2 + $0xc0] sm:$0xff]   ;;  %v6519_v19 = vcombine.low %v3149_v57, %v3159_v25  ;;  %v3228_v31 = vshll.u32 %v8050_v28, 16  ;;  %v3249_v58 = vor.u32 %v3248_v59, %v10108_v48  ;;  %v8052_v57 = vld [vmem:[#allocation2 + $0xac] sm:$0xf] }
 0x21a   : > { %v3206_v21 = vrot.slane %v3204_v41, 5  ;;  %v3215_v18 = vor.u32 %v3214_v54, %v3211_v17  ;;  %v3266_v25 = vshll.u32 %v8052_v57, 16  ;;  %v3270_v41 = vshrl.u32 %v8052_v57, 16  ;;  %v8053_v54 = vld [vmem:[#allocation2 + $0xb8] sm:$0xf] }
 0x21b   : > { %v3224_v11 = vrot.slane %v3222_v20, 4  ;;  %v8051_v20 = vld [vmem:[#allocation2 + $0xa4] sm:$0x1]  ;;  %v3230_v12 = vrot.slane %v3228_v31, 5  ;;  %v3281_v49 = vshrl.u32 %v2938_v61, 16  ;;  %v3284_v17 = vshll.u32 %v2938_v61, 16 }
 0x21c   : > { %v3252_v10 = vshll.u32 %v8051_v20, 16  ;;  %v3207_v56 = vsel %vm8627_vm2, %v3202_v47, %v3206_v21  ;;  %v3216_v8 = vrot.slane %v3215_v18, 4  ;;  %v3250_v15 = vrot.slane %v3249_v58, 4  ;;  %v2941_v20 = vld [vmem:[#allocation2 + $0xc0] sm:$0xf] }
 0x21d   : > { %v3225_v16 = vor.u32 %v3224_v11, %v10103_v42  ;;  %v3294_v11 = vshrl.u32 %v8053_v54, 16  ;;  %v3268_v59 = vrot.slane %v3266_v25, 5  ;;  %v6521_v51 = vcombine.low %v3197_v2, %v3207_v56 }
 0x21e   : > { %v3283_v47 = vrot.slane %v3281_v49, 4  ;;  %v3286_v18 = vrot.slane %v3284_v17, 5  ;;  %v3308_v61 = vshll.u32 %v2941_v20, 16 }
 0x21f   : > { %v3296_v31 = vrot.slane %v3294_v11, 4 }
 0x220   : > { %7233 = vmatmul.mubr.bf16.gmra.mrb[24].mxu1 %v7982_v7  ;;  %7457 = vmatmul.mubr.bf16.gmra.mrb[8].mxu0 %v10419_v34  ;;  %v3238_v7 = vrot.slane %v3236_v9, 5  ;;  %v3290_v34 = vshll.u32 %v8053_v54, 16  ;;  %v3287_v57 = vor.u32 %v3286_v18, %v3283_v47  ;;  %v3310_v17 = vrot.slane %v3308_v61, 5 }
 0x221   : > { %7236 = vmatprep.mubr.bf16.mxu1 %v7983_v50  ;;  %7460 = vmatprep.mubr.bf16.mxu0 %v10420_v62  ;;  %v2935_v50 = vld [vmem:[#allocation2 + $0xa8] sm:$0xf]  ;;  %v3254_v62 = vrot.slane %v3252_v10, 5 }
 0x222   : > { %v3239_v13 = vor.u32 %v3238_v7, %v3235_v22  ;;  %v3257_v9 = vshrl.u32 %v2935_v50, 16  ;;  %v3260_v5 = vshll.u32 %v2935_v50, 16  ;;  %v10421_v22 = vcombine.low %v9847_v45, %v9869_v0 }
 0x223   : > { %v3226_v7 = vrot.slane %v3225_v16, 4  ;;  %v3272_v50 = vrot.slane %v3270_v41, 4  ;;  %v3292_v28 = vrot.slane %v3290_v34, 5  ;;  %v3221_v45 = vsel %vm8627_vm2, %v3216_v8, %v10103_v42  ;;  %v8054_v16 = vld [vmem:[#allocation2 + $0xb0] sm:$0x1] }
 0x224   : > { %v3262_v21 = vrot.slane %v3260_v5, 5  ;;  %v3276_v1 = vshll.u32 %v8054_v16, 16  ;;  %v8055_v42 = vld [vmem:[#allocation2 + $0xc4] sm:$0xf]  ;;  %v8056_v41 = vld [vmem:[#allocation2 + $0xbc] sm:$0x1] }
 0x225   : > { %v3231_v0 = vsel %vm8627_vm2, %v3226_v7, %v3230_v12  ;;  %v3273_v10 = vor.u32 %v3272_v50, %v3268_v59  ;;  %v3314_v58 = vshll.u32 %v8055_v42, 16  ;;  %v3318_v5 = vshrl.u32 %v8055_v42, 16 }
 0x226   : > { %v3297_v25 = vor.u32 %v3296_v31, %v3292_v28  ;;  %v3300_v2 = vshll.u32 %v8056_v41, 16  ;;  %v3278_v12 = vrot.slane %v3276_v1, 5  ;;  %v3288_v11 = vrot.slane %v3287_v57, 4  ;;  %v10181_v31 = vld [vmem:[#allocation8] ss:$0 sm:$0xff] }
 0x227   : > { %v3274_v8 = vrot.slane %v3273_v10, 4  ;;  %v3316_v54 = vrot.slane %v3314_v58, 5  ;;  %v3320_v34 = vrot.slane %v3318_v5, 4 }
 0x228   : > { %7237 = vmatmul.mubr.bf16.gmra.mrb[28].mxu1 %v7984_v53  ;;  %7461 = vmatmul.mubr.bf16.gmra.mrb[12].mxu0 %v10421_v22  ;;  %v3240_v53 = vrot.slane %v3239_v13, 4  ;;  %v3298_v22 = vrot.slane %v3297_v25, 4  ;;  %v3302_v7 = vrot.slane %v3300_v2, 5 }
 0x229   : > { %7272 = vmatprep.mubr.bf16.mxu1 %v6519_v19  ;;  %v3259_v19 = vrot.slane %v3257_v9, 4  ;;  %7464 = vmatprep.mubr.bf16.mxu0 %v6647_v32  ;;  %v3255_v32 = vsel %vm8627_vm2, %v3250_v15, %v3254_v62  ;;  %v3305_v9 = vshrl.u32 %v2941_v20, 16  ;;  %v3279_v27 = vsel %vm8627_vm2, %v3274_v8, %v3278_v12 }
 0x22a   : > { %v3245_v33 = vsel %vm8627_vm2, %v3240_v53, %v10108_v48  ;;  %v3321_v60 = vor.u32 %v3320_v34, %v3316_v54  ;;  %v3293_v53 = vsel %vm8627_vm2, %v3288_v11, %v3292_v28  ;;  %v3303_v62 = vsel %vm8627_vm2, %v3298_v22, %v3302_v7 }
 0x22b   : > { %v3263_v13 = vor.u32 %v3262_v21, %v3259_v19  ;;  %v6523_v48 = vcombine.low %v3245_v33, %v3255_v32  ;;  %v3307_v49 = vrot.slane %v3305_v9, 4  ;;  %v6525_v15 = vcombine.low %v3293_v53, %v3303_v62 }
 0x22d   : > { %v3264_v56 = vrot.slane %v3263_v13, 4 }
 0x22f   : > { %v3269_v63 = vsel %vm8627_vm2, %v3264_v56, %v3268_v59  ;;  %v3322_v59 = vrot.slane %v3321_v60, 4 }
 0x230   : > { %7273 = vmatmul.mubr.bf16.vlgmr.msra.gmra.mrb[16].mxu1 %v9954_v3  ;;  %7465 = vmatmul.mubr.bf16.gmra.mrb[16].mxu0 %v6648_v30  ;;  %v6522_v3 = vcombine.low %v3221_v45, %v3231_v0  ;;  %v3311_v30 = vor.u32 %v3310_v17, %v3307_v49  ;;  %v6524_v19 = vcombine.low %v3269_v63, %v3279_v27 }
 0x231   : > { %7276 = vmatprep.mubr.bf16.mxu1 %v6521_v51  ;;  %7468 = vmatprep.mubr.bf16.mxu0 %v6649_v14  ;;  %v3324_v14 = vshll.u32 %v8057_v6, 16 }
 0x232   : > { %v3312_v21 = vrot.slane %v3311_v30, 4 }
 0x233   : > { %v3326_v50 = vrot.slane %v3324_v14, 5 }
 0x234   : > { %v3317_v51 = vsel %vm8627_vm2, %v3312_v21, %v3316_v54 }
 0x235   : > { %v3327_v47 = vsel %vm8627_vm2, %v3322_v59, %v3326_v50 }
 0x236   : > { %v6526_v35 = vcombine.low %v3317_v51, %v3327_v47 }
 0x238   : > { %7277 = vmatmul.mubr.bf16.gmra.mrb[20].mxu1 %v6522_v3  ;;  %7469 = vmatmul.mubr.bf16.gmra.mrb[20].mxu0 %v6650_v40 }
 0x239   : > { %7280 = vmatprep.mubr.bf16.mxu1 %v6523_v48  ;;  %7472 = vmatprep.mubr.bf16.mxu0 %v6651_v55 }
 0x240   : > { %7281 = vmatmul.mubr.bf16.gmra.mrb[24].mxu1 %v6524_v19  ;;  %7473 = vmatmul.mubr.bf16.gmra.mrb[24].mxu0 %v6652_v46 }
 0x241   : > { %7284 = vmatprep.mubr.bf16.mxu1 %v6525_v15  ;;  %7476 = vmatprep.mubr.bf16.mxu0 %v6653_v23 }
 0x248   : > { %7285 = vmatmul.mubr.bf16.gmra.mrb[28].mxu1 %v6526_v35  ;;  %7477 = vmatmul.mubr.bf16.gmra.mrb[28].mxu0 %v6654_v52 }
 0x2c3   : > { %v7210_v26 = vpop.f32.mrb[0].mxu1 }
 0x2c4   : > { %v2737_v40 = vpop.f32.mrb[1].mxu1 }
 0x2c5   : > { %v7211_v39 = vpop.f32.mrb[2].mxu1 }
 0x2c6   : > { %v2740_v44 = vpop.f32.mrb[3].mxu1 }
 0x2cb   : > { %v7214_v38 = vpop.f32.mrb[4].mxu1 }
 0x2cc   : > { %v2753_v55 = vpop.f32.mrb[5].mxu1 }
 0x2cd   : > { %v7215_v18 = vpop.f32.mrb[6].mxu1 }
 0x2ce   : > { %v2756_v28 = vpop.f32.mrb[7].mxu1 }
 0x2d3   : > { %v7218_v24 = vpop.f32.mrb[8].mxu1 }
 0x2d4   : > { %v10167_v36 = vpop.f32.mrb[9].mxu1 }
 0x2d5   : > { %v10169_v46 = vpop.f32.mrb[10].mxu1 }
 0x2d6   : > { %v10171_v37 = vpop.f32.mrb[11].mxu1 }
 0x2db   : > { %v10173_v29 = vpop.f32.mrb[12].mxu1 }
 0x2dc   : > { %v10175_v23 = vpop.f32.mrb[13].mxu1 }
 0x2dd   : > { %v10177_v4 = vpop.f32.mrb[14].mxu1 }
 0x2de   : > { %v10179_v43 = vpop.f32.mrb[15].mxu1 }
 0x2e3   : > { %v7450_v52 = vpop.f32.mrb[0].mxu0 }
 0x2e4   : > { %v7496_v20 = vadd.f32 %v7450_v52, %v7210_v26  ;;  %v5623_v45 = vpop.f32.mrb[1].mxu0 }
 0x2e5   : > { %v7497_v0 = vadd.f32 %v5623_v45, %v2737_v40  ;;  %v7451_v16 = vpop.f32.mrb[2].mxu0 }
 0x2e6   : > { %v5791_v1 = vadd.f32 %v7496_v20, %v10181_v31  ;;  %v7498_v33 = vadd.f32 %v7451_v16, %v7211_v39  ;;  %v5626_v32 = vpop.f32.mrb[3].mxu0 }
 0x2e7   : > { %v5789_v13 = vadd.f32 %v7497_v0, %v10181_v31  ;;  %v7499_v10 = vadd.f32 %v5626_v32, %v2740_v44 }
 0x2e8   : > { %v5792_v9 = vadd.f32 %v7498_v33, %v10181_v31  ;;  %v5823_v58 = vmax.f32 %v5791_v1, 0.0 }
 0x2e9   : > { %v5821_v61 = vmax.f32 %v5789_v13, 0.0  ;;  %v5790_v42 = vadd.f32 %v7499_v10, %v10181_v31 }
 0x2ea   : > { %v5824_v5 = vmax.f32 %v5792_v9, 0.0  ;;  %v5892_v54 = vmul.f32 %v5823_v58, %v5823_v58 }
 0x2eb   : > { %v5822_v57 = vmax.f32 %v5790_v42, 0.0  ;;  %v7454_v25 = vpop.f32.mrb[4].mxu0  ;;  %v5890_v41 = vmul.f32 %v5821_v61, %v5821_v61 }
 0x2ec   : > { %v6745_v2 = vpack.c.bf16 %v5824_v5, %v5823_v58  ;;  %v7500_v3 = vadd.f32 %v7454_v25, %v7214_v38  ;;  %v5639_v48 = vpop.f32.mrb[5].mxu0  ;;  %v5893_v60 = vmul.f32 %v5824_v5, %v5824_v5 }
 0x2ed   : > { %v5853_v56 = vadd.f32 %v5822_v57, %v5821_v61  ;;  %v5891_v8 = vmul.f32 %v5822_v57, %v5822_v57  ;;  %v6740_v12 = vpack.c.bf16 %v5822_v57, %v5821_v61  ;;  %v7501_v49 = vadd.f32 %v5639_v48, %v2753_v55  ;;  %v7455_v17 = vpop.f32.mrb[6].mxu0 }
 0x2ee   : > { %6817 = vst [vmem:[%s10189_s29 + $0x8] sm:$0xff] %v6745_v2   ;;  %v5795_v34 = vadd.f32 %v7500_v3, %v10181_v31  ;;  %v7502_v11 = vadd.f32 %v7455_v17, %v7215_v18  ;;  %v5642_v22 = vpop.f32.mrb[7].mxu0 }
 0x2ef   : > { %v5854_v7 = vadd.f32 %v5853_v56, %v5823_v58  ;;  %v5922_v63 = vadd.f32 %v5891_v8, %v5890_v41  ;;  %6741 = vst [vmem:[%s10189_s29] sm:$0xff] %v6740_v12   ;;  %v5793_v27 = vadd.f32 %v7501_v49, %v10181_v31  ;;  %v7503_v30 = vadd.f32 %v5642_v22, %v2756_v28 }
 0x2f0   : > { %v5796_v6 = vadd.f32 %v7502_v11, %v10181_v31  ;;  %v5827_v15 = vmax.f32 %v5795_v34, 0.0 }
 0x2f1   : > { %v5923_v14 = vadd.f32 %v5922_v63, %v5892_v54  ;;  %v5825_v53 = vmax.f32 %v5793_v27, 0.0  ;;  %v5855_v62 = vadd.f32 %v5854_v7, %v5824_v5  ;;  %v5794_v19 = vadd.f32 %v7503_v30, %v10181_v31 }
 0x2f2   : > { %v5828_v21 = vmax.f32 %v5796_v6, 0.0  ;;  %v5896_v16 = vmul.f32 %v5827_v15, %v5827_v15 }
 0x2f3   : > { %v5856_v59 = vadd.f32 %v5855_v62, %v5825_v53  ;;  %v5894_v50 = vmul.f32 %v5825_v53, %v5825_v53  ;;  %v5924_v51 = vadd.f32 %v5923_v14, %v5893_v60  ;;  %v5826_v47 = vmax.f32 %v5794_v19, 0.0  ;;  %v7458_v35 = vpop.f32.mrb[8].mxu0 }
 0x2f4   : > { %v6755_v26 = vpack.c.bf16 %v5828_v21, %v5827_v15  ;;  %v7504_v40 = vadd.f32 %v7458_v35, %v7218_v24  ;;  %v5655_v39 = vpop.f32.mrb[9].mxu0  ;;  %v5897_v10 = vmul.f32 %v5828_v21, %v5828_v21 }
 0x2f5   : > { %v5925_v44 = vadd.f32 %v5924_v51, %v5894_v50  ;;  %v5857_v38 = vadd.f32 %v5856_v59, %v5826_v47  ;;  %v5895_v55 = vmul.f32 %v5826_v47, %v5826_v47  ;;  %v6750_v18 = vpack.c.bf16 %v5826_v47, %v5825_v53  ;;  %v7459_v28 = vpop.f32.mrb[10].mxu0 }
 0x2f6   : > { %6819 = vst [vmem:[%s10189_s29 + $0x18] sm:$0xff] %v6755_v26   ;;  %v5799_v52 = vadd.f32 %v7504_v40, %v10181_v31  ;;  %v7505_v20 = vadd.f32 %v5655_v39, %v10167_v36  ;;  %v7506_v45 = vadd.f32 %v7459_v28, %v10169_v46  ;;  %v5658_v0 = vpop.f32.mrb[11].mxu0 }
 0x2f7   : > { %v5858_v1 = vadd.f32 %v5857_v38, %v5827_v15  ;;  %v5926_v33 = vadd.f32 %v5925_v44, %v5895_v55  ;;  %6818 = vst [vmem:[%s10189_s29 + $0x10] sm:$0xff] %v6750_v18   ;;  %v7507_v24 = vadd.f32 %v5658_v0, %v10171_v37 }
 0x2f8   : > { %v5797_v32 = vadd.f32 %v7505_v20, %v10181_v31  ;;  %v5800_v13 = vadd.f32 %v7506_v45, %v10181_v31  ;;  %v5831_v58 = vmax.f32 %v5799_v52, 0.0 }
 0x2f9   : > { %v5927_v9 = vadd.f32 %v5926_v33, %v5896_v16  ;;  %v5859_v61 = vadd.f32 %v5858_v1, %v5828_v21  ;;  %v5798_v42 = vadd.f32 %v7507_v24, %v10181_v31 }
 0x2fa   : > { %v5829_v36 = vmax.f32 %v5797_v32, 0.0  ;;  %v5832_v46 = vmax.f32 %v5800_v13, 0.0  ;;  %v5900_v27 = vmul.f32 %v5831_v58, %v5831_v58 }
 0x2fb   : > { %v5928_v5 = vadd.f32 %v5927_v9, %v5897_v10  ;;  %v5830_v57 = vmax.f32 %v5798_v42, 0.0  ;;  %v7462_v25 = vpop.f32.mrb[12].mxu0 }
 0x2fc   : > { %v5860_v41 = vadd.f32 %v5859_v61, %v5829_v36  ;;  %v5898_v2 = vmul.f32 %v5829_v36, %v5829_v36  ;;  %v6765_v37 = vpack.c.bf16 %v5832_v46, %v5831_v58  ;;  %v5671_v3 = vpop.f32.mrb[13].mxu0  ;;  %v7508_v8 = vadd.f32 %v7462_v25, %v10173_v29 }
 0x2fd   : > { %v5899_v48 = vmul.f32 %v5830_v57, %v5830_v57  ;;  %v6760_v56 = vpack.c.bf16 %v5830_v57, %v5829_v36  ;;  %v7509_v12 = vadd.f32 %v5671_v3, %v10175_v23  ;;  %v7463_v49 = vpop.f32.mrb[14].mxu0  ;;  %v5901_v6 = vmul.f32 %v5832_v46, %v5832_v46 }
 0x2fe   : > { %v5929_v17 = vadd.f32 %v5928_v5, %v5898_v2  ;;  %6821 = vst [vmem:[%s10189_s29 + $0x28] sm:$0xff] %v6765_v37   ;;  %v5861_v54 = vadd.f32 %v5860_v41, %v5830_v57  ;;  %v7510_v34 = vadd.f32 %v7463_v49, %v10177_v4  ;;  %v5674_v11 = vpop.f32.mrb[15].mxu0  ;;  %v5803_v22 = vadd.f32 %v7508_v8, %v10181_v31 }
 0x2ff   : > { %6820 = vst [vmem:[%s10189_s29 + $0x20] sm:$0xff] %v6760_v56   ;;  %v5801_v7 = vadd.f32 %v7509_v12, %v10181_v31  ;;  %v7511_v63 = vadd.f32 %v5674_v11, %v10179_v43 }
 0x300   : > { %v5862_v30 = vadd.f32 %v5861_v54, %v5831_v58  ;;  %v5930_v60 = vadd.f32 %v5929_v17, %v5899_v48  ;;  %v5804_v29 = vadd.f32 %v7510_v34, %v10181_v31  ;;  %v5835_v19 = vmax.f32 %v5803_v22, 0.0 }
 0x301   : > { %v5833_v14 = vmax.f32 %v5801_v7, 0.0  ;;  %v5802_v53 = vadd.f32 %v7511_v63, %v10181_v31 }
 0x302   : > { %v5931_v4 = vadd.f32 %v5930_v60, %v5900_v27  ;;  %v5863_v15 = vadd.f32 %v5862_v30, %v5832_v46  ;;  %v5836_v21 = vmax.f32 %v5804_v29, 0.0  ;;  %v5904_v24 = vmul.f32 %v5835_v19, %v5835_v19 }
 0x303   : > { %v7274_v23 = vpop.f32.mrb[16].mxu1  ;;  %v5902_v50 = vmul.f32 %v5833_v14, %v5833_v14  ;;  %v5834_v51 = vmax.f32 %v5802_v53, 0.0  ;;  %v7466_v43 = vpop.f32.mrb[16].mxu0 }
 0x304   : > { %v3554_v62 = vpop.f32.mrb[17].mxu1  ;;  %v5864_v35 = vadd.f32 %v5863_v15, %v5833_v14  ;;  %v5932_v26 = vadd.f32 %v5931_v4, %v5901_v6  ;;  %v6775_v40 = vpack.c.bf16 %v5836_v21, %v5835_v19  ;;  %v5687_v39 = vpop.f32.mrb[17].mxu0  ;;  %v7512_v55 = vadd.f32 %v7466_v43, %v7274_v23 }
 0x305   : > { %v7275_v59 = vpop.f32.mrb[18].mxu1  ;;  %v5903_v44 = vmul.f32 %v5834_v51, %v5834_v51  ;;  %v6770_v38 = vpack.c.bf16 %v5834_v51, %v5833_v14  ;;  %v7513_v18 = vadd.f32 %v5687_v39, %v3554_v62  ;;  %v7467_v28 = vpop.f32.mrb[18].mxu0  ;;  %v5905_v61 = vmul.f32 %v5836_v21, %v5836_v21 }
 0x306   : > { %v3557_v47 = vpop.f32.mrb[19].mxu1  ;;  %v5933_v52 = vadd.f32 %v5932_v26, %v5902_v50  ;;  %6823 = vst [vmem:[%s10189_s29 + $0x38] sm:$0xff] %v6775_v40   ;;  %v5865_v20 = vadd.f32 %v5864_v35, %v5834_v51  ;;  %v7514_v45 = vadd.f32 %v7467_v28, %v7275_v59  ;;  %v5690_v0 = vpop.f32.mrb[19].mxu0  ;;  %v5807_v16 = vadd.f32 %v7512_v55, %v10181_v31 }
 0x307   : > { %6822 = vst [vmem:[%s10189_s29 + $0x30] sm:$0xff] %v6770_v38   ;;  %v5805_v1 = vadd.f32 %v7513_v18, %v10181_v31  ;;  %v7515_v33 = vadd.f32 %v5690_v0, %v3557_v47 }
 0x308   : > { %v5866_v32 = vadd.f32 %v5865_v20, %v5835_v19  ;;  %v5934_v13 = vadd.f32 %v5933_v52, %v5903_v44  ;;  %v5808_v10 = vadd.f32 %v7514_v45, %v10181_v31  ;;  %v5839_v5 = vmax.f32 %v5807_v16, 0.0 }
 0x309   : > { %v5837_v42 = vmax.f32 %v5805_v1, 0.0  ;;  %v5806_v58 = vadd.f32 %v7515_v33, %v10181_v31 }
 0x30a   : > { %v5935_v46 = vadd.f32 %v5934_v13, %v5904_v24  ;;  %v5867_v57 = vadd.f32 %v5866_v32, %v5836_v21  ;;  %v5840_v25 = vmax.f32 %v5808_v10, 0.0  ;;  %v5908_v6 = vmul.f32 %v5839_v5, %v5839_v5 }
 0x30b   : > { %v7278_v9 = vpop.f32.mrb[20].mxu1  ;;  %v5906_v2 = vmul.f32 %v5837_v42, %v5837_v42  ;;  %v5838_v37 = vmax.f32 %v5806_v58, 0.0  ;;  %v7470_v3 = vpop.f32.mrb[20].mxu0 }
 0x30c   : > { %v3570_v36 = vpop.f32.mrb[21].mxu1  ;;  %v5868_v56 = vadd.f32 %v5867_v57, %v5837_v42  ;;  %v5936_v8 = vadd.f32 %v5935_v46, %v5905_v61  ;;  %v6785_v12 = vpack.c.bf16 %v5840_v25, %v5839_v5  ;;  %v5703_v49 = vpop.f32.mrb[21].mxu0  ;;  %v7516_v34 = vadd.f32 %v7470_v3, %v7278_v9 }
 0x30d   : > { %v7279_v41 = vpop.f32.mrb[22].mxu1  ;;  %v5907_v17 = vmul.f32 %v5838_v37, %v5838_v37  ;;  %v6780_v54 = vpack.c.bf16 %v5838_v37, %v5837_v42  ;;  %v7517_v11 = vadd.f32 %v5703_v49, %v3570_v36  ;;  %v7471_v22 = vpop.f32.mrb[22].mxu0  ;;  %v5909_v19 = vmul.f32 %v5840_v25, %v5840_v25 }
 0x30e   : > { %v3573_v48 = vpop.f32.mrb[23].mxu1  ;;  %v5937_v7 = vadd.f32 %v5936_v8, %v5906_v2  ;;  %6825 = vst [vmem:[%s10189_s29 + $0x48] sm:$0xff] %v6785_v12   ;;  %v5869_v63 = vadd.f32 %v5868_v56, %v5838_v37  ;;  %v7518_v27 = vadd.f32 %v7471_v22, %v7279_v41  ;;  %v5706_v30 = vpop.f32.mrb[23].mxu0  ;;  %v5811_v60 = vadd.f32 %v7516_v34, %v10181_v31 }
 0x30f   : > { %6824 = vst [vmem:[%s10189_s29 + $0x40] sm:$0xff] %v6780_v54   ;;  %v5809_v29 = vadd.f32 %v7517_v11, %v10181_v31  ;;  %v7519_v23 = vadd.f32 %v5706_v30, %v3573_v48 }
 0x310   : > { %v5870_v14 = vadd.f32 %v5869_v63, %v5839_v5  ;;  %v5938_v53 = vadd.f32 %v5937_v7, %v5907_v17  ;;  %v5812_v62 = vadd.f32 %v7518_v27, %v10181_v31  ;;  %v5843_v51 = vmax.f32 %v5811_v60, 0.0 }
 0x311   : > { %v5841_v15 = vmax.f32 %v5809_v29, 0.0  ;;  %v5810_v21 = vadd.f32 %v7519_v23, %v10181_v31 }
 0x312   : > { %v5939_v50 = vadd.f32 %v5938_v53, %v5908_v6  ;;  %v5871_v43 = vadd.f32 %v5870_v14, %v5840_v25  ;;  %v5844_v47 = vmax.f32 %v5812_v62, 0.0  ;;  %v5912_v61 = vmul.f32 %v5843_v51, %v5843_v51 }
 0x313   : > { %v7282_v4 = vpop.f32.mrb[24].mxu1  ;;  %v5910_v26 = vmul.f32 %v5841_v15, %v5841_v15  ;;  %v5842_v40 = vmax.f32 %v5810_v21, 0.0  ;;  %v7474_v39 = vpop.f32.mrb[24].mxu0 }
 0x314   : > { %v3586_v59 = vpop.f32.mrb[25].mxu1  ;;  %v5872_v38 = vadd.f32 %v5871_v43, %v5841_v15  ;;  %v5940_v55 = vadd.f32 %v5939_v50, %v5909_v19  ;;  %v6795_v18 = vpack.c.bf16 %v5844_v47, %v5843_v51  ;;  %v5719_v28 = vpop.f32.mrb[25].mxu0  ;;  %v7520_v45 = vadd.f32 %v7474_v39, %v7282_v4 }
 0x315   : > { %v7283_v35 = vpop.f32.mrb[26].mxu1  ;;  %v5911_v52 = vmul.f32 %v5842_v40, %v5842_v40  ;;  %v6790_v20 = vpack.c.bf16 %v5842_v40, %v5841_v15  ;;  %v7521_v0 = vadd.f32 %v5719_v28, %v3586_v59  ;;  %v7475_v16 = vpop.f32.mrb[26].mxu0  ;;  %v5913_v5 = vmul.f32 %v5844_v47, %v5844_v47 }
 0x316   : > { %v3589_v44 = vpop.f32.mrb[27].mxu1  ;;  %v5941_v1 = vadd.f32 %v5940_v55, %v5910_v26  ;;  %6827 = vst [vmem:[%s10189_s29 + $0x58] sm:$0xff] %v6795_v18   ;;  %v5873_v33 = vadd.f32 %v5872_v38, %v5842_v40  ;;  %v7522_v24 = vadd.f32 %v7475_v16, %v7283_v35  ;;  %v5722_v32 = vpop.f32.mrb[27].mxu0  ;;  %v5815_v13 = vadd.f32 %v7520_v45, %v10181_v31 }
 0x317   : > { %6826 = vst [vmem:[%s10189_s29 + $0x50] sm:$0xff] %v6790_v20   ;;  %v5813_v10 = vadd.f32 %v7521_v0, %v10181_v31  ;;  %v7523_v9 = vadd.f32 %v5722_v32, %v3589_v44 }
 0x318   : > { %v5874_v42 = vadd.f32 %v5873_v33, %v5843_v51  ;;  %v5942_v58 = vadd.f32 %v5941_v1, %v5911_v52  ;;  %v5816_v36 = vadd.f32 %v7522_v24, %v10181_v31  ;;  %v5847_v37 = vmax.f32 %v5815_v13, 0.0 }
 0x319   : > { %v5845_v57 = vmax.f32 %v5813_v10, 0.0  ;;  %v5814_v25 = vadd.f32 %v7523_v9, %v10181_v31 }
 0x31a   : > { %v5943_v2 = vadd.f32 %v5942_v58, %v5912_v61  ;;  %v5875_v3 = vadd.f32 %v5874_v42, %v5844_v47  ;;  %v5848_v48 = vmax.f32 %v5816_v36, 0.0  ;;  %v5916_v19 = vmul.f32 %v5847_v37, %v5847_v37 }
 0x31b   : > { %v7286_v46 = vpop.f32.mrb[28].mxu1  ;;  %v5914_v8 = vmul.f32 %v5845_v57, %v5845_v57  ;;  %v5846_v12 = vmax.f32 %v5814_v25, 0.0  ;;  %v7478_v49 = vpop.f32.mrb[28].mxu0 }
 0x31c   : > { %v3602_v41 = vpop.f32.mrb[29].mxu1  ;;  %v5876_v54 = vadd.f32 %v5875_v3, %v5845_v57  ;;  %v5944_v34 = vadd.f32 %v5943_v2, %v5913_v5  ;;  %v6805_v11 = vpack.c.bf16 %v5848_v48, %v5847_v37  ;;  %v5735_v22 = vpop.f32.mrb[29].mxu0  ;;  %v7524_v27 = vadd.f32 %v7478_v49, %v7286_v46 }
 0x31d   : > { %v7287_v56 = vpop.f32.mrb[30].mxu1  ;;  %v5915_v7 = vmul.f32 %v5846_v12, %v5846_v12  ;;  %v6800_v63 = vpack.c.bf16 %v5846_v12, %v5845_v57  ;;  %v7525_v30 = vadd.f32 %v5735_v22, %v3602_v41  ;;  %v7479_v60 = vpop.f32.mrb[30].mxu0  ;;  %v5917_v50 = vmul.f32 %v5848_v48, %v5848_v48 }
 0x31e   : > { %v3605_v17 = vpop.f32.mrb[31].mxu1  ;;  %v5945_v29 = vadd.f32 %v5944_v34, %v5914_v8  ;;  %6829 = vst [vmem:[%s10189_s29 + $0x68] sm:$0xff] %v6805_v11   ;;  %v5877_v23 = vadd.f32 %v5876_v54, %v5846_v12  ;;  %v7526_v6 = vadd.f32 %v7479_v60, %v7287_v56  ;;  %v5738_v14 = vpop.f32.mrb[31].mxu0  ;;  %v5819_v53 = vadd.f32 %v7524_v27, %v10181_v31 }
 0x31f   : > { %6828 = vst [vmem:[%s10189_s29 + $0x60] sm:$0xff] %v6800_v63   ;;  %v5817_v62 = vadd.f32 %v7525_v30, %v10181_v31  ;;  %v7527_v4 = vadd.f32 %v5738_v14, %v3605_v17 }
 0x320   : > { %v5878_v15 = vadd.f32 %v5877_v23, %v5847_v37  ;;  %v5946_v21 = vadd.f32 %v5945_v29, %v5915_v7  ;;  %v5820_v59 = vadd.f32 %v7526_v6, %v10181_v31  ;;  %v5851_v35 = vmax.f32 %v5819_v53, 0.0 }
 0x321   : > { %v5849_v51 = vmax.f32 %v5817_v62, 0.0  ;;  %v5818_v43 = vadd.f32 %v7527_v4, %v10181_v31 }
 0x322   : > { %v5947_v47 = vadd.f32 %v5946_v21, %v5916_v19  ;;  %v5879_v26 = vadd.f32 %v5878_v15, %v5848_v48  ;;  %v5852_v40 = vmax.f32 %v5820_v59, 0.0  ;;  %v5920_v45 = vmul.f32 %v5851_v35, %v5851_v35 }
 0x323   : > { %v5918_v39 = vmul.f32 %v5849_v51, %v5849_v51  ;;  %v5850_v44 = vmax.f32 %v5818_v43, 0.0 }
 0x324   : > { %v5880_v38 = vadd.f32 %v5879_v26, %v5849_v51  ;;  %v5948_v55 = vadd.f32 %v5947_v47, %v5917_v50  ;;  %v6815_v18 = vpack.c.bf16 %v5852_v40, %v5851_v35 }
 0x325   : > { %v5919_v31 = vmul.f32 %v5850_v44, %v5850_v44  ;;  %v6810_v28 = vpack.c.bf16 %v5850_v44, %v5849_v51 }
 0x326   : > { %v5949_v52 = vadd.f32 %v5948_v55, %v5918_v39  ;;  %6831 = vst [vmem:[%s10189_s29 + $0x78] sm:$0xff] %v6815_v18   ;;  %v5881_v20 = vadd.f32 %v5880_v38, %v5850_v44 }
 0x327   : > { %6830 = vst [vmem:[%s10189_s29 + $0x70] sm:$0xff] %v6810_v28  }
 0x328   : > { %v5882_v0 = vadd.f32 %v5881_v20, %v5851_v35  ;;  %v5950_v16 = vadd.f32 %v5949_v52, %v5919_v31 }
 0x329   : > { %8213 = shalt.err (!%p8210_p0)
}
 0x32a   : > { %s8214_s10 = scalar_lea.hbm %s10245_s16, 2048  ;;  %s8218_s8 = scalar_lea.hbm %s10335_s5, 4096 }
 0x32b   : > { %p8215_p4 = scmp.ne.s32.totalorder %s10245_s16, %s8214_s10  ;;  %p8219_p12 = scmp.lt.u32.totalorder %s10245_s16, %s10335_s5 }
 0x32c   : > { %p8220_p1 = scmp.lt.u32.totalorder %s8218_s8, %s8214_s10  ;;  %p8222_p2 = scmp.lt.u32.totalorder %s8214_s10, %s10245_s16 }
 0x32d   : > { %p8216_p13 = pnand %p8215_p4, %p8547_p5 }
 0x32e   : > { %p8221_p11 = por %p8220_p1, %p8219_p12 }
 0x32f   : > { %p8217_p6 = pneg %p8216_p13 }
 0x330   : > { %p8223_p8 = por %p8222_p2, %p8221_p11 }
 0x332   : > { %p8224_p10 = pnand %p8223_p8, %p8217_p6 }
 0x334   : > { %8227 = shalt.err (!%p8224_p10)
}
 0x335   : > { %s8333_s7 = smov 64   ;;  %s8334_s17 = smov 4   ;;  %v5921_v1 = vmul.f32 %v5852_v40, %v5852_v40  ;;  %v5883_v33 = vadd.f32 %v5882_v0, %v5852_v40  ;;  %v5951_v24 = vadd.f32 %v5950_v16, %v5920_v45 }
 0x336   : > { %7770 = dma.vmem_to_hbm [thread:$0]  (%p8547_p5), %s10247_s9, 2048, %s10245_s16, %s6123_s6, %s8333_s7, %s8333_s7, %s8334_s17  }
 0x337   : > { %v5884_v32 = vrot.slane %v5883_v33, 4  ;;  %v5952_v13 = vadd.f32 %v5951_v24, %v5921_v1  ;;  %s6332_s18 = sshll.u32 %s8605_s27, 1  ;;  %s6700_s19 = sshll.u32 %s8314_s24, 5 }
 0x338   : > { %s362_s9 = scalar_lea.vmem [#allocation13], %s6332_s18  ;;  %s10422_s13 = sld [smem:[#allocation31_spill]] }
 0x339   : > { %v5885_v10 = vadd.f32 %v5884_v32, %v5883_v33  ;;  %v5953_v9 = vrot.slane %v5952_v13, 4  ;;  %s6159_s16 = sshll.u32 %s362_s9, 4  ;;  %s6128_s10 = scalar_lea.sflag [#allocation14], %s8605_s27  ;;  %s10282_s16 = int_to_ptr.vmem [resolvable:$true] %s6159_s16 }
 0x33a   : > { %s8228_s20 = scalar_lea.vmem %s10282_s16, 32  ;;  %s8335_s24 = smov [#allocation13]  }
 0x33b   : > { %v5886_v61 = vrot.slane %v5885_v10, 2  ;;  %v5954_v42 = vadd.f32 %v5953_v9, %v5952_v13  ;;  %p8229_p3 = scmp.ne.s32.totalorder %s10282_s16, %s8228_s20  ;;  %s8232_s15 = sshll.u32 %s8335_s24, 4  ;;  %s8233_s15 = int_to_ptr.vmem [resolvable:$false] %s8232_s15 }
 0x33c   : > { %s8234_s8 = scalar_lea.vmem %s8233_s15, 64  ;;  %p8235_p0 = scmp.lt.s32.totalorder %s10282_s16, %s8233_s15 }
 0x33d   : > { %v5887_v58 = vadd.f32 %v5886_v61, %v5885_v10  ;;  %v5955_v36 = vrot.slane %v5954_v42, 2  ;;  %p8230_p7 = pnand %p8229_p3, %p8547_p5  ;;  %p8236_p4 = scmp.lt.s32.totalorder %s8234_s8, %s8228_s20 }
 0x33e   : > { %s10280_s30 = scalar_lea.hbm %s10422_s13, %s6700_s19 }
 0x33f   : > { %v5888_v46 = vrot.slane %v5887_v58, 1  ;;  %v5956_v5 = vadd.f32 %v5955_v36, %v5954_v42  ;;  %p8231_p9 = pneg %p8230_p7  ;;  %p8237_p13 = por %p8236_p4, %p8235_p0 }
 0x341   : > { %v5957_v57 = vrot.slane %v5956_v5, 1  ;;  %v5889_v25 = vadd.f32 %v5888_v46, %v5887_v58  ;;  %p8238_p6 = pnand %p8237_p13, %p8231_p9 }
 0x343   : > { %v5958_v41 = vadd.f32 %v5957_v57, %v5956_v5 }
 0x345   : > { %v5960_v2 = vsel %vm721_vm3, %v5889_v25, %v5958_v41 }
 0x346   : > { %5961 = vst [vmem:[%s362_s9] sm:$0x3] %v5960_v2 }
 0x347   : > { %8241 = shalt.err (!%p8238_p6)
}
 0x348   : > { %s8242_s27 = scalar_lea.hbm %s10280_s30, 32  ;;  %s8246_s7 = scalar_lea.hbm %s10422_s13, 64 }
 0x349   : > { %p8243_p12 = scmp.ne.s32.totalorder %s10280_s30, %s8242_s27  ;;  %p8247_p2 = scmp.lt.u32.totalorder %s10280_s30, %s10422_s13 }
 0x34a   : > { %p8248_p8 = scmp.lt.u32.totalorder %s8246_s7, %s8242_s27  ;;  %p8250_p3 = scmp.lt.u32.totalorder %s8242_s27, %s10280_s30 }
 0x34b   : > { %p8244_p1 = pnand %p8243_p12, %p8547_p5 }
 0x34c   : > { %p8249_p10 = por %p8248_p8, %p8247_p2 }
 0x34d   : > { %p8245_p11 = pneg %p8244_p1 }
 0x34e   : > { %p8251_p7 = por %p8250_p3, %p8249_p10 }
 0x350   : > { %p8252_p9 = pnand %p8251_p7, %p8245_p11 }
 0x352   : > { %8255 = shalt.err (!%p8252_p9)
}
 0x353   : > { %7771 = dma.vmem_to_hbm [thread:$0]  (%p8547_p5), %s10282_s16, 32, %s10280_s30, %s6128_s10  }
 0x354 PF: > { %s10423_s19 = sld [smem:[#allocation20_spill]]  ;;  %s10424_s9 = sld [smem:[#allocation21_spill]] }
 0x355   : > { %p10426_p4 = scmp.ge.s32.totalorder %s8322_s26, 2 }
 0x35a   : > { %s6171_s6 = sand.u32 1, %s10423_s19   ;;  %p10425_p0 = scmp.ne.s32.totalorder %s10424_s9, 0 }
 0x35b   : > { %s6172_s14 = scalar_lea.sflag [#allocation5], %s6171_s6 }
 0x35c   : > { %p7792_p13 = pnand %p10426_p4, %p10425_p0 }
 0x35e   : > { %8293 = dma.done.wait (!%p7792_p13), %s6172_s14, 2048  }
 0x35f   : > { %8295 = vsyncadd (!%p7792_p13), %s6172_s14, 4294965248  ;;  %s6181_s20 = scalar_lea.sflag [#allocation14], %s6171_s6 }
 0x360   : > { %8297 = dma.done.wait (!%p7792_p13), %s6181_s20, 32  }
 0x361   : > { %8299 = vsyncadd (!%p7792_p13), %s6181_s20, 4294967264  ;;  %s28_s26 = sadd.s32 1, %s8322_s26   ;;  %s10427_s21 = smov %s8306_s22 }
 0x362   : > { %p25_p6 = scmp.ge.s32.totalorder %s28_s26, 4   ;;  %s10428_s22 = smov %s8310_s23 }
 0x363   : > { %s10429_s23 = smov %s8556_s11  ;;  %s10430_s24 = smov %s8318_s25 }
 0x364   : > { %s10431_s25 = smov %s10433_s28  ;;  %27 = sbr.rel (!%p25_p6) target bundleno = 12 (0xc), region = 128 }
 0x36b   :  { %6186 = vsyncpa [#allocation4], 1 }
 0x36c   :  { %6188 = vsyncpa [#allocation4 + $0x1], 1 }
 0x36d   :  { %6189 = vsyncpa [#allocation7], 1 }
 0x36e   :  { %6190 = vsyncpa [#allocation10], 1 }
 0x36f   :  { %6191 = vsyncpa [#allocation5], 1 }
 0x370   :  { %6193 = vsyncpa [#allocation5 + $0x1], 1 }
 0x371   :  { %6194 = vsyncpa [#allocation14], 1 }
 0x372   :  { %6196 = vsyncpa [#allocation14 + $0x1], 1 }

// kernel: bottleneck_forward.3
= control target key start
LH: loop header
LB: loop body
LE: loop exit
PB: predicated region body
PF: predicated region fallthrough
CT: control target
= control target key end

     0   :  { %10 = vsyncpa [#allocation4], 0  ;;  %s9882_s0 = inlined_call_operand.hbm [shape: bf16[2,16,16,128], index: 0, kind: input, shape index: {}]   ;;  %s9883_s1 = inlined_call_operand.hbm [shape: bf16[1152,128], index: 1, kind: input, shape index: {}]   ;;  %s9884_s2 = inlined_call_operand.hbm [shape: f32[1,128], index: 2, kind: input, shape index: {}]   ;;  %s9885_s3 = inlined_call_operand.hbm [shape: bf16[2,16,16,128], index: 3, kind: output, shape index: {0}]   ;;  %s9886_s4 = inlined_call_operand.hbm [shape: f32[2,2,128], index: 4, kind: output, shape index: {1}]  }
   0x1   :  { %12 = vsyncpa [#allocation4 + $0x1], 0 }
   0x2   :  { %13 = vsyncpa [#allocation7], 0 }
   0x3   :  { %14 = vsyncpa [#allocation5], 0 }
   0x4   :  { %16 = vsyncpa [#allocation5 + $0x1], 0 }
   0x5   :  { %17 = vsyncpa [#allocation11], 0 }
   0x6   :  { %19 = vsyncpa [#allocation11 + $0x1], 0  ;;  %s8101_s15 = smov 0   ;;  %s8103_s16 = smov 0  }
   0x7   :  { %s8105_s17 = smov 0   ;;  %s8107_s18 = smov 0  }
   0x8   :  { %s8109_s19 = smov 0   ;;  %s8111_s20 = smov 0  }
   0x9 LB: > { %s6126_s21 = sadd.s32 4294967295, %s8064_s20   ;;  %s6127_s22 = sadd.s32 4294967294, %s8064_s20   ;;  %s8064_s20 = sphi %s8111_s20, %s25_s20   ;;  %s8060_s19 = sphi %s8109_s19, %s10007_s19   ;;  %s8056_s18 = sphi %s8107_s18, %s10006_s18   ;;  %s8052_s17 = sphi %s8105_s17, %s10005_s17   ;;  %s8048_s16 = sphi %s8103_s16, %s10004_s16   ;;  %s8044_s15 = sphi %s8101_s15, %s10003_s15  }
   0xa   : > { %p57_p0 = scmp.ne.s32.totalorder %s8048_s16, %s8044_s15  ;;  %p8135_p1 = scmp.eq.s32.totalorder %s6126_s21, 0 }
   0xb   : > { %p8139_p2 = scmp.eq.s32.totalorder %s6126_s21, 1  ;;  %p141_p3 = scmp.eq.s32.totalorder %s6127_s22, 1 }
   0xc   : > { %s9912_s23 = scalar_select %p8135_p1, 1, 0 }
   0xd   : > { %p8145_p4 = por %p8135_p1, %p57_p0  ;;  %p6128_p5 = scmp.ge.s32.totalorder %s8064_s20, 1 }
   0xe   : > { %p8150_p6 = por %p141_p3, %p57_p0  ;;  %p176_p7 = scmp.lt.s32.totalorder %s8064_s20, 3 }
   0xf   : > { %s9914_s25 = scalar_select %p8145_p4, 1, 0 }
  0x10   : > { %s9915_s26 = scalar_select %p8150_p6, 1, 0 }
  0x11   : > { %p8155_p8 = pnand %p6128_p5, %p176_p7  ;;  %s8066_s28 = smov [#allocation6]  }
  0x12   : > { %s190_s29 = sshll.u32 %s8066_s28, 4  ;;  %s8067_s5 = smov [#allocation8]   ;;  %s8159_s29 = int_to_ptr.vmem [resolvable:$true] %s190_s29 }
  0x13   : > { %p7572_p9 = pneg %p8155_p8  ;;  %s206_s6 = sshll.u32 %s8067_s5, 4  ;;  %s8170_s6 = int_to_ptr.vmem [resolvable:$true] %s206_s6 }
  0x14   : > { %s7860_s9 = scalar_lea.hbm %s9883_s1, 9216 }
  0x15   : > { %p8166_p11 = pnand %p7572_p9, %p8135_p1  ;;  %p7861_p12 = scmp.ne.s32.totalorder %s9883_s1, %s7860_s9 }
  0x16   : > { %p7867_p5 = scmp.lt.u32.totalorder %s7860_s9, %s9883_s1 }
  0x17   : > { %p7862_p13 = pneg %p8166_p11 }
  0x19   : > { %p7863_p0 = pnand %p7862_p13, %p7861_p12 }
  0x1b   : > { %p7864_p3 = pneg %p7863_p0 }
  0x1d   : > { %p7869_p7 = pnand %p7867_p5, %p7864_p3 }
  0x1f   : > { %7872 = shalt.err (!%p7869_p7)
}
  0x20   : > { %s7873_s14 = scalar_lea.vmem %s8159_s29, 9216  ;;  %p7881_p1 = scmp.lt.s32.totalorder %s8159_s29, %s8159_s29 }
  0x21   : > { %p7874_p9 = scmp.ne.s32.totalorder %s8159_s29, %s7873_s14  ;;  %p7882_p12 = scmp.lt.s32.totalorder %s7873_s14, %s7873_s14 }
  0x23   : > { %p7876_p10 = pnand %p7874_p9, %p7862_p13  ;;  %p7883_p0 = por %p7882_p12, %p7881_p1 }
  0x25   : > { %p7877_p6 = pneg %p7876_p10 }
  0x27   : > { %p7884_p4 = pnand %p7883_p0, %p7877_p6 }
  0x29   : > { %7887 = shalt.err (!%p7884_p4)
}
  0x2a   : > { %s8068_s21 = smov 64   ;;  %s8069_s22 = smov 4  }
  0x2b   : > { %7575 = dma.hbm_to_vmem [thread:$0]  (!%p8166_p11), %s9883_s1, 9216, %s8159_s29, [#allocation7], %s8068_s21, %s8068_s21, %s8069_s22  }
  0x2c   : > { %s7888_s9 = scalar_lea.hbm %s9884_s2, 16 }
  0x2d   : > { %p7889_p1 = scmp.ne.s32.totalorder %s9884_s2, %s7888_s9  ;;  %p7895_p10 = scmp.lt.u32.totalorder %s7888_s9, %s9884_s2 }
  0x2f   : > { %p7891_p4 = pnand %p7889_p1, %p7862_p13 }
  0x31   : > { %p7892_p6 = pneg %p7891_p4 }
  0x33   : > { %p7897_p3 = pnand %p7895_p10, %p7892_p6 }
  0x35   : > { %7900 = shalt.err (!%p7897_p3)
}
  0x36   : > { %s7901_s29 = scalar_lea.vmem %s8170_s6, 16  ;;  %s7908_s14 = scalar_lea.vmem %s8170_s6, 32 }
  0x37   : > { %p7902_p5 = scmp.ne.s32.totalorder %s8170_s6, %s7901_s29  ;;  %p7909_p12 = scmp.lt.s32.totalorder %s8170_s6, %s8170_s6 }
  0x38   : > { %p7910_p0 = scmp.lt.s32.totalorder %s7908_s14, %s7901_s29 }
  0x39   : > { %p7904_p7 = pnand %p7902_p5, %p7862_p13 }
  0x3a   : > { %p7911_p1 = por %p7910_p0, %p7909_p12 }
  0x3b   : > { %p7905_p9 = pneg %p7904_p7 }
  0x3d   : > { %p7912_p4 = pnand %p7911_p1, %p7905_p9 }
  0x3f   : > { %7915 = shalt.err (!%p7912_p4)
}
  0x40   : > { %7578 = dma.hbm_to_vmem [thread:$0]  (!%p8166_p11), %s9884_s2, 16, %s8170_s6, [#allocation7]  }
  0x41   : > { %s37_s7 = sadd.s32 1, %s8060_s19  ;;  %s44_s8 = sadd.s32 1, %s8052_s17 }
  0x42   : > { %p39_p13 = scmp.ge.s32.totalorder %s37_s7, 2  ;;  %p51_p6 = scmp.ne.s32.totalorder %s8052_s17, %s8048_s16 }
  0x43   : > { %p52_p10 = scmp.eq.s32.totalorder %s8064_s20, 0  ;;  %p7592_p3 = scmp.lt.s32.totalorder %s8064_s20, 2 }
  0x44   : > { %s10009_s7 = smov (%p39_p13, %s37_s7), 0  ;;  %p8238_p7 = por %p8139_p2, %p51_p6 }
  0x45   : > { %p53_p5 = por %p52_p10, %p51_p6  ;;  %s41_s9 = ssub.s32 %s8060_s19, %s10009_s7 }
  0x46   : > { %s9918_s30 = scalar_select %p8238_p7, 1, 0 }
  0x47   : > { %s217_s10 = sand.u32 1, %s8052_s17   ;;  %p42_p9 = scmp.eq.s32.totalorder %s41_s9, 0 }
  0x48   : > { %s6132_s6 = sshll.u32 %s217_s10, 7  ;;  %s6509_s11 = sshll.u32 %s8060_s19, 11 }
  0x49   : > { %s8247_s12 = scalar_select %p42_p9, %s8052_s17, %s44_s8  }
  0x4a   : > { %s8252_s14 = scalar_lea.hbm %s9882_s0, %s6509_s11  ;;  %s221_s24 = scalar_lea.vmem [#allocation3], %s6132_s6 }
  0x4b   : > { %s228_s28 = sshll.u32 %s221_s24, 4  ;;  %p8256_p2 = pnand %p7592_p3, %p53_p5  ;;  %s8260_s28 = int_to_ptr.vmem [resolvable:$true] %s228_s28 }
  0x4c   : > { %s8262_s8 = scalar_lea.sflag [#allocation4], %s217_s10  ;;  %s7916_s9 = scalar_lea.hbm %s8252_s14, 2048 }
  0x4d   : > { %p7917_p11 = scmp.ne.s32.totalorder %s8252_s14, %s7916_s9  ;;  %p7918_p12 = pneg %p8256_p2 }
  0x4e   : > { %s7921_s13 = scalar_lea.hbm %s9882_s0, 4096  ;;  %p7922_p4 = scmp.lt.u32.totalorder %s8252_s14, %s9882_s0 }
  0x4f   : > { %p7919_p0 = pnand %p7918_p12, %p7917_p11  ;;  %p7923_p13 = scmp.lt.u32.totalorder %s7921_s13, %s7916_s9 }
  0x50   : > { %p7925_p10 = scmp.lt.u32.totalorder %s7916_s9, %s8252_s14 }
  0x51   : > { %p7920_p1 = pneg %p7919_p0  ;;  %p7924_p6 = por %p7923_p13, %p7922_p4 }
  0x53   : > { %p7926_p3 = por %p7925_p10, %p7924_p6 }
  0x55   : > { %p7927_p5 = pnand %p7926_p3, %p7920_p1 }
  0x57   : > { %7930 = shalt.err (!%p7927_p5)
}
  0x58   : > { %s7931_s10 = scalar_lea.vmem %s8260_s28, 2048  ;;  %s8070_s6 = smov [#allocation3]  }
  0x59   : > { %p7932_p9 = scmp.ne.s32.totalorder %s8260_s28, %s7931_s10  ;;  %s7936_s11 = sshll.u32 %s8070_s6, 4  ;;  %s7937_s11 = int_to_ptr.vmem [resolvable:$false] %s7936_s11 }
  0x5a   : > { %s7938_s29 = scalar_lea.vmem %s7937_s11, 4096  ;;  %p7939_p7 = scmp.lt.s32.totalorder %s8260_s28, %s7937_s11 }
  0x5b   : > { %p7934_p11 = pnand %p7932_p9, %p7918_p12  ;;  %p7940_p4 = scmp.lt.s32.totalorder %s7938_s29, %s7931_s10 }
  0x5d   : > { %p7935_p0 = pneg %p7934_p11  ;;  %p7941_p13 = por %p7940_p4, %p7939_p7 }
  0x5f   : > { %p7942_p6 = pnand %p7941_p13, %p7935_p0 }
  0x61   : > { %7945 = shalt.err (!%p7942_p6)
}
  0x62   : > { %7582 = dma.hbm_to_vmem [thread:$0]  (!%p8256_p2), %s8252_s14, 2048, %s8260_s28, %s8262_s8, %s8068_s21, %s8068_s21, %s8069_s22  }
  0x63   : > { %240 = sbr.rel (%p8155_p8) target bundleno = 785 (0x311), region = 32 }
  0x6a   : > { %s8296_s9 = sand.u32 1, %s8048_s16   ;;  %p9920_p7 = scmp.ne.s32.totalorder %s9914_s25, 0 }
  0x6b   : > { %s6136_s13 = sshll.u32 %s8296_s9, 7  ;;  %s243_s24 = scalar_lea.sflag [#allocation4], %s8296_s9 }
  0x6c   : > { %s8302_s5 = scalar_lea.vmem [#allocation3], %s6136_s13 }
  0x6d   : > { %8027 = dma.done.wait (%p9920_p7), %s243_s24, 2048  }
  0x6e   : > { %8029 = vsyncadd (%p9920_p7), %s243_s24, 4294965248  ;;  %p9921_p2 = scmp.ne.s32.totalorder %s9912_s23, 0 }
  0x70   : > { %8031 = dma.done.wait (%p9921_p2), [#allocation7], 9232  }
  0x71   : > { %8033 = vsyncadd (%p9921_p2), [#allocation7], 4294958064  ;;  %v8071_v0 = vmov 0   ;;  %v7651_v1 = vld [vmem:[#allocation6 + $0x40] sm:$0xff]   ;;  %v7653_v3 = vld [vmem:[#allocation6 + $0x48] sm:$0xff]   ;;  %vm552_vm3 = vcmask 1040384  }
  0x72   : > { %321 = vst [vmem:[#allocation2] sm:$0xf] %v8071_v0  ;;  %322 = vst [vmem:[#allocation2 + $0x4] sm:$0xf] %v8071_v0  ;;  %v7652_v2 = vld [vmem:[#allocation6 + $0x100] sm:$0xff]   ;;  %6854 = vmatprep.subr.bf16.mxu1 %v7651_v1  ;;  %v7654_v4 = vld [vmem:[#allocation6 + $0x108] sm:$0xff]  }
  0x73   : > { %323 = vst [vmem:[#allocation2 + $0x8] sm:$0x1] %v8071_v0  ;;  %325 = vst [vmem:[#allocation2 + $0xcc] sm:$0xf] %v8071_v0  ;;  %7046 = vmatprep.subr.bf16.mxu0 %v7652_v2  ;;  %6855 = vmatpush3.bf16.msra.mxu1 %v7651_v1  ;;  %v7655_v5 = vld [vmem:[#allocation6 + $0x50] sm:$0xff]   ;;  %v7657_v7 = vld [vmem:[#allocation6 + $0x58] sm:$0xff]  }
  0x74   : > { %326 = vst [vmem:[#allocation2 + $0xd0] sm:$0xf] %v8071_v0  ;;  %327 = vst [vmem:[#allocation2 + $0xd4] sm:$0x1] %v8071_v0  ;;  %7047 = vmatpush3.bf16.msra.mxu0 %v7652_v2  ;;  %6856 = vmatprep.subr.bf16.mxu1 %v7653_v3  ;;  %v7656_v6 = vld [vmem:[#allocation6 + $0x110] sm:$0xff]   ;;  %v7658_v8 = vld [vmem:[#allocation6 + $0x118] sm:$0xff]  }
  0x75   : > { %7048 = vmatprep.subr.bf16.mxu0 %v7654_v4  ;;  %vm876_vm0 = vsmask.f32 3328  ;;  %vm877_vm1 = vsmask.f32 7440  ;;  %v7659_v9 = vld [vmem:[#allocation6 + $0x60] sm:$0xff]   ;;  %v7661_v11 = vld [vmem:[#allocation6 + $0x68] sm:$0xff]  }
  0x76   : > { %vm553_vm2 = vsmask.f32 256  ;;  %v7660_v10 = vld [vmem:[#allocation6 + $0x120] sm:$0xff]   ;;  %v7662_v12 = vld [vmem:[#allocation6 + $0x128] sm:$0xff]   ;;  %v7663_v20 = vld [vmem:[#allocation6 + $0x70] sm:$0xff]   ;;  %vm1905_vm6 = vcmask 1042432  }
  0x77   : > { %6857 = vmatpush3.bf16.msra.mxu1 %v7653_v3  ;;  %v7667_v22 = vld [vmem:[%s8302_s5] sm:$0xff]   ;;  %v7664_v23 = vld [vmem:[#allocation6 + $0x130] sm:$0xff]   ;;  %v7669_v31 = vld [vmem:[%s8302_s5 + $0x8] sm:$0xff]   ;;  %vm1906_vm7 = vcmask 1046532   ;;  %s9741_s23 = scalar_lea.vmem [#allocation9], %s6136_s13  ;;  %s6542_s25 = sshll.u32 %s8056_s18, 11 }
  0x78   : > { %7049 = vmatpush3.bf16.msra.mxu0 %v7654_v4  ;;  %6858 = vmatprep.subr.bf16.mxu1 %v7655_v5  ;;  %v409_v29 = vshrl.u32 %v7667_v22, 16  ;;  %v412_v30 = vshll.u32 %v7667_v22, 16  ;;  %v7665_v34 = vld [vmem:[#allocation6 + $0x78] sm:$0xff]   ;;  %vm8316_vm4 = vmor %vm876_vm0, %vm877_vm1  ;;  %v416_v37 = vshrl.u32 %v7669_v31, 16  ;;  %v419_v38 = vshll.u32 %v7669_v31, 16  ;;  %v7672_v46 = vld [vmem:[%s8302_s5 + $0x10] sm:$0xff]   ;;  %s9797_s14 = scalar_lea.hbm %s9885_s3, %s6542_s25 }
  0x79   : > { %7050 = vmatprep.subr.bf16.mxu0 %v7656_v6  ;;  %v812_v13 = vld [vmem:[#allocation2] sm:$0xf]  ;;  %v813_v14 = vld [vmem:[#allocation2 + $0x4] sm:$0xf]  ;;  %vm8322_vm5 = vmand %vm552_vm3, %vm553_vm2  ;;  %v423_v59 = vshrl.u32 %v7672_v46, 16  ;;  %v426_v61 = vshll.u32 %v7672_v46, 16 }
  0x7a   : > { %v860_v15 = vld [vmem:[#allocation2 + $0x8] sm:$0x1]  ;;  %v880_v16 = vshrl.u32 %v812_v13, 16  ;;  %v883_v17 = vshll.u32 %v812_v13, 16  ;;  %v889_v18 = vshll.u32 %v813_v14, 16  ;;  %v893_v19 = vshrl.u32 %v813_v14, 16  ;;  %vm8461_vm8 = vmor %vm1905_vm6, %vm1906_vm7 }
  0x7b   : > { %6859 = vmatpush3.bf16.msra.mxu1 %v7655_v5  ;;  %v899_v21 = vshll.u32 %v860_v15, 16  ;;  %v411_v36 = vrot.slane %v409_v29, 7  ;;  %v7666_v42 = vld [vmem:[#allocation6 + $0x138] sm:$0xff]   ;;  %v418_v45 = vrot.slane %v416_v37, 7  ;;  %v8338_v57 = vld [vmem:[#allocation6] sm:$0xff]   ;;  %v425_v3 = vrot.slane %v423_v59, 7 }
  0x7c   : > { %7051 = vmatpush3.bf16.msra.mxu0 %v7656_v6  ;;  %6860 = vmatprep.subr.bf16.mxu1 %v7657_v7  ;;  %v882_v24 = vrot.slane %v880_v16, 4  ;;  %v885_v25 = vrot.slane %v883_v17, 5  ;;  %v891_v26 = vrot.slane %v889_v18, 5  ;;  %v895_v27 = vrot.slane %v893_v19, 4  ;;  %v7674_v54 = vld [vmem:[%s8302_s5 + $0x18] sm:$0xff]   ;;  %v8342_v2 = vld [vmem:[#allocation6 + $0x140] sm:$0xff]  }
  0x7d   : > { %7052 = vmatprep.subr.bf16.mxu0 %v7658_v8  ;;  %v901_v28 = vrot.slane %v899_v21, 5  ;;  %v414_v43 = vor.u32 %v412_v30, %v411_v36  ;;  %v571_v44 = vsel %vm8322_vm5, %v411_v36, 0  ;;  %v421_v52 = vor.u32 %v419_v38, %v418_v45  ;;  %v8345_v5 = vld [vmem:[%s8302_s5 + $0x20] sm:$0xff]   ;;  %s5973_s27 = sshll.u32 %s9741_s23, 4  ;;  %s5954_s28 = scalar_lea.sflag [#allocation5], %s8296_s9  ;;  %s9799_s27 = int_to_ptr.vmem [resolvable:$true] %s5973_s27 }
  0x7e   : > { %v886_v32 = vor.u32 %v885_v25, %v882_v24  ;;  %v896_v33 = vor.u32 %v895_v27, %v891_v26  ;;  %v6159_v49 = vcombine.low %v571_v44, %v571_v44  ;;  %v572_v53 = vsel %vm8322_vm5, %v418_v45, 0  ;;  %v9725_v35 = vld [vmem:[#allocation8] ss:$0 sm:$0xff]  ;;  %s7946_s8 = scalar_lea.vmem %s9799_s27, 2048  ;;  %p10000_p12 = scmp.ne.s32.totalorder %s9918_s30, 0 }
  0x7f   : > { %6861 = vmatpush3.bf16.msra.mxu1 %v7657_v7  ;;  %v555_v51 = vsel %vm8322_vm5, 0, %v414_v43  ;;  %v6162_v58 = vcombine.low %v572_v53, %v572_v53  ;;  %v556_v60 = vsel %vm8322_vm5, 0, %v421_v52  ;;  %v430_v62 = vshrl.u32 %v7674_v54, 16  ;;  %p7947_p8 = scmp.ne.s32.totalorder %s9799_s27, %s7946_s8  ;;  %s8072_s10 = smov [#allocation9]  }
  0x80   : > { %7053 = vmatpush3.bf16.msra.mxu0 %v7658_v8  ;;  %6862 = vmatprep.subr.bf16.mxu1 %v7659_v9  ;;  %v887_v39 = vrot.slane %v886_v32, 4  ;;  %v897_v40 = vrot.slane %v896_v33, 4  ;;  %v6157_v55 = vcombine.low %v555_v51, %v555_v51  ;;  %v6158_v56 = vcombine.high %v555_v51, %v555_v51  ;;  %766 = vst [vmem:[#allocation2 + $0x14] sm:$0x1] %v6159_v49  ;;  %s7950_s6 = sshll.u32 %s8072_s10, 4  ;;  %s7951_s6 = int_to_ptr.vmem [resolvable:$false] %s7950_s6 }
  0x81   : > { %7054 = vmatprep.subr.bf16.mxu0 %v7660_v10  ;;  %v433_v63 = vshll.u32 %v7674_v54, 16  ;;  %v6160_v0 = vcombine.low %v556_v60, %v556_v60  ;;  %v6161_v1 = vcombine.high %v556_v60, %v556_v60  ;;  %769 = vst [vmem:[#allocation2 + $0x20] sm:$0x1] %v6162_v58  ;;  %v432_v4 = vrot.slane %v430_v62, 7  ;;  %p7948_p1 = pnand %p7947_p8, %p10000_p12  ;;  %s7952_s11 = scalar_lea.vmem %s7951_s6, 4096 }
  0x82   : > { %v892_v47 = vsel %vm8316_vm4, %v887_v39, %v891_v26  ;;  %v902_v48 = vsel %vm8316_vm4, %v897_v40, %v901_v28  ;;  %764 = vst [vmem:[#allocation2 + $0xc] sm:$0xf] %v6157_v55  ;;  %765 = vst [vmem:[#allocation2 + $0x10] sm:$0xf] %v6158_v56  ;;  %v428_v6 = vor.u32 %v426_v61, %v425_v3  ;;  %v573_v7 = vsel %vm8322_vm5, %v425_v3, 0  ;;  %p7953_p3 = scmp.lt.s32.totalorder %s9799_s27, %s7951_s6  ;;  %p7954_p5 = scmp.lt.s32.totalorder %s7952_s11, %s7946_s8 }
  0x83   : > { %6863 = vmatpush3.bf16.msra.mxu1 %v7659_v9  ;;  %v6205_v50 = vcombine.low %v892_v47, %v902_v48  ;;  %767 = vst [vmem:[#allocation2 + $0x18] sm:$0xf] %v6160_v0  ;;  %768 = vst [vmem:[#allocation2 + $0x1c] sm:$0xf] %v6161_v1  ;;  %v6165_v8 = vcombine.low %v573_v7, %v573_v7  ;;  %v435_v9 = vor.u32 %v433_v63, %v432_v4  ;;  %p7949_p10 = pneg %p7948_p1 }
  0x84   : > { %7055 = vmatpush3.bf16.msra.mxu0 %v7660_v10  ;;  %6864 = vmatprep.subr.bf16.mxu1 %v7661_v11  ;;  %v574_v10 = vsel %vm8322_vm5, %v432_v4, 0  ;;  %v440_v22 = vshll.u32 %v8345_v5, 16  ;;  %p7955_p9 = por %p7954_p5, %p7953_p3 }
  0x85   : > { %7056 = vmatprep.subr.bf16.mxu0 %v7662_v12  ;;  %6870 = vmatprep.mubr.bf16.mxu1 %v6205_v50  ;;  %v6168_v13 = vcombine.low %v574_v10, %v574_v10  ;;  %772 = vst [vmem:[#allocation2 + $0x2c] sm:$0x1] %v6165_v8  ;;  %v558_v18 = vsel %vm8322_vm5, 0, %v435_v9 }
  0x86   : > { %v6166_v26 = vcombine.low %v558_v18, %v558_v18  ;;  %v6167_v27 = vcombine.high %v558_v18, %v558_v18  ;;  %p7956_p11 = pnand %p7955_p9, %p7949_p10 }
  0x87   : > { %6865 = vmatpush3.bf16.msra.mxu1 %v7661_v11  ;;  %v437_v11 = vshrl.u32 %v8345_v5, 16  ;;  %v8356_v14 = vld [vmem:[#allocation2 + $0x14] sm:$0x1]  ;;  %775 = vst [vmem:[#allocation2 + $0x38] sm:$0x1] %v6168_v13 }
  0x88   : > { %7057 = vmatpush3.bf16.msra.mxu0 %v7662_v12  ;;  %6866 = vmatprep.subr.bf16.mxu1 %v7663_v20  ;;  %v557_v12 = vsel %vm8322_vm5, 0, %v428_v6  ;;  %v861_v15 = vld [vmem:[#allocation2 + $0x14] sm:$0x1]  ;;  %v2795_v19 = vshll.u32 %v8356_v14, 16  ;;  %773 = vst [vmem:[#allocation2 + $0x30] sm:$0xf] %v6166_v26 }
  0x89   : > { %7058 = vmatprep.subr.bf16.mxu0 %v7664_v23  ;;  %v6163_v16 = vcombine.low %v557_v12, %v557_v12  ;;  %v6164_v17 = vcombine.high %v557_v12, %v557_v12  ;;  %v8361_v21 = vrot.slane %v437_v11, 7  ;;  %v8364_v24 = vld [vmem:[#allocation2 + $0x10] sm:$0xf]  ;;  %v814_v25 = vld [vmem:[#allocation2 + $0xc] sm:$0xf] }
  0x8a   : > { %v2785_v30 = vshll.u32 %v8364_v24, 16  ;;  %v2789_v31 = vshrl.u32 %v8364_v24, 16  ;;  %v815_v32 = vld [vmem:[#allocation2 + $0x10] sm:$0xf]  ;;  %v2797_v33 = vrot.slane %v2795_v19, 5  ;;  %v907_v36 = vshll.u32 %v814_v25, 16 }
  0x8b   : > { %6867 = vmatpush3.bf16.msra.mxu1 %v7663_v20  ;;  %v923_v20 = vshll.u32 %v861_v15, 16  ;;  %770 = vst [vmem:[#allocation2 + $0x24] sm:$0xf] %v6163_v16  ;;  %771 = vst [vmem:[#allocation2 + $0x28] sm:$0xf] %v6164_v17  ;;  %v913_v37 = vshll.u32 %v815_v32, 16  ;;  %v8382_v18 = vor.u32 %v440_v22, %v8361_v21 }
  0x8c   : > { %7059 = vmatpush3.bf16.msra.mxu0 %v7664_v23  ;;  %6868 = vmatprep.subr.bf16.mxu1 %v7665_v34  ;;  %v2727_v23 = vld [vmem:[#allocation2 + $0xc] sm:$0xf]  ;;  %v2730_v38 = vld [vmem:[#allocation2 + $0x18] sm:$0xf]  ;;  %774 = vst [vmem:[#allocation2 + $0x34] sm:$0xf] %v6167_v27 }
  0x8d   : > { %7060 = vmatprep.subr.bf16.mxu0 %v7666_v42  ;;  %v2776_v28 = vshrl.u32 %v2727_v23, 16  ;;  %v2779_v29 = vshll.u32 %v2727_v23, 16  ;;  %v2791_v43 = vrot.slane %v2789_v31, 4  ;;  %v8368_v44 = vld [vmem:[#allocation2 + $0x1c] sm:$0xf]  ;;  %v909_v46 = vrot.slane %v907_v36, 5 }
  0x8e   : > { %v915_v47 = vrot.slane %v913_v37, 5  ;;  %v917_v48 = vshrl.u32 %v815_v32, 16  ;;  %v925_v51 = vrot.slane %v923_v20, 5  ;;  %v2800_v52 = vshrl.u32 %v2730_v38, 16  ;;  %v8370_v55 = vld [vmem:[#allocation2 + $0x20] sm:$0x1] }
  0x8f   : > { %6869 = vmatpush3.bf16.msra.mxu1 %v7665_v34  ;;  %v904_v34 = vshrl.u32 %v814_v25, 16  ;;  %v2778_v39 = vrot.slane %v2776_v28, 4  ;;  %v2781_v40 = vrot.slane %v2779_v29, 5  ;;  %v2803_v56 = vshll.u32 %v2730_v38, 16  ;;  %v816_v8 = vld [vmem:[#allocation2 + $0x18] sm:$0xf] }
  0x90   : > { %7061 = vmatpush3.bf16.msra.mxu0 %v7666_v42  ;;  %6902 = vmatprep.subr.bf16.mxu1 %v8338_v57  ;;  %v2787_v42 = vrot.slane %v2785_v30, 5  ;;  %v919_v54 = vrot.slane %v917_v48, 4  ;;  %v2809_v58 = vshll.u32 %v8368_v44, 16  ;;  %v2802_v61 = vrot.slane %v2800_v52, 4  ;;  %v817_v13 = vld [vmem:[#allocation2 + $0x1c] sm:$0xf] }
  0x91   : > { %7094 = vmatprep.subr.bf16.mxu0 %v8342_v2  ;;  %v906_v45 = vrot.slane %v904_v34, 4  ;;  %v2782_v49 = vor.u32 %v2781_v40, %v2778_v39  ;;  %v2813_v62 = vshrl.u32 %v8368_v44, 16  ;;  %v2805_v1 = vrot.slane %v2803_v56, 5  ;;  %v862_v17 = vld [vmem:[#allocation2 + $0x20] sm:$0x1] }
  0x92   : > { %v2792_v50 = vor.u32 %v2791_v43, %v2787_v42  ;;  %v920_v0 = vor.u32 %v919_v54, %v915_v47  ;;  %v2811_v3 = vrot.slane %v2809_v58, 5  ;;  %v2819_v7 = vshll.u32 %v8370_v55, 16  ;;  %v2733_v26 = vld [vmem:[#allocation2 + $0x24] sm:$0xf]  ;;  %v8387_v31 = vld [vmem:[#allocation2 + $0x28] sm:$0xf] }
  0x93   : > { %v910_v53 = vor.u32 %v909_v46, %v906_v45  ;;  %v2783_v59 = vrot.slane %v2782_v49, 4  ;;  %v2815_v6 = vrot.slane %v2813_v62, 4  ;;  %v2806_v12 = vor.u32 %v2805_v1, %v2802_v61  ;;  %v7673_v32 = vld [vmem:[#allocation6 + $0x8] sm:$0xff]   ;;  %v8391_v38 = vld [vmem:[#allocation2 + $0x2c] sm:$0x1] }
  0x94   : > { %v2793_v60 = vrot.slane %v2792_v50, 4  ;;  %v921_v11 = vrot.slane %v920_v0, 4  ;;  %v2821_v16 = vrot.slane %v2819_v7, 5  ;;  %v928_v23 = vshrl.u32 %v816_v8, 16  ;;  %v818_v45 = vld [vmem:[#allocation2 + $0x24] sm:$0xf] }
  0x95   : > { %v911_v63 = vrot.slane %v910_v53, 4  ;;  %v2788_v4 = vsel %vm8316_vm4, %v2783_v59, %v2787_v42  ;;  %v2816_v15 = vor.u32 %v2815_v6, %v2811_v3  ;;  %v2807_v20 = vrot.slane %v2806_v12, 4  ;;  %v7678_v46 = vld [vmem:[#allocation6 + $0x10] sm:$0xff]  }
  0x96   : > { %v2798_v5 = vsel %vm8316_vm4, %v2793_v60, %v2797_v33  ;;  %v926_v19 = vsel %vm8316_vm4, %v921_v11, %v925_v51  ;;  %v931_v25 = vshll.u32 %v816_v8, 16  ;;  %v3553_v29 = vrot.slane %v8368_v44, 5  ;;  %v7671_v33 = vld [vmem:[#allocation6 + $0x148] sm:$0xff]   ;;  %v819_v51 = vld [vmem:[#allocation2 + $0x28] sm:$0xf] }
  0x97   : > { %v6317_v9 = vcombine.low %v2788_v4, %v2798_v5  ;;  %v916_v10 = vsel %vm8316_vm4, %v911_v63, %v915_v47  ;;  %v2817_v28 = vrot.slane %v2816_v15, 4  ;;  %v937_v30 = vshll.u32 %v817_v13, 16  ;;  %v863_v58 = vld [vmem:[#allocation2 + $0x2c] sm:$0x1]  ;;  %v2736_v4 = vld [vmem:[#allocation2 + $0x30] sm:$0xf] }
  0x98   : > { %v6206_v27 = vcombine.low %v916_v10, %v926_v19  ;;  %v2812_v22 = vsel %vm8316_vm4, %v2807_v20, %v2811_v3  ;;  %v930_v34 = vrot.slane %v928_v23, 4  ;;  %v933_v36 = vrot.slane %v931_v25, 5  ;;  %v7675_v63 = vld [vmem:[#allocation6 + $0x150] sm:$0xff]   ;;  %v8406_v20 = vld [vmem:[#allocation2 + $0x38] sm:$0x1] }
  0x99   : > { %7062 = vmatprep.mubr.bf16.mxu0 %v6317_v9  ;;  %v941_v37 = vshrl.u32 %v817_v13, 16  ;;  %v2822_v39 = vsel %vm8316_vm4, %v2817_v28, %v2821_v16  ;;  %v939_v40 = vrot.slane %v937_v30, 5  ;;  %v947_v42 = vshll.u32 %v862_v17, 16  ;;  %v8402_v9 = vld [vmem:[#allocation2 + $0x34] sm:$0xf] }
  0x9a   : > { %6871 = vmatmul.mubr.bf16.vlgmr.msra.gmra.mrb[0].mxu1 %v6206_v27  ;;  %v2824_v43 = vshrl.u32 %v2733_v26, 16  ;;  %v6318_v47 = vcombine.low %v2812_v22, %v2822_v39  ;;  %v934_v48 = vor.u32 %v933_v36, %v930_v34  ;;  %v2827_v50 = vshll.u32 %v2733_v26, 16  ;;  %v820_v28 = vld [vmem:[#allocation2 + $0x30] sm:$0xf] }
  0x9b   : > { %6903 = vmatpush3.bf16.msra.mxu1 %v8338_v57  ;;  %v943_v49 = vrot.slane %v941_v37, 4  ;;  %v949_v52 = vrot.slane %v947_v42, 5  ;;  %v2833_v54 = vshll.u32 %v8387_v31, 16  ;;  %v2837_v56 = vshrl.u32 %v8387_v31, 16  ;;  %v7676_v36 = vld [vmem:[#allocation6 + $0x158] sm:$0xff]  }
  0x9c   : > { %v2826_v53 = vrot.slane %v2824_v43, 4  ;;  %6904 = vmatprep.subr.bf16.mxu1 %v7673_v32  ;;  %7063 = vmatmul.mubr.bf16.vlgmr.msra.gmra.mrb[0].mxu0 %v6318_v47  ;;  %v935_v59 = vrot.slane %v934_v48, 4  ;;  %v2829_v61 = vrot.slane %v2827_v50, 5  ;;  %v2843_v62 = vshll.u32 %v8391_v38, 16  ;;  %v821_v37 = vld [vmem:[#allocation2 + $0x34] sm:$0xf] }
  0x9d   : > { %v944_v60 = vor.u32 %v943_v49, %v939_v40  ;;  %7095 = vmatpush3.bf16.msra.mxu0 %v8342_v2  ;;  %v2835_v57 = vrot.slane %v2833_v54, 5  ;;  %v2839_v0 = vrot.slane %v2837_v56, 4  ;;  %v952_v1 = vshrl.u32 %v818_v45, 16  ;;  %v7683_v2 = vld [vmem:[#allocation6 + $0x18] sm:$0xff]   ;;  %v7688_v49 = vld [vmem:[#allocation6 + $0x20] sm:$0xff]  }
  0x9e   : > { %v955_v3 = vshll.u32 %v818_v45, 16  ;;  %7096 = vmatprep.subr.bf16.mxu0 %v7671_v33  ;;  %v940_v5 = vsel %vm8316_vm4, %v935_v59, %v939_v40  ;;  %v2830_v7 = vor.u32 %v2829_v61, %v2826_v53  ;;  %v2845_v8 = vrot.slane %v2843_v62, 5  ;;  %v864_v53 = vld [vmem:[#allocation2 + $0x38] sm:$0x1] }
  0x9f   : > { %v945_v6 = vrot.slane %v944_v60, 4  ;;  %6905 = vmatpush3.bf16.msra.mxu1 %v7673_v32  ;;  %v2840_v10 = vor.u32 %v2839_v0, %v2835_v57  ;;  %v954_v11 = vrot.slane %v952_v1, 4  ;;  %v961_v13 = vshll.u32 %v819_v51, 16  ;;  %v7680_v54 = vld [vmem:[#allocation6 + $0x160] sm:$0xff]  }
  0xa0   : > { %v957_v12 = vrot.slane %v955_v3, 5  ;;  %6906 = vmatprep.subr.bf16.mxu1 %v7678_v46  ;;  %v2831_v16 = vrot.slane %v2830_v7, 4  ;;  %v965_v17 = vshrl.u32 %v819_v51, 16  ;;  %v971_v19 = vshll.u32 %v863_v58, 16 }
  0xa1   : > { %v950_v15 = vsel %vm8316_vm4, %v945_v6, %v949_v52  ;;  %7097 = vmatpush3.bf16.msra.mxu0 %v7671_v33  ;;  %v2841_v25 = vrot.slane %v2840_v10, 4  ;;  %v963_v27 = vrot.slane %v961_v13, 5  ;;  %v2848_v34 = vshrl.u32 %v2736_v4, 16  ;;  %v7681_v6 = vld [vmem:[#allocation6 + $0x168] sm:$0xff]  }
  0xa2   : > { %v6207_v23 = vcombine.low %v940_v5, %v950_v15  ;;  %v958_v26 = vor.u32 %v957_v12, %v954_v11  ;;  %v2836_v30 = vsel %vm8316_vm4, %v2831_v16, %v2835_v57  ;;  %v967_v32 = vrot.slane %v965_v17, 4  ;;  %7098 = vmatprep.subr.bf16.mxu0 %v7675_v63  ;;  %v7679_v5 = vld [vmem:[%s8302_s5 + $0x28] sm:$0xff]   ;;  %v7682_v17 = vld [vmem:[%s8302_s5 + $0x30] sm:$0xff]  }
  0xa3   : > { %v973_v22 = vrot.slane %v971_v19, 5  ;;  %6907 = vmatpush3.bf16.msra.mxu1 %v7678_v46  ;;  %v2846_v39 = vsel %vm8316_vm4, %v2841_v25, %v2845_v8  ;;  %v2851_v40 = vshll.u32 %v2736_v4, 16  ;;  %v2857_v42 = vshll.u32 %v8402_v9, 16  ;;  %v7692_v12 = vld [vmem:[#allocation6 + $0x28] sm:$0xff]  }
  0xa4   : > { %6874 = vmatprep.mubr.bf16.mxu1 %v6207_v23  ;;  %v959_v33 = vrot.slane %v958_v26, 4  ;;  %6908 = vmatprep.subr.bf16.mxu1 %v7683_v2  ;;  %v6319_v43 = vcombine.low %v2836_v30, %v2846_v39  ;;  %v968_v45 = vor.u32 %v967_v32, %v963_v27  ;;  %v2850_v47 = vrot.slane %v2848_v34, 4 }
  0xa5   : > { %v2861_v48 = vshrl.u32 %v8402_v9, 16  ;;  %v2853_v51 = vrot.slane %v2851_v40, 5  ;;  %v2859_v46 = vrot.slane %v2857_v42, 5  ;;  %v2867_v52 = vshll.u32 %v8406_v20, 16  ;;  %7099 = vmatpush3.bf16.msra.mxu0 %v7675_v63 }
  0xa6   : > { %v964_v50 = vsel %vm8316_vm4, %v959_v33, %v963_v27  ;;  %7066 = vmatprep.mubr.bf16.mxu0 %v6319_v43  ;;  %v969_v56 = vrot.slane %v968_v45, 4  ;;  %7100 = vmatprep.subr.bf16.mxu0 %v7676_v36  ;;  %v976_v59 = vshrl.u32 %v820_v28, 16  ;;  %v979_v60 = vshll.u32 %v820_v28, 16  ;;  %v8430_v27 = vld [vmem:[%s8302_s5 + $0x38] sm:$0xff]   ;;  %v7696_v28 = vld [vmem:[#allocation6 + $0x30] sm:$0xff]  }
  0xa7   : > { %v2863_v58 = vrot.slane %v2861_v48, 4  ;;  %v2854_v61 = vor.u32 %v2853_v51, %v2850_v47  ;;  %v2869_v62 = vrot.slane %v2867_v52, 5  ;;  %v985_v57 = vshll.u32 %v821_v37, 16  ;;  %6909 = vmatpush3.bf16.msra.mxu1 %v7683_v2  ;;  %v7685_v43 = vld [vmem:[#allocation6 + $0x170] sm:$0xff]  }
  0xa8   : > { %v989_v0 = vshrl.u32 %v821_v37, 16  ;;  %v974_v1 = vsel %vm8316_vm4, %v969_v56, %v973_v22  ;;  %v978_v4 = vrot.slane %v976_v59, 4  ;;  %v981_v63 = vrot.slane %v979_v60, 5  ;;  %6910 = vmatprep.subr.bf16.mxu1 %v7688_v49  ;;  %v7700_v60 = vld [vmem:[#allocation6 + $0x38] sm:$0xff]  }
  0xa9   : > { %v2864_v3 = vor.u32 %v2863_v58, %v2859_v46  ;;  %v6208_v7 = vcombine.low %v964_v50, %v974_v1  ;;  %v2855_v8 = vrot.slane %v2854_v61, 4  ;;  %7101 = vmatpush3.bf16.msra.mxu0 %v7676_v36  ;;  %v987_v10 = vrot.slane %v985_v57, 5 }
  0xaa   : > { %v991_v11 = vrot.slane %v989_v0, 4  ;;  %v982_v2 = vor.u32 %v981_v63, %v978_v4  ;;  %v995_v15 = vshll.u32 %v864_v53, 16  ;;  %v559_v16 = vsel %vm8322_vm5, 0, %v8382_v18  ;;  %7102 = vmatprep.subr.bf16.mxu0 %v7680_v54  ;;  %v8444_v53 = vld [vmem:[#allocation6 + $0x178] sm:$0xff]  }
  0xab   : > { %v2865_v13 = vrot.slane %v2864_v3, 4  ;;  %6875 = vmatmul.mubr.bf16.gmra.mrb[4].mxu1 %v6208_v7  ;;  %v2860_v19 = vsel %vm8316_vm4, %v2855_v8, %v2859_v46  ;;  %v575_v25 = vsel %vm8322_vm5, %v8361_v21, 0  ;;  %v6169_v26 = vcombine.low %v559_v16, %v559_v16 }
  0xac   : > { %v992_v23 = vor.u32 %v991_v11, %v987_v10  ;;  %v983_v32 = vrot.slane %v982_v2, 4  ;;  %v997_v18 = vrot.slane %v995_v15, 5  ;;  %v6170_v22 = vcombine.high %v559_v16, %v559_v16  ;;  %6911 = vmatpush3.bf16.msra.mxu1 %v7688_v49  ;;  %v8439_v49 = vld [vmem:[#allocation2 + $0xc] sm:$0xe]  ;;  %v7704_v11 = vld [vmem:[#allocation6 + $0x80] sm:$0xff]  }
  0xad   : > { %v2870_v30 = vsel %vm8316_vm4, %v2865_v13, %v2869_v62  ;;  %v6171_v37 = vcombine.low %v575_v25, %v575_v25  ;;  %776 = vst [vmem:[#allocation2 + $0x3c] sm:$0xf] %v6169_v26  ;;  %v444_v39 = vshrl.u32 %v7679_v5, 16  ;;  %7103 = vmatpush3.bf16.msra.mxu0 %v7680_v54  ;;  %6912 = vmatprep.subr.bf16.mxu1 %v7692_v12  ;;  %v447_v33 = vshll.u32 %v7679_v5, 16 }
  0xae   : > { %v6320_v34 = vcombine.low %v2860_v19, %v2870_v30  ;;  %v993_v36 = vrot.slane %v992_v23, 4  ;;  %v988_v21 = vsel %vm8316_vm4, %v983_v32, %v987_v10  ;;  %777 = vst [vmem:[#allocation2 + $0x40] sm:$0xf] %v6170_v22  ;;  %7104 = vmatprep.subr.bf16.mxu0 %v7681_v6  ;;  %v451_v40 = vshrl.u32 %v7682_v17, 16  ;;  %v8470_v19 = vld [vmem:[%s8302_s5 + $0x40] sm:$0xff]  }
  0xaf   : > { %v454_v42 = vshll.u32 %v7682_v17, 16  ;;  %778 = vst [vmem:[#allocation2 + $0x44] sm:$0x1] %v6171_v37  ;;  %v446_v47 = vrot.slane %v444_v39, 7  ;;  %v458_v48 = vshrl.u32 %v8430_v27, 16  ;;  %v3555_v50 = vrot.slane %v3553_v29, 4 }
  0xb0   : > { %7067 = vmatmul.mubr.bf16.gmra.mrb[4].mxu0 %v6320_v34  ;;  %v998_v45 = vsel %vm8316_vm4, %v993_v36, %v997_v18  ;;  %v3556_v51 = vrot.slane %v8370_v55, 5  ;;  %v453_v52 = vrot.slane %v451_v40, 7  ;;  %6913 = vmatpush3.bf16.msra.mxu1 %v7692_v12  ;;  %v461_v59 = vshll.u32 %v8430_v27, 16  ;;  %v8482_v32 = vld [vmem:[#allocation6 + $0x180] sm:$0xff]  }
  0xb1   : > { %v6209_v46 = vcombine.low %v988_v21, %v998_v45  ;;  %v449_v54 = vor.u32 %v447_v33, %v446_v47  ;;  %v576_v56 = vsel %vm8322_vm5, %v446_v47, 0  ;;  %7105 = vmatpush3.bf16.msra.mxu0 %v7681_v6  ;;  %v8448_v58 = vrot.slane %v458_v48, 7  ;;  %6914 = vmatprep.subr.bf16.mxu1 %v7696_v28 }
  0xb2   : > { %v6174_v61 = vcombine.low %v576_v56, %v576_v56  ;;  %v456_v62 = vor.u32 %v454_v42, %v453_v52  ;;  %v577_v55 = vsel %vm8322_vm5, %v453_v52, 0  ;;  %7106 = vmatprep.subr.bf16.mxu0 %v7685_v43  ;;  %v6341_v57 = vrot.slane %v8439_v49, 9 }
  0xb3   : > { %6878 = vmatprep.mubr.bf16.mxu1 %v6209_v46  ;;  %v560_v0 = vsel %vm8322_vm5, 0, %v449_v54  ;;  %v6177_v1 = vcombine.low %v577_v55, %v577_v55  ;;  %v578_v3 = vsel %vm8322_vm5, %v8448_v58, 0  ;;  %v8480_v30 = vsel %vm8461_vm8, %v3555_v50, %v3556_v51 }
  0xb4   : > { %v2739_v63 = vld [vmem:[#allocation2 + $0x3c] sm:$0xf]  ;;  %v6172_v6 = vcombine.low %v560_v0, %v560_v0  ;;  %v6173_v7 = vcombine.high %v560_v0, %v560_v0  ;;  %781 = vst [vmem:[#allocation2 + $0x50] sm:$0x1] %v6174_v61  ;;  %v561_v8 = vsel %vm8322_vm5, 0, %v456_v62  ;;  %v6180_v10 = vcombine.low %v578_v3, %v578_v3  ;;  %6915 = vmatpush3.bf16.msra.mxu1 %v7696_v28 }
  0xb5   : > { %v822_v5 = vld [vmem:[#allocation2 + $0x3c] sm:$0xf]  ;;  %v8467_v12 = vld [vmem:[#allocation2 + $0x40] sm:$0xf]  ;;  %v2872_v13 = vshrl.u32 %v2739_v63, 16  ;;  %v2875_v2 = vshll.u32 %v2739_v63, 16  ;;  %v6175_v16 = vcombine.low %v561_v8, %v561_v8  ;;  %v6176_v17 = vcombine.high %v561_v8, %v561_v8  ;;  %7107 = vmatpush3.bf16.msra.mxu0 %v7685_v43  ;;  %6916 = vmatprep.subr.bf16.mxu1 %v7700_v60 }
  0xb6   : > { %v823_v15 = vld [vmem:[#allocation2 + $0x40] sm:$0xf]  ;;  %784 = vst [vmem:[#allocation2 + $0x5c] sm:$0x1] %v6177_v1  ;;  %v8472_v23 = vld [vmem:[#allocation2 + $0x44] sm:$0x1]  ;;  %7108 = vmatprep.subr.bf16.mxu0 %v8444_v53 }
  0xb7   : > { %v2881_v25 = vshll.u32 %v8467_v12, 16  ;;  %v2885_v26 = vshrl.u32 %v8467_v12, 16  ;;  %779 = vst [vmem:[#allocation2 + $0x48] sm:$0xf] %v6172_v6  ;;  %780 = vst [vmem:[#allocation2 + $0x4c] sm:$0xf] %v6173_v7  ;;  %v8507_v7 = vor.u32 %v461_v59, %v8448_v58 }
  0xb8   : > { %787 = vst [vmem:[#allocation2 + $0x68] sm:$0x1] %v6180_v10  ;;  %v3546_v28 = vrot.slane %v8364_v24, 5  ;;  %v2874_v18 = vrot.slane %v2872_v13, 4  ;;  %v2877_v22 = vrot.slane %v2875_v2, 5  ;;  %v2891_v34 = vshll.u32 %v8472_v23, 16  ;;  %6917 = vmatpush3.bf16.msra.mxu1 %v7700_v60 }
  0xb9   : > { %v865_v36 = vld [vmem:[#allocation2 + $0x44] sm:$0x1]  ;;  %v1000_v37 = vshrl.u32 %v822_v5, 16  ;;  %782 = vst [vmem:[#allocation2 + $0x54] sm:$0xf] %v6175_v16  ;;  %v2883_v39 = vrot.slane %v2881_v25, 5  ;;  %7109 = vmatpush3.bf16.msra.mxu0 %v8444_v53  ;;  %6950 = vmatprep.subr.bf16.mxu1 %v7704_v11 }
  0xba   : > { %783 = vst [vmem:[#allocation2 + $0x58] sm:$0xf] %v6176_v17  ;;  %v2887_v21 = vrot.slane %v2885_v26, 4  ;;  %v1003_v33 = vshll.u32 %v822_v5, 16  ;;  %v1009_v40 = vshll.u32 %v823_v15, 16  ;;  %v2878_v42 = vor.u32 %v2877_v22, %v2874_v18  ;;  %7142 = vmatprep.subr.bf16.mxu0 %v8482_v32 }
  0xbb   : > { %v2893_v43 = vrot.slane %v2891_v34, 5  ;;  %v1002_v45 = vrot.slane %v1000_v37, 4  ;;  %v1013_v47 = vshrl.u32 %v823_v15, 16  ;;  %v1019_v46 = vshll.u32 %v865_v36, 16  ;;  %v8488_v61 = vld [vmem:[#allocation2 + $0x50] sm:$0x1] }
  0xbc   : > { %v2888_v48 = vor.u32 %v2887_v21, %v2883_v39  ;;  %v1005_v50 = vrot.slane %v1003_v33, 5  ;;  %v1011_v51 = vrot.slane %v1009_v40, 5  ;;  %v3549_v52 = vrot.slane %v8356_v14, 5  ;;  %v866_v26 = vld [vmem:[#allocation2 + $0x50] sm:$0x1] }
  0xbd   : > { %v2879_v54 = vrot.slane %v2878_v42, 4  ;;  %v1015_v56 = vrot.slane %v1013_v47, 4  ;;  %v465_v60 = vshrl.u32 %v8470_v19, 16  ;;  %v2915_v0 = vshll.u32 %v8488_v61, 16 }
  0xbe   : > { %v2889_v62 = vrot.slane %v2888_v48, 4  ;;  %v1006_v55 = vor.u32 %v1005_v50, %v1002_v45  ;;  %v8498_v53 = vsel %vm8461_vm8, %v6341_v57, %v3546_v28  ;;  %v1021_v63 = vrot.slane %v1019_v46, 5  ;;  %v2742_v5 = vld [vmem:[#allocation2 + $0x48] sm:$0xf]  ;;  %v8502_v6 = vld [vmem:[#allocation2 + $0x4c] sm:$0xf] }
  0xbf   : > { %v2884_v1 = vsel %vm8316_vm4, %v2879_v54, %v2883_v39  ;;  %v1016_v3 = vor.u32 %v1015_v56, %v1011_v51  ;;  %v2896_v10 = vshrl.u32 %v2742_v5, 16  ;;  %v2899_v57 = vshll.u32 %v2742_v5, 16  ;;  %v824_v11 = vld [vmem:[#allocation2 + $0x48] sm:$0xf]  ;;  %v825_v17 = vld [vmem:[#allocation2 + $0x4c] sm:$0xf] }
  0xc0   : > { %v2894_v49 = vsel %vm8316_vm4, %v2889_v62, %v2893_v43  ;;  %v1007_v8 = vrot.slane %v1006_v55, 4  ;;  %v2905_v15 = vshll.u32 %v8502_v6, 16  ;;  %v2909_v16 = vshrl.u32 %v8502_v6, 16  ;;  %v2745_v37 = vld [vmem:[#allocation2 + $0x54] sm:$0xf] }
  0xc1   : > { %v6321_v13 = vcombine.low %v2884_v1, %v2894_v49  ;;  %v1017_v2 = vrot.slane %v1016_v3, 4  ;;  %v2898_v27 = vrot.slane %v2896_v10, 4  ;;  %v2901_v58 = vrot.slane %v2899_v57, 5  ;;  %v8517_v48 = vld [vmem:[#allocation2 + $0x58] sm:$0xf] }
  0xc2   : > { %v1012_v25 = vsel %vm8316_vm4, %v1007_v8, %v1011_v51  ;;  %v2917_v59 = vrot.slane %v2915_v0, 5  ;;  %v2907_v22 = vrot.slane %v2905_v15, 5  ;;  %v2911_v34 = vrot.slane %v2909_v16, 4  ;;  %v8519_v54 = vld [vmem:[#allocation2 + $0x5c] sm:$0x1] }
  0xc3   : > { %7070 = vmatprep.mubr.bf16.mxu0 %v6321_v13  ;;  %v1022_v18 = vsel %vm8316_vm4, %v1017_v2, %v1021_v63  ;;  %v1024_v36 = vshrl.u32 %v824_v11, 16  ;;  %v2902_v21 = vor.u32 %v2901_v58, %v2898_v27  ;;  %v1027_v33 = vshll.u32 %v824_v11, 16  ;;  %v826_v3 = vld [vmem:[#allocation2 + $0x54] sm:$0xf]  ;;  %v827_v2 = vld [vmem:[#allocation2 + $0x58] sm:$0xf] }
  0xc4   : > { %v6210_v39 = vcombine.low %v1012_v25, %v1022_v18  ;;  %v1033_v40 = vshll.u32 %v825_v17, 16  ;;  %v2912_v42 = vor.u32 %v2911_v34, %v2907_v22  ;;  %v1037_v45 = vshrl.u32 %v825_v17, 16  ;;  %v867_v27 = vld [vmem:[#allocation2 + $0x5c] sm:$0x1] }
  0xc5   : > { %v1026_v43 = vrot.slane %v1024_v36, 4  ;;  %v1043_v47 = vshll.u32 %v866_v26, 16  ;;  %v2903_v50 = vrot.slane %v2902_v21, 4  ;;  %v1029_v51 = vrot.slane %v1027_v33, 5  ;;  %v868_v21 = vld [vmem:[#allocation2 + $0x68] sm:$0x1] }
  0xc6   : > { %6879 = vmatmul.mubr.bf16.gmra.mrb[8].mxu1 %v6210_v39  ;;  %v1035_v46 = vrot.slane %v1033_v40, 5  ;;  %v2920_v56 = vshrl.u32 %v2745_v37, 16  ;;  %v2913_v62 = vrot.slane %v2912_v42, 4  ;;  %v1039_v55 = vrot.slane %v1037_v45, 4  ;;  %v8530_v39 = vld [vmem:[#allocation2 + $0x68] sm:$0x1] }
  0xc7   : > { %v1045_v0 = vrot.slane %v1043_v47, 5  ;;  %v2923_v1 = vshll.u32 %v2745_v37, 16  ;;  %v2908_v63 = vsel %vm8316_vm4, %v2903_v50, %v2907_v22  ;;  %v1030_v5 = vor.u32 %v1029_v51, %v1026_v43 }
  0xc8   : > { %v2922_v49 = vrot.slane %v2920_v56, 4  ;;  %v2929_v8 = vshll.u32 %v8517_v48, 16  ;;  %v2918_v10 = vsel %vm8316_vm4, %v2913_v62, %v2917_v59  ;;  %v1040_v57 = vor.u32 %v1039_v55, %v1035_v46 }
  0xc9   : > { %v2925_v11 = vrot.slane %v2923_v1, 5  ;;  %v2933_v13 = vshrl.u32 %v8517_v48, 16  ;;  %v6322_v15 = vcombine.low %v2908_v63, %v2918_v10  ;;  %v1031_v16 = vrot.slane %v1030_v5, 4  ;;  %v3481_v1 = vld [vmem:[#allocation2 + $0x18] sm:$0xe] }
  0xca   : > { %v2931_v17 = vrot.slane %v2929_v8, 5  ;;  %v2939_v25 = vshll.u32 %v8519_v54, 16  ;;  %v1041_v58 = vrot.slane %v1040_v57, 4  ;;  %v1048_v22 = vshrl.u32 %v826_v3, 16 }
  0xcb   : > { %v2926_v26 = vor.u32 %v2925_v11, %v2922_v49  ;;  %v2935_v18 = vrot.slane %v2933_v13, 4  ;;  %7071 = vmatmul.mubr.bf16.gmra.mrb[8].mxu0 %v6322_v15  ;;  %v1036_v34 = vsel %vm8316_vm4, %v1031_v16, %v1035_v46  ;;  %v1051_v36 = vshll.u32 %v826_v3, 16  ;;  %v7690_v11 = vld [vmem:[%s8302_s5 + $0x48] sm:$0xff]  }
  0xcc   : > { %v2941_v59 = vrot.slane %v2939_v25, 5  ;;  %v1057_v37 = vshll.u32 %v827_v2, 16  ;;  %v1046_v33 = vsel %vm8316_vm4, %v1041_v58, %v1045_v0  ;;  %v1050_v43 = vrot.slane %v1048_v22, 4  ;;  %v8552_v58 = vld [vmem:[#allocation2 + $0x24] sm:$0xe] }
  0xcd   : > { %v2927_v40 = vrot.slane %v2926_v26, 4  ;;  %v2936_v42 = vor.u32 %v2935_v18, %v2931_v17  ;;  %v6211_v45 = vcombine.low %v1036_v34, %v1046_v33  ;;  %v1053_v47 = vrot.slane %v1051_v36, 5 }
  0xce   : > { %v1059_v50 = vrot.slane %v1057_v37, 5  ;;  %v1061_v51 = vshrl.u32 %v827_v2, 16  ;;  %v1067_v62 = vshll.u32 %v867_v27, 16  ;;  %v562_v55 = vsel %vm8322_vm5, 0, %v8507_v7 }
  0xcf   : > { %v2932_v46 = vsel %vm8316_vm4, %v2927_v40, %v2931_v17  ;;  %v2937_v56 = vrot.slane %v2936_v42, 4  ;;  %6882 = vmatprep.mubr.bf16.mxu1 %v6211_v45  ;;  %v1054_v0 = vor.u32 %v1053_v47, %v1050_v43  ;;  %v6178_v63 = vcombine.low %v562_v55, %v562_v55 }
  0xd0   : > { %v1063_v3 = vrot.slane %v1061_v51, 4  ;;  %v6179_v5 = vcombine.high %v562_v55, %v562_v55  ;;  %v1069_v8 = vrot.slane %v1067_v62, 5  ;;  %v2963_v10 = vshll.u32 %v8530_v39, 16 }
  0xd1   : > { %v2942_v49 = vsel %vm8316_vm4, %v2937_v56, %v2941_v59  ;;  %v1091_v57 = vshll.u32 %v868_v21, 16  ;;  %v1055_v2 = vrot.slane %v1054_v0, 4  ;;  %785 = vst [vmem:[#allocation2 + $0x60] sm:$0xf] %v6178_v63  ;;  %v3548_v7 = vrot.slane %v3546_v28, 4 }
  0xd2   : > { %v6323_v13 = vcombine.low %v2932_v46, %v2942_v49  ;;  %v1064_v15 = vor.u32 %v1063_v3, %v1059_v50  ;;  %786 = vst [vmem:[#allocation2 + $0x64] sm:$0xf] %v6179_v5  ;;  %v8545_v16 = vrot.slane %v2963_v10, 5  ;;  %v467_v25 = vrot.slane %v465_v60, 7 }
  0xd3   : > { %v8547_v17 = vrot.slane %v1091_v57, 5  ;;  %v468_v27 = vshll.u32 %v8470_v19, 16  ;;  %v1060_v26 = vsel %vm8316_vm4, %v1055_v2, %v1059_v50  ;;  %v8560_v24 = vsel %vm8461_vm8, %v3548_v7, %v3549_v52 }
  0xd4   : > { %7074 = vmatprep.mubr.bf16.mxu0 %v6323_v13  ;;  %v1065_v18 = vrot.slane %v1064_v15, 4  ;;  %v6342_v28 = vrot.slane %v3481_v1, 9  ;;  %v6357_v22 = vcombine.low %v8498_v53, %v8560_v24  ;;  %v579_v19 = vsel %vm8322_vm5, %v467_v25, 0 }
  0xd5   : > { %v470_v60 = vor.u32 %v468_v27, %v467_v25  ;;  %v472_v34 = vshrl.u32 %v7690_v11, 16  ;;  %v6183_v36 = vcombine.low %v579_v19, %v579_v19  ;;  %v475_v52 = vshll.u32 %v7690_v11, 16 }
  0xd6   : > { %v1070_v59 = vsel %vm8316_vm4, %v1065_v18, %v1069_v8  ;;  %v8572_v14 = vsel %vm8461_vm8, %v6342_v28, %v3553_v29  ;;  %v6343_v45 = vrot.slane %v8552_v58, 9  ;;  %v3560_v44 = vrot.slane %v8387_v31, 5 }
  0xd7   : > { %v6212_v37 = vcombine.low %v1060_v26, %v1070_v59  ;;  %v563_v21 = vsel %vm8322_vm5, 0, %v470_v60  ;;  %v6358_v33 = vcombine.low %v8572_v14, %v8480_v30  ;;  %v474_v40 = vrot.slane %v472_v34, 7  ;;  %790 = vst [vmem:[#allocation2 + $0x74] sm:$0x1] %v6183_v36 }
  0xd8   : > { %v6181_v42 = vcombine.low %v563_v21, %v563_v21  ;;  %v6182_v43 = vcombine.high %v563_v21, %v563_v21  ;;  %v2748_v47 = vld [vmem:[#allocation2 + $0x60] sm:$0xf] }
  0xd9   : > { %6883 = vmatmul.mubr.bf16.gmra.mrb[12].mxu1 %v6212_v37  ;;  %v8580_v29 = vld [vmem:[#allocation2 + $0x64] sm:$0xf]  ;;  %v828_v50 = vld [vmem:[#allocation2 + $0x60] sm:$0xf]  ;;  %v477_v51 = vor.u32 %v475_v52, %v474_v40  ;;  %v2944_v46 = vshrl.u32 %v2748_v47, 16  ;;  %v2947_v56 = vshll.u32 %v2748_v47, 16 }
  0xda   : > { %v2953_v62 = vshll.u32 %v8580_v29, 16  ;;  %v2957_v55 = vshrl.u32 %v8580_v29, 16  ;;  %v829_v1 = vld [vmem:[#allocation2 + $0x64] sm:$0xf]  ;;  %788 = vst [vmem:[#allocation2 + $0x6c] sm:$0xf] %v6181_v42 }
  0xdb   : > { %789 = vst [vmem:[#allocation2 + $0x70] sm:$0xf] %v6182_v43  ;;  %v1072_v0 = vshrl.u32 %v828_v50, 16  ;;  %v1075_v3 = vshll.u32 %v828_v50, 16  ;;  %v1081_v63 = vshll.u32 %v829_v1, 16  ;;  %v1085_v5 = vshrl.u32 %v829_v1, 16 }
  0xdc   : > { %v2946_v31 = vrot.slane %v2944_v46, 4  ;;  %v2949_v49 = vrot.slane %v2947_v56, 5  ;;  %v2955_v8 = vrot.slane %v2953_v62, 5  ;;  %v2959_v10 = vrot.slane %v2957_v55, 4  ;;  %v7691_v46 = vld [vmem:[%s8302_s5 + $0x50] sm:$0xff]  }
  0xdd   : > { %v1074_v57 = vrot.slane %v1072_v0, 4  ;;  %v1077_v11 = vrot.slane %v1075_v3, 5  ;;  %v1083_v13 = vrot.slane %v1081_v63, 5  ;;  %v1087_v2 = vrot.slane %v1085_v5, 4  ;;  %v3483_v56 = vld [vmem:[#allocation2 + $0x30] sm:$0xe] }
  0xde   : > { %v2950_v15 = vor.u32 %v2949_v49, %v2946_v31  ;;  %v2960_v7 = vor.u32 %v2959_v10, %v2955_v8  ;;  %v564_v25 = vsel %vm8322_vm5, 0, %v477_v51  ;;  %v580_v27 = vsel %vm8322_vm5, %v474_v40, 0  ;;  %v869_v18 = vld [vmem:[#allocation2 + $0x74] sm:$0x1] }
  0xdf   : > { %v1078_v58 = vor.u32 %v1077_v11, %v1074_v57  ;;  %v1088_v26 = vor.u32 %v1087_v2, %v1083_v13  ;;  %v6184_v28 = vcombine.low %v564_v25, %v564_v25  ;;  %v6185_v60 = vcombine.high %v564_v25, %v564_v25 }
  0xe0   : > { %v2951_v19 = vrot.slane %v2950_v15, 4  ;;  %v2961_v34 = vrot.slane %v2960_v7, 4  ;;  %v1115_v59 = vshll.u32 %v869_v18, 16  ;;  %v6186_v36 = vcombine.low %v580_v27, %v580_v27 }
  0xe1   : > { %v1079_v52 = vrot.slane %v1078_v58, 4  ;;  %v1089_v37 = vrot.slane %v1088_v26, 4  ;;  %v830_v21 = vld [vmem:[#allocation2 + $0x6c] sm:$0xf]  ;;  %791 = vst [vmem:[#allocation2 + $0x78] sm:$0xf] %v6184_v28  ;;  %v8590_v43 = vsel %vm8461_vm8, %v6343_v45, %v3560_v44 }
  0xe2   : > { %v831_v42 = vld [vmem:[#allocation2 + $0x70] sm:$0xf]  ;;  %792 = vst [vmem:[#allocation2 + $0x7c] sm:$0xf] %v6185_v60  ;;  %v2956_v40 = vsel %vm8316_vm4, %v2951_v19, %v2955_v8  ;;  %v2966_v47 = vsel %vm8316_vm4, %v2961_v34, %v8545_v16  ;;  %v1096_v50 = vshrl.u32 %v830_v21, 16  ;;  %v1099_v51 = vshll.u32 %v830_v21, 16 }
  0xe3   : > { %793 = vst [vmem:[#allocation2 + $0x80] sm:$0x1] %v6186_v36  ;;  %v6324_v62 = vcombine.low %v2956_v40, %v2966_v47  ;;  %v1084_v55 = vsel %vm8316_vm4, %v1079_v52, %v1083_v13  ;;  %v1094_v45 = vsel %vm8316_vm4, %v1089_v37, %v8547_v17  ;;  %v1105_v1 = vshll.u32 %v831_v42, 16  ;;  %v7693_v34 = vld [vmem:[#allocation6 + $0x188] sm:$0xff]  }
  0xe4   : > { %v6213_v0 = vcombine.low %v1084_v55, %v1094_v45  ;;  %v1098_v3 = vrot.slane %v1096_v50, 4  ;;  %v1101_v63 = vrot.slane %v1099_v51, 5  ;;  %v1109_v5 = vshrl.u32 %v831_v42, 16  ;;  %v3484_v42 = vld [vmem:[#allocation2 + $0x3c] sm:$0xe] }
  0xe5   : > { %7075 = vmatmul.mubr.bf16.gmra.mrb[12].mxu0 %v6324_v62  ;;  %v1107_v16 = vrot.slane %v1105_v1, 5  ;;  %v1117_v31 = vrot.slane %v1115_v59, 5  ;;  %v3562_v49 = vrot.slane %v3560_v44, 4  ;;  %v3563_v8 = vrot.slane %v8391_v38, 5  ;;  %v7694_v59 = vld [vmem:[%s8302_s5 + $0x58] sm:$0xff]   ;;  %v7695_v51 = vld [vmem:[%s8302_s5 + $0x60] sm:$0xff]  }
  0xe6   : > { %6886 = vmatprep.mubr.bf16.mxu1 %v6213_v0  ;;  %7110 = vmatprep.mubr.bf16.mxu0 %v6357_v22  ;;  %v1102_v10 = vor.u32 %v1101_v63, %v1098_v3  ;;  %v1111_v57 = vrot.slane %v1109_v5, 4  ;;  %v479_v11 = vshrl.u32 %v7691_v46, 16  ;;  %v482_v17 = vshll.u32 %v7691_v46, 16  ;;  %v8636_v63 = vld [vmem:[#allocation2 + $0x48] sm:$0xe] }
  0xe7   : > { %v3564_v13 = vsel %vm8461_vm8, %v3562_v49, %v3563_v8  ;;  %v6344_v2 = vrot.slane %v3483_v56, 9  ;;  %v3567_v15 = vrot.slane %v8402_v9, 5  ;;  %v3570_v7 = vrot.slane %v8406_v20, 5  ;;  %v7697_v5 = vld [vmem:[#allocation6 + $0x190] sm:$0xff]  }
  0xe8   : > { %v1103_v44 = vrot.slane %v1102_v10, 4  ;;  %v1112_v38 = vor.u32 %v1111_v57, %v1107_v16  ;;  %v8611_v25 = vld [vmem:[#allocation2 + $0x78] sm:$0xf]  ;;  %v6359_v53 = vcombine.low %v8590_v43, %v3564_v13  ;;  %v481_v24 = vrot.slane %v479_v11, 7  ;;  %v8647_v13 = vld [vmem:[%s8302_s5 + $0x68] sm:$0xff]  }
  0xe9   : > { %v8613_v27 = vld [vmem:[#allocation2 + $0x7c] sm:$0xf]  ;;  %v1120_v58 = vshrl.u32 %v8611_v25, 16  ;;  %v1123_v26 = vshll.u32 %v8611_v25, 16  ;;  %v3568_v0 = vsel %vm8461_vm8, %v6344_v2, %v3567_v15  ;;  %v3569_v3 = vrot.slane %v3567_v15, 4 }
  0xea   : > { %v870_v22 = vld [vmem:[#allocation2 + $0x80] sm:$0x1]  ;;  %v1129_v18 = vshll.u32 %v8613_v27, 16  ;;  %v1133_v9 = vshrl.u32 %v8613_v27, 16  ;;  %v1108_v20 = vsel %vm8316_vm4, %v1103_v44, %v1107_v16  ;;  %v1113_v28 = vrot.slane %v1112_v38, 4 }
  0xeb   : > { %v1139_v60 = vshll.u32 %v870_v22, 16  ;;  %v484_v19 = vor.u32 %v482_v17, %v481_v24  ;;  %v1122_v36 = vrot.slane %v1120_v58, 4  ;;  %v1125_v52 = vrot.slane %v1123_v26, 5 }
  0xec   : > { %v1131_v37 = vrot.slane %v1129_v18, 5  ;;  %v1135_v21 = vrot.slane %v1133_v9, 4  ;;  %v1118_v43 = vsel %vm8316_vm4, %v1113_v28, %v1117_v31  ;;  %v581_v50 = vsel %vm8322_vm5, %v481_v24, 0  ;;  %v7701_v24 = vld [vmem:[#allocation6 + $0x198] sm:$0xff]  }
  0xed   : > { %v1141_v40 = vrot.slane %v1139_v60, 5  ;;  %v565_v47 = vsel %vm8322_vm5, 0, %v484_v19  ;;  %v6214_v46 = vcombine.low %v1108_v20, %v1118_v43  ;;  %7111 = vmatmul.mubr.bf16.vlgmr.msra.gmra.mrb[0].mxu0 %v6358_v33  ;;  %v1126_v56 = vor.u32 %v1125_v52, %v1122_v36 }
  0xee   : > { %v1136_v62 = vor.u32 %v1135_v21, %v1131_v37  ;;  %v6187_v55 = vcombine.low %v565_v47, %v565_v47  ;;  %7143 = vmatpush3.bf16.msra.mxu0 %v8482_v32  ;;  %7114 = vmatprep.mubr.bf16.mxu0 %v6359_v53  ;;  %v6188_v45 = vcombine.high %v565_v47, %v565_v47  ;;  %v486_v14 = vshrl.u32 %v7694_v59, 16 }
  0xef   : > { %v6189_v1 = vcombine.low %v581_v50, %v581_v50  ;;  %6887 = vmatmul.mubr.bf16.gmra.mrb[16].mxu1 %v6214_v46  ;;  %v1127_v16 = vrot.slane %v1126_v56, 4  ;;  %7144 = vmatprep.subr.bf16.mxu0 %v7693_v34  ;;  %v489_v33 = vshll.u32 %v7694_v59, 16  ;;  %v3571_v32 = vsel %vm8461_vm8, %v3569_v3, %v3570_v7  ;;  %v3486_v46 = vld [vmem:[#allocation2 + $0x54] sm:$0xe] }
  0xf0   : > { %v1137_v30 = vrot.slane %v1136_v62, 4  ;;  %794 = vst [vmem:[#allocation2 + $0x84] sm:$0xf] %v6187_v55  ;;  %795 = vst [vmem:[#allocation2 + $0x88] sm:$0xf] %v6188_v45  ;;  %v6345_v31 = vrot.slane %v3484_v42, 9  ;;  %v6360_v11 = vcombine.low %v3568_v0, %v3571_v32 }
  0xf1   : > { %796 = vst [vmem:[#allocation2 + $0x8c] sm:$0x1] %v6189_v1  ;;  %v3574_v49 = vrot.slane %v8467_v12, 5  ;;  %v3577_v8 = vrot.slane %v8472_v23, 5  ;;  %v1132_v10 = vsel %vm8316_vm4, %v1127_v16, %v1131_v37  ;;  %v488_v17 = vrot.slane %v486_v14, 7 }
  0xf2   : > { %v1142_v57 = vsel %vm8316_vm4, %v1137_v30, %v1141_v40  ;;  %7145 = vmatpush3.bf16.msra.mxu0 %v7693_v34  ;;  %v493_v44 = vshrl.u32 %v7695_v51, 16  ;;  %v496_v38 = vshll.u32 %v7695_v51, 16  ;;  %v6346_v53 = vrot.slane %v8636_v63, 9 }
  0xf3   : > { %v6215_v2 = vcombine.low %v1132_v10, %v1142_v57  ;;  %v3575_v15 = vsel %vm8461_vm8, %v6345_v31, %v3574_v49  ;;  %v3576_v7 = vrot.slane %v3574_v49, 4  ;;  %v491_v12 = vor.u32 %v489_v33, %v488_v17  ;;  %7146 = vmatprep.subr.bf16.mxu0 %v7697_v5  ;;  %v7709_v33 = vld [vmem:[#allocation6 + $0x1a8] sm:$0xff]  }
  0xf4   : > { %v582_v23 = vsel %vm8322_vm5, %v488_v17, 0  ;;  %v495_v26 = vrot.slane %v493_v44, 7  ;;  %v3581_v18 = vrot.slane %v8502_v6, 5  ;;  %v3584_v28 = vrot.slane %v8488_v61, 5  ;;  %v7705_v6 = vld [vmem:[#allocation6 + $0x1a0] sm:$0xff]  }
  0xf5   : > { %6890 = vmatprep.mubr.bf16.mxu1 %v6215_v2  ;;  %v6192_v22 = vcombine.low %v582_v23, %v582_v23  ;;  %v3578_v58 = vsel %vm8461_vm8, %v3576_v7, %v3577_v8  ;;  %7115 = vmatmul.mubr.bf16.gmra.mrb[4].mxu0 %v6360_v11  ;;  %v566_v9 = vsel %vm8322_vm5, 0, %v491_v12  ;;  %v500_v60 = vshrl.u32 %v8647_v13, 16 }
  0xf6   : > { %v6361_v20 = vcombine.low %v3575_v15, %v3578_v58  ;;  %v6190_v34 = vcombine.low %v566_v9, %v566_v9  ;;  %v6191_v59 = vcombine.high %v566_v9, %v566_v9  ;;  %v498_v36 = vor.u32 %v496_v38, %v495_v26  ;;  %7147 = vmatpush3.bf16.msra.mxu0 %v7697_v5  ;;  %v7713_v15 = vld [vmem:[#allocation6 + $0x1b0] sm:$0xff]  }
  0xf7   : > { %v8661_v19 = vld [vmem:[#allocation2 + $0x84] sm:$0xf]  ;;  %799 = vst [vmem:[#allocation2 + $0x98] sm:$0x1] %v6192_v22  ;;  %v583_v52 = vsel %vm8322_vm5, %v495_v26, 0  ;;  %7148 = vmatprep.subr.bf16.mxu0 %v7701_v24  ;;  %v3582_v3 = vsel %vm8461_vm8, %v6346_v53, %v3581_v18  ;;  %v3583_v63 = vrot.slane %v3581_v18, 4 }
  0xf8   : > { %v8665_v37 = vld [vmem:[#allocation2 + $0x88] sm:$0xf]  ;;  %v871_v21 = vld [vmem:[#allocation2 + $0x8c] sm:$0x1]  ;;  %v1144_v42 = vshrl.u32 %v8661_v19, 16  ;;  %v1147_v61 = vshll.u32 %v8661_v19, 16  ;;  %7118 = vmatprep.mubr.bf16.mxu0 %v6361_v20  ;;  %v6195_v43 = vcombine.low %v583_v52, %v583_v52 }
  0xf9   : > { %v1153_v40 = vshll.u32 %v8665_v37, 16  ;;  %v1157_v47 = vshrl.u32 %v8665_v37, 16  ;;  %v1163_v50 = vshll.u32 %v871_v21, 16  ;;  %797 = vst [vmem:[#allocation2 + $0x90] sm:$0xf] %v6190_v34  ;;  %v567_v51 = vsel %vm8322_vm5, 0, %v498_v36 }
  0xfa   : > { %798 = vst [vmem:[#allocation2 + $0x94] sm:$0xf] %v6191_v59  ;;  %v1146_v56 = vrot.slane %v1144_v42, 4  ;;  %v1149_v62 = vrot.slane %v1147_v61, 5  ;;  %v6193_v55 = vcombine.low %v567_v51, %v567_v51  ;;  %v6194_v45 = vcombine.high %v567_v51, %v567_v51  ;;  %802 = vst [vmem:[#allocation2 + $0xa4] sm:$0x1] %v6195_v43  ;;  %7149 = vmatpush3.bf16.msra.mxu0 %v7701_v24 }
  0xfb   : > { %v1155_v1 = vrot.slane %v1153_v40, 5  ;;  %v1159_v0 = vrot.slane %v1157_v47, 4  ;;  %v502_v16 = vrot.slane %v500_v60, 7  ;;  %v503_v30 = vshll.u32 %v8647_v13, 16  ;;  %7150 = vmatprep.subr.bf16.mxu0 %v7705_v6  ;;  %v7699_v59 = vld [vmem:[%s8302_s5 + $0x70] sm:$0xff]   ;;  %v7718_v42 = vld [vmem:[#allocation6 + $0x1b8] sm:$0xff]  }
  0xfc   : > { %v1150_v5 = vor.u32 %v1149_v62, %v1146_v56  ;;  %800 = vst [vmem:[#allocation2 + $0x9c] sm:$0xf] %v6193_v55  ;;  %801 = vst [vmem:[#allocation2 + $0xa0] sm:$0xf] %v6194_v45  ;;  %v6347_v14 = vrot.slane %v3486_v46, 9  ;;  %v1165_v31 = vrot.slane %v1163_v50, 5  ;;  %v3585_v49 = vsel %vm8461_vm8, %v3583_v63, %v3584_v28 }
  0xfd   : > { %v1160_v32 = vor.u32 %v1159_v0, %v1155_v1  ;;  %v3588_v8 = vrot.slane %v8517_v48, 5  ;;  %v6362_v11 = vcombine.low %v3582_v3, %v3585_v49  ;;  %v505_v17 = vor.u32 %v503_v30, %v502_v16  ;;  %v3487_v3 = vld [vmem:[#allocation2 + $0x60] sm:$0xe] }
  0xfe   : > { %v1151_v10 = vrot.slane %v1150_v5, 4  ;;  %v872_v57 = vld [vmem:[#allocation2 + $0x98] sm:$0x1]  ;;  %v584_v2 = vsel %vm8322_vm5, %v502_v16, 0  ;;  %7151 = vmatpush3.bf16.msra.mxu0 %v7705_v6  ;;  %v3591_v24 = vrot.slane %v8519_v54, 5  ;;  %v510_v49 = vshll.u32 %v7699_v59, 16 }
  0xff   : > { %v1161_v7 = vrot.slane %v1160_v32, 4  ;;  %v1187_v13 = vshll.u32 %v872_v57, 16  ;;  %v6198_v44 = vcombine.low %v584_v2, %v584_v2  ;;  %7119 = vmatmul.mubr.bf16.gmra.mrb[8].mxu0 %v6362_v11  ;;  %v568_v48 = vsel %vm8322_vm5, 0, %v505_v17  ;;  %7152 = vmatprep.subr.bf16.mxu0 %v7709_v33  ;;  %v3488_v2 = vld [vmem:[#allocation2 + $0x6c] sm:$0xe] }
 0x100   : > { %v1156_v12 = vsel %vm8316_vm4, %v1151_v10, %v1155_v1  ;;  %v8683_v23 = vld [vmem:[#allocation2 + $0x90] sm:$0xf]  ;;  %v3589_v53 = vsel %vm8461_vm8, %v6347_v14, %v3588_v8  ;;  %v3590_v34 = vrot.slane %v3588_v8, 4  ;;  %v6196_v21 = vcombine.low %v568_v48, %v568_v48  ;;  %v8709_v8 = vld [vmem:[#allocation6 + $0x1c0] sm:$0xff]  }
 0x101   : > { %v8685_v38 = vld [vmem:[#allocation2 + $0x94] sm:$0xf]  ;;  %v1166_v22 = vsel %vm8316_vm4, %v1161_v7, %v1165_v31  ;;  %v1168_v58 = vshrl.u32 %v8683_v23, 16  ;;  %v1171_v26 = vshll.u32 %v8683_v23, 16  ;;  %v873_v9 = vld [vmem:[#allocation2 + $0xa4] sm:$0x1]  ;;  %v6197_v62 = vcombine.high %v568_v48, %v568_v48 }
 0x102   : > { %v1177_v18 = vshll.u32 %v8685_v38, 16  ;;  %805 = vst [vmem:[#allocation2 + $0xb0] sm:$0x1] %v6198_v44  ;;  %v6216_v20 = vcombine.low %v1156_v12, %v1166_v22  ;;  %v1181_v28 = vshrl.u32 %v8685_v38, 16  ;;  %v1189_v60 = vrot.slane %v1187_v13, 5  ;;  %7153 = vmatpush3.bf16.msra.mxu0 %v7709_v33 }
 0x103   : > { %v1170_v36 = vrot.slane %v1168_v58, 4  ;;  %v1173_v54 = vrot.slane %v1171_v26, 5  ;;  %v8699_v6 = vld [vmem:[#allocation2 + $0x9c] sm:$0xf]  ;;  %v8701_v43 = vld [vmem:[#allocation2 + $0xa0] sm:$0xf]  ;;  %7154 = vmatprep.subr.bf16.mxu0 %v7713_v15  ;;  %v3592_v0 = vsel %vm8461_vm8, %v3590_v34, %v3591_v24 }
 0x104   : > { %v1179_v52 = vrot.slane %v1177_v18, 5  ;;  %6891 = vmatmul.mubr.bf16.gmra.mrb[20].mxu1 %v6216_v20  ;;  %v1183_v61 = vrot.slane %v1181_v28, 4  ;;  %v1192_v40 = vshrl.u32 %v8699_v6, 16  ;;  %v1195_v47 = vshll.u32 %v8699_v6, 16  ;;  %803 = vst [vmem:[#allocation2 + $0xa8] sm:$0xf] %v6196_v21 }
 0x105   : > { %v1211_v50 = vshll.u32 %v873_v9, 16  ;;  %v1174_v51 = vor.u32 %v1173_v54, %v1170_v36  ;;  %v1201_v46 = vshll.u32 %v8701_v43, 16  ;;  %v1205_v56 = vshrl.u32 %v8701_v43, 16  ;;  %804 = vst [vmem:[#allocation2 + $0xac] sm:$0xf] %v6197_v62 }
 0x106   : > { %v1184_v55 = vor.u32 %v1183_v61, %v1179_v52  ;;  %v1194_v45 = vrot.slane %v1192_v40, 4  ;;  %v1197_v1 = vrot.slane %v1195_v47, 5  ;;  %v6363_v30 = vcombine.low %v3589_v53, %v3592_v0  ;;  %7155 = vmatpush3.bf16.msra.mxu0 %v7713_v15  ;;  %v2752_v20 = vld [vmem:[#allocation2 + $0x70] sm:$0xf]  ;;  %v2753_v34 = vld [vmem:[#allocation2 + $0x74] sm:$0x1] }
 0x107   : > { %v1175_v63 = vrot.slane %v1174_v51, 4  ;;  %v1203_v5 = vrot.slane %v1201_v46, 5  ;;  %v1207_v16 = vrot.slane %v1205_v56, 4  ;;  %v507_v31 = vshrl.u32 %v7699_v59, 16  ;;  %7156 = vmatprep.subr.bf16.mxu0 %v7718_v42 }
 0x108   : > { %v1185_v14 = vrot.slane %v1184_v55, 4  ;;  %v1198_v33 = vor.u32 %v1197_v1, %v1194_v45  ;;  %v1213_v11 = vrot.slane %v1211_v50, 5  ;;  %7122 = vmatprep.mubr.bf16.mxu0 %v6363_v30  ;;  %v6348_v17 = vrot.slane %v3487_v3, 9  ;;  %v8736_v50 = vld [vmem:[#allocation2 + $0x7c] sm:$0xf] }
 0x109   : > { %v874_v32 = vld [vmem:[#allocation2 + $0xb0] sm:$0x1]  ;;  %v1180_v10 = vsel %vm8316_vm4, %v1175_v63, %v1179_v52  ;;  %v1208_v57 = vor.u32 %v1207_v16, %v1203_v5  ;;  %v509_v13 = vrot.slane %v507_v31, 7  ;;  %v3595_v44 = vrot.slane %v8580_v29, 5  ;;  %v3489_v55 = vld [vmem:[#allocation2 + $0x78] sm:$0xe] }
 0x10a   : > { %v1190_v7 = vsel %vm8316_vm4, %v1185_v14, %v1189_v60  ;;  %v1199_v15 = vrot.slane %v1198_v33, 4  ;;  %v1235_v53 = vshll.u32 %v874_v32, 16  ;;  %v3598_v24 = vrot.slane %v8530_v39, 5  ;;  %7157 = vmatpush3.bf16.msra.mxu0 %v7718_v42  ;;  %v8742_v30 = vld [vmem:[#allocation2 + $0x80] sm:$0x1] }
 0x10b   : > { %v6217_v12 = vcombine.low %v1180_v10, %v1190_v7  ;;  %v1209_v48 = vrot.slane %v1208_v57, 4  ;;  %v8719_v58 = vld [vmem:[#allocation2 + $0xa8] sm:$0xf]  ;;  %v512_v26 = vor.u32 %v510_v49, %v509_v13  ;;  %v585_v18 = vsel %vm8322_vm5, %v509_v13, 0  ;;  %7190 = vmatprep.subr.bf16.mxu0 %v8709_v8  ;;  %v3490_v31 = vld [vmem:[#allocation2 + $0x84] sm:$0xe] }
 0x10c   : > { %v1204_v22 = vsel %vm8316_vm4, %v1199_v15, %v1203_v5  ;;  %v3596_v9 = vsel %vm8461_vm8, %v6348_v17, %v3595_v44  ;;  %v1216_v29 = vshrl.u32 %v8719_v58, 16  ;;  %v1219_v28 = vshll.u32 %v8719_v58, 16  ;;  %v8730_v36 = vld [vmem:[#allocation2 + $0xac] sm:$0xf] }
 0x10d   : > { %6894 = vmatprep.mubr.bf16.mxu1 %v6217_v12  ;;  %v1214_v39 = vsel %vm8316_vm4, %v1209_v48, %v1213_v11  ;;  %v6201_v60 = vcombine.low %v585_v18, %v585_v18  ;;  %v569_v54 = vsel %vm8322_vm5, 0, %v512_v26  ;;  %v3597_v52 = vrot.slane %v3595_v44, 4  ;;  %v2758_v11 = vld [vmem:[#allocation2 + $0x88] sm:$0xf]  ;;  %v2759_v48 = vld [vmem:[#allocation2 + $0x8c] sm:$0x1] }
 0x10e   : > { %v6218_v59 = vcombine.low %v1204_v22, %v1214_v39  ;;  %v6349_v21 = vrot.slane %v3488_v2, 9  ;;  %v1218_v42 = vrot.slane %v1216_v29, 4  ;;  %v1221_v61 = vrot.slane %v1219_v28, 5  ;;  %v2761_v26 = vld [vmem:[#allocation2 + $0x94] sm:$0xf] }
 0x10f   : > { %v1225_v40 = vshll.u32 %v8730_v36, 16  ;;  %v1229_v47 = vshrl.u32 %v8730_v36, 16  ;;  %808 = vst [vmem:[#allocation2 + $0xbc] sm:$0x1] %v6201_v60  ;;  %v6199_v51 = vcombine.low %v569_v54, %v569_v54  ;;  %v6200_v46 = vcombine.high %v569_v54, %v569_v54  ;;  %v2762_v39 = vld [vmem:[#allocation2 + $0x98] sm:$0x1] }
 0x110   : > { %6895 = vmatmul.mubr.bf16.gmra.mrb[24].mxu1 %v6218_v59  ;;  %v3599_v56 = vsel %vm8461_vm8, %v3597_v52, %v3598_v24  ;;  %v3602_v62 = vrot.slane %v2752_v20, 5  ;;  %v1222_v45 = vor.u32 %v1221_v61, %v1218_v42  ;;  %v3605_v16 = vrot.slane %v2753_v34, 5  ;;  %v3491_v29 = vld [vmem:[#allocation2 + $0x90] sm:$0xe]  ;;  %v8760_v59 = vld [vmem:[#allocation2] sm:$0xf] }
 0x111   : > { %v1227_v1 = vrot.slane %v1225_v40, 5  ;;  %v1231_v0 = vrot.slane %v1229_v47, 4  ;;  %v6364_v3 = vcombine.low %v3596_v9, %v3599_v56  ;;  %806 = vst [vmem:[#allocation2 + $0xb4] sm:$0xf] %v6199_v51  ;;  %807 = vst [vmem:[#allocation2 + $0xb8] sm:$0xf] %v6200_v46 }
 0x112   : > { %v3603_v63 = vsel %vm8461_vm8, %v6349_v21, %v3602_v62  ;;  %v3604_v5 = vrot.slane %v3602_v62, 4  ;;  %v1223_v14 = vrot.slane %v1222_v45, 4  ;;  %v1237_v32 = vrot.slane %v1235_v53, 5  ;;  %v8762_v54 = vld [vmem:[#allocation2 + $0x4] sm:$0xf] }
 0x113   : > { %v1232_v33 = vor.u32 %v1231_v0, %v1227_v1  ;;  %7123 = vmatmul.mubr.bf16.gmra.mrb[12].mxu0 %v6364_v3  ;;  %v6350_v10 = vrot.slane %v3489_v55, 9  ;;  %v3609_v57 = vrot.slane %v8736_v50, 5  ;;  %v3612_v12 = vrot.slane %v8742_v30, 5  ;;  %v3492_v61 = vld [vmem:[#allocation2 + $0x9c] sm:$0xe] }
 0x114   : > { %v3606_v49 = vsel %vm8461_vm8, %v3604_v5, %v3605_v16  ;;  %v1228_v17 = vsel %vm8316_vm4, %v1223_v14, %v1227_v1  ;;  %v6351_v22 = vrot.slane %v3490_v31, 9  ;;  %v3616_v20 = vrot.slane %v2758_v11, 5  ;;  %v2764_v56 = vld [vmem:[#allocation2 + $0xa0] sm:$0xf]  ;;  %v2765_v62 = vld [vmem:[#allocation2 + $0xa4] sm:$0x1] }
 0x115   : > { %v1233_v2 = vrot.slane %v1232_v33, 4  ;;  %v6365_v7 = vcombine.low %v3603_v63, %v3606_v49  ;;  %v3610_v13 = vsel %vm8461_vm8, %v6350_v10, %v3609_v57  ;;  %v3611_v44 = vrot.slane %v3609_v57, 4  ;;  %v3493_v55 = vld [vmem:[#allocation2 + $0xa8] sm:$0xe]  ;;  %v2767_v63 = vld [vmem:[#allocation2 + $0xac] sm:$0xf] }
 0x116   : > { %v875_v15 = vld [vmem:[#allocation2 + $0xbc] sm:$0x1]  ;;  %v6229_v52 = vcombine.low %v8760_v59, %v8762_v54  ;;  %v3619_v42 = vrot.slane %v2759_v48, 5  ;;  %v3617_v45 = vsel %vm8461_vm8, %v6351_v22, %v3616_v20  ;;  %v3618_v1 = vrot.slane %v3616_v20, 4  ;;  %v7717_v20 = vld [vmem:[%s8302_s5 + $0x78] sm:$0xff]  }
 0x117   : > { %v1238_v53 = vsel %vm8316_vm4, %v1233_v2, %v1237_v32  ;;  %v1259_v24 = vshll.u32 %v875_v15, 16  ;;  %7126 = vmatprep.mubr.bf16.mxu0 %v6365_v7  ;;  %v3613_v9 = vsel %vm8461_vm8, %v3611_v44, %v3612_v12  ;;  %v6352_v0 = vrot.slane %v3491_v29, 9  ;;  %v2768_v32 = vld [vmem:[#allocation2 + $0xb0] sm:$0x1]  ;;  %v2771_v44 = vld [vmem:[#allocation2 + $0xbc] sm:$0x1] }
 0x118   : > { %v6219_v18 = vcombine.low %v1228_v17, %v1238_v53  ;;  %v8756_v28 = vld [vmem:[#allocation2 + $0xb4] sm:$0xf]  ;;  %v8758_v60 = vld [vmem:[#allocation2 + $0xb8] sm:$0xf]  ;;  %v6366_v21 = vcombine.low %v3610_v13, %v3613_v9  ;;  %v3623_v3 = vrot.slane %v2761_v26, 5  ;;  %v3620_v31 = vsel %vm8461_vm8, %v3618_v1, %v3619_v42 }
 0x119   : > { %v1261_v34 = vrot.slane %v1259_v24, 5  ;;  %v1240_v40 = vshrl.u32 %v8756_v28, 16  ;;  %v1243_v47 = vshll.u32 %v8756_v28, 16  ;;  %v1249_v51 = vshll.u32 %v8758_v60, 16  ;;  %v3494_v11 = vld [vmem:[#allocation2 + $0xb4] sm:$0xe] }
 0x11a   : > { %6898 = vmatprep.mubr.bf16.mxu1 %v6219_v18  ;;  %v1253_v46 = vshrl.u32 %v8758_v60, 16  ;;  %v3624_v49 = vsel %vm8461_vm8, %v6352_v0, %v3623_v3  ;;  %v3625_v10 = vrot.slane %v3623_v3, 4  ;;  %v3626_v57 = vrot.slane %v2762_v39, 5  ;;  %v2770_v13 = vld [vmem:[#allocation2 + $0xb8] sm:$0xf] }
 0x11b   : > { %7127 = vmatmul.mubr.bf16.gmra.mrb[16].mxu0 %v6366_v21  ;;  %v1242_v5 = vrot.slane %v1240_v40, 4  ;;  %v1245_v16 = vrot.slane %v1243_v47, 5  ;;  %v1251_v14 = vrot.slane %v1249_v51, 5  ;;  %v6367_v7 = vcombine.low %v3617_v45, %v3620_v31  ;;  %v8803_v59 = vld [vmem:[#allocation2 + $0x1c] sm:$0xf] }
 0x11c   : > { %v1255_v33 = vrot.slane %v1253_v46, 4  ;;  %v6353_v15 = vrot.slane %v3492_v61, 9  ;;  %v3627_v12 = vsel %vm8461_vm8, %v3625_v10, %v3626_v57  ;;  %v3630_v48 = vrot.slane %v2764_v56, 5  ;;  %v8800_v10 = vld [vmem:[#allocation2 + $0x10] sm:$0xf] }
 0x11d   : > { %v1246_v17 = vor.u32 %v1245_v16, %v1242_v5  ;;  %v3633_v53 = vrot.slane %v2765_v62, 5  ;;  %v6354_v24 = vrot.slane %v3493_v55, 9  ;;  %7130 = vmatprep.mubr.bf16.mxu0 %v6367_v7  ;;  %v6368_v18 = vcombine.low %v3624_v49, %v3627_v12  ;;  %v7789_v49 = vld [vmem:[#allocation2 + $0xc] sm:$0xf]  ;;  %v7708_v7 = vld [vmem:[#allocation6 + $0x88] sm:$0xff]  }
 0x11e   : > { %v1256_v2 = vor.u32 %v1255_v33, %v1251_v14  ;;  %v3637_v9 = vrot.slane %v2767_v63, 5  ;;  %v3631_v39 = vsel %vm8461_vm8, %v6353_v15, %v3630_v48  ;;  %v3632_v29 = vrot.slane %v3630_v48, 4  ;;  %v7712_v12 = vld [vmem:[#allocation6 + $0x90] sm:$0xff]   ;;  %v7794_v48 = vld [vmem:[#allocation2 + $0x24] sm:$0xf] }
 0x11f   : > { %v1247_v22 = vrot.slane %v1246_v17, 4  ;;  %v3640_v21 = vrot.slane %v2768_v32, 5  ;;  %v6355_v42 = vrot.slane %v3494_v11, 9  ;;  %v3644_v62 = vrot.slane %v2770_v13, 5  ;;  %v7791_v17 = vld [vmem:[#allocation2 + $0x18] sm:$0xf] }
 0x120   : > { %v1257_v26 = vrot.slane %v1256_v2, 4  ;;  %v3638_v47 = vsel %vm8461_vm8, %v6354_v24, %v3637_v9  ;;  %v3639_v51 = vrot.slane %v3637_v9, 4  ;;  %v3634_v56 = vsel %vm8461_vm8, %v3632_v29, %v3633_v53  ;;  %v8808_v53 = vld [vmem:[#allocation2 + $0x28] sm:$0xf]  ;;  %v7796_v24 = vld [vmem:[#allocation2 + $0x30] sm:$0xf] }
 0x121   : > { %v1252_v61 = vsel %vm8316_vm4, %v1247_v22, %v1251_v14  ;;  %v3647_v55 = vrot.slane %v2771_v44, 5  ;;  %v6369_v45 = vcombine.low %v3631_v39, %v3634_v56  ;;  %v514_v0 = vshrl.u32 %v7717_v20, 16  ;;  %v7793_v44 = vld [vmem:[#allocation6 + $0x80] sm:$0xff]   ;;  %v8811_v22 = vld [vmem:[#allocation2 + $0x34] sm:$0xf] }
 0x122   : > { %v1262_v40 = vsel %vm8316_vm4, %v1257_v26, %v1261_v34  ;;  %v3641_v1 = vsel %vm8461_vm8, %v3639_v51, %v3640_v21  ;;  %v517_v3 = vshll.u32 %v7717_v20, 16  ;;  %v3645_v34 = vsel %vm8461_vm8, %v6355_v42, %v3644_v62  ;;  %v7716_v9 = vld [vmem:[#allocation6 + $0x98] sm:$0xff]   ;;  %v7798_v56 = vld [vmem:[#allocation2 + $0x3c] sm:$0xf] }
 0x123   : > { %v6220_v46 = vcombine.low %v1252_v61, %v1262_v40  ;;  %7131 = vmatmul.mubr.bf16.gmra.mrb[20].mxu0 %v6368_v18  ;;  %v3646_v63 = vrot.slane %v3644_v62, 4  ;;  %v516_v5 = vrot.slane %v514_v0, 7  ;;  %v6370_v16 = vcombine.low %v3638_v47, %v3641_v1  ;;  %v8818_v62 = vld [vmem:[#allocation2 + $0x40] sm:$0xf]  ;;  %v7720_v1 = vld [vmem:[#allocation2 + $0x18] sm:$0xff]  }
 0x124   : > { %7134 = vmatprep.mubr.bf16.mxu0 %v6369_v45  ;;  %v6230_v57 = vcombine.low %v7789_v49, %v8800_v10  ;;  %v6232_v41 = vcombine.low %v7794_v48, %v8808_v53  ;;  %v6233_v26 = vcombine.low %v7796_v24, %v8811_v22  ;;  %v3001_v61 = vshll.u32 %v8736_v50, 16  ;;  %v7800_v0 = vld [vmem:[#allocation2 + $0x48] sm:$0xf]  ;;  %v8831_v49 = vld [vmem:[#allocation2 + $0x14] sm:$0x1] }
 0x125   : > { %6899 = vmatmul.mubr.bf16.gmra.mrb[28].mxu1 %v6220_v46  ;;  %v3648_v14 = vsel %vm8461_vm8, %v3646_v63, %v3647_v55  ;;  %v519_v32 = vor.u32 %v517_v3, %v516_v5  ;;  %v586_v31 = vsel %vm8322_vm5, %v516_v5, 0  ;;  %v3005_v40 = vshrl.u32 %v8736_v50, 16  ;;  %v7722_v46 = vld [vmem:[#allocation6 + $0xa0] sm:$0xff]   ;;  %v8823_v3 = vld [vmem:[#allocation2 + $0x4c] sm:$0xf] }
 0x126   : > { %6918 = vmatprep.mubr.bf16.mxu1 %v6229_v52  ;;  %v6371_v33 = vcombine.low %v3645_v34, %v3648_v14  ;;  %v6204_v11 = vcombine.low %v586_v31, %v586_v31  ;;  %v6231_v52 = vcombine.low %v7791_v17, %v8803_v59  ;;  %v6234_v55 = vcombine.low %v7798_v56, %v8818_v62  ;;  %v1857_v63 = vld [vmem:[#allocation2] sm:$0xe]  ;;  %v8834_v17 = vld [vmem:[#allocation2 + $0x58] sm:$0xf]  ;;  %v1862_v56 = vld [vmem:[#allocation2 + $0x3c] sm:$0xe] }
 0x127   : > { %v570_v2 = vsel %vm8322_vm5, 0, %v519_v32  ;;  %v6235_v50 = vcombine.low %v7800_v0, %v8823_v3  ;;  %v1910_v5 = vrot.slane %v8762_v54, 5  ;;  %v8829_v14 = vrot.slane %v3005_v40, 4  ;;  %v7802_v32 = vld [vmem:[#allocation2 + $0x8] sm:$0x1] }
 0x128   : > { %v6202_v15 = vcombine.low %v570_v2, %v570_v2  ;;  %v6203_v13 = vcombine.high %v570_v2, %v570_v2  ;;  %811 = vst [vmem:[#allocation2 + $0xc8] sm:$0x1] %v6204_v11  ;;  %v1913_v31 = vrot.slane %v7802_v32, 5  ;;  %v7804_v11 = vld [vmem:[#allocation2 + $0x54] sm:$0xf]  ;;  %v6253_v54 = vrot.slane %v1857_v63, 9 }
 0x129   : > { %v1858_v2 = vld [vmem:[#allocation2 + $0xc] sm:$0xe]  ;;  %v1917_v48 = vrot.slane %v8800_v10, 5  ;;  %v6239_v10 = vcombine.low %v8611_v25, %v8613_v27  ;;  %v7730_v63 = vld [vmem:[#allocation6 + $0x1c8] sm:$0xff]  }
 0x12a   : > { %809 = vst [vmem:[#allocation2 + $0xc0] sm:$0xf] %v6202_v15  ;;  %810 = vst [vmem:[#allocation2 + $0xc4] sm:$0xf] %v6203_v13  ;;  %v7806_v15 = vld [vmem:[#allocation2 + $0x60] sm:$0xf] }
 0x12b   : > { %7135 = vmatmul.mubr.bf16.gmra.mrb[24].mxu0 %v6370_v16  ;;  %v8827_v16 = vrot.slane %v3001_v61, 5  ;;  %v8837_v13 = vld [vmem:[#allocation2 + $0x64] sm:$0xf]  ;;  %v1938_v61 = vrot.slane %v8811_v22, 5  ;;  %v7810_v22 = vld [vmem:[#allocation2 + $0x20] sm:$0x1] }
 0x12c   : > { %7138 = vmatprep.mubr.bf16.mxu0 %v6371_v33  ;;  %v7728_v33 = vld [vmem:[#allocation6 + $0xa8] sm:$0xff]   ;;  %v7736_v24 = vld [vmem:[#allocation6 + $0x1d0] sm:$0xff]  }
 0x12d   : > { %6919 = vmatmul.mubr.bf16.vlgmr.msra.gmra.mrb[0].mxu1 %v6230_v57  ;;  %9928 = vst [vmem:[#allocation16_spill] sm:$0xff] %v8827_v16  ;;  %v1920_v57 = vrot.slane %v8831_v49, 5 }
 0x12e   : > { %6951 = vmatpush3.bf16.msra.mxu1 %v7793_v44  ;;  %6922 = vmatprep.mubr.bf16.mxu1 %v6231_v52  ;;  %v6236_v52 = vcombine.low %v7804_v11, %v8834_v17  ;;  %v6237_v44 = vcombine.low %v7806_v15, %v8837_v13  ;;  %v1940_v15 = vrot.slane %v1938_v61, 4 }
 0x12f   : > { %6952 = vmatprep.subr.bf16.mxu1 %v7708_v7  ;;  %v2774_v18 = vld [vmem:[#allocation2 + $0xc8] sm:$0x1] }
 0x130   : > { %v3654_v29 = vrot.slane %v2774_v18, 5  ;;  %v8845_v18 = vld [vmem:[#allocation2 + $0x6c] sm:$0xf] }
 0x131   : > { %v2773_v20 = vld [vmem:[#allocation2 + $0xc4] sm:$0xf]  ;;  %v3495_v39 = vld [vmem:[#allocation2 + $0xc0] sm:$0xe] }
 0x132   : > { %6953 = vmatpush3.bf16.msra.mxu1 %v7708_v7  ;;  %v6356_v21 = vrot.slane %v3495_v39, 9  ;;  %v3651_v42 = vrot.slane %v2773_v20, 5  ;;  %v1859_v7 = vld [vmem:[#allocation2 + $0x18] sm:$0xe]  ;;  %v7734_v39 = vld [vmem:[#allocation6 + $0xb0] sm:$0xff]  }
 0x133   : > { %6954 = vmatprep.subr.bf16.mxu1 %v7712_v12 }
 0x134   : > { %v3652_v47 = vsel %vm8461_vm8, %v6356_v21, %v3651_v42  ;;  %v3653_v51 = vrot.slane %v3651_v42, 4  ;;  %v7723_v21 = vld [vmem:[#allocation2 + $0x24] sm:$0xff]  }
 0x135   : > { %6923 = vmatmul.mubr.bf16.gmra.mrb[4].mxu1 %v6232_v41  ;;  %v1924_v41 = vrot.slane %v8803_v59, 5  ;;  %v1860_v42 = vld [vmem:[#allocation2 + $0x24] sm:$0xe] }
 0x136   : > { %6926 = vmatprep.mubr.bf16.mxu1 %v6233_v26  ;;  %6955 = vmatpush3.bf16.msra.mxu1 %v7712_v12  ;;  %v3655_v45 = vsel %vm8461_vm8, %v3653_v51, %v3654_v29  ;;  %v1912_v12 = vrot.slane %v1910_v5, 4  ;;  %v3011_v26 = vshll.u32 %v8742_v30, 16  ;;  %v1931_v29 = vrot.slane %v8808_v53, 5  ;;  %v7750_v59 = vld [vmem:[#allocation6 + $0x1e8] sm:$0xff]  }
 0x137   : > { %6956 = vmatprep.subr.bf16.mxu1 %v7716_v9  ;;  %v6372_v34 = vcombine.low %v3652_v47, %v3655_v45  ;;  %v8863_v47 = vsel %vm8461_vm8, %v6253_v54, %v1910_v5  ;;  %v6254_v53 = vrot.slane %v1858_v2, 9  ;;  %v6255_v51 = vrot.slane %v1859_v7, 9  ;;  %v7811_v54 = vld [vmem:[#allocation2 + $0x2c] sm:$0x1] }
 0x138   : > { %v8867_v45 = vsel %vm8461_vm8, %v1912_v12, %v1913_v31  ;;  %v1926_v0 = vrot.slane %v1924_v41, 4  ;;  %v6256_v32 = vrot.slane %v1860_v42, 9  ;;  %v1933_v11 = vrot.slane %v1931_v29, 4  ;;  %v7740_v31 = vld [vmem:[#allocation6 + $0xb8] sm:$0xff]   ;;  %v7812_v12 = vld [vmem:[#allocation2 + $0x38] sm:$0x1] }
 0x139   : > { %7139 = vmatmul.mubr.bf16.gmra.mrb[28].mxu0 %v6372_v34  ;;  %v8869_v34 = vld [vmem:[#allocation2 + $0x48] sm:$0xe]  ;;  %v1934_v2 = vrot.slane %v7811_v54, 5  ;;  %v8875_v40 = vrot.slane %v3011_v26, 5  ;;  %v8886_v54 = vsel %vm8461_vm8, %v6255_v51, %v1924_v41  ;;  %v6258_v26 = vrot.slane %v1862_v56, 9  ;;  %v8899_v41 = vld [vmem:[#allocation6 + $0xc0] sm:$0xff]  }
 0x13a   : > { %6957 = vmatpush3.bf16.msra.mxu1 %v7716_v9  ;;  %7158 = vmatprep.mubr.bf16.mxu0 %v7720_v1  ;;  %v8847_v9 = vld [vmem:[#allocation2 + $0x70] sm:$0xf]  ;;  %v1919_v1 = vrot.slane %v1917_v48, 4  ;;  %v8903_v49 = vsel %vm8461_vm8, %v6256_v32, %v1931_v29  ;;  %v1952_v51 = vrot.slane %v8823_v3, 5  ;;  %v8923_v3 = vld [vmem:[#allocation2 + $0x54] sm:$0xe] }
 0x13b   : > { %6958 = vmatprep.subr.bf16.mxu1 %v7722_v46  ;;  %v6238_v20 = vcombine.low %v8845_v18, %v8847_v9  ;;  %9929 = vst [vmem:[#allocation17_spill] sm:$0xff] %v8875_v40 }
 0x13d   : > { %6927 = vmatmul.mubr.bf16.gmra.mrb[8].mxu1 %v6234_v55  ;;  %v7726_v55 = vld [vmem:[#allocation2 + $0x30] sm:$0xff]  }
 0x13e   : > { %6930 = vmatprep.mubr.bf16.mxu1 %v6235_v50  ;;  %6959 = vmatpush3.bf16.msra.mxu1 %v7722_v46  ;;  %v1861_v46 = vld [vmem:[#allocation2 + $0x30] sm:$0xe]  ;;  %v1927_v50 = vrot.slane %v7810_v22, 5  ;;  %v1941_v22 = vrot.slane %v7812_v12, 5  ;;  %v7729_v12 = vld [vmem:[#allocation2 + $0x3c] sm:$0xff]  }
 0x13f   : > { %6960 = vmatprep.subr.bf16.mxu1 %v7728_v33  ;;  %v6257_v7 = vrot.slane %v1861_v46, 9  ;;  %v4363_v46 = vld [vmem:[#allocation2 + $0x18] sm:$0xf] }
 0x140   : > { %v4412_v56 = vshrl.u32 %v4363_v46, 16  ;;  %v4415_v29 = vshll.u32 %v4363_v46, 16  ;;  %v7742_v46 = vld [vmem:[#allocation6 + $0x1d8] sm:$0xff]  }
 0x141   : > { %7159 = vmatmul.mubr.bf16.vlgmr.msra.gmra.mrb[0].mxu0 %v7723_v21  ;;  %v8882_v21 = vsel %vm8461_vm8, %v6254_v53, %v1917_v48  ;;  %v1945_v48 = vrot.slane %v8818_v62, 5  ;;  %v4364_v53 = vld [vmem:[#allocation2 + $0x1c] sm:$0xf]  ;;  %v8913_v62 = vsel %vm8461_vm8, %v6257_v7, %v1938_v61  ;;  %v8931_v7 = vld [vmem:[#allocation2 + $0x60] sm:$0xe]  ;;  %v1959_v61 = vrot.slane %v8834_v17, 5 }
 0x142   : > { %6961 = vmatpush3.bf16.msra.mxu1 %v7728_v33  ;;  %7191 = vmatpush3.bf16.msra.mxu0 %v8709_v8  ;;  %v8892_v8 = vsel %vm8461_vm8, %v1919_v1, %v1920_v57  ;;  %v8907_v57 = vsel %vm8461_vm8, %v1933_v11, %v1934_v2  ;;  %v7813_v11 = vld [vmem:[#allocation2 + $0x44] sm:$0x1]  ;;  %v7814_v1 = vld [vmem:[#allocation2 + $0x50] sm:$0x1]  ;;  %v4417_v33 = vrot.slane %v4415_v29, 5  ;;  %v6261_v27 = vrot.slane %v8931_v7, 9 }
 0x143   : > { %6962 = vmatprep.subr.bf16.mxu1 %v7734_v39  ;;  %7162 = vmatprep.mubr.bf16.mxu0 %v7726_v55  ;;  %v7732_v55 = vld [vmem:[#allocation2 + $0x48] sm:$0xff]   ;;  %v8929_v32 = vsel %vm8461_vm8, %v6258_v26, %v1945_v48  ;;  %v1948_v2 = vrot.slane %v7813_v11, 5  ;;  %v1955_v42 = vrot.slane %v7814_v1, 5  ;;  %v4414_v11 = vrot.slane %v4412_v56, 4  ;;  %v4365_v1 = vld [vmem:[#allocation2 + $0x20] sm:$0x1] }
 0x144   : > { %7192 = vmatprep.subr.bf16.mxu0 %v7730_v63  ;;  %v8951_v56 = vld [vmem:[#allocation2 + $0x6c] sm:$0xe]  ;;  %v1961_v25 = vrot.slane %v1959_v61, 4  ;;  %v4431_v30 = vshll.u32 %v4365_v1, 16  ;;  %v4368_v7 = vld [vmem:[#allocation2 + $0x2c] sm:$0x1] }
 0x145   : > { %6931 = vmatmul.mubr.bf16.gmra.mrb[12].mxu1 %v6236_v52  ;;  %v8896_v52 = vsel %vm8461_vm8, %v1926_v0, %v1927_v50  ;;  %v4421_v50 = vshll.u32 %v4364_v53, 16  ;;  %v1954_v0 = vrot.slane %v1952_v51, 4 }
 0x146   : > { %6934 = vmatprep.mubr.bf16.mxu1 %v6237_v44  ;;  %6963 = vmatpush3.bf16.msra.mxu1 %v7734_v39  ;;  %v6259_v44 = vrot.slane %v8869_v34, 9  ;;  %v8917_v39 = vsel %vm8461_vm8, %v1940_v15, %v1941_v22  ;;  %v4425_v34 = vshrl.u32 %v4364_v53, 16  ;;  %v4366_v15 = vld [vmem:[#allocation2 + $0x24] sm:$0xf]  ;;  %v4367_v22 = vld [vmem:[#allocation2 + $0x28] sm:$0xf] }
 0x147   : > { %6964 = vmatprep.subr.bf16.mxu1 %v7740_v31  ;;  %7193 = vmatpush3.bf16.msra.mxu0 %v7730_v63  ;;  %v1947_v63 = vrot.slane %v1945_v48, 4  ;;  %v1966_v48 = vrot.slane %v8837_v13, 5  ;;  %v8945_v53 = vrot.slane %v4421_v50, 5  ;;  %v4439_v5 = vshll.u32 %v4366_v15, 16 }
 0x148   : > { %7194 = vmatprep.subr.bf16.mxu0 %v7736_v24  ;;  %v8939_v26 = vsel %vm8461_vm8, %v6259_v44, %v1952_v51  ;;  %v4427_v17 = vrot.slane %v4425_v34, 4  ;;  %v6260_v13 = vrot.slane %v8923_v3, 9  ;;  %v7815_v44 = vld [vmem:[#allocation2 + $0x5c] sm:$0x1]  ;;  %v4445_v18 = vshll.u32 %v4367_v22, 16 }
 0x149   : > { %7163 = vmatmul.mubr.bf16.gmra.mrb[4].mxu0 %v7729_v12  ;;  %v4436_v12 = vshrl.u32 %v4366_v15, 16  ;;  %v1962_v51 = vrot.slane %v7815_v44, 5  ;;  %v8955_v29 = vsel %vm8461_vm8, %v1947_v63, %v1948_v2  ;;  %v7816_v3 = vld [vmem:[#allocation2 + $0x68] sm:$0x1]  ;;  %v4418_v34 = vor.u32 %v4417_v33, %v4414_v11  ;;  %v7817_v11 = vld [vmem:[#allocation2 + $0x74] sm:$0x1] }
 0x14a   : > { %6965 = vmatpush3.bf16.msra.mxu1 %v7740_v31  ;;  %7166 = vmatprep.mubr.bf16.mxu0 %v7732_v55  ;;  %v7746_v31 = vld [vmem:[#allocation6 + $0x1e0] sm:$0xff]   ;;  %v8959_v55 = vsel %vm8461_vm8, %v1954_v0, %v1955_v42  ;;  %v1969_v50 = vrot.slane %v7816_v3, 5  ;;  %v1973_v15 = vrot.slane %v8847_v9, 5  ;;  %v4428_v44 = vor.u32 %v4427_v17, %v8945_v53  ;;  %v4369_v17 = vld [vmem:[#allocation2 + $0x30] sm:$0xf] }
 0x14b   : > { %6998 = vmatprep.subr.bf16.mxu1 %v8899_v41  ;;  %7195 = vmatpush3.bf16.msra.mxu0 %v7736_v24  ;;  %v7735_v24 = vld [vmem:[#allocation2 + $0x54] sm:$0xff]   ;;  %v4438_v63 = vrot.slane %v4436_v12, 4  ;;  %v4441_v2 = vrot.slane %v4439_v5, 5  ;;  %v8968_v40 = vrot.slane %v4445_v18, 5  ;;  %v8972_v9 = vsel %vm8461_vm8, %v6260_v13, %v1959_v61 }
 0x14c   : > { %7196 = vmatprep.subr.bf16.mxu0 %v7742_v46  ;;  %v8976_v5 = vsel %vm8461_vm8, %v1961_v25, %v1962_v51  ;;  %v1976_v1 = vrot.slane %v7817_v11, 5  ;;  %v4370_v12 = vld [vmem:[#allocation2 + $0x34] sm:$0xf]  ;;  %v8981_v18 = vsel %vm8461_vm8, %v6261_v27, %v1966_v48  ;;  %v4419_v61 = vrot.slane %v4418_v34, 4  ;;  %v1867_v11 = vld [vmem:[#allocation2 + $0x78] sm:$0xe] }
 0x14d   : > { %6935 = vmatmul.mubr.bf16.gmra.mrb[16].mxu1 %v6238_v20  ;;  %v4449_v20 = vshrl.u32 %v4367_v22, 16  ;;  %v7738_v22 = vld [vmem:[#allocation2 + $0x60] sm:$0xff]   ;;  %9930 = vst [vmem:[#allocation18_spill] sm:$0xff] %v8981_v18  ;;  %v1975_v13 = vrot.slane %v1973_v15, 4  ;;  %v9932_v51 = vcombine.low %v8661_v19, %v8665_v37  ;;  %v4433_v25 = vrot.slane %v4431_v30, 5  ;;  %v7741_v27 = vld [vmem:[#allocation2 + $0x6c] sm:$0xff]  }
 0x14e   : > { %6938 = vmatprep.mubr.bf16.mxu1 %v6239_v10  ;;  %v1968_v10 = vrot.slane %v1966_v48, 4  ;;  %v4442_v3 = vor.u32 %v4441_v2, %v4438_v63  ;;  %v9933_v48 = vcombine.low %v8683_v23, %v8685_v38  ;;  %v4455_v34 = vshll.u32 %v4368_v7, 16  ;;  %v4372_v63 = vld [vmem:[#allocation2 + $0x3c] sm:$0xf] }
 0x14f   : > { %7197 = vmatpush3.bf16.msra.mxu0 %v7742_v46  ;;  %v4451_v33 = vrot.slane %v4449_v20, 4  ;;  %v6262_v46 = vrot.slane %v8951_v56, 9  ;;  %v4429_v56 = vrot.slane %v4428_v44, 4  ;;  %v4460_v42 = vshrl.u32 %v4369_v17, 16  ;;  %v7743_v23 = vld [vmem:[#allocation2 + $0x78] sm:$0xff]  }
 0x150   : > { %7198 = vmatprep.subr.bf16.mxu0 %v7746_v31  ;;  %v8985_v20 = vsel %vm8461_vm8, %v1968_v10, %v1969_v50  ;;  %v7754_v10 = vld [vmem:[#allocation6 + $0x1f0] sm:$0xff]   ;;  %v4463_v19 = vshll.u32 %v4369_v17, 16  ;;  %v4473_v44 = vshrl.u32 %v4370_v12, 16  ;;  %v4424_v38 = vsel %vm8316_vm4, %v4419_v61, %v8945_v53  ;;  %v7758_v17 = vld [vmem:[#allocation6 + $0x1f8] sm:$0xff]  }
 0x151   : > { %7167 = vmatmul.mubr.bf16.gmra.mrb[8].mxu0 %v7735_v24  ;;  %9931 = vst [vmem:[#allocation19_spill] sm:$0xff] %v8985_v20  ;;  %v7818_v24 = vld [vmem:[#allocation2 + $0x7c] sm:$0xf]  ;;  %v4452_v50 = vor.u32 %v4451_v33, %v8968_v40  ;;  %v9007_v2 = vsel %vm8461_vm8, %v1975_v13, %v1976_v1  ;;  %v6263_v7 = vrot.slane %v1867_v11, 9  ;;  %v4373_v33 = vld [vmem:[#allocation2 + $0x40] sm:$0xf] }
 0x152   : > { %7170 = vmatprep.mubr.bf16.mxu0 %v7738_v22  ;;  %v1980_v0 = vrot.slane %v7818_v24, 5  ;;  %v4469_v22 = vshll.u32 %v4370_v12, 16  ;;  %9935 = vst [vmem:[#allocation21_spill] sm:$0xff] %v9007_v2  ;;  %v4434_v12 = vsel %vm8316_vm4, %v4429_v56, %v4433_v25  ;;  %v4457_v61 = vrot.slane %v4455_v34, 5  ;;  %v1868_v25 = vld [vmem:[#allocation2 + $0x84] sm:$0xe] }
 0x153   : > { %7199 = vmatpush3.bf16.msra.mxu0 %v7746_v31  ;;  %v9003_v31 = vsel %vm8461_vm8, %v6262_v46, %v1973_v15  ;;  %v4453_v53 = vrot.slane %v4452_v50, 4  ;;  %v4462_v37 = vrot.slane %v4460_v42, 4  ;;  %v4465_v15 = vrot.slane %v4463_v19, 5  ;;  %v4371_v46 = vld [vmem:[#allocation2 + $0x38] sm:$0x1] }
 0x154   : > { %7200 = vmatprep.subr.bf16.mxu0 %v7750_v59  ;;  %9934 = vst [vmem:[#allocation20_spill] sm:$0xff] %v9003_v31  ;;  %v1982_v24 = vrot.slane %v1980_v0, 4  ;;  %v9011_v20 = vrot.slane %v4469_v22, 5  ;;  %v4475_v1 = vrot.slane %v4473_v44, 4  ;;  %v4484_v13 = vshrl.u32 %v4372_v63, 16 }
 0x155   : > { %6939 = vmatmul.mubr.bf16.gmra.mrb[20].mxu1 %v9932_v51  ;;  %v4443_v51 = vrot.slane %v4442_v3, 4  ;;  %v4487_v11 = vshll.u32 %v4372_v63, 16  ;;  %v9013_v18 = vcombine.low %v4424_v38, %v4434_v12  ;;  %v4493_v3 = vshll.u32 %v4373_v33, 16 }
 0x156   : > { %6942 = vmatprep.mubr.bf16.mxu1 %v9933_v48  ;;  %v7819_v48 = vld [vmem:[#allocation2 + $0x80] sm:$0x1]  ;;  %v9936_v42 = vor.u32 %v8829_v14, %v8827_v16  ;;  %v9938_v34 = vcombine.low %v8699_v6, %v8701_v43  ;;  %v9030_v19 = vsel %vm8461_vm8, %v6263_v7, %v1980_v0  ;;  %v4375_v14 = vld [vmem:[#allocation2 + $0x48] sm:$0xf]  ;;  %v9941_v44 = vcombine.low %v8719_v58, %v8730_v36  ;;  %v9041_v0 = vld [vmem:[#allocation2 + $0x4c] sm:$0xf] }
 0x157   : > { %v1983_v30 = vrot.slane %v7819_v48, 5  ;;  %7201 = vmatpush3.bf16.msra.mxu0 %v7750_v59  ;;  %v4497_v59 = vshrl.u32 %v4373_v33, 16  ;;  %9939 = vst [vmem:[#allocation23_spill] sm:$0xff] %v9030_v19  ;;  %v7745_v6 = vld [vmem:[#allocation2 + $0x84] sm:$0xff]   ;;  %v4458_v43 = vsel %vm8316_vm4, %v4453_v53, %v4457_v61  ;;  %v4466_v63 = vor.u32 %v4465_v15, %v4462_v37  ;;  %9942 = vst [vmem:[#allocation25_spill] sm:$0xff] %v9041_v0  ;;  %v7747_v7 = vld [vmem:[#allocation2 + $0x90] sm:$0xff]  }
 0x158   : > { %7202 = vmatprep.subr.bf16.mxu0 %v7754_v10  ;;  %v9020_v50 = vrot.slane %v9936_v42, 4  ;;  %v4476_v33 = vor.u32 %v4475_v1, %v9011_v20  ;;  %v6264_v12 = vrot.slane %v1868_v25, 9  ;;  %v4374_v58 = vld [vmem:[#allocation2 + $0x44] sm:$0x1]  ;;  %v4486_v36 = vrot.slane %v4484_v13, 4 }
 0x159   : > { %7171 = vmatmul.mubr.bf16.gmra.mrb[12].mxu0 %v7741_v27  ;;  %v4448_v27 = vsel %vm8316_vm4, %v4443_v51, %v8968_v40  ;;  %v9034_v22 = vsel %vm8461_vm8, %v1982_v24, %v1983_v30  ;;  %v4479_v40 = vshll.u32 %v4371_v46, 16  ;;  %v9043_v30 = vld [vmem:[#allocation6 + $0x200] sm:$0xff]   ;;  %v4489_v51 = vrot.slane %v4487_v11, 5  ;;  %v4378_v53 = vld [vmem:[#allocation2 + $0x54] sm:$0xf]  ;;  %v7748_v16 = vld [vmem:[#allocation6 + $0xc8] sm:$0xff]  }
 0x15a   : > { %9937 = vst [vmem:[#allocation22_spill] sm:$0xff] %v9020_v50  ;;  %7174 = vmatprep.mubr.bf16.mxu0 %v7743_v23  ;;  %9940 = vst [vmem:[#allocation24_spill] sm:$0xff] %v9034_v22  ;;  %v7820_v23 = vld [vmem:[#allocation2 + $0x88] sm:$0xf]  ;;  %v4499_v24 = vrot.slane %v4497_v59, 4  ;;  %v4508_v48 = vshrl.u32 %v4375_v14, 16  ;;  %v9048_v61 = vcombine.low %v4448_v27, %v4458_v43 }
 0x15b   : > { %7203 = vmatpush3.bf16.msra.mxu0 %v7754_v10  ;;  %v1987_v38 = vrot.slane %v7820_v23, 5  ;;  %9943 = vst [vmem:[#allocation26_spill] sm:$0xff] %v9043_v30  ;;  %v9046_v10 = vrot.slane %v4493_v3, 5  ;;  %v4511_v37 = vshll.u32 %v4375_v14, 16  ;;  %v4517_v46 = vshll.u32 %v9041_v0, 16 }
 0x15c   : > { %7204 = vmatprep.subr.bf16.mxu0 %v7758_v17  ;;  %v4521_v42 = vshrl.u32 %v9041_v0, 16  ;;  %v9054_v1 = vrot.slane %v4466_v63, 4  ;;  %v9056_v13 = vrot.slane %v4479_v40, 5  ;;  %v7821_v25 = vld [vmem:[#allocation2 + $0x8c] sm:$0x1]  ;;  %v9059_v59 = vrot.slane %v4476_v33, 4 }
 0x15d   : > { %6943 = vmatmul.mubr.bf16.gmra.mrb[24].mxu1 %v9938_v34  ;;  %v1989_v11 = vrot.slane %v1987_v38, 4  ;;  %v1990_v3 = vrot.slane %v7821_v25, 5  ;;  %v9063_v34 = vsel %vm8461_vm8, %v6264_v12, %v1987_v38  ;;  %v4490_v27 = vor.u32 %v4489_v51, %v4486_v36  ;;  %v9065_v43 = vld [vmem:[#allocation2 + $0x58] sm:$0xf]  ;;  %v7822_v63 = vld [vmem:[#allocation2 + $0x94] sm:$0xf] }
 0x15e   : > { %6946 = vmatprep.mubr.bf16.mxu1 %v9941_v44  ;;  %v4503_v14 = vshll.u32 %v4374_v58, 16  ;;  %v1869_v44 = vld [vmem:[#allocation2 + $0x90] sm:$0xe]  ;;  %9944 = vst [vmem:[#allocation27_spill] sm:$0xff] %v9065_v43  ;;  %v1994_v40 = vrot.slane %v7822_v63, 5  ;;  %v4510_v25 = vrot.slane %v4508_v48, 4  ;;  %v9945_v33 = vcombine.low %v8756_v28, %v8758_v60 }
 0x15f   : > { %7205 = vmatpush3.bf16.msra.mxu0 %v7758_v17  ;;  %v4500_v17 = vor.u32 %v4499_v24, %v9046_v10  ;;  %v9068_v23 = vld [vmem:[#allocation2 + $0x50] sm:$0x1]  ;;  %v4513_v15 = vrot.slane %v4511_v37, 5  ;;  %v9073_v38 = vrot.slane %v4517_v46, 5  ;;  %v4523_v12 = vrot.slane %v4521_v42, 4  ;;  %v7749_v24 = vld [vmem:[#allocation2 + $0x9c] sm:$0xff]  }
 0x160   : > { %7238 = vmatprep.subr.bf16.mxu0 %v9043_v30  ;;  %v1870_v58 = vld [vmem:[#allocation2 + $0x9c] sm:$0xe]  ;;  %v4532_v36 = vshrl.u32 %v4378_v53, 16  ;;  %v4535_v51 = vshll.u32 %v4378_v53, 16  ;;  %v9084_v28 = vsel %vm8461_vm8, %v1989_v11, %v1990_v3  ;;  %v9086_v60 = vld [vmem:[#allocation2 + $0x5c] sm:$0x1] }
 0x161   : > { %7175 = vmatmul.mubr.bf16.gmra.mrb[16].mxu0 %v7745_v6  ;;  %v9946_v6 = vcombine.low %v8863_v47, %v8867_v45  ;;  %v4545_v37 = vshrl.u32 %v9065_v43, 16  ;;  %v7751_v53 = vld [vmem:[#allocation2 + $0xa8] sm:$0xff]   ;;  %v9090_v46 = vrot.slane %v4490_v27, 4  ;;  %v9092_v47 = vrot.slane %v4503_v14, 5  ;;  %v7823_v42 = vld [vmem:[#allocation2 + $0xa0] sm:$0xf] }
 0x162   : > { %7178 = vmatprep.mubr.bf16.mxu0 %v7747_v7  ;;  %v4541_v7 = vshll.u32 %v9065_v43, 16  ;;  %v6265_v45 = vrot.slane %v1869_v44, 9  ;;  %v2001_v63 = vrot.slane %v7823_v42, 5  ;;  %v1996_v56 = vrot.slane %v1994_v40, 4  ;;  %v7824_v11 = vld [vmem:[#allocation2 + $0x98] sm:$0x1] }
 0x163   : > { %v1997_v3 = vrot.slane %v7824_v11, 5  ;;  %v4527_v48 = vshll.u32 %v9068_v23, 16  ;;  %v4514_v50 = vor.u32 %v4513_v15, %v4510_v25  ;;  %v4524_v43 = vor.u32 %v4523_v12, %v9073_v38  ;;  %v9098_v22 = vld [vmem:[#allocation2 + $0x64] sm:$0xf] }
 0x164   : > { %v4534_v0 = vrot.slane %v4532_v36, 4  ;;  %v4537_v27 = vrot.slane %v4535_v51, 5  ;;  %v6266_v14 = vrot.slane %v1870_v58, 9  ;;  %v7825_v44 = vld [vmem:[#allocation2 + $0xa4] sm:$0x1]  ;;  %v9100_v42 = vrot.slane %v4541_v7, 5 }
 0x165   : > { %6947 = vmatmul.mubr.bf16.gmra.mrb[28].mxu1 %v9945_v33  ;;  %v4381_v33 = vld [vmem:[#allocation2 + $0x60] sm:$0xf]  ;;  %v2004_v19 = vrot.slane %v7825_v44, 5  ;;  %v2003_v2 = vrot.slane %v2001_v63, 4  ;;  %v4551_v31 = vshll.u32 %v9086_v60, 16  ;;  %v4482_v15 = vsel %vm8316_vm4, %v9059_v59, %v9056_v13  ;;  %v7752_v51 = vld [vmem:[#allocation6 + $0xd0] sm:$0xff]  }
 0x166   : > { %6966 = vmatprep.mubr.bf16.mxu1 %v9946_v6  ;;  %v9094_v6 = vrot.slane %v4500_v17, 4  ;;  %v4547_v17 = vrot.slane %v4545_v37, 4  ;;  %v4556_v11 = vshrl.u32 %v4381_v33, 16  ;;  %v4559_v30 = vshll.u32 %v4381_v33, 16  ;;  %v7753_v59 = vld [vmem:[#allocation2 + $0xb4] sm:$0xff]  }
 0x167   : > { %v9109_v25 = vsel %vm8461_vm8, %v6265_v45, %v1994_v40  ;;  %v4565_v12 = vshll.u32 %v9098_v22, 16  ;;  %v4569_v58 = vshrl.u32 %v9098_v22, 16  ;;  %v9947_v36 = vcombine.low %v8882_v21, %v8892_v8 }
 0x168   : > { %v4525_v7 = vrot.slane %v4524_v43, 4  ;;  %v4529_v37 = vrot.slane %v4527_v48, 5  ;;  %v4538_v33 = vor.u32 %v4537_v27, %v4534_v0  ;;  %v9948_v13 = vcombine.low %v8886_v54, %v8896_v52  ;;  %v7826_v0 = vld [vmem:[#allocation2 + $0xac] sm:$0xf] }
 0x169   : > { %7179 = vmatmul.mubr.bf16.gmra.mrb[20].mxu0 %v7749_v24  ;;  %v4515_v24 = vrot.slane %v4514_v50, 4  ;;  %v4496_v40 = vsel %vm8316_vm4, %v9090_v46, %v9046_v10  ;;  %v4506_v21 = vsel %vm8316_vm4, %v9094_v6, %v9092_v47  ;;  %v4548_v8 = vor.u32 %v4547_v17, %v9100_v42  ;;  %v1871_v50 = vld [vmem:[#allocation2 + $0xa8] sm:$0xe]  ;;  %v9137_v10 = vld [vmem:[#allocation2 + $0x68] sm:$0x1] }
 0x16a   : > { %7182 = vmatprep.mubr.bf16.mxu0 %v7751_v53  ;;  %v9131_v54 = vsel %vm8461_vm8, %v1996_v56, %v1997_v3  ;;  %v9135_v52 = vsel %vm8461_vm8, %v6266_v14, %v2001_v63  ;;  %v4558_v43 = vrot.slane %v4556_v11, 4  ;;  %v4561_v48 = vrot.slane %v4559_v30, 5  ;;  %v7755_v53 = vld [vmem:[#allocation2 + $0xc0] sm:$0xff]   ;;  %v1872_v56 = vld [vmem:[#allocation2 + $0xb4] sm:$0xe] }
 0x16b   : > { %9949 = vst [vmem:[#allocation28_spill] sm:$0xff] %v9135_v52  ;;  %v9141_v46 = vsel %vm8461_vm8, %v2003_v2, %v2004_v19  ;;  %v9143_v47 = vrot.slane %v4551_v31, 5  ;;  %v9145_v45 = vrot.slane %v4565_v12, 5  ;;  %v4571_v6 = vrot.slane %v4569_v58, 4  ;;  %v9147_v3 = vld [vmem:[#allocation2 + $0x6c] sm:$0xf] }
 0x16c   : > { %9950 = vst [vmem:[#allocation29_spill] sm:$0xff] %v9141_v46  ;;  %v4520_v63 = vsel %vm8316_vm4, %v4515_v24, %v9073_v38  ;;  %v4530_v30 = vsel %vm8316_vm4, %v4525_v7, %v4529_v37  ;;  %v9154_v27 = vrot.slane %v4538_v33, 4  ;;  %v6267_v14 = vrot.slane %v1871_v50, 9  ;;  %v7827_v19 = vld [vmem:[#allocation2 + $0xb0] sm:$0x1]  ;;  %v7761_v58 = vld [vmem:[#allocation6 + $0xe8] sm:$0xff]  }
 0x16d   : > { %6967 = vmatmul.mubr.bf16.vlgmr.msra.gmra.mrb[0].mxu1 %v9947_v36  ;;  %v9156_v2 = vrot.slane %v4548_v8, 4  ;;  %v2011_v44 = vrot.slane %v7827_v19, 5  ;;  %v4575_v17 = vshll.u32 %v9137_v10, 16  ;;  %v7756_v11 = vld [vmem:[#allocation6 + $0xd8] sm:$0xff]   ;;  %v9951_v38 = vsel %vm8316_vm4, %v9054_v1, %v9011_v20  ;;  %v7828_v37 = vld [vmem:[#allocation2 + $0xb8] sm:$0xf] }
 0x16e   : > { %6999 = vmatpush3.bf16.msra.mxu1 %v8899_v41  ;;  %6970 = vmatprep.mubr.bf16.mxu1 %v9948_v13  ;;  %v2008_v41 = vrot.slane %v7826_v0, 5  ;;  %v9164_v12 = vcombine.low %v9951_v38, %v4482_v15  ;;  %v4562_v36 = vor.u32 %v4561_v48, %v4558_v43  ;;  %v4572_v7 = vor.u32 %v4571_v6, %v9145_v45  ;;  %v9173_v13 = vld [vmem:[#allocation2 + $0x70] sm:$0xf]  ;;  %v4387_v1 = vld [vmem:[#allocation2 + $0x78] sm:$0xf] }
 0x16f   : > { %7000 = vmatprep.subr.bf16.mxu1 %v7748_v16  ;;  %v2015_v33 = vrot.slane %v7828_v37, 5  ;;  %v4580_v20 = vshrl.u32 %v9147_v3, 16  ;;  %v9952_v15 = vcombine.low %v8903_v49, %v8907_v57  ;;  %v6268_v8 = vrot.slane %v1872_v56, 9  ;;  %v9187_v50 = vld [vmem:[#allocation2 + $0x7c] sm:$0xf]  ;;  %v7757_v49 = vld [vmem:[#allocation2 + $0xcc] sm:$0xff]  }
 0x170   : > { %v2010_v31 = vrot.slane %v2008_v41, 4  ;;  %9954 = vst [vmem:[#allocation31_spill] sm:$0xff] %v9187_v50  ;;  %v4390_v0 = vld [vmem:[#allocation2 + $0x84] sm:$0xf]  ;;  %v9955_v43 = vcombine.low %v8913_v62, %v8917_v39  ;;  %v7759_v57 = vld [vmem:[#allocation6 + $0xe0] sm:$0xff]   ;;  %v9204_v6 = vrot.slane %v4575_v17, 5 }
 0x171   : > { %7183 = vmatmul.mubr.bf16.gmra.mrb[24].mxu0 %v7753_v59  ;;  %v9206_v62 = vld [vmem:[#allocation2 + $0x88] sm:$0xf]  ;;  %v9208_v39 = vrot.slane %v4562_v36, 4  ;;  %v9215_v19 = vrot.slane %v4572_v7, 4  ;;  %v4593_v17 = vshrl.u32 %v9173_v13, 16  ;;  %v9228_v37 = vsel %vm8461_vm8, %v6268_v8, %v2015_v33 }
 0x172   : > { %7001 = vmatpush3.bf16.msra.mxu1 %v7748_v16  ;;  %v9168_v16 = vcombine.low %v4496_v40, %v4506_v21  ;;  %7186 = vmatprep.mubr.bf16.mxu0 %v7755_v53  ;;  %v9179_v40 = vcombine.low %v4520_v63, %v4530_v30  ;;  %v9185_v21 = vsel %vm8461_vm8, %v6267_v14, %v2008_v41  ;;  %v4583_v63 = vshll.u32 %v9147_v3, 16  ;;  %v4393_v14 = vld [vmem:[#allocation2 + $0x90] sm:$0xf]  ;;  %v9222_v38 = vld [vmem:[#allocation2 + $0x94] sm:$0xf] }
 0x173   : > { %7002 = vmatprep.subr.bf16.mxu1 %v7752_v51  ;;  %9953 = vst [vmem:[#allocation30_spill] sm:$0xff] %v9185_v21  ;;  %v9202_v53 = vsel %vm8461_vm8, %v2010_v31, %v2011_v44  ;;  %9957 = vst [vmem:[#allocation33_spill] sm:$0xff] %v9206_v62  ;;  %v4589_v30 = vshll.u32 %v9173_v13, 16  ;;  %v9217_v31 = vrot.slane %v2015_v33, 4  ;;  %v9219_v44 = vrot.slane %v4580_v20, 4 }
 0x174   : > { %9956 = vst [vmem:[#allocation32_spill] sm:$0xff] %v9202_v53  ;;  %9958 = vst [vmem:[#allocation34_spill] sm:$0xff] %v9222_v38  ;;  %v4604_v3 = vshrl.u32 %v4387_v1, 16  ;;  %v9230_v7 = vld [vmem:[#allocation2 + $0x74] sm:$0x1]  ;;  %v4617_v20 = vshrl.u32 %v9187_v50, 16  ;;  %v9960_v53 = vcombine.low %v8929_v32, %v8955_v29 }
 0x175   : > { %6971 = vmatmul.mubr.bf16.gmra.mrb[4].mxu1 %v9952_v15  ;;  %v4607_v15 = vshll.u32 %v4387_v1, 16  ;;  %9959 = vst [vmem:[#allocation35_spill] sm:$0xff] %v9230_v7  ;;  %v4628_v59 = vshrl.u32 %v4390_v0, 16  ;;  %v4631_v24 = vshll.u32 %v4390_v0, 16  ;;  %v4585_v48 = vrot.slane %v4583_v63, 5  ;;  %v7763_v0 = vld [vmem:[#allocation6 + $0xf0] sm:$0xff]  }
 0x176   : > { %6974 = vmatprep.mubr.bf16.mxu1 %v9955_v43  ;;  %7003 = vmatpush3.bf16.msra.mxu1 %v7752_v51  ;;  %v9210_v51 = vld [vmem:[#allocation2 + $0xbc] sm:$0x1]  ;;  %v4613_v43 = vshll.u32 %v9187_v50, 16  ;;  %v9234_v41 = vrot.slane %v4589_v30, 5  ;;  %v4637_v36 = vshll.u32 %v9206_v62, 16  ;;  %v4641_v33 = vshrl.u32 %v9206_v62, 16 }
 0x177   : > { %7004 = vmatprep.subr.bf16.mxu1 %v7756_v11  ;;  %v4652_v1 = vshrl.u32 %v4393_v14, 16  ;;  %v4661_v8 = vshll.u32 %v9222_v38, 16  ;;  %v4665_v56 = vshrl.u32 %v9222_v38, 16  ;;  %v4595_v63 = vrot.slane %v4593_v17, 4  ;;  %v4396_v32 = vld [vmem:[#allocation2 + $0x9c] sm:$0xf] }
 0x178   : > { %v4599_v30 = vshll.u32 %v9230_v7, 16  ;;  %v4606_v21 = vrot.slane %v4604_v3, 4  ;;  %v4609_v46 = vrot.slane %v4607_v15, 5  ;;  %v4619_v38 = vrot.slane %v4617_v20, 4  ;;  %v9257_v17 = vld [vmem:[#allocation2 + $0x8c] sm:$0x1] }
 0x179   : > { %7187 = vmatmul.mubr.bf16.gmra.mrb[28].mxu0 %v7757_v49  ;;  %v9961_v49 = vcombine.low %v8939_v26, %v8959_v55  ;;  %v4630_v62 = vrot.slane %v4628_v59, 4  ;;  %v4633_v52 = vrot.slane %v4631_v24, 5  ;;  %9963 = vst [vmem:[#allocation37_spill] sm:$0xff] %v9257_v17  ;;  %v9259_v26 = vrot.slane %v4637_v36, 5  ;;  %v9263_v15 = vld [vmem:[#allocation2 + $0xa0] sm:$0xf] }
 0x17a   : > { %7005 = vmatpush3.bf16.msra.mxu1 %v7756_v11  ;;  %v4655_v11 = vshll.u32 %v4393_v14, 16  ;;  %7206 = vmatprep.mubr.bf16.mxu0 %v9013_v18  ;;  %v9248_v14 = vrot.slane %v4613_v43, 5  ;;  %v4586_v18 = vor.u32 %v4585_v48, %v9219_v44  ;;  %v4643_v55 = vrot.slane %v4641_v33, 4  ;;  %9964 = vst [vmem:[#allocation38_spill] sm:$0xff] %v9263_v15  ;;  %v9968_v7 = vld [vmem:[#allocation19_spill] sm:$0xff] }
 0x17b   : > { %7006 = vmatprep.subr.bf16.mxu1 %v7759_v57  ;;  %v9261_v59 = vrot.slane %v4661_v8, 5  ;;  %v4667_v24 = vrot.slane %v4665_v56, 4  ;;  %v4596_v43 = vor.u32 %v4595_v63, %v9234_v41  ;;  %v4610_v20 = vor.u32 %v4609_v46, %v4606_v21 }
 0x17c   : > { %v4657_v3 = vrot.slane %v4655_v11, 5  ;;  %v4676_v48 = vshrl.u32 %v4396_v32, 16  ;;  %v4679_v44 = vshll.u32 %v4396_v32, 16  ;;  %v9268_v29 = vrot.slane %v4599_v30, 5  ;;  %v7762_v11 = vld [vmem:[#allocation6 + $0x208] sm:$0xff]  }
 0x17d   : > { %6975 = vmatmul.mubr.bf16.gmra.mrb[8].mxu1 %v9960_v53  ;;  %v9255_v53 = vld [vmem:[#allocation2 + $0x80] sm:$0x1]  ;;  %v4620_v36 = vor.u32 %v4619_v38, %v9248_v14  ;;  %v4644_v56 = vor.u32 %v4643_v55, %v9259_v26  ;;  %v4647_v8 = vshll.u32 %v9257_v17, 16  ;;  %v4685_v46 = vshll.u32 %v9263_v15, 16 }
 0x17e   : > { %6978 = vmatprep.mubr.bf16.mxu1 %v9961_v49  ;;  %7007 = vmatpush3.bf16.msra.mxu1 %v7759_v57  ;;  %9962 = vst [vmem:[#allocation36_spill] sm:$0xff] %v9255_v53  ;;  %v4654_v57 = vrot.slane %v4652_v1, 4  ;;  %v9266_v49 = vld [vmem:[#allocation2 + $0x98] sm:$0x1]  ;;  %v4623_v33 = vshll.u32 %v9255_v53, 16  ;;  %v4634_v1 = vor.u32 %v4633_v52, %v4630_v62  ;;  %v4689_v21 = vshrl.u32 %v9263_v15, 16 }
 0x17f   : > { %7008 = vmatprep.subr.bf16.mxu1 %v7761_v58  ;;  %v4587_v63 = vrot.slane %v4586_v18, 4  ;;  %v4668_v38 = vor.u32 %v4667_v24, %v9261_v59  ;;  %v4671_v32 = vshll.u32 %v9266_v49, 16  ;;  %v9965_v52 = vcombine.low %v8972_v9, %v8976_v5  ;;  %v9966_v62 = vld [vmem:[#allocation26_spill] sm:$0xff]  ;;  %v9291_v24 = vld [vmem:[#allocation2 + $0xa4] sm:$0x1] }
 0x180   : > { %v4658_v30 = vor.u32 %v4657_v3, %v4654_v57  ;;  %v4597_v55 = vrot.slane %v4596_v43, 4  ;;  %v4611_v17 = vrot.slane %v4610_v20, 4  ;;  %v4678_v53 = vrot.slane %v4676_v48, 4  ;;  %v9967_v15 = vld [vmem:[#allocation18_spill] sm:$0xff] }
 0x181   : > { %7207 = vmatmul.mubr.bf16.vlgmr.msra.gmra.mrb[0].mxu0 %v9048_v61  ;;  %v4681_v50 = vrot.slane %v4679_v44, 5  ;;  %v9969_v61 = vcombine.low %v9967_v15, %v9968_v7  ;;  %v7764_v18 = vld [vmem:[#allocation6 + $0x210] sm:$0xff]   ;;  %v4578_v57 = vsel %vm8316_vm4, %v9215_v19, %v9204_v6  ;;  %v4621_v9 = vrot.slane %v4620_v36, 4 }
 0x182   : > { %7009 = vmatpush3.bf16.msra.mxu1 %v7761_v58  ;;  %v7765_v58 = vld [vmem:[#allocation6 + $0xf8] sm:$0xff]   ;;  %7239 = vmatpush3.bf16.msra.mxu0 %v9966_v62  ;;  %v4625_v5 = vrot.slane %v4623_v33, 5  ;;  %v4635_v3 = vrot.slane %v4634_v1, 4  ;;  %v4645_v43 = vrot.slane %v4644_v56, 4  ;;  %v4649_v20 = vrot.slane %v4647_v8, 5 }
 0x183   : > { %7010 = vmatprep.subr.bf16.mxu1 %v7763_v0  ;;  %7210 = vmatprep.mubr.bf16.mxu0 %v9164_v12  ;;  %v9293_v48 = vrot.slane %v4685_v46, 5  ;;  %v4691_v7 = vrot.slane %v4689_v21, 4  ;;  %v4399_v15 = vld [vmem:[#allocation2 + $0xa8] sm:$0xf]  ;;  %v9970_v12 = vrot.slane %v9210_v51, 5  ;;  %v4659_v6 = vrot.slane %v4658_v30, 4 }
 0x184   : > { %7240 = vmatprep.subr.bf16.mxu0 %v7762_v11  ;;  %v4669_v19 = vrot.slane %v4668_v38, 4  ;;  %v4673_v36 = vrot.slane %v4671_v32, 5  ;;  %v9302_v33 = vld [vmem:[#allocation2 + $0xac] sm:$0xf]  ;;  %v4602_v51 = vsel %vm8316_vm4, %v4597_v55, %v9268_v29  ;;  %v4682_v1 = vor.u32 %v4681_v50, %v4678_v53  ;;  %v9342_v30 = vld [vmem:[#allocation2 + $0xb0] sm:$0x1] }
 0x185   : > { %6979 = vmatmul.mubr.bf16.gmra.mrb[12].mxu1 %v9965_v52  ;;  %v9300_v44 = vsel %vm8461_vm8, %v9217_v31, %v9970_v12  ;;  %v4616_v31 = vsel %vm8316_vm4, %v4611_v17, %v9248_v14  ;;  %v4626_v56 = vsel %vm8316_vm4, %v4621_v9, %v4625_v5  ;;  %v4700_v8 = vshrl.u32 %v4399_v15, 16  ;;  %v9974_v38 = vld [vmem:[#allocation21_spill] sm:$0xff]  ;;  %v9360_v55 = vld [vmem:[#allocation2 + $0xb4] sm:$0xf]  ;;  %v9978_v5 = vld [vmem:[#allocation24_spill] sm:$0xff] }
 0x186   : > { %6982 = vmatprep.mubr.bf16.mxu1 %v9969_v61  ;;  %7011 = vmatpush3.bf16.msra.mxu1 %v7763_v0  ;;  %v4592_v0 = vsel %vm8316_vm4, %v4587_v63, %v9234_v41  ;;  %v4703_v46 = vshll.u32 %v4399_v15, 16  ;;  %v7766_v41 = vld [vmem:[#allocation6 + $0x218] sm:$0xff]   ;;  %v4650_v29 = vsel %vm8316_vm4, %v4645_v43, %v4649_v20  ;;  %v4692_v21 = vor.u32 %v4691_v7, %v9293_v48  ;;  %v5120_v61 = vld [vmem:[#allocation2 + $0x48] sm:$0xe]  ;;  %v7769_v20 = vld [vmem:[#allocation6 + $0x220] sm:$0xff]  }
 0x187   : > { %7012 = vmatprep.subr.bf16.mxu1 %v7765_v58  ;;  %7241 = vmatpush3.bf16.msra.mxu0 %v7762_v11  ;;  %v4640_v11 = vsel %vm8316_vm4, %v4635_v3, %v9259_v26  ;;  %v4695_v14 = vshll.u32 %v9291_v24, 16  ;;  %v4709_v50 = vshll.u32 %v9302_v33, 16  ;;  %v9971_v53 = vsel %vm8316_vm4, %v9156_v2, %v9143_v47  ;;  %v9973_v2 = vld [vmem:[#allocation20_spill] sm:$0xff]  ;;  %v9977_v9 = vld [vmem:[#allocation23_spill] sm:$0xff] }
 0x188   : > { %7242 = vmatprep.subr.bf16.mxu0 %v7764_v18  ;;  %v9972_v17 = vsel %vm8316_vm4, %v9154_v27, %v9100_v42  ;;  %v4664_v63 = vsel %vm8316_vm4, %v4659_v6, %v9261_v59  ;;  %v4713_v47 = vshrl.u32 %v9302_v33, 16  ;;  %v9975_v32 = vcombine.low %v9973_v2, %v9974_v38 }
 0x189   : > { %7211 = vmatmul.mubr.bf16.gmra.mrb[4].mxu0 %v9168_v16  ;;  %v6410_v26 = vcombine.low %v9972_v17, %v9971_v53  ;;  %v4674_v16 = vsel %vm8316_vm4, %v4669_v19, %v4673_v36  ;;  %v9976_v42 = vsel %vm8316_vm4, %v9208_v39, %v9145_v45  ;;  %v6284_v59 = vcombine.low %v9228_v37, %v9300_v44  ;;  %v9373_v19 = vld [vmem:[#allocation2 + $0xb8] sm:$0xf]  ;;  %v5123_v17 = vld [vmem:[#allocation2 + $0x6c] sm:$0xe] }
 0x18a   : > { %7013 = vmatpush3.bf16.msra.mxu1 %v7765_v58  ;;  %v9334_v58 = vld [vmem:[#allocation6 + $0x100] sm:$0xff]   ;;  %7214 = vmatprep.mubr.bf16.mxu0 %v9179_v40  ;;  %v6411_v27 = vcombine.low %v9976_v42, %v4578_v57  ;;  %v9356_v52 = vcombine.low %v4592_v0, %v4602_v51  ;;  %v9358_v62 = vrot.slane %v4682_v1, 4  ;;  %v9979_v3 = vcombine.low %v9977_v9, %v9978_v5  ;;  %v5121_v57 = vld [vmem:[#allocation2 + $0x54] sm:$0xe] }
 0x18b   : > { %7286 = vmatprep.subr.bf16.mxu1 %v9334_v58  ;;  %7243 = vmatpush3.bf16.msra.mxu0 %v7764_v18  ;;  %v9365_v40 = vcombine.low %v4616_v31, %v4626_v56  ;;  %v9367_v43 = vcombine.low %v4640_v11, %v4650_v29  ;;  %v4702_v45 = vrot.slane %v4700_v8, 4  ;;  %v4705_v39 = vrot.slane %v4703_v46, 5  ;;  %v5122_v31 = vld [vmem:[#allocation2 + $0x60] sm:$0xe]  ;;  %v9980_v56 = vld [vmem:[#allocation25_spill] sm:$0xff] }
 0x18c   : > { %7244 = vmatprep.subr.bf16.mxu0 %v7766_v41  ;;  %v9369_v7 = vcombine.low %v4664_v63, %v4674_v16  ;;  %v4693_v15 = vrot.slane %v4692_v21, 4  ;;  %v4697_v12 = vrot.slane %v4695_v14, 5  ;;  %v9371_v6 = vrot.slane %v4709_v50, 5  ;;  %v9981_v50 = vld [vmem:[#allocation27_spill] sm:$0xff]  ;;  %v7772_v63 = vld [vmem:[#allocation6 + $0x228] sm:$0xff]  }
 0x18d   : > { %6983 = vmatmul.mubr.bf16.gmra.mrb[16].mxu1 %v9975_v32  ;;  %v4715_v36 = vrot.slane %v4713_v47, 4  ;;  %v4719_v18 = vshll.u32 %v9342_v30, 16  ;;  %v4724_v0 = vshrl.u32 %v9360_v55, 16  ;;  %v6433_v51 = vrot.slane %v5120_v61, 9  ;;  %v9422_v9 = vld [vmem:[#allocation2 + $0xbc] sm:$0x1] }
 0x18e   : > { %6986 = vmatprep.mubr.bf16.mxu1 %v9979_v3  ;;  %v4688_v1 = vsel %vm8316_vm4, %v9358_v62, %v9293_v48  ;;  %v5210_v11 = vrot.slane %v9980_v56, 5  ;;  %v5213_v8 = vrot.slane %v9068_v23, 5  ;;  %v6434_v46 = vrot.slane %v5121_v57, 9  ;;  %v9984_v3 = vld [vmem:[#allocation35_spill] sm:$0xff] }
 0x18f   : > { %7245 = vmatpush3.bf16.msra.mxu0 %v7766_v41  ;;  %v4706_v29 = vor.u32 %v4705_v39, %v4702_v45  ;;  %v4727_v21 = vshll.u32 %v9360_v55, 16  ;;  %v4733_v14 = vshll.u32 %v9373_v19, 16  ;;  %v5217_v53 = vrot.slane %v9981_v50, 5 }
 0x190   : > { %7246 = vmatprep.subr.bf16.mxu0 %v7769_v20  ;;  %v9388_v16 = vsel %vm8461_vm8, %v6433_v51, %v5210_v11  ;;  %v5212_v48 = vrot.slane %v5210_v11, 4  ;;  %v5220_v47 = vrot.slane %v9086_v60, 5  ;;  %v6435_v23 = vrot.slane %v5122_v31, 9  ;;  %v9440_v51 = vld [vmem:[#allocation2 + $0xc4] sm:$0xf] }
 0x191   : > { %7215 = vmatmul.mubr.bf16.gmra.mrb[8].mxu0 %v6410_v26  ;;  %v4698_v41 = vsel %vm8316_vm4, %v4693_v15, %v4697_v12  ;;  %v9395_v2 = vsel %vm8461_vm8, %v6434_v46, %v5217_v53  ;;  %v5219_v38 = vrot.slane %v5217_v53, 4  ;;  %v5224_v32 = vrot.slane %v9098_v22, 5  ;;  %v5124_v12 = vld [vmem:[#allocation2 + $0x78] sm:$0xe] }
 0x192   : > { %v9982_v42 = vcombine.low %v9063_v34, %v9084_v28  ;;  %7218 = vmatprep.mubr.bf16.mxu0 %v6411_v27  ;;  %v4716_v62 = vor.u32 %v4715_v36, %v9371_v6  ;;  %v9404_v60 = vsel %vm8461_vm8, %v5212_v48, %v5213_v8  ;;  %v5227_v26 = vrot.slane %v9137_v10, 5  ;;  %v2754_v46 = vld [vmem:[#allocation2 + $0x78] sm:$0xf]  ;;  %v9986_v48 = vld [vmem:[#allocation36_spill] sm:$0xff] }
 0x193   : > { %v6436_v55 = vrot.slane %v5123_v17, 9  ;;  %v9983_v61 = vcombine.low %v9109_v25, %v9131_v54  ;;  %7247 = vmatpush3.bf16.msra.mxu0 %v7769_v20  ;;  %v6449_v22 = vcombine.low %v9388_v16, %v9404_v60  ;;  %v9414_v34 = vsel %vm8461_vm8, %v5219_v38, %v5220_v47  ;;  %v7775_v25 = vld [vmem:[#allocation6 + $0x230] sm:$0xff]   ;;  %v9985_v53 = vld [vmem:[#allocation31_spill] sm:$0xff]  ;;  %v5125_v47 = vld [vmem:[#allocation2 + $0x84] sm:$0xe] }
 0x194   : > { %v9418_v28 = vsel %vm8461_vm8, %v6435_v23, %v5224_v32  ;;  %v5226_v27 = vrot.slane %v5224_v32, 4  ;;  %7248 = vmatprep.subr.bf16.mxu0 %v7772_v63  ;;  %v9420_v10 = vrot.slane %v4719_v18, 5  ;;  %v6450_v54 = vcombine.low %v9395_v2, %v9414_v34  ;;  %v4405_v18 = vld [vmem:[#allocation2 + $0xc0] sm:$0xf] }
 0x195   : > { %6987 = vmatmul.mubr.bf16.gmra.mrb[20].mxu1 %v9982_v42  ;;  %v5231_v5 = vrot.slane %v9173_v13, 5  ;;  %v5234_v45 = vrot.slane %v9984_v3, 5  ;;  %v9428_v39 = vcombine.low %v4688_v1, %v4698_v41  ;;  %v9430_v57 = vrot.slane %v4706_v29, 4  ;;  %v7778_v29 = vld [vmem:[#allocation6 + $0x238] sm:$0xff]   ;;  %v9987_v32 = vld [vmem:[#allocation28_spill] sm:$0xff]  ;;  %v9988_v42 = vld [vmem:[#allocation29_spill] sm:$0xff] }
 0x196   : > { %6990 = vmatprep.mubr.bf16.mxu1 %v9983_v61  ;;  %v9432_v20 = vrot.slane %v4724_v0, 4  ;;  %v9436_v15 = vsel %vm8461_vm8, %v5226_v27, %v5227_v26  ;;  %v9438_v36 = vrot.slane %v4727_v21, 5  ;;  %v9448_v0 = vrot.slane %v4716_v62, 4  ;;  %v9990_v27 = vld [vmem:[#allocation30_spill] sm:$0xff] }
 0x197   : > { %v6451_v13 = vcombine.low %v9418_v28, %v9436_v15  ;;  %v9446_v31 = vsel %vm8461_vm8, %v6436_v55, %v5231_v5  ;;  %v5233_v1 = vrot.slane %v5231_v5, 4  ;;  %7249 = vmatpush3.bf16.msra.mxu0 %v7772_v63  ;;  %v9450_v56 = vrot.slane %v4733_v14, 5  ;;  %v9991_v5 = vld [vmem:[#allocation32_spill] sm:$0xff] }
 0x198   : > { %v4737_v11 = vshrl.u32 %v9373_v19, 16  ;;  %v4743_v8 = vshll.u32 %v9422_v9, 16  ;;  %7250 = vmatprep.subr.bf16.mxu0 %v7775_v25  ;;  %v6437_v50 = vrot.slane %v5124_v12, 9  ;;  %v5238_v17 = vrot.slane %v9985_v53, 5 }
 0x199   : > { %v9456_v21 = vsel %vm8461_vm8, %v5233_v1, %v5234_v45  ;;  %v5241_v63 = vrot.slane %v9986_v48, 5  ;;  %7219 = vmatmul.mubr.bf16.gmra.mrb[12].mxu0 %v9356_v52  ;;  %v4748_v14 = vshrl.u32 %v4405_v18, 16  ;;  %v4751_v23 = vshll.u32 %v4405_v18, 16  ;;  %v9993_v18 = vld [vmem:[#allocation17_spill] sm:$0xff]  ;;  %v9994_v1 = vld [vmem:[#allocation22_spill] sm:$0xff] }
 0x19a   : > { %v4757_v41 = vshll.u32 %v9440_v51, 16  ;;  %v6452_v38 = vcombine.low %v9446_v31, %v9456_v21  ;;  %v9989_v62 = vcombine.low %v9987_v32, %v9988_v42  ;;  %7222 = vmatprep.mubr.bf16.mxu0 %v9365_v40  ;;  %v9470_v26 = vsel %vm8461_vm8, %v6437_v50, %v5238_v17  ;;  %v9995_v48 = vld [vmem:[#allocation33_spill] sm:$0xff] }
 0x19b   : > { %v5240_v55 = vrot.slane %v5238_v17, 4  ;;  %v2992_v61 = vshrl.u32 %v2754_v46, 16  ;;  %v2995_v52 = vshll.u32 %v2754_v46, 16  ;;  %v9992_v3 = vcombine.low %v9990_v27, %v9991_v5  ;;  %7251 = vmatpush3.bf16.msra.mxu0 %v7775_v25  ;;  %v5126_v5 = vld [vmem:[#allocation2 + $0x90] sm:$0xe] }
 0x19c   : > { %v4739_v45 = vrot.slane %v4737_v11, 4  ;;  %v4761_v12 = vshrl.u32 %v9440_v51, 16  ;;  %v3014_v40 = vsel %vm8316_vm4, %v9994_v1, %v9993_v18  ;;  %v6438_v53 = vrot.slane %v5125_v47, 9  ;;  %7252 = vmatprep.subr.bf16.mxu0 %v7778_v29 }
 0x19d   : > { %6991 = vmatmul.mubr.bf16.gmra.mrb[24].mxu1 %v9989_v62  ;;  %v9482_v50 = vsel %vm8461_vm8, %v5240_v55, %v5241_v63  ;;  %v2994_v46 = vrot.slane %v2992_v61, 4  ;;  %v2997_v17 = vrot.slane %v2995_v52, 5  ;;  %v5245_v32 = vrot.slane %v9995_v48, 5  ;;  %v9996_v62 = vld [vmem:[#allocation37_spill] sm:$0xff] }
 0x19e   : > { %6994 = vmatprep.mubr.bf16.mxu1 %v9992_v3  ;;  %v4750_v42 = vrot.slane %v4748_v14, 4  ;;  %v4753_v11 = vrot.slane %v4751_v23, 5  ;;  %v6453_v25 = vcombine.low %v9470_v26, %v9482_v50  ;;  %v5248_v27 = vrot.slane %v9996_v62, 5  ;;  %v4408_v3 = vld [vmem:[#allocation2 + $0xcc] sm:$0xf] }
 0x19f   : > { %v4712_v47 = vsel %vm8316_vm4, %v9430_v57, %v9371_v6  ;;  %v2998_v63 = vor.u32 %v2997_v17, %v2994_v46  ;;  %v9494_v55 = vsel %vm8461_vm8, %v6438_v53, %v5245_v32  ;;  %v5247_v61 = vrot.slane %v5245_v32, 4  ;;  %v7767_v14 = vld [vmem:[#allocation2 + $0xc] sm:$0xff]   ;;  %7253 = vmatpush3.bf16.msra.mxu0 %v7778_v29  ;;  %v9507_v53 = vld [vmem:[#allocation2 + $0xc8] sm:$0x1] }
 0x1a0   : > { %v4722_v23 = vsel %vm8316_vm4, %v9448_v0, %v9420_v10  ;;  %v4730_v52 = vor.u32 %v9438_v36, %v9432_v20  ;;  %v9502_v18 = vrot.slane %v4757_v41, 5  ;;  %v4763_v1 = vrot.slane %v4761_v12, 4  ;;  %v9504_v6 = vld [vmem:[#allocation2 + $0xd0] sm:$0xf] }
 0x1a1   : > { %v4740_v57 = vor.u32 %v4739_v45, %v9450_v56  ;;  %v2999_v46 = vrot.slane %v2998_v63, 4  ;;  %v9511_v17 = vsel %vm8461_vm8, %v5247_v61, %v5248_v27  ;;  %v6439_v48 = vrot.slane %v5126_v5, 9  ;;  %7223 = vmatmul.mubr.bf16.gmra.mrb[16].mxu0 %v9367_v43  ;;  %v9997_v45 = vld [vmem:[#allocation16_spill] sm:$0xff]  ;;  %v9998_v12 = vld [vmem:[#allocation34_spill] sm:$0xff] }
 0x1a2   : > { %v4754_v10 = vor.u32 %v4753_v11, %v4750_v42  ;;  %v4772_v20 = vshrl.u32 %v4408_v3, 16  ;;  %v4775_v36 = vshll.u32 %v4408_v3, 16  ;;  %v6454_v0 = vcombine.low %v9494_v55, %v9511_v17  ;;  %7226 = vmatprep.mubr.bf16.mxu0 %v9369_v7 }
 0x1a3   : > { %v4781_v29 = vshll.u32 %v9504_v6, 16  ;;  %v4785_v41 = vshrl.u32 %v9504_v6, 16  ;;  %v3004_v43 = vsel %vm8316_vm4, %v2999_v46, %v9997_v45  ;;  %v5252_v32 = vrot.slane %v9998_v12, 5 }
 0x1a4   : > { %v4764_v42 = vor.u32 %v4763_v1, %v9502_v18  ;;  %v4767_v11 = vshll.u32 %v9507_v53, 16  ;;  %v9528_v62 = vcombine.low %v3004_v43, %v3014_v40  ;;  %v5255_v37 = vrot.slane %v9266_v49, 5  ;;  %v7768_v1 = vld [vmem:[#allocation2 + $0x18] sm:$0xff]   ;;  %v9537_v40 = vld [vmem:[#allocation2 + $0xd4] sm:$0x1] }
 0x1a5   : > { %6995 = vmatmul.mubr.bf16.gmra.mrb[28].mxu1 %v6284_v59  ;;  %v4731_v44 = vrot.slane %v4730_v52, 4  ;;  %v4745_v59 = vrot.slane %v4743_v8, 5  ;;  %v9535_v7 = vsel %vm8461_vm8, %v6439_v48, %v5252_v32  ;;  %v5254_v27 = vrot.slane %v5252_v32, 4  ;;  %v7770_v52 = vld [vmem:[#allocation2 + $0x24] sm:$0xff]  }
 0x1a6   : > { %7014 = vmatprep.mubr.bf16.mxu1 %v7767_v14  ;;  %v6417_v5 = vcombine.low %v4712_v47, %v4722_v23  ;;  %v4741_v3 = vrot.slane %v4740_v57, 4  ;;  %v4774_v63 = vrot.slane %v4772_v20, 4  ;;  %v4777_v61 = vrot.slane %v4775_v36, 5  ;;  %v5127_v14 = vld [vmem:[#allocation2 + $0x9c] sm:$0xe] }
 0x1a7   : > { %v4755_v46 = vrot.slane %v4754_v10, 4  ;;  %v9539_v45 = vrot.slane %v4781_v29, 5  ;;  %v4787_v49 = vrot.slane %v4785_v41, 4  ;;  %v9543_v8 = vsel %vm8461_vm8, %v5254_v27, %v5255_v37  ;;  %v5116_v36 = vld [vmem:[#allocation2 + $0x18] sm:$0xe]  ;;  %v9999_v29 = vld [vmem:[#allocation38_spill] sm:$0xff] }
 0x1a8   : > { %v4765_v48 = vrot.slane %v4764_v42, 4  ;;  %v4769_v43 = vrot.slane %v4767_v11, 5  ;;  %v6455_v47 = vcombine.low %v9535_v7, %v9543_v8  ;;  %v4736_v23 = vsel %vm8316_vm4, %v4731_v44, %v9450_v56  ;;  %v7831_v11 = vld [vmem:[#allocation2 + $0x1c] sm:$0xf]  ;;  %v7832_v27 = vld [vmem:[#allocation6 + $0x108] sm:$0xff]  }
 0x1a9   : > { %v6440_v57 = vrot.slane %v5127_v14, 9  ;;  %7227 = vmatmul.mubr.bf16.gmra.mrb[20].mxu0 %v9428_v39  ;;  %v4778_v10 = vor.u32 %v4777_v61, %v4774_v63  ;;  %v4791_v20 = vshll.u32 %v9537_v40, 16  ;;  %v5259_v41 = vrot.slane %v9999_v29, 5  ;;  %v7771_v61 = vld [vmem:[#allocation2 + $0x30] sm:$0xff]  }
 0x1aa   : > { %v5262_v12 = vrot.slane %v9291_v24, 5  ;;  %7230 = vmatprep.mubr.bf16.mxu0 %v6417_v5  ;;  %v4746_v32 = vsel %vm8316_vm4, %v4741_v3, %v4745_v59  ;;  %v4760_v56 = vsel %vm8316_vm4, %v4755_v46, %v9502_v18  ;;  %v4788_v42 = vor.u32 %v4787_v49, %v9539_v45  ;;  %v5128_v59 = vld [vmem:[#allocation2 + $0xa8] sm:$0xe] }
 0x1ab   : > { %v4770_v39 = vsel %vm8316_vm4, %v4765_v48, %v4769_v43  ;;  %v5182_v37 = vrot.slane %v7831_v11, 5  ;;  %v9565_v24 = vsel %vm8461_vm8, %v6440_v57, %v5259_v41  ;;  %v5261_v44 = vrot.slane %v5259_v41, 4  ;;  %v7833_v43 = vld [vmem:[#allocation2 + $0x20] sm:$0x1]  ;;  %v5129_v41 = vld [vmem:[#allocation2 + $0xb4] sm:$0xe] }
 0x1ac   : > { %v6429_v5 = vrot.slane %v5116_v36, 9  ;;  %v6418_v18 = vcombine.low %v4736_v23, %v4746_v32  ;;  %v4779_v3 = vrot.slane %v4778_v10, 4  ;;  %v4793_v63 = vrot.slane %v4791_v20, 5  ;;  %v7834_v20 = vld [vmem:[#allocation6 + $0x110] sm:$0xff]   ;;  %v5117_v32 = vld [vmem:[#allocation2 + $0x24] sm:$0xe] }
 0x1ad   : > { %7015 = vmatmul.mubr.bf16.vlgmr.msra.gmra.mrb[0].mxu1 %v7768_v1  ;;  %v6419_v14 = vcombine.low %v4760_v56, %v4770_v39  ;;  %v4789_v1 = vrot.slane %v4788_v42, 4  ;;  %v6441_v49 = vrot.slane %v5128_v59, 9  ;;  %v5184_v48 = vrot.slane %v5182_v37, 4  ;;  %v5118_v11 = vld [vmem:[#allocation2 + $0x30] sm:$0xe] }
 0x1ae   : > { %7294 = vmatpush3.bf16.msra.mxu1 %v9334_v58  ;;  %7018 = vmatprep.mubr.bf16.mxu1 %v7770_v52  ;;  %v9569_v58 = vsel %vm8461_vm8, %v5261_v44, %v5262_v12  ;;  %v7773_v52 = vld [vmem:[#allocation2 + $0x3c] sm:$0xff]   ;;  %v5185_v57 = vrot.slane %v7833_v43, 5  ;;  %v5266_v23 = vrot.slane %v9302_v33, 5  ;;  %v5269_v10 = vrot.slane %v9342_v30, 5  ;;  %v7835_v30 = vld [vmem:[#allocation2 + $0x28] sm:$0xf] }
 0x1af   : > { %7287 = vmatprep.subr.bf16.mxu1 %v7832_v27  ;;  %v6456_v46 = vcombine.low %v9565_v24, %v9569_v58  ;;  %v4784_v12 = vsel %vm8316_vm4, %v4779_v3, %v9539_v45  ;;  %v4794_v33 = vsel %vm8316_vm4, %v4789_v1, %v4793_v63  ;;  %v5189_v56 = vrot.slane %v7835_v30, 5  ;;  %v7836_v44 = vld [vmem:[#allocation2 + $0x34] sm:$0xf]  ;;  %v7841_v30 = vld [vmem:[#allocation2 + $0x40] sm:$0xf] }
 0x1b0   : > { %v9577_v36 = vsel %vm8461_vm8, %v6441_v49, %v5266_v23  ;;  %v5268_v29 = vrot.slane %v5266_v23, 4  ;;  %v5183_v42 = vsel %vm8461_vm8, %v6429_v5, %v5182_v37  ;;  %v5186_v39 = vsel %vm8461_vm8, %v5184_v48, %v5185_v57  ;;  %v7776_v57 = vld [vmem:[#allocation2 + $0x54] sm:$0xff]  }
 0x1b1   : > { %7231 = vmatmul.mubr.bf16.gmra.mrb[24].mxu0 %v6418_v18  ;;  %v5196_v59 = vrot.slane %v7836_v44, 5  ;;  %v6442_v3 = vrot.slane %v5129_v41, 9  ;;  %v6420_v63 = vcombine.low %v4784_v12, %v4794_v33  ;;  %v5273_v37 = vrot.slane %v9373_v19, 5  ;;  %v5130_v12 = vld [vmem:[#allocation2 + $0xc0] sm:$0xe]  ;;  %v7840_v19 = vld [vmem:[#allocation6 + $0x120] sm:$0xff]  }
 0x1b2   : > { %7295 = vmatpush3.bf16.msra.mxu1 %v7832_v27  ;;  %7234 = vmatprep.mubr.bf16.mxu0 %v6419_v14  ;;  %v9590_v45 = vsel %vm8461_vm8, %v5268_v29, %v5269_v10  ;;  %v7837_v27 = vld [vmem:[#allocation6 + $0x118] sm:$0xff]   ;;  %v5276_v5 = vrot.slane %v9422_v9, 5  ;;  %v7774_v14 = vld [vmem:[#allocation2 + $0x48] sm:$0xff]   ;;  %v6445_v1 = vcombine.low %v5183_v42, %v5186_v39  ;;  %v5191_v49 = vrot.slane %v5189_v56, 4  ;;  %v7839_v10 = vld [vmem:[#allocation2 + $0x38] sm:$0x1] }
 0x1b3   : > { %7288 = vmatprep.subr.bf16.mxu1 %v7834_v20  ;;  %v6457_v18 = vcombine.low %v9577_v36, %v9590_v45  ;;  %v6431_v43 = vrot.slane %v5118_v11, 9  ;;  %v5198_v23 = vrot.slane %v5196_v59, 4  ;;  %v9598_v29 = vsel %vm8461_vm8, %v6442_v3, %v5273_v37 }
 0x1b4   : > { %v5275_v41 = vrot.slane %v5273_v37, 4  ;;  %v5203_v42 = vrot.slane %v7841_v30, 5  ;;  %v6443_v11 = vrot.slane %v5130_v12, 9  ;;  %v5280_v3 = vrot.slane %v9440_v51, 5 }
 0x1b5   : > { %7019 = vmatmul.mubr.bf16.gmra.mrb[4].mxu1 %v7771_v61  ;;  %v6430_v61 = vrot.slane %v5117_v32, 9  ;;  %v5290_v12 = vrot.slane %v9537_v40, 5 }
 0x1b6   : > { %7022 = vmatprep.mubr.bf16.mxu1 %v7773_v52  ;;  %7296 = vmatpush3.bf16.msra.mxu1 %v7834_v20  ;;  %v7838_v52 = vld [vmem:[#allocation2 + $0x2c] sm:$0x1]  ;;  %v5199_v20 = vrot.slane %v7839_v10, 5  ;;  %v9604_v33 = vsel %vm8461_vm8, %v5275_v41, %v5276_v5  ;;  %v9618_v5 = vsel %vm8461_vm8, %v6443_v11, %v5280_v3  ;;  %v5287_v41 = vrot.slane %v9504_v6, 5  ;;  %v7845_v11 = vld [vmem:[#allocation6 + $0x138] sm:$0xff]  }
 0x1b7   : > { %7289 = vmatprep.subr.bf16.mxu1 %v7837_v27  ;;  %v5192_v48 = vrot.slane %v7838_v52, 5  ;;  %v5190_v9 = vsel %vm8461_vm8, %v6430_v61, %v5189_v56  ;;  %v6458_v39 = vcombine.low %v9598_v29, %v9604_v33  ;;  %v5197_v56 = vsel %vm8461_vm8, %v6431_v43, %v5196_v59  ;;  %v7842_v61 = vld [vmem:[#allocation6 + $0x128] sm:$0xff]  }
 0x1b8   : > { %v5200_v44 = vsel %vm8461_vm8, %v5198_v23, %v5199_v20  ;;  %v7843_v43 = vld [vmem:[#allocation2 + $0x44] sm:$0x1]  ;;  %v7779_v23 = vld [vmem:[#allocation2 + $0x6c] sm:$0xff]   ;;  %v5289_v30 = vrot.slane %v5287_v41, 4 }
 0x1b9   : > { %7235 = vmatmul.mubr.bf16.gmra.mrb[28].mxu0 %v6420_v63  ;;  %v5193_v32 = vsel %vm8461_vm8, %v5191_v49, %v5192_v48  ;;  %v5283_v63 = vrot.slane %v9507_v53, 5  ;;  %v7777_v49 = vld [vmem:[#allocation2 + $0x60] sm:$0xff]   ;;  %v6447_v52 = vcombine.low %v5197_v56, %v5200_v44  ;;  %v5205_v48 = vrot.slane %v5203_v42, 4  ;;  %v7844_v53 = vld [vmem:[#allocation6 + $0x130] sm:$0xff]   ;;  %v7780_v56 = vld [vmem:[#allocation2 + $0x78] sm:$0xff]  }
 0x1ba   : > { %7297 = vmatpush3.bf16.msra.mxu1 %v7837_v27  ;;  %7254 = vmatprep.mubr.bf16.mxu0 %v6445_v1  ;;  %v5119_v27 = vld [vmem:[#allocation2 + $0x3c] sm:$0xe]  ;;  %v6446_v37 = vcombine.low %v5190_v9, %v5193_v32  ;;  %v5131_v1 = vld [vmem:[#allocation2 + $0xcc] sm:$0xe]  ;;  %v9638_v40 = vsel %vm8461_vm8, %v5289_v30, %v5290_v12  ;;  %v7781_v44 = vld [vmem:[#allocation2 + $0x84] sm:$0xff]  }
 0x1bb   : > { %7290 = vmatprep.subr.bf16.mxu1 %v7840_v19  ;;  %v6432_v59 = vrot.slane %v5119_v27, 9  ;;  %v6444_v20 = vrot.slane %v5131_v1, 9  ;;  %v2751_v27 = vld [vmem:[#allocation2 + $0x6c] sm:$0xf] }
 0x1bd   : > { %7023 = vmatmul.mubr.bf16.gmra.mrb[8].mxu1 %v7774_v14  ;;  %v5282_v14 = vrot.slane %v5280_v3, 4  ;;  %v9634_v32 = vsel %vm8461_vm8, %v6444_v20, %v5287_v41  ;;  %v2968_v3 = vshrl.u32 %v2751_v27, 16  ;;  %v7848_v20 = vld [vmem:[#allocation2 + $0x88] sm:$0xf] }
 0x1be   : > { %7026 = vmatprep.mubr.bf16.mxu1 %v7776_v57  ;;  %7298 = vmatpush3.bf16.msra.mxu1 %v7840_v19  ;;  %v5206_v57 = vrot.slane %v7843_v43, 5  ;;  %v5204_v19 = vsel %vm8461_vm8, %v6432_v59, %v5203_v42  ;;  %v6460_v42 = vcombine.low %v9634_v32, %v9638_v40  ;;  %v2757_v43 = vld [vmem:[#allocation2 + $0x84] sm:$0xf]  ;;  %v3025_v41 = vshll.u32 %v7848_v20, 16 }
 0x1bf   : > { %7291 = vmatprep.subr.bf16.mxu1 %v7842_v61  ;;  %v9622_v51 = vsel %vm8461_vm8, %v5282_v14, %v5283_v63  ;;  %v2971_v63 = vshll.u32 %v2751_v27, 16  ;;  %v7782_v14 = vld [vmem:[#allocation2 + $0x90] sm:$0xff]   ;;  %v2970_v1 = vrot.slane %v2968_v3, 4  ;;  %v3029_v12 = vshrl.u32 %v7848_v20, 16  ;;  %v7786_v20 = vld [vmem:[#allocation2 + $0xc0] sm:$0xff]  }
 0x1c0   : > { %v6459_v10 = vcombine.low %v9618_v5, %v9622_v51  ;;  %v5207_v9 = vsel %vm8461_vm8, %v5205_v48, %v5206_v57  ;;  %v7783_v48 = vld [vmem:[#allocation2 + $0x9c] sm:$0xff]   ;;  %v7847_v57 = vld [vmem:[#allocation2 + $0x74] sm:$0x1] }
 0x1c1   : > { %7255 = vmatmul.mubr.bf16.vlgmr.msra.gmra.mrb[0].mxu0 %v6446_v37  ;;  %v6448_v6 = vcombine.low %v5204_v19, %v5207_v9  ;;  %v2987_v16 = vshll.u32 %v7847_v57, 16  ;;  %v2760_v19 = vld [vmem:[#allocation2 + $0x90] sm:$0xf]  ;;  %v7784_v9 = vld [vmem:[#allocation2 + $0xa8] sm:$0xff]   ;;  %v3031_v28 = vrot.slane %v3029_v12, 4 }
 0x1c2   : > { %7299 = vmatpush3.bf16.msra.mxu1 %v7842_v61  ;;  %7258 = vmatprep.mubr.bf16.mxu0 %v6447_v52  ;;  %v7846_v61 = vld [vmem:[#allocation2 + $0x70] sm:$0xf]  ;;  %v3040_v15 = vshrl.u32 %v2760_v19, 16  ;;  %v7849_v27 = vld [vmem:[#allocation2 + $0x94] sm:$0xf] }
 0x1c3   : > { %7292 = vmatprep.subr.bf16.mxu1 %v7844_v53  ;;  %v2977_v37 = vshll.u32 %v7846_v61, 16  ;;  %v2981_v4 = vshrl.u32 %v7846_v61, 16  ;;  %v2989_v30 = vrot.slane %v2987_v16, 5  ;;  %v3049_v3 = vshll.u32 %v7849_v27, 16 }
 0x1c5   : > { %7027 = vmatmul.mubr.bf16.gmra.mrb[12].mxu1 %v7777_v49  ;;  %v2973_v49 = vrot.slane %v2971_v63, 5  ;;  %v2979_v52 = vrot.slane %v2977_v37, 5  ;;  %v2983_v59 = vrot.slane %v2981_v4, 4  ;;  %v3053_v63 = vshrl.u32 %v7849_v27, 16  ;;  %v7850_v4 = vld [vmem:[#allocation2 + $0xa0] sm:$0xf] }
 0x1c6   : > { %7030 = vmatprep.mubr.bf16.mxu1 %v7779_v23  ;;  %7300 = vmatpush3.bf16.msra.mxu1 %v7844_v53  ;;  %v3016_v23 = vshrl.u32 %v2757_v43, 16  ;;  %v3019_v53 = vshll.u32 %v2757_v43, 16  ;;  %v9664_v16 = vrot.slane %v3049_v3, 5 }
 0x1c7   : > { %7293 = vmatprep.subr.bf16.mxu1 %v7845_v11  ;;  %v2974_v60 = vor.u32 %v2973_v49, %v2970_v1  ;;  %v3077_v1 = vshrl.u32 %v7850_v4, 16 }
 0x1c9   : > { %7259 = vmatmul.mubr.bf16.gmra.mrb[4].mxu0 %v6448_v6  ;;  %v2975_v2 = vrot.slane %v2974_v60, 4  ;;  %v2763_v6 = vld [vmem:[#allocation2 + $0x9c] sm:$0xf]  ;;  %v3055_v60 = vrot.slane %v3053_v63, 4 }
 0x1ca   : > { %7301 = vmatpush3.bf16.msra.mxu1 %v7845_v11  ;;  %7262 = vmatprep.mubr.bf16.mxu0 %v6449_v22  ;;  %v2984_v22 = vor.u32 %v2983_v59, %v2979_v52  ;;  %v3021_v11 = vrot.slane %v3019_v53, 5  ;;  %v3064_v61 = vshrl.u32 %v2763_v6, 16  ;;  %v3067_v37 = vshll.u32 %v2763_v6, 16 }
 0x1cb   : > { %v2980_v49 = vsel %vm8316_vm4, %v2975_v2, %v2979_v52  ;;  %v3079_v53 = vrot.slane %v3077_v1, 4  ;;  %v3056_v2 = vor.u32 %v3055_v60, %v9664_v16 }
 0x1cc   : > { %v2985_v34 = vrot.slane %v2984_v22, 4  ;;  %v3066_v22 = vrot.slane %v3064_v61, 4  ;;  %v3069_v52 = vrot.slane %v3067_v37, 5 }
 0x1cd   : > { %7031 = vmatmul.mubr.bf16.gmra.mrb[16].mxu1 %v7780_v56  ;;  %v7785_v56 = vld [vmem:[#allocation2 + $0xb4] sm:$0xff]  }
 0x1ce   : > { %7034 = vmatprep.mubr.bf16.mxu1 %v7781_v44  ;;  %v9651_v44 = vrot.slane %v3025_v41, 5  ;;  %v2990_v59 = vsel %vm8316_vm4, %v2985_v34, %v2989_v30  ;;  %v2766_v30 = vld [vmem:[#allocation2 + $0xa8] sm:$0xf]  ;;  %v3070_v34 = vor.u32 %v3069_v52, %v3066_v22  ;;  %v2772_v22 = vld [vmem:[#allocation2 + $0xc0] sm:$0xf] }
 0x1cf   : > { %v6325_v41 = vcombine.low %v2980_v49, %v2990_v59  ;;  %v3136_v24 = vshrl.u32 %v2772_v22, 16  ;;  %v3139_v58 = vshll.u32 %v2772_v22, 16 }
 0x1d0   : > { %v3032_v21 = vor.u32 %v3031_v28, %v9651_v44  ;;  %v3088_v28 = vshrl.u32 %v2766_v30, 16 }
 0x1d1   : > { %7263 = vmatmul.mubr.bf16.gmra.mrb[8].mxu0 %v6450_v54  ;;  %v3018_v54 = vrot.slane %v3016_v23, 4  ;;  %v3138_v45 = vrot.slane %v3136_v24, 4 }
 0x1d2   : > { %7266 = vmatprep.mubr.bf16.mxu0 %v6451_v13  ;;  %v3043_v13 = vshll.u32 %v2760_v19, 16  ;;  %v7852_v19 = vld [vmem:[#allocation2 + $0x98] sm:$0x1]  ;;  %v3090_v59 = vrot.slane %v3088_v28, 4 }
 0x1d3   : > { %v3022_v31 = vor.u32 %v3021_v11, %v3018_v54  ;;  %v7853_v11 = vld [vmem:[#allocation2 + $0xa4] sm:$0x1] }
 0x1d4   : > { %v3045_v57 = vrot.slane %v3043_v13, 5  ;;  %v3083_v6 = vshll.u32 %v7853_v11, 16  ;;  %v7854_v13 = vld [vmem:[#allocation2 + $0xac] sm:$0xf] }
 0x1d5   : > { %7035 = vmatmul.mubr.bf16.gmra.mrb[20].mxu1 %v7782_v14  ;;  %v3073_v14 = vshll.u32 %v7850_v4, 16  ;;  %v3023_v50 = vrot.slane %v3022_v31, 4  ;;  %v3097_v27 = vshll.u32 %v7854_v13, 16  ;;  %v3101_v3 = vshrl.u32 %v7854_v13, 16  ;;  %v7855_v4 = vld [vmem:[#allocation2 + $0xb8] sm:$0xf] }
 0x1d6   : > { %7038 = vmatprep.mubr.bf16.mxu1 %v7783_v48  ;;  %v7851_v48 = vld [vmem:[#allocation2 + $0x8c] sm:$0x1]  ;;  %v3121_v7 = vshll.u32 %v7855_v4, 16  ;;  %v3125_v8 = vshrl.u32 %v7855_v4, 16  ;;  %v3085_v49 = vrot.slane %v3083_v6, 5 }
 0x1d7   : > { %v3035_v43 = vshll.u32 %v7851_v48, 16  ;;  %v9666_v23 = vrot.slane %v3073_v14, 5  ;;  %v3028_v55 = vsel %vm8316_vm4, %v3023_v50, %v9651_v44  ;;  %v3071_v14 = vrot.slane %v3070_v34, 4  ;;  %v7856_v50 = vld [vmem:[#allocation2 + $0xb0] sm:$0x1] }
 0x1d8   : > { %v3103_v31 = vrot.slane %v3101_v3, 4  ;;  %v3127_v60 = vrot.slane %v3125_v8, 4 }
 0x1d9   : > { %7267 = vmatmul.mubr.bf16.gmra.mrb[12].mxu0 %v6452_v38  ;;  %v3042_v38 = vrot.slane %v3040_v15, 4  ;;  %v3037_v26 = vrot.slane %v3035_v43, 5  ;;  %v3080_v54 = vor.u32 %v3079_v53, %v9666_v23  ;;  %v3091_v15 = vshll.u32 %v2766_v30, 16 }
 0x1da   : > { %7270 = vmatprep.mubr.bf16.mxu0 %v6453_v25  ;;  %v3033_v25 = vrot.slane %v3032_v21, 4  ;;  %v3099_v43 = vrot.slane %v3097_v27, 5 }
 0x1db   : > { %v3046_v12 = vor.u32 %v3045_v57, %v3042_v38  ;;  %v3081_v1 = vrot.slane %v3080_v54, 4  ;;  %v3093_v48 = vrot.slane %v3091_v15, 5  ;;  %v3123_v57 = vrot.slane %v3121_v7, 5 }
 0x1dc   : > { %v3038_v17 = vsel %vm8316_vm4, %v3033_v25, %v3037_v26  ;;  %v3104_v26 = vor.u32 %v3103_v31, %v3099_v43  ;;  %v3107_v25 = vshll.u32 %v7856_v50, 16 }
 0x1dd   : > { %7039 = vmatmul.mubr.bf16.gmra.mrb[24].mxu1 %v7784_v9  ;;  %v3059_v9 = vshll.u32 %v7852_v19, 16  ;;  %v6327_v21 = vcombine.low %v3028_v55, %v3038_v17 }
 0x1de   : > { %7042 = vmatprep.mubr.bf16.mxu1 %v7785_v56  ;;  %v2769_v56 = vld [vmem:[#allocation2 + $0xb4] sm:$0xf]  ;;  %v3105_v11 = vrot.slane %v3104_v26, 4  ;;  %v3109_v36 = vrot.slane %v3107_v25, 5 }
 0x1df   : > { %v3061_v63 = vrot.slane %v3059_v9, 5  ;;  %v3112_v61 = vshrl.u32 %v2769_v56, 16  ;;  %v3115_v37 = vshll.u32 %v2769_v56, 16  ;;  %v3128_v9 = vor.u32 %v3127_v60, %v3123_v57 }
 0x1e0   : > { %v3110_v3 = vsel %vm8316_vm4, %v3105_v11, %v3109_v36 }
 0x1e1   : > { %7271 = vmatmul.mubr.bf16.gmra.mrb[16].mxu0 %v6454_v0  ;;  %v3047_v0 = vrot.slane %v3046_v12, 4  ;;  %v3114_v44 = vrot.slane %v3112_v61, 4  ;;  %v3117_v38 = vrot.slane %v3115_v37, 5  ;;  %v3129_v15 = vrot.slane %v3128_v9, 4 }
 0x1e2   : > { %7274 = vmatprep.mubr.bf16.mxu0 %v6455_v47  ;;  %v3057_v47 = vrot.slane %v3056_v2, 4 }
 0x1e3   : > { %v3052_v52 = vsel %vm8316_vm4, %v3047_v0, %v9664_v16  ;;  %v3094_v16 = vor.u32 %v3093_v48, %v3090_v59  ;;  %v7859_v0 = vld [vmem:[#allocation2 + $0xc8] sm:$0x1] }
 0x1e4   : > { %v3062_v53 = vsel %vm8316_vm4, %v3057_v47, %v3061_v63  ;;  %v3155_v63 = vshll.u32 %v7859_v0, 16 }
 0x1e5   : > { %7043 = vmatmul.mubr.bf16.gmra.mrb[28].mxu1 %v7786_v20  ;;  %v3076_v20 = vsel %vm8316_vm4, %v3071_v14, %v9666_v23  ;;  %v3118_v23 = vor.u32 %v3117_v38, %v3114_v44  ;;  %v6328_v2 = vcombine.low %v3052_v52, %v3062_v53  ;;  %v3095_v54 = vrot.slane %v3094_v16, 4 }
 0x1e6   : > { %7078 = vmatprep.mubr.bf16.mxu1 %v6325_v41  ;;  %v3086_v41 = vsel %vm8316_vm4, %v3081_v1, %v3085_v49  ;;  %v3157_v5 = vrot.slane %v3155_v63, 5 }
 0x1e7   : > { %v6329_v34 = vcombine.low %v3076_v20, %v3086_v41  ;;  %v3119_v28 = vrot.slane %v3118_v23, 4  ;;  %v3100_v27 = vsel %vm8316_vm4, %v3095_v54, %v3099_v43 }
 0x1e9   : > { %7275 = vmatmul.mubr.bf16.gmra.mrb[20].mxu0 %v6456_v46  ;;  %v7857_v46 = vld [vmem:[#allocation2 + $0xc4] sm:$0xf]  ;;  %v3124_v29 = vsel %vm8316_vm4, %v3119_v28, %v3123_v57 }
 0x1ea   : > { %7278 = vmatprep.mubr.bf16.mxu0 %v6457_v18  ;;  %v3145_v12 = vshll.u32 %v7857_v46, 16  ;;  %v3149_v19 = vshrl.u32 %v7857_v46, 16  ;;  %v3141_v18 = vrot.slane %v3139_v58, 5 }
 0x1ec   : > { %v3147_v6 = vrot.slane %v3145_v12, 5  ;;  %v3151_v56 = vrot.slane %v3149_v19, 4  ;;  %v3142_v55 = vor.u32 %v3141_v18, %v3138_v45 }
 0x1ed   : > { %7079 = vmatmul.mubr.bf16.vlgmr.msra.gmra.mrb[16].mxu1 %v9528_v62  ;;  %v7858_v62 = vld [vmem:[#allocation2 + $0xbc] sm:$0x1] }
 0x1ee   : > { %7082 = vmatprep.mubr.bf16.mxu1 %v6327_v21  ;;  %v3131_v30 = vshll.u32 %v7858_v62, 16  ;;  %v3152_v17 = vor.u32 %v3151_v56, %v3147_v6  ;;  %v3143_v37 = vrot.slane %v3142_v55, 4 }
 0x1f0   : > { %v3133_v13 = vrot.slane %v3131_v30, 5  ;;  %v3153_v4 = vrot.slane %v3152_v17, 4  ;;  %v3148_v51 = vsel %vm8316_vm4, %v3143_v37, %v3147_v6 }
 0x1f1   : > { %7279 = vmatmul.mubr.bf16.gmra.mrb[24].mxu0 %v6458_v39  ;;  %v6330_v39 = vcombine.low %v3100_v27, %v3110_v3 }
 0x1f2   : > { %7282 = vmatprep.mubr.bf16.mxu0 %v6459_v10  ;;  %v3134_v33 = vsel %vm8316_vm4, %v3129_v15, %v3133_v13  ;;  %v3158_v10 = vsel %vm8316_vm4, %v3153_v4, %v3157_v5 }
 0x1f3   : > { %v6331_v61 = vcombine.low %v3124_v29, %v3134_v33  ;;  %v6332_v7 = vcombine.low %v3148_v51, %v3158_v10 }
 0x1f5   : > { %7083 = vmatmul.mubr.bf16.gmra.mrb[20].mxu1 %v6328_v2 }
 0x1f6   : > { %7086 = vmatprep.mubr.bf16.mxu1 %v6329_v34 }
 0x1f9   : > { %7283 = vmatmul.mubr.bf16.gmra.mrb[28].mxu0 %v6460_v42 }
 0x1fd   : > { %7087 = vmatmul.mubr.bf16.gmra.mrb[24].mxu1 %v6330_v39 }
 0x1fe   : > { %7090 = vmatprep.mubr.bf16.mxu1 %v6331_v61 }
 0x205   : > { %7091 = vmatmul.mubr.bf16.gmra.mrb[28].mxu1 %v6332_v7 }
 0x280   : > { %v7016_v8 = vpop.f32.mrb[0].mxu1 }
 0x281   : > { %v2568_v47 = vpop.f32.mrb[1].mxu1 }
 0x282   : > { %v7017_v14 = vpop.f32.mrb[2].mxu1 }
 0x283   : > { %v2571_v1 = vpop.f32.mrb[3].mxu1 }
 0x288   : > { %v7020_v49 = vpop.f32.mrb[4].mxu1 }
 0x289   : > { %v2584_v59 = vpop.f32.mrb[5].mxu1 }
 0x28a   : > { %v7021_v48 = vpop.f32.mrb[6].mxu1 }
 0x28b   : > { %v2587_v43 = vpop.f32.mrb[7].mxu1 }
 0x290   : > { %v7024_v32 = vpop.f32.mrb[8].mxu1 }
 0x291   : > { %v9719_v40 = vpop.f32.mrb[9].mxu1 }
 0x292   : > { %v9721_v42 = vpop.f32.mrb[10].mxu1 }
 0x293   : > { %v9723_v31 = vpop.f32.mrb[11].mxu1 }
 0x294   : > { %v7256_v21 = vpop.f32.mrb[0].mxu0 }
 0x295   : > { %v7302_v38 = vadd.f32 %v7256_v21, %v7016_v8  ;;  %v5454_v57 = vpop.f32.mrb[1].mxu0 }
 0x296   : > { %v7303_v22 = vadd.f32 %v5454_v57, %v2568_v47  ;;  %v7257_v52 = vpop.f32.mrb[2].mxu0 }
 0x297   : > { %v5622_v20 = vadd.f32 %v7302_v38, %v9725_v35  ;;  %v7304_v41 = vadd.f32 %v7257_v52, %v7017_v14  ;;  %v5457_v16 = vpop.f32.mrb[3].mxu0 }
 0x298   : > { %v9727_v44 = vpop.f32.mrb[12].mxu1  ;;  %v5620_v50 = vadd.f32 %v7303_v22, %v9725_v35  ;;  %v7305_v25 = vadd.f32 %v5457_v16, %v2571_v1 }
 0x299   : > { %v9729_v60 = vpop.f32.mrb[13].mxu1  ;;  %v5623_v24 = vadd.f32 %v7304_v41, %v9725_v35  ;;  %v5654_v12 = vmax.f32 %v5622_v20, 0.0 }
 0x29a   : > { %v9731_v53 = vpop.f32.mrb[14].mxu1  ;;  %v5652_v58 = vmax.f32 %v5620_v50, 0.0  ;;  %v5621_v46 = vadd.f32 %v7305_v25, %v9725_v35 }
 0x29b   : > { %v9734_v26 = vpop.f32.mrb[15].mxu1  ;;  %v5655_v19 = vmax.f32 %v5623_v24, 0.0  ;;  %v5723_v6 = vmul.f32 %v5654_v12, %v5654_v12 }
 0x29c   : > { %v5653_v23 = vmax.f32 %v5621_v46, 0.0  ;;  %v7260_v9 = vpop.f32.mrb[4].mxu0  ;;  %v5721_v62 = vmul.f32 %v5652_v58, %v5652_v58 }
 0x29d   : > { %v6551_v30 = vpack.c.bf16 %v5655_v19, %v5654_v12  ;;  %v7306_v2 = vadd.f32 %v7260_v9, %v7020_v49  ;;  %v5470_v34 = vpop.f32.mrb[5].mxu0  ;;  %v5724_v17 = vmul.f32 %v5655_v19, %v5655_v19 }
 0x29e   : > { %v5684_v54 = vadd.f32 %v5653_v23, %v5652_v58  ;;  %v5722_v11 = vmul.f32 %v5653_v23, %v5653_v23  ;;  %v6546_v36 = vpack.c.bf16 %v5653_v23, %v5652_v58  ;;  %v7307_v45 = vadd.f32 %v5470_v34, %v2584_v59  ;;  %v7261_v18 = vpop.f32.mrb[6].mxu0 }
 0x29f   : > { %6623 = vst [vmem:[%s9741_s23 + $0x8] sm:$0xff] %v6551_v30   ;;  %v5626_v56 = vadd.f32 %v7306_v2, %v9725_v35  ;;  %v7308_v28 = vadd.f32 %v7261_v18, %v7021_v48  ;;  %v5473_v15 = vpop.f32.mrb[7].mxu0 }
 0x2a0   : > { %v5685_v13 = vadd.f32 %v5684_v54, %v5654_v12  ;;  %v5753_v27 = vadd.f32 %v5722_v11, %v5721_v62  ;;  %6547 = vst [vmem:[%s9741_s23] sm:$0xff] %v6546_v36   ;;  %v5624_v3 = vadd.f32 %v7307_v45, %v9725_v35  ;;  %v7309_v55 = vadd.f32 %v5473_v15, %v2587_v43 }
 0x2a1   : > { %v5627_v0 = vadd.f32 %v7308_v28, %v9725_v35  ;;  %v5658_v61 = vmax.f32 %v5626_v56, 0.0 }
 0x2a2   : > { %v5754_v63 = vadd.f32 %v5753_v27, %v5723_v6  ;;  %v5656_v29 = vmax.f32 %v5624_v3, 0.0  ;;  %v5686_v33 = vadd.f32 %v5685_v13, %v5655_v19  ;;  %v5625_v39 = vadd.f32 %v7309_v55, %v9725_v35 }
 0x2a3   : > { %v5659_v37 = vmax.f32 %v5627_v0, 0.0  ;;  %v5727_v52 = vmul.f32 %v5658_v61, %v5658_v61 }
 0x2a4   : > { %v5687_v4 = vadd.f32 %v5686_v33, %v5656_v29  ;;  %v5725_v5 = vmul.f32 %v5656_v29, %v5656_v29  ;;  %v5755_v51 = vadd.f32 %v5754_v63, %v5724_v17  ;;  %v5657_v10 = vmax.f32 %v5625_v39, 0.0  ;;  %v7264_v7 = vpop.f32.mrb[8].mxu0 }
 0x2a5   : > { %v6561_v8 = vpack.c.bf16 %v5659_v37, %v5658_v61  ;;  %v7310_v47 = vadd.f32 %v7264_v7, %v7024_v32  ;;  %v5486_v14 = vpop.f32.mrb[9].mxu0  ;;  %v5728_v25 = vmul.f32 %v5659_v37, %v5659_v37 }
 0x2a6   : > { %v5756_v1 = vadd.f32 %v5755_v51, %v5725_v5  ;;  %v5688_v49 = vadd.f32 %v5687_v4, %v5657_v10  ;;  %v5726_v59 = vmul.f32 %v5657_v10, %v5657_v10  ;;  %v6556_v48 = vpack.c.bf16 %v5657_v10, %v5656_v29  ;;  %v7265_v43 = vpop.f32.mrb[10].mxu0 }
 0x2a7   : > { %6625 = vst [vmem:[%s9741_s23 + $0x18] sm:$0xff] %v6561_v8   ;;  %v5630_v21 = vadd.f32 %v7310_v47, %v9725_v35  ;;  %v7311_v38 = vadd.f32 %v5486_v14, %v9719_v40  ;;  %v7312_v57 = vadd.f32 %v7265_v43, %v9721_v42  ;;  %v5489_v22 = vpop.f32.mrb[11].mxu0 }
 0x2a8   : > { %v5689_v20 = vadd.f32 %v5688_v49, %v5658_v61  ;;  %v5757_v41 = vadd.f32 %v5756_v1, %v5726_v59  ;;  %6624 = vst [vmem:[%s9741_s23 + $0x10] sm:$0xff] %v6556_v48   ;;  %v7313_v32 = vadd.f32 %v5489_v22, %v9723_v31 }
 0x2a9   : > { %v5628_v16 = vadd.f32 %v7311_v38, %v9725_v35  ;;  %v5631_v50 = vadd.f32 %v7312_v57, %v9725_v35  ;;  %v5662_v12 = vmax.f32 %v5630_v21, 0.0 }
 0x2aa   : > { %v5758_v24 = vadd.f32 %v5757_v41, %v5727_v52  ;;  %v5690_v58 = vadd.f32 %v5689_v20, %v5659_v37  ;;  %v5629_v46 = vadd.f32 %v7313_v32, %v9725_v35 }
 0x2ab   : > { %v5660_v40 = vmax.f32 %v5628_v16, 0.0  ;;  %v5663_v42 = vmax.f32 %v5631_v50, 0.0  ;;  %v5731_v3 = vmul.f32 %v5662_v12, %v5662_v12 }
 0x2ac   : > { %v5759_v19 = vadd.f32 %v5758_v24, %v5728_v25  ;;  %v5661_v23 = vmax.f32 %v5629_v46, 0.0  ;;  %v7268_v9 = vpop.f32.mrb[12].mxu0 }
 0x2ad   : > { %v5691_v62 = vadd.f32 %v5690_v58, %v5660_v40  ;;  %v5729_v30 = vmul.f32 %v5660_v40, %v5660_v40  ;;  %v6571_v31 = vpack.c.bf16 %v5663_v42, %v5662_v12  ;;  %v5502_v2 = vpop.f32.mrb[13].mxu0  ;;  %v7314_v11 = vadd.f32 %v7268_v9, %v9727_v44 }
 0x2ae   : > { %v5730_v34 = vmul.f32 %v5661_v23, %v5661_v23  ;;  %v6566_v54 = vpack.c.bf16 %v5661_v23, %v5660_v40  ;;  %v7315_v36 = vadd.f32 %v5502_v2, %v9729_v60  ;;  %v7269_v45 = vpop.f32.mrb[14].mxu0  ;;  %v5732_v60 = vmul.f32 %v5663_v42, %v5663_v42 }
 0x2af   : > { %v5760_v18 = vadd.f32 %v5759_v19, %v5729_v30  ;;  %6627 = vst [vmem:[%s9741_s23 + $0x28] sm:$0xff] %v6571_v31   ;;  %v5692_v6 = vadd.f32 %v5691_v62, %v5661_v23  ;;  %v7316_v56 = vadd.f32 %v7269_v45, %v9731_v53  ;;  %v5505_v28 = vpop.f32.mrb[15].mxu0  ;;  %v5634_v15 = vadd.f32 %v7314_v11, %v9725_v35 }
 0x2b0   : > { %6626 = vst [vmem:[%s9741_s23 + $0x20] sm:$0xff] %v6566_v54   ;;  %v5632_v13 = vadd.f32 %v7315_v36, %v9725_v35  ;;  %v7317_v27 = vadd.f32 %v5505_v28, %v9734_v26 }
 0x2b1   : > { %v5693_v55 = vadd.f32 %v5692_v6, %v5662_v12  ;;  %v5761_v17 = vadd.f32 %v5760_v18, %v5730_v34  ;;  %v5635_v44 = vadd.f32 %v7316_v56, %v9725_v35  ;;  %v5666_v53 = vmax.f32 %v5634_v15, 0.0 }
 0x2b2   : > { %v5664_v0 = vmax.f32 %v5632_v13, 0.0  ;;  %v5633_v63 = vadd.f32 %v7317_v27, %v9725_v35 }
 0x2b3   : > { %v5762_v29 = vadd.f32 %v5761_v17, %v5731_v3  ;;  %v5694_v33 = vadd.f32 %v5693_v55, %v5663_v42  ;;  %v5667_v39 = vmax.f32 %v5635_v44, 0.0  ;;  %v5735_v59 = vmul.f32 %v5666_v53, %v5666_v53 }
 0x2b4   : > { %v5733_v61 = vmul.f32 %v5664_v0, %v5664_v0  ;;  %v5665_v37 = vmax.f32 %v5633_v63, 0.0  ;;  %v7272_v4 = vpop.f32.mrb[16].mxu0 }
 0x2b5   : > { %v5695_v5 = vadd.f32 %v5694_v33, %v5664_v0  ;;  %v5763_v26 = vadd.f32 %v5762_v29, %v5732_v60  ;;  %v6581_v51 = vpack.c.bf16 %v5667_v39, %v5666_v53  ;;  %v5518_v10 = vpop.f32.mrb[17].mxu0  ;;  %v5736_v21 = vmul.f32 %v5667_v39, %v5667_v39 }
 0x2b6   : > { %v5734_v7 = vmul.f32 %v5665_v37, %v5665_v37  ;;  %v6576_v8 = vpack.c.bf16 %v5665_v37, %v5664_v0  ;;  %v7273_v47 = vpop.f32.mrb[18].mxu0 }
 0x2b7   : > { %v5764_v14 = vadd.f32 %v5763_v26, %v5733_v61  ;;  %6629 = vst [vmem:[%s9741_s23 + $0x38] sm:$0xff] %v6581_v51   ;;  %v5696_v1 = vadd.f32 %v5695_v5, %v5665_v37  ;;  %v5521_v49 = vpop.f32.mrb[19].mxu0 }
 0x2b8   : > { %6628 = vst [vmem:[%s9741_s23 + $0x30] sm:$0xff] %v6576_v8  }
 0x2b9   : > { %v5697_v48 = vadd.f32 %v5696_v1, %v5666_v53  ;;  %v5765_v43 = vadd.f32 %v5764_v14, %v5734_v7 }
 0x2bb   : > { %v5766_v38 = vadd.f32 %v5765_v43, %v5735_v59  ;;  %v5698_v57 = vadd.f32 %v5697_v48, %v5667_v39 }
 0x2bc   : > { %v7276_v22 = vpop.f32.mrb[20].mxu0 }
 0x2bd   : > { %v5767_v20 = vadd.f32 %v5766_v38, %v5736_v21  ;;  %v5534_v41 = vpop.f32.mrb[21].mxu0 }
 0x2be   : > { %v7277_v50 = vpop.f32.mrb[22].mxu0 }
 0x2bf   : > { %v5537_v58 = vpop.f32.mrb[23].mxu0 }
 0x2c0   : > { %v7080_v52 = vpop.f32.mrb[16].mxu1 }
 0x2c1   : > { %v7318_v32 = vadd.f32 %v7272_v4, %v7080_v52  ;;  %v3385_v16 = vpop.f32.mrb[17].mxu1 }
 0x2c2   : > { %v7319_v25 = vadd.f32 %v5518_v10, %v3385_v16  ;;  %v7081_v24 = vpop.f32.mrb[18].mxu1 }
 0x2c3   : > { %v5638_v46 = vadd.f32 %v7318_v32, %v9725_v35  ;;  %v7320_v12 = vadd.f32 %v7273_v47, %v7081_v24  ;;  %v3388_v40 = vpop.f32.mrb[19].mxu1 }
 0x2c4   : > { %v5636_v42 = vadd.f32 %v7319_v25, %v9725_v35  ;;  %v7321_v19 = vadd.f32 %v5521_v49, %v3388_v40  ;;  %v7280_v2 = vpop.f32.mrb[24].mxu0 }
 0x2c5   : > { %v5639_v23 = vadd.f32 %v7320_v12, %v9725_v35  ;;  %v5670_v30 = vmax.f32 %v5638_v46, 0.0  ;;  %v5550_v45 = vpop.f32.mrb[25].mxu0 }
 0x2c6   : > { %v5668_v9 = vmax.f32 %v5636_v42, 0.0  ;;  %v5637_v62 = vadd.f32 %v7321_v19, %v9725_v35  ;;  %v7281_v28 = vpop.f32.mrb[26].mxu0 }
 0x2c7   : > { %v5671_v31 = vmax.f32 %v5639_v23, 0.0  ;;  %v5553_v17 = vpop.f32.mrb[27].mxu0  ;;  %v5739_v29 = vmul.f32 %v5670_v30, %v5670_v30 }
 0x2c8   : > { %v5699_v34 = vadd.f32 %v5698_v57, %v5668_v9  ;;  %v5737_v54 = vmul.f32 %v5668_v9, %v5668_v9  ;;  %v5669_v11 = vmax.f32 %v5637_v62, 0.0  ;;  %v7084_v36 = vpop.f32.mrb[20].mxu1 }
 0x2c9   : > { %v6591_v18 = vpack.c.bf16 %v5671_v31, %v5670_v30  ;;  %v7322_v6 = vadd.f32 %v7276_v22, %v7084_v36  ;;  %v3401_v56 = vpop.f32.mrb[21].mxu1  ;;  %v5740_v4 = vmul.f32 %v5671_v31, %v5671_v31 }
 0x2ca   : > { %v5768_v15 = vadd.f32 %v5767_v20, %v5737_v54  ;;  %v5700_v13 = vadd.f32 %v5699_v34, %v5669_v11  ;;  %v5738_v27 = vmul.f32 %v5669_v11, %v5669_v11  ;;  %v6586_v3 = vpack.c.bf16 %v5669_v11, %v5668_v9  ;;  %v7085_v55 = vpop.f32.mrb[22].mxu1 }
 0x2cb   : > { %6631 = vst [vmem:[%s9741_s23 + $0x48] sm:$0xff] %v6591_v18   ;;  %v5642_v44 = vadd.f32 %v7322_v6, %v9725_v35  ;;  %v7323_v60 = vadd.f32 %v5534_v41, %v3401_v56  ;;  %v7324_v0 = vadd.f32 %v7277_v50, %v7085_v55  ;;  %v3404_v63 = vpop.f32.mrb[23].mxu1 }
 0x2cc   : > { %v5701_v53 = vadd.f32 %v5700_v13, %v5670_v30  ;;  %v5769_v33 = vadd.f32 %v5768_v15, %v5738_v27  ;;  %6630 = vst [vmem:[%s9741_s23 + $0x40] sm:$0xff] %v6586_v3   ;;  %v7325_v39 = vadd.f32 %v5537_v58, %v3404_v63  ;;  %v7284_v47 = vpop.f32.mrb[28].mxu0 }
 0x2cd   : > { %v5640_v61 = vadd.f32 %v7323_v60, %v9725_v35  ;;  %v5643_v37 = vadd.f32 %v7324_v0, %v9725_v35  ;;  %v5674_v10 = vmax.f32 %v5642_v44, 0.0  ;;  %v5566_v59 = vpop.f32.mrb[29].mxu0 }
 0x2ce   : > { %v5770_v5 = vadd.f32 %v5769_v33, %v5739_v29  ;;  %v5702_v26 = vadd.f32 %v5701_v53, %v5671_v31  ;;  %v5641_v51 = vadd.f32 %v7325_v39, %v9725_v35  ;;  %v7285_v57 = vpop.f32.mrb[30].mxu0 }
 0x2cf   : > { %v5672_v7 = vmax.f32 %v5640_v61, 0.0  ;;  %v5675_v8 = vmax.f32 %v5643_v37, 0.0  ;;  %v5569_v16 = vpop.f32.mrb[31].mxu0  ;;  %v5743_v42 = vmul.f32 %v5674_v10, %v5674_v10 }
 0x2d0   : > { %v5771_v14 = vadd.f32 %v5770_v5, %v5740_v4  ;;  %v5673_v1 = vmax.f32 %v5641_v51, 0.0  ;;  %v7088_v49 = vpop.f32.mrb[24].mxu1 }
 0x2d1   : > { %v5703_v48 = vadd.f32 %v5702_v26, %v5672_v7  ;;  %v5741_v43 = vmul.f32 %v5672_v7, %v5672_v7  ;;  %v6601_v21 = vpack.c.bf16 %v5675_v8, %v5674_v10  ;;  %v3417_v38 = vpop.f32.mrb[25].mxu1  ;;  %v7326_v20 = vadd.f32 %v7280_v2, %v7088_v49 }
 0x2d2   : > { %v5742_v22 = vmul.f32 %v5673_v1, %v5673_v1  ;;  %v6596_v52 = vpack.c.bf16 %v5673_v1, %v5672_v7  ;;  %v7327_v41 = vadd.f32 %v5550_v45, %v3417_v38  ;;  %v7089_v32 = vpop.f32.mrb[26].mxu1  ;;  %v5744_v62 = vmul.f32 %v5675_v8, %v5675_v8 }
 0x2d3   : > { %v5772_v50 = vadd.f32 %v5771_v14, %v5741_v43  ;;  %6633 = vst [vmem:[%s9741_s23 + $0x58] sm:$0xff] %v6601_v21   ;;  %v5704_v25 = vadd.f32 %v5703_v48, %v5673_v1  ;;  %v7328_v24 = vadd.f32 %v7281_v28, %v7089_v32  ;;  %v3420_v58 = vpop.f32.mrb[27].mxu1  ;;  %v5646_v46 = vadd.f32 %v7326_v20, %v9725_v35 }
 0x2d4   : > { %6632 = vst [vmem:[%s9741_s23 + $0x50] sm:$0xff] %v6596_v52   ;;  %v5644_v12 = vadd.f32 %v7327_v41, %v9725_v35  ;;  %v7329_v40 = vadd.f32 %v5553_v17, %v3420_v58 }
 0x2d5   : > { %v5705_v19 = vadd.f32 %v5704_v25, %v5674_v10  ;;  %v5773_v23 = vadd.f32 %v5772_v50, %v5742_v22  ;;  %v5647_v9 = vadd.f32 %v7328_v24, %v9725_v35  ;;  %v5678_v34 = vmax.f32 %v5646_v46, 0.0 }
 0x2d6   : > { %v5676_v30 = vmax.f32 %v5644_v12, 0.0  ;;  %v5645_v31 = vadd.f32 %v7329_v40, %v9725_v35 }
 0x2d7   : > { %v5774_v2 = vadd.f32 %v5773_v23, %v5743_v42  ;;  %v5706_v54 = vadd.f32 %v5705_v19, %v5675_v8  ;;  %v5679_v11 = vmax.f32 %v5647_v9, 0.0  ;;  %v5747_v39 = vmul.f32 %v5678_v34, %v5678_v34 }
 0x2d8   : > { %v5745_v36 = vmul.f32 %v5676_v30, %v5676_v30  ;;  %v5677_v45 = vmax.f32 %v5645_v31, 0.0  ;;  %v7092_v18 = vpop.f32.mrb[28].mxu1 }
 0x2d9   : > { %v5707_v6 = vadd.f32 %v5706_v54, %v5676_v30  ;;  %v5775_v56 = vadd.f32 %v5774_v2, %v5744_v62  ;;  %v6611_v28 = vpack.c.bf16 %v5679_v11, %v5678_v34  ;;  %v3433_v15 = vpop.f32.mrb[29].mxu1  ;;  %v7330_v3 = vadd.f32 %v7284_v47, %v7092_v18 }
 0x2da   : > { %v5746_v13 = vmul.f32 %v5677_v45, %v5677_v45  ;;  %v6606_v27 = vpack.c.bf16 %v5677_v45, %v5676_v30  ;;  %v7331_v55 = vadd.f32 %v5566_v59, %v3433_v15  ;;  %v7093_v17 = vpop.f32.mrb[30].mxu1  ;;  %v5748_v5 = vmul.f32 %v5679_v11, %v5679_v11 }
 0x2db   : > { %v5776_v44 = vadd.f32 %v5775_v56, %v5745_v36  ;;  %6635 = vst [vmem:[%s9741_s23 + $0x68] sm:$0xff] %v6611_v28   ;;  %v5708_v60 = vadd.f32 %v5707_v6, %v5677_v45  ;;  %v7332_v0 = vadd.f32 %v7285_v57, %v7093_v17  ;;  %v3436_v63 = vpop.f32.mrb[31].mxu1  ;;  %v5650_v29 = vadd.f32 %v7330_v3, %v9725_v35 }
 0x2dc   : > { %6634 = vst [vmem:[%s9741_s23 + $0x60] sm:$0xff] %v6606_v27   ;;  %v5648_v53 = vadd.f32 %v7331_v55, %v9725_v35  ;;  %v7333_v33 = vadd.f32 %v5569_v16, %v3436_v63 }
 0x2dd   : > { %v5709_v61 = vadd.f32 %v5708_v60, %v5678_v34  ;;  %v5777_v37 = vadd.f32 %v5776_v44, %v5746_v13  ;;  %v5651_v4 = vadd.f32 %v7332_v0, %v9725_v35  ;;  %v5682_v7 = vmax.f32 %v5650_v29, 0.0 }
 0x2de   : > { %v5680_v26 = vmax.f32 %v5648_v53, 0.0  ;;  %v5649_v51 = vadd.f32 %v7333_v33, %v9725_v35 }
 0x2df   : > { %v5778_v10 = vadd.f32 %v5777_v37, %v5747_v39  ;;  %v5710_v8 = vadd.f32 %v5709_v61, %v5679_v11  ;;  %v5683_v47 = vmax.f32 %v5651_v4, 0.0  ;;  %v5751_v57 = vmul.f32 %v5682_v7, %v5682_v7 }
 0x2e0   : > { %v5749_v14 = vmul.f32 %v5680_v26, %v5680_v26  ;;  %v5681_v1 = vmax.f32 %v5649_v51, 0.0 }
 0x2e1   : > { %v5711_v49 = vadd.f32 %v5710_v8, %v5680_v26  ;;  %v5779_v59 = vadd.f32 %v5778_v10, %v5748_v5  ;;  %v6621_v48 = vpack.c.bf16 %v5683_v47, %v5682_v7 }
 0x2e2   : > { %v5750_v35 = vmul.f32 %v5681_v1, %v5681_v1  ;;  %v6616_v43 = vpack.c.bf16 %v5681_v1, %v5680_v26 }
 0x2e3   : > { %v5780_v21 = vadd.f32 %v5779_v59, %v5749_v14  ;;  %6637 = vst [vmem:[%s9741_s23 + $0x78] sm:$0xff] %v6621_v48   ;;  %v5712_v38 = vadd.f32 %v5711_v49, %v5681_v1 }
 0x2e4   : > { %6636 = vst [vmem:[%s9741_s23 + $0x70] sm:$0xff] %v6616_v43  }
 0x2e5   : > { %v5713_v22 = vadd.f32 %v5712_v38, %v5682_v7  ;;  %v5781_v52 = vadd.f32 %v5780_v21, %v5750_v35 }
 0x2e6   : > { %7959 = shalt.err (!%p7956_p11)
}
 0x2e7   : > { %s7960_s29 = scalar_lea.hbm %s9797_s14, 2048  ;;  %s7964_s5 = scalar_lea.hbm %s9885_s3, 4096 }
 0x2e8   : > { %p7961_p0 = scmp.ne.s32.totalorder %s9797_s14, %s7960_s29  ;;  %p7965_p6 = scmp.lt.u32.totalorder %s9797_s14, %s9885_s3 }
 0x2e9   : > { %p7966_p7 = scmp.lt.u32.totalorder %s7964_s5, %s7960_s29  ;;  %p7968_p8 = scmp.lt.u32.totalorder %s7960_s29, %s9797_s14 }
 0x2ea   : > { %p7962_p4 = pnand %p7961_p0, %p10000_p12 }
 0x2eb   : > { %p7967_p2 = por %p7966_p7, %p7965_p6 }
 0x2ec   : > { %p7963_p13 = pneg %p7962_p4 }
 0x2ed   : > { %p7969_p1 = por %p7968_p8, %p7967_p2 }
 0x2ef   : > { %p7970_p10 = pnand %p7969_p1, %p7963_p13 }
 0x2f1   : > { %7973 = shalt.err (!%p7970_p10)
}
 0x2f2   : > { %s8073_s21 = smov 64   ;;  %s8074_s22 = smov 4   ;;  %v5752_v20 = vmul.f32 %v5683_v47, %v5683_v47  ;;  %v5714_v41 = vadd.f32 %v5713_v22, %v5683_v47  ;;  %v5782_v32 = vadd.f32 %v5781_v52, %v5751_v57 }
 0x2f3   : > { %7568 = dma.vmem_to_hbm [thread:$0]  (%p10000_p12), %s9799_s27, 2048, %s9797_s14, %s5954_s28, %s8073_s21, %s8073_s21, %s8074_s22  }
 0x2f4   : > { %v5715_v16 = vrot.slane %v5714_v41, 4  ;;  %v5783_v50 = vadd.f32 %v5782_v32, %v5752_v20  ;;  %s6140_s8 = sshll.u32 %s8296_s9, 1  ;;  %s6506_s10 = sshll.u32 %s8056_s18, 5 }
 0x2f5   : > { %s283_s27 = scalar_lea.vmem [#allocation10], %s6140_s8  ;;  %s9832_s11 = scalar_lea.hbm %s9886_s4, %s6506_s10 }
 0x2f6   : > { %v5716_v25 = vadd.f32 %v5715_v16, %v5714_v41  ;;  %v5784_v24 = vrot.slane %v5783_v50, 4  ;;  %s5990_s14 = sshll.u32 %s283_s27, 4  ;;  %s5959_s29 = scalar_lea.sflag [#allocation11], %s8296_s9  ;;  %s9834_s14 = int_to_ptr.vmem [resolvable:$true] %s5990_s14 }
 0x2f7   : > { %s7974_s13 = scalar_lea.vmem %s9834_s14, 32  ;;  %s8075_s18 = smov [#allocation10]  }
 0x2f8   : > { %v5717_v58 = vrot.slane %v5716_v25, 2  ;;  %v5785_v46 = vadd.f32 %v5784_v24, %v5783_v50  ;;  %p7975_p3 = scmp.ne.s32.totalorder %s9834_s14, %s7974_s13  ;;  %s7978_s24 = sshll.u32 %s8075_s18, 4  ;;  %s7979_s24 = int_to_ptr.vmem [resolvable:$false] %s7978_s24 }
 0x2f9   : > { %s7980_s5 = scalar_lea.vmem %s7979_s24, 64  ;;  %p7981_p11 = scmp.lt.s32.totalorder %s9834_s14, %s7979_s24 }
 0x2fa   : > { %v5718_v12 = vadd.f32 %v5717_v58, %v5716_v25  ;;  %v5786_v40 = vrot.slane %v5785_v46, 2  ;;  %p7976_p5 = pnand %p7975_p3, %p10000_p12  ;;  %p7982_p0 = scmp.lt.s32.totalorder %s7980_s5, %s7974_s13 }
 0x2fc   : > { %v5719_v42 = vrot.slane %v5718_v12, 1  ;;  %v5787_v19 = vadd.f32 %v5786_v40, %v5785_v46  ;;  %p7977_p9 = pneg %p7976_p5  ;;  %p7983_p4 = por %p7982_p0, %p7981_p11 }
 0x2fe   : > { %v5788_v23 = vrot.slane %v5787_v19, 1  ;;  %v5720_v9 = vadd.f32 %v5719_v42, %v5718_v12  ;;  %p7984_p13 = pnand %p7983_p4, %p7977_p9 }
 0x300   : > { %v5789_v62 = vadd.f32 %v5788_v23, %v5787_v19 }
 0x302   : > { %v5791_v30 = vsel %vm552_vm3, %v5720_v9, %v5789_v62 }
 0x303   : > { %5792 = vst [vmem:[%s283_s27] sm:$0x3] %v5791_v30 }
 0x304   : > { %7987 = shalt.err (!%p7984_p13)
}
 0x305   : > { %s7988_s9 = scalar_lea.hbm %s9832_s11, 32  ;;  %s7992_s21 = scalar_lea.hbm %s9886_s4, 64 }
 0x306   : > { %p7989_p6 = scmp.ne.s32.totalorder %s9832_s11, %s7988_s9  ;;  %p7993_p8 = scmp.lt.u32.totalorder %s9832_s11, %s9886_s4 }
 0x307   : > { %p7994_p1 = scmp.lt.u32.totalorder %s7992_s21, %s7988_s9  ;;  %p7996_p3 = scmp.lt.u32.totalorder %s7988_s9, %s9832_s11 }
 0x308   : > { %p7990_p7 = pnand %p7989_p6, %p10000_p12 }
 0x309   : > { %p7995_p10 = por %p7994_p1, %p7993_p8 }
 0x30a   : > { %p7991_p2 = pneg %p7990_p7 }
 0x30b   : > { %p7997_p5 = por %p7996_p3, %p7995_p10 }
 0x30d   : > { %p7998_p9 = pnand %p7997_p5, %p7991_p2 }
 0x30f   : > { %8001 = shalt.err (!%p7998_p9)
}
 0x310   : > { %7569 = dma.vmem_to_hbm [thread:$0]  (%p10000_p12), %s9834_s14, 32, %s9832_s11, %s5959_s29  }
 0x311 PF: > { %s6002_s10 = sand.u32 1, %s8044_s15   ;;  %p10001_p11 = scmp.ne.s32.totalorder %s9915_s26, 0 }
 0x312   : > { %p10002_p0 = scmp.ge.s32.totalorder %s8064_s20, 2  ;;  %s6003_s27 = scalar_lea.sflag [#allocation5], %s6002_s10 }
 0x314   : > { %p7584_p4 = pnand %p10002_p0, %p10001_p11 }
 0x316   : > { %8035 = dma.done.wait (!%p7584_p4), %s6003_s27, 2048  }
 0x317   : > { %8037 = vsyncadd (!%p7584_p4), %s6003_s27, 4294965248  ;;  %s6012_s28 = scalar_lea.sflag [#allocation11], %s6002_s10 }
 0x318   : > { %8039 = dma.done.wait (!%p7584_p4), %s6012_s28, 32  }
 0x319   : > { %8041 = vsyncadd (!%p7584_p4), %s6012_s28, 4294967264  ;;  %s25_s20 = sadd.s32 1, %s8064_s20   ;;  %s10003_s15 = smov %s8048_s16 }
 0x31a   : > { %p22_p13 = scmp.ge.s32.totalorder %s25_s20, 4   ;;  %s10004_s16 = smov %s8052_s17 }
 0x31b   : > { %s10005_s17 = smov %s8247_s12  ;;  %s10006_s18 = smov %s8060_s19 }
 0x31c   : > { %s10007_s19 = smov %s10009_s7  ;;  %24 = sbr.rel (!%p22_p13) target bundleno = 9 (0x9), region = 112 }
 0x323   :  { %6017 = vsyncpa [#allocation4], 1 }
 0x324   :  { %6019 = vsyncpa [#allocation4 + $0x1], 1 }
 0x325   :  { %6020 = vsyncpa [#allocation7], 1 }
 0x326   :  { %6021 = vsyncpa [#allocation5], 1 }
 0x327   :  { %6023 = vsyncpa [#allocation5 + $0x1], 1 }
 0x328   :  { %6024 = vsyncpa [#allocation11], 1 }
 0x329   :  { %6026 = vsyncpa [#allocation11 + $0x1], 1 }

</bundles_post_ra>
